<compile_context>
chip_gen: v7x
topology: tpu7x:2x2x1
jax: 0.10.0
libtpu: 0.0.40
codegen_flags: <defaults>
</compile_context>

<pallas_src>
import functools
import math

import jax
import jax.numpy as jnp
from jax.experimental import pallas as pl
from jax.experimental.pallas import tpu as pltpu

EMBED_DIM = 96
NUM_HEADS = 8
NUM_LAYERS = 8
HEAD_DIM = EMBED_DIM // NUM_HEADS          # 12
FF_DIM = 4 * EMBED_DIM                     # 384
LN_EPS = 1e-5
BN_EPS = 1e-5
MAX_SEQ = int(128 * 88 * 4 / 64)           # 704 (LearnablePositionalEncoding)

GEMM_TILE_M = 512                          # fits 2x-buffered in <4 MiB on all gens
GEMM_VMEM_LIMIT = 32 * 1024 * 1024
XFMR_VMEM_LIMIT = 48 * 1024 * 1024


def _round_up(x, m):
    return ((x + m - 1) // m) * m


def _gelu(x):
    # exact (erf) GELU — matches torch.nn.GELU() and activation='gelu'
    return x * 0.5 * (1.0 + jax.lax.erf(x * (1.0 / math.sqrt(2.0))))


# --------------------------------------------------------------------------
# Pallas kernel 1: tiled GEMM with fused scale/shift/GELU epilogue
# --------------------------------------------------------------------------
def _gemm_kernel(a_ref, w_ref, scale_ref, shift_ref, o_ref, *, gelu):
    """o = act((a @ w) * scale + shift); bias/BN already folded into scale/shift."""
    acc = jnp.dot(a_ref[...], w_ref[...], preferred_element_type=jnp.float32)
    acc = acc * scale_ref[...] + shift_ref[...]
    if gelu:
        acc = _gelu(acc)
    o_ref[...] = acc


def pallas_gemm(a, w, scale, shift, gelu=False, tile_m=GEMM_TILE_M):
    """a:(M,K) f32, w:(K,N) f32, scale/shift:(N,) f32 -> (M,N) f32.

    Operands are cast to bf16 (f32 accumulation on the MXU).  N is padded to a
    multiple of 128 (lane-dense stores), M is padded to the tile size; the grid
    iterates over M tiles (parallel -> megacore sharding on v7x) with the small
    weight / scale / shift blocks held as full, resident blocks.
    """
    M, K = a.shape
    _, N = w.shape

    n_pad = _round_up(N, 128)
    if n_pad != N:
        w = jnp.pad(w, ((0, 0), (0, n_pad - N)))
        scale = jnp.pad(scale, (0, n_pad - N))
        shift = jnp.pad(shift, (0, n_pad - N))

    tm = min(tile_m, _round_up(M, 8))
    m_pad = _round_up(M, tm)
    if m_pad != M:
        a = jnp.pad(a, ((0, m_pad - M), (0, 0)))

    out = pl.pallas_call(
        functools.partial(_gemm_kernel, gelu=gelu),
        out_shape=jax.ShapeDtypeStruct((m_pad, n_pad), jnp.float32),
        grid=(m_pad // tm,),
        in_specs=[
            pl.BlockSpec((tm, K), lambda i: (i, 0)),
            pl.BlockSpec((K, n_pad), lambda i: (0, 0)),
            pl.BlockSpec((1, n_pad), lambda i: (0, 0)),
            pl.BlockSpec((1, n_pad), lambda i: (0, 0)),
        ],
        out_specs=pl.BlockSpec((tm, n_pad), lambda i: (i, 0)),
        compiler_params=pltpu.CompilerParams(
            dimension_semantics=("parallel",),
            vmem_limit_bytes=GEMM_VMEM_LIMIT),
    )(a.astype(jnp.bfloat16), w.astype(jnp.bfloat16),
      scale.reshape(1, n_pad).astype(jnp.float32),
      shift.reshape(1, n_pad).astype(jnp.float32))
    return out[:M, :N]


# --------------------------------------------------------------------------
# Pallas kernel 2: fully fused transformer encoder (grid over layers)
# --------------------------------------------------------------------------
def _transformer_kernel(x_ref,
                        ln1g_ref, ln1b_ref, wqkv_ref, bqkv_ref, wo_ref, bo_ref,
                        ln2g_ref, ln2b_ref, w1_ref, b1_ref, w2_ref, b2_ref,
                        out_ref,
                        resid_ref, qkv_ref, attn_ref, hid_ref,
                        *, B, S):
    l = pl.program_id(0)
    C = EMBED_DIM
    HD = HEAD_DIM
    sm_scale = 1.0 / math.sqrt(HD)

    @pl.when(l == 0)
    def _():
        resid_ref[...] = x_ref[...]

    def layernorm(x, g_ref, b_ref):
        mu = jnp.mean(x, axis=-1, keepdims=True)
        var = jnp.mean(jnp.square(x - mu), axis=-1, keepdims=True)
        return (x - mu) * jax.lax.rsqrt(var + LN_EPS) * g_ref[0] + b_ref[0]

    # ---------------- self-attention sub-block (pre-norm) ----------------
    xn = layernorm(resid_ref[...], ln1g_ref, ln1b_ref).astype(jnp.bfloat16)
    qkv_ref[...] = (jnp.dot(xn, wqkv_ref[0], preferred_element_type=jnp.float32)
                    + bqkv_ref[0])

    for b in range(B):                       # static unroll over batch
        rows = pl.ds(b * S, S)
        qkv_b = qkv_ref[rows, :]             # (S, 3C) f32
        q_b = qkv_b[:, 0:C].astype(jnp.bfloat16)
        k_b = qkv_b[:, C:2 * C].astype(jnp.bfloat16)
        v_b = qkv_b[:, 2 * C:3 * C].astype(jnp.bfloat16)
        heads = []
        for h in range(NUM_HEADS):           # static unroll over heads
            sl = slice(h * HD, (h + 1) * HD)
            qh = q_b[:, sl]
            kh = k_b[:, sl]
            vh = v_b[:, sl]
            # contract on dim 1 of both operands (no explicit k.T transpose)
            s = jax.lax.dot_general(
                qh, kh, dimension_numbers=(((1,), (1,)), ((), ())),
                preferred_element_type=jnp.float32) * sm_scale
            s = s - jnp.max(s, axis=-1, keepdims=True)
            p = jnp.exp(s)
            p = p * pl.reciprocal(jnp.sum(p, axis=-1, keepdims=True), approx=True)
            heads.append(jnp.dot(p.astype(jnp.bfloat16), vh,
                                 preferred_element_type=jnp.float32))
        attn_ref[rows, :] = jnp.concatenate(heads, axis=-1)   # lane-dense (S, 96)

    resid_ref[...] = (resid_ref[...]
                      + jnp.dot(attn_ref[...].astype(jnp.bfloat16), wo_ref[0],
                                preferred_element_type=jnp.float32)
                      + bo_ref[0])

    # ---------------- feed-forward sub-block (pre-norm) ----------------
    xn = layernorm(resid_ref[...], ln2g_ref, ln2b_ref).astype(jnp.bfloat16)
    hid_ref[...] = _gelu(jnp.dot(xn, w1_ref[0], preferred_element_type=jnp.float32)
                         + b1_ref[0])
    resid_ref[...] = (resid_ref[...]
                      + jnp.dot(hid_ref[...].astype(jnp.bfloat16), w2_ref[0],
                                preferred_element_type=jnp.float32)
                      + b2_ref[0])

    @pl.when(l == pl.num_programs(0) - 1)
    def _():
        out_ref[...] = resid_ref[...]


def run_transformer(tok, layers):
    """tok: (B, S, C) f32 tokens (pos-encoding already added) -> (B*S, C) f32."""
    B, S, C = tok.shape
    BS = B * S
    tok2 = tok.reshape(BS, C).astype(jnp.float32)

    def stack(name):
        return jnp.stack([lp[name] for lp in layers])

    ln1g = stack('ln1_g')[:, None, :]                         # (L,1,C)   f32
    ln1b = stack('ln1_b')[:, None, :]
    wqkv = stack('w_qkv').astype(jnp.bfloat16)                # (L,C,3C)  bf16
    bqkv = stack('b_qkv')[:, None, :]                         # (L,1,3C)  f32
    wo = stack('w_o').astype(jnp.bfloat16)                    # (L,C,C)
    bo = stack('b_o')[:, None, :]
    ln2g = stack('ln2_g')[:, None, :]
    ln2b = stack('ln2_b')[:, None, :]
    w1 = stack('w1').astype(jnp.bfloat16)                     # (L,C,FF)
    b1 = stack('b1')[:, None, :]
    w2 = stack('w2').astype(jnp.bfloat16)                     # (L,FF,C)
    b2 = stack('b2')[:, None, :]

    return pl.pallas_call(
        functools.partial(_transformer_kernel, B=B, S=S),
        out_shape=jax.ShapeDtypeStruct((BS, C), jnp.float32),
        grid=(NUM_LAYERS,),
        in_specs=[
            pl.BlockSpec((BS, C), lambda l: (0, 0)),            # tokens
            pl.BlockSpec((1, 1, C), lambda l: (l, 0, 0)),       # ln1_g
            pl.BlockSpec((1, 1, C), lambda l: (l, 0, 0)),       # ln1_b
            pl.BlockSpec((1, C, 3 * C), lambda l: (l, 0, 0)),   # w_qkv
            pl.BlockSpec((1, 1, 3 * C), lambda l: (l, 0, 0)),   # b_qkv
            pl.BlockSpec((1, C, C), lambda l: (l, 0, 0)),       # w_o
            pl.BlockSpec((1, 1, C), lambda l: (l, 0, 0)),       # b_o
            pl.BlockSpec((1, 1, C), lambda l: (l, 0, 0)),       # ln2_g
            pl.BlockSpec((1, 1, C), lambda l: (l, 0, 0)),       # ln2_b
            pl.BlockSpec((1, C, FF_DIM), lambda l: (l, 0, 0)),  # w1
            pl.BlockSpec((1, 1, FF_DIM), lambda l: (l, 0, 0)),  # b1
            pl.BlockSpec((1, FF_DIM, C), lambda l: (l, 0, 0)),  # w2
            pl.BlockSpec((1, 1, C), lambda l: (l, 0, 0)),       # b2
        ],
        out_specs=pl.BlockSpec((BS, C), lambda l: (0, 0)),
        scratch_shapes=[
            pltpu.VMEM((BS, C), jnp.float32),          # residual stream
            pltpu.VMEM((BS, 3 * C), jnp.float32),      # qkv
            pltpu.VMEM((BS, C), jnp.float32),          # attention output
            pltpu.VMEM((BS, FF_DIM), jnp.float32),     # FF hidden
        ],
        compiler_params=pltpu.CompilerParams(
            dimension_semantics=("arbitrary",),        # layers are sequential
            vmem_limit_bytes=XFMR_VMEM_LIMIT),
    )(tok2, ln1g, ln1b, wqkv, bqkv, wo, bo, ln2g, ln2b, w1, b1, w2, b2)


# --------------------------------------------------------------------------
# JAX glue: im2col, pooling, transposed-conv rewrites, weight conversion
# --------------------------------------------------------------------------
def _im2col(x, k, pad_h, pad_w):
    """x: (B, H, W, C) NHWC -> (B*Ho*Wo, k*k*C) patches (taps ordered kh, kw, c)."""
    # TODO(synk): patch extraction kept as JAX glue; a strided-window DMA
    # formulation inside the GEMM kernel would avoid the 9x HBM expansion.
    B, H, W, C = x.shape
    xp = jnp.pad(x, ((0, 0), pad_h, pad_w, (0, 0)))
    Ho = H + pad_h[0] + pad_h[1] - k + 1
    Wo = W + pad_w[0] + pad_w[1] - k + 1
    cols = []
    for dy in range(k):
        for dx in range(k):
            cols.append(xp[:, dy:dy + Ho, dx:dx + Wo, :])
    p = jnp.stack(cols, axis=3)                    # (B, Ho, Wo, k*k, C)
    return p.reshape(B * Ho * Wo, k * k * C), B, Ho, Wo


def conv2d_bn_gelu(x, w_kkio, bias, scale, shift, gelu,
                   pad_h=(1, 1), pad_w=(1, 1)):
    # TODO(synk): the Cin=1 first conv (K=9) would be cheaper as 9 shifted
    # VPU multiply-adds than as a K=9 MXU GEMM; kept on the shared GEMM path.
    k, _, cin, cout = w_kkio.shape
    patches, B, Ho, Wo = _im2col(x, k, pad_h, pad_w)
    w2 = w_kkio.reshape(k * k * cin, cout)
    fused_shift = bias * scale + shift             # fold conv bias into BN shift
    out = pallas_gemm(patches, w2, scale, fused_shift, gelu=gelu)
    return out.reshape(B, Ho, Wo, cout)


def maxpool2(x):
    # TODO(synk): MaxPool2d(2) kept in plain JAX glue (tiny memory-bound window
    # reduce; strided-window extraction is awkward to express in Mosaic here).
    B, H, W, C = x.shape
    return jnp.max(x.reshape(B, H // 2, 2, W // 2, 2, C), axis=(2, 4))


def dilate2(x):
    """Insert one zero between neighbouring pixels (stride-2 transposed conv)."""
    B, H, W, C = x.shape
    out = jnp.zeros((B, 2 * H - 1, 2 * W - 1, C), x.dtype)
    return out.at[:, ::2, ::2, :].set(x)


def torch_conv_w_to_kkio(w_oikk):
    # Conv2d weight (O, I, kh, kw) -> (kh, kw, I, O)
    return jnp.transpose(w_oikk, (2, 3, 1, 0))


def torch_convT_w_to_kkio(w_iokk):
    # ConvTranspose2d weight (I, O, kh, kw): equivalent forward conv uses the
    # spatially-flipped, in/out-swapped kernel.
    w = w_iokk[:, :, ::-1, ::-1]
    return jnp.transpose(w, (2, 3, 0, 1))          # (kh, kw, I, O)


def bn_scale_shift(gamma, beta):
    # eval-mode BatchNorm with fresh running stats (mean=0, var=1).
    # TODO(synk): for a real checkpoint fold running stats:
    #   scale = gamma / sqrt(var + eps); shift = beta - mean * scale
    inv = 1.0 / jnp.sqrt(1.0 + BN_EPS)
    return gamma * inv, beta


# --------------------------------------------------------------------------
# Parameters (deterministic synthetic init — shapes from the module __init__)
# --------------------------------------------------------------------------
def init_params(key):
    keys = iter(jax.random.split(key, 128))

    def nrm(shape, std=0.02):
        return std * jax.random.normal(next(keys), shape, jnp.float32)

    p = {
        # encoder
        'enc_conv1_w': nrm((48, 1, 3, 3)),  'enc_conv1_b': nrm((48,)),
        'enc_bn1_g': 1.0 + nrm((48,)),      'enc_bn1_b': nrm((48,)),
        'enc_conv2_w': nrm((96, 48, 3, 3)), 'enc_conv2_b': nrm((96,)),
        'enc_bn2_g': 1.0 + nrm((96,)),      'enc_bn2_b': nrm((96,)),
        # learnable positional encoding
        'pos_embed': nrm((1, MAX_SEQ, EMBED_DIM)),
        # decoder (ConvTranspose2d weights in torch layout (I, O, kh, kw))
        'dec_conv1_w': nrm((96, 96, 3, 3)), 'dec_conv1_b': nrm((96,)),
        'dec_bn1_g': 1.0 + nrm((96,)),      'dec_bn1_b': nrm((96,)),
        'dec_conv2_w': nrm((96, 48, 3, 3)), 'dec_conv2_b': nrm((48,)),
        'dec_bn2_g': 1.0 + nrm((48,)),      'dec_bn2_b': nrm((48,)),
        'dec_conv3_w': nrm((48, 1, 3, 3)),  'dec_conv3_b': nrm((1,)),
    }
    layers = []
    for _ in range(NUM_LAYERS):
        layers.append({
            'ln1_g': jnp.ones((EMBED_DIM,), jnp.float32),
            'ln1_b': jnp.zeros((EMBED_DIM,), jnp.float32),
            'w_qkv': nrm((EMBED_DIM, 3 * EMBED_DIM)),
            'b_qkv': nrm((3 * EMBED_DIM,)),
            'w_o': nrm((EMBED_DIM, EMBED_DIM)),
            'b_o': nrm((EMBED_DIM,)),
            'ln2_g': jnp.ones((EMBED_DIM,), jnp.float32),
            'ln2_b': jnp.zeros((EMBED_DIM,), jnp.float32),
            'w1': nrm((EMBED_DIM, FF_DIM)),
            'b1': nrm((FF_DIM,)),
            'w2': nrm((FF_DIM, EMBED_DIM)),
            'b2': nrm((EMBED_DIM,)),
        })
    p['layers'] = layers
    return p


# --------------------------------------------------------------------------
# Forward pass
# --------------------------------------------------------------------------
def hybrid_transformer_forward(x_nchw, p):
    B = x_nchw.shape[0]
    x = jnp.transpose(x_nchw, (0, 2, 3, 1)).astype(jnp.float32)   # NHWC

    # ---------------- encoder ----------------
    s, t = bn_scale_shift(p['enc_bn1_g'], p['enc_bn1_b'])
    x = conv2d_bn_gelu(x, torch_conv_w_to_kkio(p['enc_conv1_w']),
                       p['enc_conv1_b'], s, t, gelu=True)
    x = maxpool2(x)
    s, t = bn_scale_shift(p['enc_bn2_g'], p['enc_bn2_b'])
    x = conv2d_bn_gelu(x, torch_conv_w_to_kkio(p['enc_conv2_w']),
                       p['enc_conv2_b'], s, t, gelu=True)
    x = maxpool2(x)
    cnn_features = x                                              # (B, H, W, 96)
    _, H, W, C = x.shape
    S = H * W

    # ---------------- tokens + positional encoding ----------------
    tok = x.reshape(B, S, C) + p['pos_embed'][:, :S, :]

    # ---------------- transformer encoder (single fused Pallas call) --------
    xf = run_transformer(tok, p['layers'])                        # (B*S, C)

    x = xf.reshape(B, H, W, C) + cnn_features

    # ---------------- decoder ----------------
    # ConvTranspose2d(96, 96, 3, padding=1): stride 1 -> conv with flipped kernel
    s, t = bn_scale_shift(p['dec_bn1_g'], p['dec_bn1_b'])
    x = conv2d_bn_gelu(x, torch_convT_w_to_kkio(p['dec_conv1_w']),
                       p['dec_conv1_b'], s, t, gelu=True)
    # ConvTranspose2d(96, 48, 3, stride=2, padding=1, output_padding=1)
    s, t = bn_scale_shift(p['dec_bn2_g'], p['dec_bn2_b'])
    x = conv2d_bn_gelu(dilate2(x), torch_convT_w_to_kkio(p['dec_conv2_w']),
                       p['dec_conv2_b'], s, t, gelu=True,
                       pad_h=(1, 2), pad_w=(1, 2))
    # ConvTranspose2d(48, 1, 3, stride=2, padding=1, output_padding=1)
    x = conv2d_bn_gelu(dilate2(x), torch_convT_w_to_kkio(p['dec_conv3_w']),
                       p['dec_conv3_b'],
                       jnp.ones((1,), jnp.float32), jnp.zeros((1,), jnp.float32),
                       gelu=False, pad_h=(1, 2), pad_w=(1, 2))

    return jnp.transpose(x, (0, 3, 1, 2))                         # NCHW out


if __name__ == "__main__":
    key = jax.random.PRNGKey(0)
    pkey, xkey = jax.random.split(key)
    params = init_params(pkey)

    # small input consistent with the module: (B, 1, H, W) NCHW
    x = jax.random.normal(xkey, (2, 1, 16, 16), jnp.float32)

    fwd = jax.jit(hybrid_transformer_forward)
    out = fwd(x, params)
    jax.block_until_ready(out)
    assert out.shape == (2, 1, 16, 16), out.shape
    assert jnp.all(jnp.isfinite(out))
    print("KERNEL_OK")
</pallas_src>

<mosaic_0001>
module attributes {stable_mosaic.version = 11 : i64} {
  func.func @_gemm_kernel(%arg0: i32, %arg1: memref<512x9xbf16, #tpu.memory_space<vmem>>, %arg2: memref<9x128xbf16, #tpu.memory_space<vmem>>, %arg3: memref<1x128xf32, #tpu.memory_space<vmem>>, %arg4: memref<1x128xf32, #tpu.memory_space<vmem>>, %arg5: memref<512x128xf32, #tpu.memory_space<vmem>>) attributes {dimension_semantics = [#tpu.dimension_semantics<parallel>], iteration_bounds = array<i64: 1>, scalar_prefetch = 0 : i64, scratch_operands = 0 : i64, tpu.core_type = #tpu.core_type<tc>, window_params = [{transform_indices = @transform_0, window_bounds = array<i64: 512, 9>}, {pipeline_mode = #tpu.pipeline_mode<synchronous>, transform_indices = @transform_1, window_bounds = array<i64: 9, 128>}, {pipeline_mode = #tpu.pipeline_mode<synchronous>, transform_indices = @transform_2, window_bounds = array<i64: 1, 128>}, {pipeline_mode = #tpu.pipeline_mode<synchronous>, transform_indices = @transform_3, window_bounds = array<i64: 1, 128>}, {transform_indices = @transform_4, window_bounds = array<i64: 512, 128>}]} {
    %c0 = arith.constant 0 : index
    %c0_0 = arith.constant 0 : index
    %0 = vector.load %arg1[%c0, %c0_0] : memref<512x9xbf16, #tpu.memory_space<vmem>>, vector<512x9xbf16>
    %c0_1 = arith.constant 0 : index
    %c0_2 = arith.constant 0 : index
    %1 = vector.load %arg2[%c0_1, %c0_2] : memref<9x128xbf16, #tpu.memory_space<vmem>>, vector<9x128xbf16>
    %cst = arith.constant dense<0.000000e+00> : vector<512x128xf32>
    %2 = tpu.matmul %0, %1, %cst {dimension_numbers = #tpu.dot_dimension_numbers<[1], [0], [0], [1], [0, 0, 1, 1], [], []>} : vector<512x9xbf16>, vector<9x128xbf16>, vector<512x128xf32> -> vector<512x128xf32>
    %c0_3 = arith.constant 0 : index
    %c0_4 = arith.constant 0 : index
    %3 = vector.load %arg3[%c0_3, %c0_4] : memref<1x128xf32, #tpu.memory_space<vmem>>, vector<1x128xf32>
    %4 = vector.broadcast %3 : vector<1x128xf32> to vector<512x128xf32>
    %5 = arith.mulf %2, %4 : vector<512x128xf32>
    %c0_5 = arith.constant 0 : index
    %c0_6 = arith.constant 0 : index
    %6 = vector.load %arg4[%c0_5, %c0_6] : memref<1x128xf32, #tpu.memory_space<vmem>>, vector<1x128xf32>
    %7 = vector.broadcast %6 : vector<1x128xf32> to vector<512x128xf32>
    %8 = arith.addf %5, %7 : vector<512x128xf32>
    %cst_7 = arith.constant 5.000000e-01 : f32
    %9 = vector.broadcast %cst_7 : f32 to vector<512x128xf32>
    %10 = arith.mulf %8, %9 : vector<512x128xf32>
    %cst_8 = arith.constant 0.707106769 : f32
    %11 = vector.broadcast %cst_8 : f32 to vector<512x128xf32>
    %12 = arith.mulf %8, %11 : vector<512x128xf32>
    %13 = math.erf %12 : vector<512x128xf32>
    %cst_9 = arith.constant 1.000000e+00 : f32
    %14 = vector.broadcast %cst_9 : f32 to vector<512x128xf32>
    %15 = arith.addf %14, %13 : vector<512x128xf32>
    %16 = arith.mulf %10, %15 : vector<512x128xf32>
    %c0_10 = arith.constant 0 : index
    %c0_11 = arith.constant 0 : index
    %17 = vector.load %arg5[%c0_10, %c0_11] : memref<512x128xf32, #tpu.memory_space<vmem>>, vector<512x128xf32>
    tpu.vector_store %arg5[%c0_10, %c0_11], %16 {strides = array<i32>} : memref<512x128xf32, #tpu.memory_space<vmem>>, vector<512x128xf32>,
    return
  }
  func.func @transform_0(%arg0: i32) -> (i32, i32) {
    %c0_i32 = arith.constant 0 : i32
    %c0_i32_0 = arith.constant 0 : i32
    return %arg0, %c0_i32 : i32, i32
  }
  func.func @transform_1(%arg0: i32) -> (i32, i32) {
    %c0_i32 = arith.constant 0 : i32
    %c0_i32_0 = arith.constant 0 : i32
    %c0_i32_1 = arith.constant 0 : i32
    return %c0_i32, %c0_i32_0 : i32, i32
  }
  func.func @transform_2(%arg0: i32) -> (i32, i32) {
    %c0_i32 = arith.constant 0 : i32
    %c0_i32_0 = arith.constant 0 : i32
    %c0_i32_1 = arith.constant 0 : i32
    return %c0_i32, %c0_i32_0 : i32, i32
  }
  func.func @transform_3(%arg0: i32) -> (i32, i32) {
    %c0_i32 = arith.constant 0 : i32
    %c0_i32_0 = arith.constant 0 : i32
    %c0_i32_1 = arith.constant 0 : i32
    return %c0_i32, %c0_i32_0 : i32, i32
  }
  func.func @transform_4(%arg0: i32) -> (i32, i32) {
    %c0_i32 = arith.constant 0 : i32
    %c0_i32_0 = arith.constant 0 : i32
    return %arg0, %c0_i32 : i32, i32
  }
}

module attributes {stable_mosaic.version = 11 : i64} {
  func.func @_gemm_kernel(%arg0: i32, %arg1: memref<128x432xbf16, #tpu.memory_space<vmem>>, %arg2: memref<432x128xbf16, #tpu.memory_space<vmem>>, %arg3: memref<1x128xf32, #tpu.memory_space<vmem>>, %arg4: memref<1x128xf32, #tpu.memory_space<vmem>>, %arg5: memref<128x128xf32, #tpu.memory_space<vmem>>) attributes {dimension_semantics = [#tpu.dimension_semantics<parallel>], iteration_bounds = array<i64: 1>, scalar_prefetch = 0 : i64, scratch_operands = 0 : i64, tpu.core_type = #tpu.core_type<tc>, window_params = [{transform_indices = @transform_0, window_bounds = array<i64: 128, 432>}, {pipeline_mode = #tpu.pipeline_mode<synchronous>, transform_indices = @transform_1, window_bounds = array<i64: 432, 128>}, {pipeline_mode = #tpu.pipeline_mode<synchronous>, transform_indices = @transform_2, window_bounds = array<i64: 1, 128>}, {pipeline_mode = #tpu.pipeline_mode<synchronous>, transform_indices = @transform_3, window_bounds = array<i64: 1, 128>}, {transform_indices = @transform_4, window_bounds = array<i64: 128, 128>}]} {
    %c0 = arith.constant 0 : index
    %c0_0 = arith.constant 0 : index
    %0 = vector.load %arg1[%c0, %c0_0] : memref<128x432xbf16, #tpu.memory_space<vmem>>, vector<128x432xbf16>
    %c0_1 = arith.constant 0 : index
    %c0_2 = arith.constant 0 : index
    %1 = vector.load %arg2[%c0_1, %c0_2] : memref<432x128xbf16, #tpu.memory_space<vmem>>, vector<432x128xbf16>
    %cst = arith.constant dense<0.000000e+00> : vector<128x128xf32>
    %2 = tpu.matmul %0, %1, %cst {dimension_numbers = #tpu.dot_dimension_numbers<[1], [0], [0], [1], [0, 0, 1, 1], [], []>} : vector<128x432xbf16>, vector<432x128xbf16>, vector<128x128xf32> -> vector<128x128xf32>
    %c0_3 = arith.constant 0 : index
    %c0_4 = arith.constant 0 : index
    %3 = vector.load %arg3[%c0_3, %c0_4] : memref<1x128xf32, #tpu.memory_space<vmem>>, vector<1x128xf32>
    %4 = vector.broadcast %3 : vector<1x128xf32> to vector<128x128xf32>
    %5 = arith.mulf %2, %4 : vector<128x128xf32>
    %c0_5 = arith.constant 0 : index
    %c0_6 = arith.constant 0 : index
    %6 = vector.load %arg4[%c0_5, %c0_6] : memref<1x128xf32, #tpu.memory_space<vmem>>, vector<1x128xf32>
    %7 = vector.broadcast %6 : vector<1x128xf32> to vector<128x128xf32>
    %8 = arith.addf %5, %7 : vector<128x128xf32>
    %cst_7 = arith.constant 5.000000e-01 : f32
    %9 = vector.broadcast %cst_7 : f32 to vector<128x128xf32>
    %10 = arith.mulf %8, %9 : vector<128x128xf32>
    %cst_8 = arith.constant 0.707106769 : f32
    %11 = vector.broadcast %cst_8 : f32 to vector<128x128xf32>
    %12 = arith.mulf %8, %11 : vector<128x128xf32>
    %13 = math.erf %12 : vector<128x128xf32>
    %cst_9 = arith.constant 1.000000e+00 : f32
    %14 = vector.broadcast %cst_9 : f32 to vector<128x128xf32>
    %15 = arith.addf %14, %13 : vector<128x128xf32>
    %16 = arith.mulf %10, %15 : vector<128x128xf32>
    %c0_10 = arith.constant 0 : index
    %c0_11 = arith.constant 0 : index
    %17 = vector.load %arg5[%c0_10, %c0_11] : memref<128x128xf32, #tpu.memory_space<vmem>>, vector<128x128xf32>
    tpu.vector_store %arg5[%c0_10, %c0_11], %16 {strides = array<i32>} : memref<128x128xf32, #tpu.memory_space<vmem>>, vector<128x128xf32>,
    return
  }
  func.func @transform_0(%arg0: i32) -> (i32, i32) {
    %c0_i32 = arith.constant 0 : i32
    %c0_i32_0 = arith.constant 0 : i32
    return %arg0, %c0_i32 : i32, i32
  }
  func.func @transform_1(%arg0: i32) -> (i32, i32) {
    %c0_i32 = arith.constant 0 : i32
    %c0_i32_0 = arith.constant 0 : i32
    %c0_i32_1 = arith.constant 0 : i32
    return %c0_i32, %c0_i32_0 : i32, i32
  }
  func.func @transform_2(%arg0: i32) -> (i32, i32) {
    %c0_i32 = arith.constant 0 : i32
    %c0_i32_0 = arith.constant 0 : i32
    %c0_i32_1 = arith.constant 0 : i32
    return %c0_i32, %c0_i32_0 : i32, i32
  }
  func.func @transform_3(%arg0: i32) -> (i32, i32) {
    %c0_i32 = arith.constant 0 : i32
    %c0_i32_0 = arith.constant 0 : i32
    %c0_i32_1 = arith.constant 0 : i32
    return %c0_i32, %c0_i32_0 : i32, i32
  }
  func.func @transform_4(%arg0: i32) -> (i32, i32) {
    %c0_i32 = arith.constant 0 : i32
    %c0_i32_0 = arith.constant 0 : i32
    return %arg0, %c0_i32 : i32, i32
  }
}

module attributes {stable_mosaic.version = 11 : i64} {
  func.func @_transformer_kernel(%arg0: i32, %arg1: memref<32x96xf32, #tpu.memory_space<vmem>>, %arg2: memref<1x1x96xf32, #tpu.memory_space<vmem>>, %arg3: memref<1x1x96xf32, #tpu.memory_space<vmem>>, %arg4: memref<1x96x288xbf16, #tpu.memory_space<vmem>>, %arg5: memref<1x1x288xf32, #tpu.memory_space<vmem>>, %arg6: memref<1x96x96xbf16, #tpu.memory_space<vmem>>, %arg7: memref<1x1x96xf32, #tpu.memory_space<vmem>>, %arg8: memref<1x1x96xf32, #tpu.memory_space<vmem>>, %arg9: memref<1x1x96xf32, #tpu.memory_space<vmem>>, %arg10: memref<1x96x384xbf16, #tpu.memory_space<vmem>>, %arg11: memref<1x1x384xf32, #tpu.memory_space<vmem>>, %arg12: memref<1x384x96xbf16, #tpu.memory_space<vmem>>, %arg13: memref<1x1x96xf32, #tpu.memory_space<vmem>>, %arg14: memref<32x96xf32, #tpu.memory_space<vmem>>, %arg15: memref<32x96xf32, #tpu.memory_space<vmem>>, %arg16: memref<32x288xf32, #tpu.memory_space<vmem>>, %arg17: memref<32x96xf32, #tpu.memory_space<vmem>>, %arg18: memref<32x384xf32, #tpu.memory_space<vmem>>) attributes {dimension_semantics = [#tpu.dimension_semantics<arbitrary>], iteration_bounds = array<i64: 8>, scalar_prefetch = 0 : i64, scratch_operands = 4 : i64, tpu.core_type = #tpu.core_type<tc>, window_params = [{pipeline_mode = #tpu.pipeline_mode<synchronous>, transform_indices = @transform_0, window_bounds = array<i64: 32, 96>}, {transform_indices = @transform_1, window_bounds = array<i64: 1, 1, 96>}, {transform_indices = @transform_2, window_bounds = array<i64: 1, 1, 96>}, {transform_indices = @transform_3, window_bounds = array<i64: 1, 96, 288>}, {transform_indices = @transform_4, window_bounds = array<i64: 1, 1, 288>}, {transform_indices = @transform_5, window_bounds = array<i64: 1, 96, 96>}, {transform_indices = @transform_6, window_bounds = array<i64: 1, 1, 96>}, {transform_indices = @transform_7, window_bounds = array<i64: 1, 1, 96>}, {transform_indices = @transform_8, window_bounds = array<i64: 1, 1, 96>}, {transform_indices = @transform_9, window_bounds = array<i64: 1, 96, 384>}, {transform_indices = @transform_10, window_bounds = array<i64: 1, 1, 384>}, {transform_indices = @transform_11, window_bounds = array<i64: 1, 384, 96>}, {transform_indices = @transform_12, window_bounds = array<i64: 1, 1, 96>}, {pipeline_mode = #tpu.pipeline_mode<synchronous>, transform_indices = @transform_13, window_bounds = array<i64: 32, 96>}]} {
    %c0_i32 = arith.constant 0 : i32
    %0 = arith.cmpi eq, %arg0, %c0_i32 : i32
    %1 = arith.extui %0 : i1 to i32
    %c0_i32_0 = arith.constant 0 : i32
    %2 = arith.cmpi ne, %1, %c0_i32_0 : i32
    scf.if %2 {
      %c0_160 = arith.constant 0 : index
      %c0_161 = arith.constant 0 : index
      %416 = vector.load %arg1[%c0_160, %c0_161] : memref<32x96xf32, #tpu.memory_space<vmem>>, vector<32x96xf32>
      %c0_162 = arith.constant 0 : index
      %c0_163 = arith.constant 0 : index
      %417 = vector.load %arg15[%c0_162, %c0_163] : memref<32x96xf32, #tpu.memory_space<vmem>>, vector<32x96xf32>
      tpu.vector_store %arg15[%c0_162, %c0_163], %416 {strides = array<i32>} : memref<32x96xf32, #tpu.memory_space<vmem>>, vector<32x96xf32>,
    } else {
    }
    %c0 = arith.constant 0 : index
    %c0_1 = arith.constant 0 : index
    %3 = vector.load %arg15[%c0, %c0_1] : memref<32x96xf32, #tpu.memory_space<vmem>>, vector<32x96xf32>
    %cst = arith.constant dense<0.000000e+00> : vector<32xf32>
    %4 = vector.multi_reduction <add>, %3, %cst [1] : vector<32x96xf32> to vector<32xf32>
    %5 = vector.shape_cast %4 : vector<32xf32> to vector<32x1xf32>
    %cst_2 = arith.constant 9.600000e+01 : f32
    %6 = vector.broadcast %cst_2 : f32 to vector<32x1xf32>
    %7 = arith.divf %5, %6 : vector<32x1xf32>
    %8 = vector.broadcast %7 : vector<32x1xf32> to vector<32x96xf32>
    %9 = arith.subf %3, %8 : vector<32x96xf32>
    %10 = arith.mulf %9, %9 : vector<32x96xf32>
    %cst_3 = arith.constant dense<0.000000e+00> : vector<32xf32>
    %11 = vector.multi_reduction <add>, %10, %cst_3 [1] : vector<32x96xf32> to vector<32xf32>
    %12 = vector.shape_cast %11 : vector<32xf32> to vector<32x1xf32>
    %cst_4 = arith.constant 9.600000e+01 : f32
    %13 = vector.broadcast %cst_4 : f32 to vector<32x1xf32>
    %14 = arith.divf %12, %13 : vector<32x1xf32>
    %15 = vector.broadcast %7 : vector<32x1xf32> to vector<32x96xf32>
    %16 = arith.subf %3, %15 : vector<32x96xf32>
    %cst_5 = arith.constant 9.99999974E-6 : f32
    %17 = vector.broadcast %cst_5 : f32 to vector<32x1xf32>
    %18 = arith.addf %14, %17 : vector<32x1xf32>
    %19 = math.rsqrt %18 : vector<32x1xf32>
    %20 = vector.broadcast %19 : vector<32x1xf32> to vector<32x96xf32>
    %21 = arith.mulf %16, %20 : vector<32x96xf32>
    %c0_6 = arith.constant 0 : index
    %c0_7 = arith.constant 0 : index
    %c0_8 = arith.constant 0 : index
    %22 = vector.load %arg2[%c0_6, %c0_7, %c0_8] : memref<1x1x96xf32, #tpu.memory_space<vmem>>, vector<1x1x96xf32>
    %23 = vector.shape_cast %22 : vector<1x1x96xf32> to vector<1x96xf32>
    %24 = vector.broadcast %23 : vector<1x96xf32> to vector<32x96xf32>
    %25 = arith.mulf %21, %24 : vector<32x96xf32>
    %c0_9 = arith.constant 0 : index
    %c0_10 = arith.constant 0 : index
    %c0_11 = arith.constant 0 : index
    %26 = vector.load %arg3[%c0_9, %c0_10, %c0_11] : memref<1x1x96xf32, #tpu.memory_space<vmem>>, vector<1x1x96xf32>
    %27 = vector.shape_cast %26 : vector<1x1x96xf32> to vector<1x96xf32>
    %28 = vector.broadcast %27 : vector<1x96xf32> to vector<32x96xf32>
    %29 = arith.addf %25, %28 : vector<32x96xf32>
    %30 = arith.truncf %29 : vector<32x96xf32> to vector<32x96xbf16>
    %c0_12 = arith.constant 0 : index
    %c0_13 = arith.constant 0 : index
    %c0_14 = arith.constant 0 : index
    %31 = vector.load %arg4[%c0_12, %c0_13, %c0_14] : memref<1x96x288xbf16, #tpu.memory_space<vmem>>, vector<1x96x288xbf16>
    %32 = vector.shape_cast %31 : vector<1x96x288xbf16> to vector<96x288xbf16>
    %cst_15 = arith.constant dense<0.000000e+00> : vector<32x288xf32>
    %33 = tpu.matmul %30, %32, %cst_15 {dimension_numbers = #tpu.dot_dimension_numbers<[1], [0], [0], [1], [0, 0, 1, 1], [], []>} : vector<32x96xbf16>, vector<96x288xbf16>, vector<32x288xf32> -> vector<32x288xf32>
    %c0_16 = arith.constant 0 : index
    %c0_17 = arith.constant 0 : index
    %c0_18 = arith.constant 0 : index
    %34 = vector.load %arg5[%c0_16, %c0_17, %c0_18] : memref<1x1x288xf32, #tpu.memory_space<vmem>>, vector<1x1x288xf32>
    %35 = vector.shape_cast %34 : vector<1x1x288xf32> to vector<1x288xf32>
    %36 = vector.broadcast %35 : vector<1x288xf32> to vector<32x288xf32>
    %37 = arith.addf %33, %36 : vector<32x288xf32>
    %c0_19 = arith.constant 0 : index
    %c0_20 = arith.constant 0 : index
    %38 = vector.load %arg16[%c0_19, %c0_20] : memref<32x288xf32, #tpu.memory_space<vmem>>, vector<32x288xf32>
    tpu.vector_store %arg16[%c0_19, %c0_20], %37 {strides = array<i32>} : memref<32x288xf32, #tpu.memory_space<vmem>>, vector<32x288xf32>,
    %c0_21 = arith.constant 0 : index
    %c0_22 = arith.constant 0 : index
    %39 = vector.load %arg16[%c0_21, %c0_22] : memref<32x288xf32, #tpu.memory_space<vmem>>, vector<16x288xf32>
    %40 = vector.extract_strided_slice %39 {offsets = [0, 0], sizes = [16, 96], strides = [1, 1]} : vector<16x288xf32> to vector<16x96xf32>
    %41 = arith.truncf %40 : vector<16x96xf32> to vector<16x96xbf16>
    %42 = vector.extract_strided_slice %39 {offsets = [0, 96], sizes = [16, 96], strides = [1, 1]} : vector<16x288xf32> to vector<16x96xf32>
    %43 = arith.truncf %42 : vector<16x96xf32> to vector<16x96xbf16>
    %44 = vector.extract_strided_slice %39 {offsets = [0, 192], sizes = [16, 96], strides = [1, 1]} : vector<16x288xf32> to vector<16x96xf32>
    %45 = arith.truncf %44 : vector<16x96xf32> to vector<16x96xbf16>
    %46 = vector.extract_strided_slice %41 {offsets = [0, 0], sizes = [16, 12], strides = [1, 1]} : vector<16x96xbf16> to vector<16x12xbf16>
    %47 = vector.extract_strided_slice %43 {offsets = [0, 0], sizes = [16, 12], strides = [1, 1]} : vector<16x96xbf16> to vector<16x12xbf16>
    %48 = vector.extract_strided_slice %45 {offsets = [0, 0], sizes = [16, 12], strides = [1, 1]} : vector<16x96xbf16> to vector<16x12xbf16>
    %cst_23 = arith.constant dense<0.000000e+00> : vector<16x16xf32>
    %49 = tpu.matmul %46, %47, %cst_23 {dimension_numbers = #tpu.dot_dimension_numbers<[1], [1], [0], [0], [0, 0, 1, 0], [], []>} : vector<16x12xbf16>, vector<16x12xbf16>, vector<16x16xf32> -> vector<16x16xf32>
    %cst_24 = arith.constant 0.288675129 : f32
    %50 = vector.broadcast %cst_24 : f32 to vector<16x16xf32>
    %51 = arith.mulf %49, %50 : vector<16x16xf32>
    %cst_25 = arith.constant dense<0xFF800000> : vector<16xf32>
    %52 = vector.multi_reduction <maximumf>, %51, %cst_25 [1] : vector<16x16xf32> to vector<16xf32>
    %53 = vector.shape_cast %52 : vector<16xf32> to vector<16x1xf32>
    %54 = vector.broadcast %53 : vector<16x1xf32> to vector<16x16xf32>
    %55 = arith.subf %51, %54 : vector<16x16xf32>
    %56 = math.exp %55 : vector<16x16xf32>
    %cst_26 = arith.constant dense<0.000000e+00> : vector<16xf32>
    %57 = vector.multi_reduction <add>, %56, %cst_26 [1] : vector<16x16xf32> to vector<16xf32>
    %58 = vector.shape_cast %57 : vector<16xf32> to vector<16x1xf32>
    %59 = tpu.reciprocal %58 {approx = true} : vector<16x1xf32> -> vector<16x1xf32>
    %60 = vector.broadcast %59 : vector<16x1xf32> to vector<16x16xf32>
    %61 = arith.mulf %56, %60 : vector<16x16xf32>
    %62 = arith.truncf %61 : vector<16x16xf32> to vector<16x16xbf16>
    %cst_27 = arith.constant dense<0.000000e+00> : vector<16x12xf32>
    %63 = tpu.matmul %62, %48, %cst_27 {dimension_numbers = #tpu.dot_dimension_numbers<[1], [0], [0], [1], [0, 0, 1, 1], [], []>} : vector<16x16xbf16>, vector<16x12xbf16>, vector<16x12xf32> -> vector<16x12xf32>
    %64 = vector.extract_strided_slice %41 {offsets = [0, 12], sizes = [16, 12], strides = [1, 1]} : vector<16x96xbf16> to vector<16x12xbf16>
    %65 = vector.extract_strided_slice %43 {offsets = [0, 12], sizes = [16, 12], strides = [1, 1]} : vector<16x96xbf16> to vector<16x12xbf16>
    %66 = vector.extract_strided_slice %45 {offsets = [0, 12], sizes = [16, 12], strides = [1, 1]} : vector<16x96xbf16> to vector<16x12xbf16>
    %cst_28 = arith.constant dense<0.000000e+00> : vector<16x16xf32>
    %67 = tpu.matmul %64, %65, %cst_28 {dimension_numbers = #tpu.dot_dimension_numbers<[1], [1], [0], [0], [0, 0, 1, 0], [], []>} : vector<16x12xbf16>, vector<16x12xbf16>, vector<16x16xf32> -> vector<16x16xf32>
    %cst_29 = arith.constant 0.288675129 : f32
    %68 = vector.broadcast %cst_29 : f32 to vector<16x16xf32>
    %69 = arith.mulf %67, %68 : vector<16x16xf32>
    %cst_30 = arith.constant dense<0xFF800000> : vector<16xf32>
    %70 = vector.multi_reduction <maximumf>, %69, %cst_30 [1] : vector<16x16xf32> to vector<16xf32>
    %71 = vector.shape_cast %70 : vector<16xf32> to vector<16x1xf32>
    %72 = vector.broadcast %71 : vector<16x1xf32> to vector<16x16xf32>
    %73 = arith.subf %69, %72 : vector<16x16xf32>
    %74 = math.exp %73 : vector<16x16xf32>
    %cst_31 = arith.constant dense<0.000000e+00> : vector<16xf32>
    %75 = vector.multi_reduction <add>, %74, %cst_31 [1] : vector<16x16xf32> to vector<16xf32>
    %76 = vector.shape_cast %75 : vector<16xf32> to vector<16x1xf32>
    %77 = tpu.reciprocal %76 {approx = true} : vector<16x1xf32> -> vector<16x1xf32>
    %78 = vector.broadcast %77 : vector<16x1xf32> to vector<16x16xf32>
    %79 = arith.mulf %74, %78 : vector<16x16xf32>
    %80 = arith.truncf %79 : vector<16x16xf32> to vector<16x16xbf16>
    %cst_32 = arith.constant dense<0.000000e+00> : vector<16x12xf32>
    %81 = tpu.matmul %80, %66, %cst_32 {dimension_numbers = #tpu.dot_dimension_numbers<[1], [0], [0], [1], [0, 0, 1, 1], [], []>} : vector<16x16xbf16>, vector<16x12xbf16>, vector<16x12xf32> -> vector<16x12xf32>
    %82 = vector.extract_strided_slice %41 {offsets = [0, 24], sizes = [16, 12], strides = [1, 1]} : vector<16x96xbf16> to vector<16x12xbf16>
    %83 = vector.extract_strided_slice %43 {offsets = [0, 24], sizes = [16, 12], strides = [1, 1]} : vector<16x96xbf16> to vector<16x12xbf16>
    %84 = vector.extract_strided_slice %45 {offsets = [0, 24], sizes = [16, 12], strides = [1, 1]} : vector<16x96xbf16> to vector<16x12xbf16>
    %cst_33 = arith.constant dense<0.000000e+00> : vector<16x16xf32>
    %85 = tpu.matmul %82, %83, %cst_33 {dimension_numbers = #tpu.dot_dimension_numbers<[1], [1], [0], [0], [0, 0, 1, 0], [], []>} : vector<16x12xbf16>, vector<16x12xbf16>, vector<16x16xf32> -> vector<16x16xf32>
    %cst_34 = arith.constant 0.288675129 : f32
    %86 = vector.broadcast %cst_34 : f32 to vector<16x16xf32>
    %87 = arith.mulf %85, %86 : vector<16x16xf32>
    %cst_35 = arith.constant dense<0xFF800000> : vector<16xf32>
    %88 = vector.multi_reduction <maximumf>, %87, %cst_35 [1] : vector<16x16xf32> to vector<16xf32>
    %89 = vector.shape_cast %88 : vector<16xf32> to vector<16x1xf32>
    %90 = vector.broadcast %89 : vector<16x1xf32> to vector<16x16xf32>
    %91 = arith.subf %87, %90 : vector<16x16xf32>
    %92 = math.exp %91 : vector<16x16xf32>
    %cst_36 = arith.constant dense<0.000000e+00> : vector<16xf32>
    %93 = vector.multi_reduction <add>, %92, %cst_36 [1] : vector<16x16xf32> to vector<16xf32>
    %94 = vector.shape_cast %93 : vector<16xf32> to vector<16x1xf32>
    %95 = tpu.reciprocal %94 {approx = true} : vector<16x1xf32> -> vector<16x1xf32>
    %96 = vector.broadcast %95 : vector<16x1xf32> to vector<16x16xf32>
    %97 = arith.mulf %92, %96 : vector<16x16xf32>
    %98 = arith.truncf %97 : vector<16x16xf32> to vector<16x16xbf16>
    %cst_37 = arith.constant dense<0.000000e+00> : vector<16x12xf32>
    %99 = tpu.matmul %98, %84, %cst_37 {dimension_numbers = #tpu.dot_dimension_numbers<[1], [0], [0], [1], [0, 0, 1, 1], [], []>} : vector<16x16xbf16>, vector<16x12xbf16>, vector<16x12xf32> -> vector<16x12xf32>
    %100 = vector.extract_strided_slice %41 {offsets = [0, 36], sizes = [16, 12], strides = [1, 1]} : vector<16x96xbf16> to vector<16x12xbf16>
    %101 = vector.extract_strided_slice %43 {offsets = [0, 36], sizes = [16, 12], strides = [1, 1]} : vector<16x96xbf16> to vector<16x12xbf16>
    %102 = vector.extract_strided_slice %45 {offsets = [0, 36], sizes = [16, 12], strides = [1, 1]} : vector<16x96xbf16> to vector<16x12xbf16>
    %cst_38 = arith.constant dense<0.000000e+00> : vector<16x16xf32>
    %103 = tpu.matmul %100, %101, %cst_38 {dimension_numbers = #tpu.dot_dimension_numbers<[1], [1], [0], [0], [0, 0, 1, 0], [], []>} : vector<16x12xbf16>, vector<16x12xbf16>, vector<16x16xf32> -> vector<16x16xf32>
    %cst_39 = arith.constant 0.288675129 : f32
    %104 = vector.broadcast %cst_39 : f32 to vector<16x16xf32>
    %105 = arith.mulf %103, %104 : vector<16x16xf32>
    %cst_40 = arith.constant dense<0xFF800000> : vector<16xf32>
    %106 = vector.multi_reduction <maximumf>, %105, %cst_40 [1] : vector<16x16xf32> to vector<16xf32>
    %107 = vector.shape_cast %106 : vector<16xf32> to vector<16x1xf32>
    %108 = vector.broadcast %107 : vector<16x1xf32> to vector<16x16xf32>
    %109 = arith.subf %105, %108 : vector<16x16xf32>
    %110 = math.exp %109 : vector<16x16xf32>
    %cst_41 = arith.constant dense<0.000000e+00> : vector<16xf32>
    %111 = vector.multi_reduction <add>, %110, %cst_41 [1] : vector<16x16xf32> to vector<16xf32>
    %112 = vector.shape_cast %111 : vector<16xf32> to vector<16x1xf32>
    %113 = tpu.reciprocal %112 {approx = true} : vector<16x1xf32> -> vector<16x1xf32>
    %114 = vector.broadcast %113 : vector<16x1xf32> to vector<16x16xf32>
    %115 = arith.mulf %110, %114 : vector<16x16xf32>
    %116 = arith.truncf %115 : vector<16x16xf32> to vector<16x16xbf16>
    %cst_42 = arith.constant dense<0.000000e+00> : vector<16x12xf32>
    %117 = tpu.matmul %116, %102, %cst_42 {dimension_numbers = #tpu.dot_dimension_numbers<[1], [0], [0], [1], [0, 0, 1, 1], [], []>} : vector<16x16xbf16>, vector<16x12xbf16>, vector<16x12xf32> -> vector<16x12xf32>
    %118 = vector.extract_strided_slice %41 {offsets = [0, 48], sizes = [16, 12], strides = [1, 1]} : vector<16x96xbf16> to vector<16x12xbf16>
    %119 = vector.extract_strided_slice %43 {offsets = [0, 48], sizes = [16, 12], strides = [1, 1]} : vector<16x96xbf16> to vector<16x12xbf16>
    %120 = vector.extract_strided_slice %45 {offsets = [0, 48], sizes = [16, 12], strides = [1, 1]} : vector<16x96xbf16> to vector<16x12xbf16>
    %cst_43 = arith.constant dense<0.000000e+00> : vector<16x16xf32>
    %121 = tpu.matmul %118, %119, %cst_43 {dimension_numbers = #tpu.dot_dimension_numbers<[1], [1], [0], [0], [0, 0, 1, 0], [], []>} : vector<16x12xbf16>, vector<16x12xbf16>, vector<16x16xf32> -> vector<16x16xf32>
    %cst_44 = arith.constant 0.288675129 : f32
    %122 = vector.broadcast %cst_44 : f32 to vector<16x16xf32>
    %123 = arith.mulf %121, %122 : vector<16x16xf32>
    %cst_45 = arith.constant dense<0xFF800000> : vector<16xf32>
    %124 = vector.multi_reduction <maximumf>, %123, %cst_45 [1] : vector<16x16xf32> to vector<16xf32>
    %125 = vector.shape_cast %124 : vector<16xf32> to vector<16x1xf32>
    %126 = vector.broadcast %125 : vector<16x1xf32> to vector<16x16xf32>
    %127 = arith.subf %123, %126 : vector<16x16xf32>
    %128 = math.exp %127 : vector<16x16xf32>
    %cst_46 = arith.constant dense<0.000000e+00> : vector<16xf32>
    %129 = vector.multi_reduction <add>, %128, %cst_46 [1] : vector<16x16xf32> to vector<16xf32>
    %130 = vector.shape_cast %129 : vector<16xf32> to vector<16x1xf32>
    %131 = tpu.reciprocal %130 {approx = true} : vector<16x1xf32> -> vector<16x1xf32>
    %132 = vector.broadcast %131 : vector<16x1xf32> to vector<16x16xf32>
    %133 = arith.mulf %128, %132 : vector<16x16xf32>
    %134 = arith.truncf %133 : vector<16x16xf32> to vector<16x16xbf16>
    %cst_47 = arith.constant dense<0.000000e+00> : vector<16x12xf32>
    %135 = tpu.matmul %134, %120, %cst_47 {dimension_numbers = #tpu.dot_dimension_numbers<[1], [0], [0], [1], [0, 0, 1, 1], [], []>} : vector<16x16xbf16>, vector<16x12xbf16>, vector<16x12xf32> -> vector<16x12xf32>
    %136 = vector.extract_strided_slice %41 {offsets = [0, 60], sizes = [16, 12], strides = [1, 1]} : vector<16x96xbf16> to vector<16x12xbf16>
    %137 = vector.extract_strided_slice %43 {offsets = [0, 60], sizes = [16, 12], strides = [1, 1]} : vector<16x96xbf16> to vector<16x12xbf16>
    %138 = vector.extract_strided_slice %45 {offsets = [0, 60], sizes = [16, 12], strides = [1, 1]} : vector<16x96xbf16> to vector<16x12xbf16>
    %cst_48 = arith.constant dense<0.000000e+00> : vector<16x16xf32>
    %139 = tpu.matmul %136, %137, %cst_48 {dimension_numbers = #tpu.dot_dimension_numbers<[1], [1], [0], [0], [0, 0, 1, 0], [], []>} : vector<16x12xbf16>, vector<16x12xbf16>, vector<16x16xf32> -> vector<16x16xf32>
    %cst_49 = arith.constant 0.288675129 : f32
    %140 = vector.broadcast %cst_49 : f32 to vector<16x16xf32>
    %141 = arith.mulf %139, %140 : vector<16x16xf32>
    %cst_50 = arith.constant dense<0xFF800000> : vector<16xf32>
    %142 = vector.multi_reduction <maximumf>, %141, %cst_50 [1] : vector<16x16xf32> to vector<16xf32>
    %143 = vector.shape_cast %142 : vector<16xf32> to vector<16x1xf32>
    %144 = vector.broadcast %143 : vector<16x1xf32> to vector<16x16xf32>
    %145 = arith.subf %141, %144 : vector<16x16xf32>
    %146 = math.exp %145 : vector<16x16xf32>
    %cst_51 = arith.constant dense<0.000000e+00> : vector<16xf32>
    %147 = vector.multi_reduction <add>, %146, %cst_51 [1] : vector<16x16xf32> to vector<16xf32>
    %148 = vector.shape_cast %147 : vector<16xf32> to vector<16x1xf32>
    %149 = tpu.reciprocal %148 {approx = true} : vector<16x1xf32> -> vector<16x1xf32>
    %150 = vector.broadcast %149 : vector<16x1xf32> to vector<16x16xf32>
    %151 = arith.mulf %146, %150 : vector<16x16xf32>
    %152 = arith.truncf %151 : vector<16x16xf32> to vector<16x16xbf16>
    %cst_52 = arith.constant dense<0.000000e+00> : vector<16x12xf32>
    %153 = tpu.matmul %152, %138, %cst_52 {dimension_numbers = #tpu.dot_dimension_numbers<[1], [0], [0], [1], [0, 0, 1, 1], [], []>} : vector<16x16xbf16>, vector<16x12xbf16>, vector<16x12xf32> -> vector<16x12xf32>
    %154 = vector.extract_strided_slice %41 {offsets = [0, 72], sizes = [16, 12], strides = [1, 1]} : vector<16x96xbf16> to vector<16x12xbf16>
    %155 = vector.extract_strided_slice %43 {offsets = [0, 72], sizes = [16, 12], strides = [1, 1]} : vector<16x96xbf16> to vector<16x12xbf16>
    %156 = vector.extract_strided_slice %45 {offsets = [0, 72], sizes = [16, 12], strides = [1, 1]} : vector<16x96xbf16> to vector<16x12xbf16>
    %cst_53 = arith.constant dense<0.000000e+00> : vector<16x16xf32>
    %157 = tpu.matmul %154, %155, %cst_53 {dimension_numbers = #tpu.dot_dimension_numbers<[1], [1], [0], [0], [0, 0, 1, 0], [], []>} : vector<16x12xbf16>, vector<16x12xbf16>, vector<16x16xf32> -> vector<16x16xf32>
    %cst_54 = arith.constant 0.288675129 : f32
    %158 = vector.broadcast %cst_54 : f32 to vector<16x16xf32>
    %159 = arith.mulf %157, %158 : vector<16x16xf32>
    %cst_55 = arith.constant dense<0xFF800000> : vector<16xf32>
    %160 = vector.multi_reduction <maximumf>, %159, %cst_55 [1] : vector<16x16xf32> to vector<16xf32>
    %161 = vector.shape_cast %160 : vector<16xf32> to vector<16x1xf32>
    %162 = vector.broadcast %161 : vector<16x1xf32> to vector<16x16xf32>
    %163 = arith.subf %159, %162 : vector<16x16xf32>
    %164 = math.exp %163 : vector<16x16xf32>
    %cst_56 = arith.constant dense<0.000000e+00> : vector<16xf32>
    %165 = vector.multi_reduction <add>, %164, %cst_56 [1] : vector<16x16xf32> to vector<16xf32>
    %166 = vector.shape_cast %165 : vector<16xf32> to vector<16x1xf32>
    %167 = tpu.reciprocal %166 {approx = true} : vector<16x1xf32> -> vector<16x1xf32>
    %168 = vector.broadcast %167 : vector<16x1xf32> to vector<16x16xf32>
    %169 = arith.mulf %164, %168 : vector<16x16xf32>
    %170 = arith.truncf %169 : vector<16x16xf32> to vector<16x16xbf16>
    %cst_57 = arith.constant dense<0.000000e+00> : vector<16x12xf32>
    %171 = tpu.matmul %170, %156, %cst_57 {dimension_numbers = #tpu.dot_dimension_numbers<[1], [0], [0], [1], [0, 0, 1, 1], [], []>} : vector<16x16xbf16>, vector<16x12xbf16>, vector<16x12xf32> -> vector<16x12xf32>
    %172 = vector.extract_strided_slice %41 {offsets = [0, 84], sizes = [16, 12], strides = [1, 1]} : vector<16x96xbf16> to vector<16x12xbf16>
    %173 = vector.extract_strided_slice %43 {offsets = [0, 84], sizes = [16, 12], strides = [1, 1]} : vector<16x96xbf16> to vector<16x12xbf16>
    %174 = vector.extract_strided_slice %45 {offsets = [0, 84], sizes = [16, 12], strides = [1, 1]} : vector<16x96xbf16> to vector<16x12xbf16>
    %cst_58 = arith.constant dense<0.000000e+00> : vector<16x16xf32>
    %175 = tpu.matmul %172, %173, %cst_58 {dimension_numbers = #tpu.dot_dimension_numbers<[1], [1], [0], [0], [0, 0, 1, 0], [], []>} : vector<16x12xbf16>, vector<16x12xbf16>, vector<16x16xf32> -> vector<16x16xf32>
    %cst_59 = arith.constant 0.288675129 : f32
    %176 = vector.broadcast %cst_59 : f32 to vector<16x16xf32>
    %177 = arith.mulf %175, %176 : vector<16x16xf32>
    %cst_60 = arith.constant dense<0xFF800000> : vector<16xf32>
    %178 = vector.multi_reduction <maximumf>, %177, %cst_60 [1] : vector<16x16xf32> to vector<16xf32>
    %179 = vector.shape_cast %178 : vector<16xf32> to vector<16x1xf32>
    %180 = vector.broadcast %179 : vector<16x1xf32> to vector<16x16xf32>
    %181 = arith.subf %177, %180 : vector<16x16xf32>
    %182 = math.exp %181 : vector<16x16xf32>
    %cst_61 = arith.constant dense<0.000000e+00> : vector<16xf32>
    %183 = vector.multi_reduction <add>, %182, %cst_61 [1] : vector<16x16xf32> to vector<16xf32>
    %184 = vector.shape_cast %183 : vector<16xf32> to vector<16x1xf32>
    %185 = tpu.reciprocal %184 {approx = true} : vector<16x1xf32> -> vector<16x1xf32>
    %186 = vector.broadcast %185 : vector<16x1xf32> to vector<16x16xf32>
    %187 = arith.mulf %182, %186 : vector<16x16xf32>
    %188 = arith.truncf %187 : vector<16x16xf32> to vector<16x16xbf16>
    %cst_62 = arith.constant dense<0.000000e+00> : vector<16x12xf32>
    %189 = tpu.matmul %188, %174, %cst_62 {dimension_numbers = #tpu.dot_dimension_numbers<[1], [0], [0], [1], [0, 0, 1, 1], [], []>} : vector<16x16xbf16>, vector<16x12xbf16>, vector<16x12xf32> -> vector<16x12xf32>
    %190 = tpu.concatenate %63, %81, %99, %117, %135, %153, %171, %189 in 1 : vector<16x12xf32>, vector<16x12xf32>, vector<16x12xf32>, vector<16x12xf32>, vector<16x12xf32>, vector<16x12xf32>, vector<16x12xf32>, vector<16x12xf32> -> vector<16x96xf32>
    %c0_63 = arith.constant 0 : index
    %c0_64 = arith.constant 0 : index
    %191 = vector.load %arg17[%c0_63, %c0_64] : memref<32x96xf32, #tpu.memory_space<vmem>>, vector<16x96xf32>
    tpu.vector_store %arg17[%c0_63, %c0_64], %190 {strides = array<i32>} : memref<32x96xf32, #tpu.memory_space<vmem>>, vector<16x96xf32>,
    %c16 = arith.constant 16 : index
    %c0_65 = arith.constant 0 : index
    %192 = vector.load %arg16[%c16, %c0_65] : memref<32x288xf32, #tpu.memory_space<vmem>>, vector<16x288xf32>
    %193 = vector.extract_strided_slice %192 {offsets = [0, 0], sizes = [16, 96], strides = [1, 1]} : vector<16x288xf32> to vector<16x96xf32>
    %194 = arith.truncf %193 : vector<16x96xf32> to vector<16x96xbf16>
    %195 = vector.extract_strided_slice %192 {offsets = [0, 96], sizes = [16, 96], strides = [1, 1]} : vector<16x288xf32> to vector<16x96xf32>
    %196 = arith.truncf %195 : vector<16x96xf32> to vector<16x96xbf16>
    %197 = vector.extract_strided_slice %192 {offsets = [0, 192], sizes = [16, 96], strides = [1, 1]} : vector<16x288xf32> to vector<16x96xf32>
    %198 = arith.truncf %197 : vector<16x96xf32> to vector<16x96xbf16>
    %199 = vector.extract_strided_slice %194 {offsets = [0, 0], sizes = [16, 12], strides = [1, 1]} : vector<16x96xbf16> to vector<16x12xbf16>
    %200 = vector.extract_strided_slice %196 {offsets = [0, 0], sizes = [16, 12], strides = [1, 1]} : vector<16x96xbf16> to vector<16x12xbf16>
    %201 = vector.extract_strided_slice %198 {offsets = [0, 0], sizes = [16, 12], strides = [1, 1]} : vector<16x96xbf16> to vector<16x12xbf16>
    %cst_66 = arith.constant dense<0.000000e+00> : vector<16x16xf32>
    %202 = tpu.matmul %199, %200, %cst_66 {dimension_numbers = #tpu.dot_dimension_numbers<[1], [1], [0], [0], [0, 0, 1, 0], [], []>} : vector<16x12xbf16>, vector<16x12xbf16>, vector<16x16xf32> -> vector<16x16xf32>
    %cst_67 = arith.constant 0.288675129 : f32
    %203 = vector.broadcast %cst_67 : f32 to vector<16x16xf32>
    %204 = arith.mulf %202, %203 : vector<16x16xf32>
    %cst_68 = arith.constant dense<0xFF800000> : vector<16xf32>
    %205 = vector.multi_reduction <maximumf>, %204, %cst_68 [1] : vector<16x16xf32> to vector<16xf32>
    %206 = vector.shape_cast %205 : vector<16xf32> to vector<16x1xf32>
    %207 = vector.broadcast %206 : vector<16x1xf32> to vector<16x16xf32>
    %208 = arith.subf %204, %207 : vector<16x16xf32>
    %209 = math.exp %208 : vector<16x16xf32>
    %cst_69 = arith.constant dense<0.000000e+00> : vector<16xf32>
    %210 = vector.multi_reduction <add>, %209, %cst_69 [1] : vector<16x16xf32> to vector<16xf32>
    %211 = vector.shape_cast %210 : vector<16xf32> to vector<16x1xf32>
    %212 = tpu.reciprocal %211 {approx = true} : vector<16x1xf32> -> vector<16x1xf32>
    %213 = vector.broadcast %212 : vector<16x1xf32> to vector<16x16xf32>
    %214 = arith.mulf %209, %213 : vector<16x16xf32>
    %215 = arith.truncf %214 : vector<16x16xf32> to vector<16x16xbf16>
    %cst_70 = arith.constant dense<0.000000e+00> : vector<16x12xf32>
    %216 = tpu.matmul %215, %201, %cst_70 {dimension_numbers = #tpu.dot_dimension_numbers<[1], [0], [0], [1], [0, 0, 1, 1], [], []>} : vector<16x16xbf16>, vector<16x12xbf16>, vector<16x12xf32> -> vector<16x12xf32>
    %217 = vector.extract_strided_slice %194 {offsets = [0, 12], sizes = [16, 12], strides = [1, 1]} : vector<16x96xbf16> to vector<16x12xbf16>
    %218 = vector.extract_strided_slice %196 {offsets = [0, 12], sizes = [16, 12], strides = [1, 1]} : vector<16x96xbf16> to vector<16x12xbf16>
    %219 = vector.extract_strided_slice %198 {offsets = [0, 12], sizes = [16, 12], strides = [1, 1]} : vector<16x96xbf16> to vector<16x12xbf16>
    %cst_71 = arith.constant dense<0.000000e+00> : vector<16x16xf32>
    %220 = tpu.matmul %217, %218, %cst_71 {dimension_numbers = #tpu.dot_dimension_numbers<[1], [1], [0], [0], [0, 0, 1, 0], [], []>} : vector<16x12xbf16>, vector<16x12xbf16>, vector<16x16xf32> -> vector<16x16xf32>
    %cst_72 = arith.constant 0.288675129 : f32
    %221 = vector.broadcast %cst_72 : f32 to vector<16x16xf32>
    %222 = arith.mulf %220, %221 : vector<16x16xf32>
    %cst_73 = arith.constant dense<0xFF800000> : vector<16xf32>
    %223 = vector.multi_reduction <maximumf>, %222, %cst_73 [1] : vector<16x16xf32> to vector<16xf32>
    %224 = vector.shape_cast %223 : vector<16xf32> to vector<16x1xf32>
    %225 = vector.broadcast %224 : vector<16x1xf32> to vector<16x16xf32>
    %226 = arith.subf %222, %225 : vector<16x16xf32>
    %227 = math.exp %226 : vector<16x16xf32>
    %cst_74 = arith.constant dense<0.000000e+00> : vector<16xf32>
    %228 = vector.multi_reduction <add>, %227, %cst_74 [1] : vector<16x16xf32> to vector<16xf32>
    %229 = vector.shape_cast %228 : vector<16xf32> to vector<16x1xf32>
    %230 = tpu.reciprocal %229 {approx = true} : vector<16x1xf32> -> vector<16x1xf32>
    %231 = vector.broadcast %230 : vector<16x1xf32> to vector<16x16xf32>
    %232 = arith.mulf %227, %231 : vector<16x16xf32>
    %233 = arith.truncf %232 : vector<16x16xf32> to vector<16x16xbf16>
    %cst_75 = arith.constant dense<0.000000e+00> : vector<16x12xf32>
    %234 = tpu.matmul %233, %219, %cst_75 {dimension_numbers = #tpu.dot_dimension_numbers<[1], [0], [0], [1], [0, 0, 1, 1], [], []>} : vector<16x16xbf16>, vector<16x12xbf16>, vector<16x12xf32> -> vector<16x12xf32>
    %235 = vector.extract_strided_slice %194 {offsets = [0, 24], sizes = [16, 12], strides = [1, 1]} : vector<16x96xbf16> to vector<16x12xbf16>
    %236 = vector.extract_strided_slice %196 {offsets = [0, 24], sizes = [16, 12], strides = [1, 1]} : vector<16x96xbf16> to vector<16x12xbf16>
    %237 = vector.extract_strided_slice %198 {offsets = [0, 24], sizes = [16, 12], strides = [1, 1]} : vector<16x96xbf16> to vector<16x12xbf16>
    %cst_76 = arith.constant dense<0.000000e+00> : vector<16x16xf32>
    %238 = tpu.matmul %235, %236, %cst_76 {dimension_numbers = #tpu.dot_dimension_numbers<[1], [1], [0], [0], [0, 0, 1, 0], [], []>} : vector<16x12xbf16>, vector<16x12xbf16>, vector<16x16xf32> -> vector<16x16xf32>
    %cst_77 = arith.constant 0.288675129 : f32
    %239 = vector.broadcast %cst_77 : f32 to vector<16x16xf32>
    %240 = arith.mulf %238, %239 : vector<16x16xf32>
    %cst_78 = arith.constant dense<0xFF800000> : vector<16xf32>
    %241 = vector.multi_reduction <maximumf>, %240, %cst_78 [1] : vector<16x16xf32> to vector<16xf32>
    %242 = vector.shape_cast %241 : vector<16xf32> to vector<16x1xf32>
    %243 = vector.broadcast %242 : vector<16x1xf32> to vector<16x16xf32>
    %244 = arith.subf %240, %243 : vector<16x16xf32>
    %245 = math.exp %244 : vector<16x16xf32>
    %cst_79 = arith.constant dense<0.000000e+00> : vector<16xf32>
    %246 = vector.multi_reduction <add>, %245, %cst_79 [1] : vector<16x16xf32> to vector<16xf32>
    %247 = vector.shape_cast %246 : vector<16xf32> to vector<16x1xf32>
    %248 = tpu.reciprocal %247 {approx = true} : vector<16x1xf32> -> vector<16x1xf32>
    %249 = vector.broadcast %248 : vector<16x1xf32> to vector<16x16xf32>
    %250 = arith.mulf %245, %249 : vector<16x16xf32>
    %251 = arith.truncf %250 : vector<16x16xf32> to vector<16x16xbf16>
    %cst_80 = arith.constant dense<0.000000e+00> : vector<16x12xf32>
    %252 = tpu.matmul %251, %237, %cst_80 {dimension_numbers = #tpu.dot_dimension_numbers<[1], [0], [0], [1], [0, 0, 1, 1], [], []>} : vector<16x16xbf16>, vector<16x12xbf16>, vector<16x12xf32> -> vector<16x12xf32>
    %253 = vector.extract_strided_slice %194 {offsets = [0, 36], sizes = [16, 12], strides = [1, 1]} : vector<16x96xbf16> to vector<16x12xbf16>
    %254 = vector.extract_strided_slice %196 {offsets = [0, 36], sizes = [16, 12], strides = [1, 1]} : vector<16x96xbf16> to vector<16x12xbf16>
    %255 = vector.extract_strided_slice %198 {offsets = [0, 36], sizes = [16, 12], strides = [1, 1]} : vector<16x96xbf16> to vector<16x12xbf16>
    %cst_81 = arith.constant dense<0.000000e+00> : vector<16x16xf32>
    %256 = tpu.matmul %253, %254, %cst_81 {dimension_numbers = #tpu.dot_dimension_numbers<[1], [1], [0], [0], [0, 0, 1, 0], [], []>} : vector<16x12xbf16>, vector<16x12xbf16>, vector<16x16xf32> -> vector<16x16xf32>
    %cst_82 = arith.constant 0.288675129 : f32
    %257 = vector.broadcast %cst_82 : f32 to vector<16x16xf32>
    %258 = arith.mulf %256, %257 : vector<16x16xf32>
    %cst_83 = arith.constant dense<0xFF800000> : vector<16xf32>
    %259 = vector.multi_reduction <maximumf>, %258, %cst_83 [1] : vector<16x16xf32> to vector<16xf32>
    %260 = vector.shape_cast %259 : vector<16xf32> to vector<16x1xf32>
    %261 = vector.broadcast %260 : vector<16x1xf32> to vector<16x16xf32>
    %262 = arith.subf %258, %261 : vector<16x16xf32>
    %263 = math.exp %262 : vector<16x16xf32>
    %cst_84 = arith.constant dense<0.000000e+00> : vector<16xf32>
    %264 = vector.multi_reduction <add>, %263, %cst_84 [1] : vector<16x16xf32> to vector<16xf32>
    %265 = vector.shape_cast %264 : vector<16xf32> to vector<16x1xf32>
    %266 = tpu.reciprocal %265 {approx = true} : vector<16x1xf32> -> vector<16x1xf32>
    %267 = vector.broadcast %266 : vector<16x1xf32> to vector<16x16xf32>
    %268 = arith.mulf %263, %267 : vector<16x16xf32>
    %269 = arith.truncf %268 : vector<16x16xf32> to vector<16x16xbf16>
    %cst_85 = arith.constant dense<0.000000e+00> : vector<16x12xf32>
    %270 = tpu.matmul %269, %255, %cst_85 {dimension_numbers = #tpu.dot_dimension_numbers<[1], [0], [0], [1], [0, 0, 1, 1], [], []>} : vector<16x16xbf16>, vector<16x12xbf16>, vector<16x12xf32> -> vector<16x12xf32>
    %271 = vector.extract_strided_slice %194 {offsets = [0, 48], sizes = [16, 12], strides = [1, 1]} : vector<16x96xbf16> to vector<16x12xbf16>
    %272 = vector.extract_strided_slice %196 {offsets = [0, 48], sizes = [16, 12], strides = [1, 1]} : vector<16x96xbf16> to vector<16x12xbf16>
    %273 = vector.extract_strided_slice %198 {offsets = [0, 48], sizes = [16, 12], strides = [1, 1]} : vector<16x96xbf16> to vector<16x12xbf16>
    %cst_86 = arith.constant dense<0.000000e+00> : vector<16x16xf32>
    %274 = tpu.matmul %271, %272, %cst_86 {dimension_numbers = #tpu.dot_dimension_numbers<[1], [1], [0], [0], [0, 0, 1, 0], [], []>} : vector<16x12xbf16>, vector<16x12xbf16>, vector<16x16xf32> -> vector<16x16xf32>
    %cst_87 = arith.constant 0.288675129 : f32
    %275 = vector.broadcast %cst_87 : f32 to vector<16x16xf32>
    %276 = arith.mulf %274, %275 : vector<16x16xf32>
    %cst_88 = arith.constant dense<0xFF800000> : vector<16xf32>
    %277 = vector.multi_reduction <maximumf>, %276, %cst_88 [1] : vector<16x16xf32> to vector<16xf32>
    %278 = vector.shape_cast %277 : vector<16xf32> to vector<16x1xf32>
    %279 = vector.broadcast %278 : vector<16x1xf32> to vector<16x16xf32>
    %280 = arith.subf %276, %279 : vector<16x16xf32>
    %281 = math.exp %280 : vector<16x16xf32>
    %cst_89 = arith.constant dense<0.000000e+00> : vector<16xf32>
    %282 = vector.multi_reduction <add>, %281, %cst_89 [1] : vector<16x16xf32> to vector<16xf32>
    %283 = vector.shape_cast %282 : vector<16xf32> to vector<16x1xf32>
    %284 = tpu.reciprocal %283 {approx = true} : vector<16x1xf32> -> vector<16x1xf32>
    %285 = vector.broadcast %284 : vector<16x1xf32> to vector<16x16xf32>
    %286 = arith.mulf %281, %285 : vector<16x16xf32>
    %287 = arith.truncf %286 : vector<16x16xf32> to vector<16x16xbf16>
    %cst_90 = arith.constant dense<0.000000e+00> : vector<16x12xf32>
    %288 = tpu.matmul %287, %273, %cst_90 {dimension_numbers = #tpu.dot_dimension_numbers<[1], [0], [0], [1], [0, 0, 1, 1], [], []>} : vector<16x16xbf16>, vector<16x12xbf16>, vector<16x12xf32> -> vector<16x12xf32>
    %289 = vector.extract_strided_slice %194 {offsets = [0, 60], sizes = [16, 12], strides = [1, 1]} : vector<16x96xbf16> to vector<16x12xbf16>
    %290 = vector.extract_strided_slice %196 {offsets = [0, 60], sizes = [16, 12], strides = [1, 1]} : vector<16x96xbf16> to vector<16x12xbf16>
    %291 = vector.extract_strided_slice %198 {offsets = [0, 60], sizes = [16, 12], strides = [1, 1]} : vector<16x96xbf16> to vector<16x12xbf16>
    %cst_91 = arith.constant dense<0.000000e+00> : vector<16x16xf32>
    %292 = tpu.matmul %289, %290, %cst_91 {dimension_numbers = #tpu.dot_dimension_numbers<[1], [1], [0], [0], [0, 0, 1, 0], [], []>} : vector<16x12xbf16>, vector<16x12xbf16>, vector<16x16xf32> -> vector<16x16xf32>
    %cst_92 = arith.constant 0.288675129 : f32
    %293 = vector.broadcast %cst_92 : f32 to vector<16x16xf32>
    %294 = arith.mulf %292, %293 : vector<16x16xf32>
    %cst_93 = arith.constant dense<0xFF800000> : vector<16xf32>
    %295 = vector.multi_reduction <maximumf>, %294, %cst_93 [1] : vector<16x16xf32> to vector<16xf32>
    %296 = vector.shape_cast %295 : vector<16xf32> to vector<16x1xf32>
    %297 = vector.broadcast %296 : vector<16x1xf32> to vector<16x16xf32>
    %298 = arith.subf %294, %297 : vector<16x16xf32>
    %299 = math.exp %298 : vector<16x16xf32>
    %cst_94 = arith.constant dense<0.000000e+00> : vector<16xf32>
    %300 = vector.multi_reduction <add>, %299, %cst_94 [1] : vector<16x16xf32> to vector<16xf32>
    %301 = vector.shape_cast %300 : vector<16xf32> to vector<16x1xf32>
    %302 = tpu.reciprocal %301 {approx = true} : vector<16x1xf32> -> vector<16x1xf32>
    %303 = vector.broadcast %302 : vector<16x1xf32> to vector<16x16xf32>
    %304 = arith.mulf %299, %303 : vector<16x16xf32>
    %305 = arith.truncf %304 : vector<16x16xf32> to vector<16x16xbf16>
    %cst_95 = arith.constant dense<0.000000e+00> : vector<16x12xf32>
    %306 = tpu.matmul %305, %291, %cst_95 {dimension_numbers = #tpu.dot_dimension_numbers<[1], [0], [0], [1], [0, 0, 1, 1], [], []>} : vector<16x16xbf16>, vector<16x12xbf16>, vector<16x12xf32> -> vector<16x12xf32>
    %307 = vector.extract_strided_slice %194 {offsets = [0, 72], sizes = [16, 12], strides = [1, 1]} : vector<16x96xbf16> to vector<16x12xbf16>
    %308 = vector.extract_strided_slice %196 {offsets = [0, 72], sizes = [16, 12], strides = [1, 1]} : vector<16x96xbf16> to vector<16x12xbf16>
    %309 = vector.extract_strided_slice %198 {offsets = [0, 72], sizes = [16, 12], strides = [1, 1]} : vector<16x96xbf16> to vector<16x12xbf16>
    %cst_96 = arith.constant dense<0.000000e+00> : vector<16x16xf32>
    %310 = tpu.matmul %307, %308, %cst_96 {dimension_numbers = #tpu.dot_dimension_numbers<[1], [1], [0], [0], [0, 0, 1, 0], [], []>} : vector<16x12xbf16>, vector<16x12xbf16>, vector<16x16xf32> -> vector<16x16xf32>
    %cst_97 = arith.constant 0.288675129 : f32
    %311 = vector.broadcast %cst_97 : f32 to vector<16x16xf32>
    %312 = arith.mulf %310, %311 : vector<16x16xf32>
    %cst_98 = arith.constant dense<0xFF800000> : vector<16xf32>
    %313 = vector.multi_reduction <maximumf>, %312, %cst_98 [1] : vector<16x16xf32> to vector<16xf32>
    %314 = vector.shape_cast %313 : vector<16xf32> to vector<16x1xf32>
    %315 = vector.broadcast %314 : vector<16x1xf32> to vector<16x16xf32>
    %316 = arith.subf %312, %315 : vector<16x16xf32>
    %317 = math.exp %316 : vector<16x16xf32>
    %cst_99 = arith.constant dense<0.000000e+00> : vector<16xf32>
    %318 = vector.multi_reduction <add>, %317, %cst_99 [1] : vector<16x16xf32> to vector<16xf32>
    %319 = vector.shape_cast %318 : vector<16xf32> to vector<16x1xf32>
    %320 = tpu.reciprocal %319 {approx = true} : vector<16x1xf32> -> vector<16x1xf32>
    %321 = vector.broadcast %320 : vector<16x1xf32> to vector<16x16xf32>
    %322 = arith.mulf %317, %321 : vector<16x16xf32>
    %323 = arith.truncf %322 : vector<16x16xf32> to vector<16x16xbf16>
    %cst_100 = arith.constant dense<0.000000e+00> : vector<16x12xf32>
    %324 = tpu.matmul %323, %309, %cst_100 {dimension_numbers = #tpu.dot_dimension_numbers<[1], [0], [0], [1], [0, 0, 1, 1], [], []>} : vector<16x16xbf16>, vector<16x12xbf16>, vector<16x12xf32> -> vector<16x12xf32>
    %325 = vector.extract_strided_slice %194 {offsets = [0, 84], sizes = [16, 12], strides = [1, 1]} : vector<16x96xbf16> to vector<16x12xbf16>
    %326 = vector.extract_strided_slice %196 {offsets = [0, 84], sizes = [16, 12], strides = [1, 1]} : vector<16x96xbf16> to vector<16x12xbf16>
    %327 = vector.extract_strided_slice %198 {offsets = [0, 84], sizes = [16, 12], strides = [1, 1]} : vector<16x96xbf16> to vector<16x12xbf16>
    %cst_101 = arith.constant dense<0.000000e+00> : vector<16x16xf32>
    %328 = tpu.matmul %325, %326, %cst_101 {dimension_numbers = #tpu.dot_dimension_numbers<[1], [1], [0], [0], [0, 0, 1, 0], [], []>} : vector<16x12xbf16>, vector<16x12xbf16>, vector<16x16xf32> -> vector<16x16xf32>
    %cst_102 = arith.constant 0.288675129 : f32
    %329 = vector.broadcast %cst_102 : f32 to vector<16x16xf32>
    %330 = arith.mulf %328, %329 : vector<16x16xf32>
    %cst_103 = arith.constant dense<0xFF800000> : vector<16xf32>
    %331 = vector.multi_reduction <maximumf>, %330, %cst_103 [1] : vector<16x16xf32> to vector<16xf32>
    %332 = vector.shape_cast %331 : vector<16xf32> to vector<16x1xf32>
    %333 = vector.broadcast %332 : vector<16x1xf32> to vector<16x16xf32>
    %334 = arith.subf %330, %333 : vector<16x16xf32>
    %335 = math.exp %334 : vector<16x16xf32>
    %cst_104 = arith.constant dense<0.000000e+00> : vector<16xf32>
    %336 = vector.multi_reduction <add>, %335, %cst_104 [1] : vector<16x16xf32> to vector<16xf32>
    %337 = vector.shape_cast %336 : vector<16xf32> to vector<16x1xf32>
    %338 = tpu.reciprocal %337 {approx = true} : vector<16x1xf32> -> vector<16x1xf32>
    %339 = vector.broadcast %338 : vector<16x1xf32> to vector<16x16xf32>
    %340 = arith.mulf %335, %339 : vector<16x16xf32>
    %341 = arith.truncf %340 : vector<16x16xf32> to vector<16x16xbf16>
    %cst_105 = arith.constant dense<0.000000e+00> : vector<16x12xf32>
    %342 = tpu.matmul %341, %327, %cst_105 {dimension_numbers = #tpu.dot_dimension_numbers<[1], [0], [0], [1], [0, 0, 1, 1], [], []>} : vector<16x16xbf16>, vector<16x12xbf16>, vector<16x12xf32> -> vector<16x12xf32>
    %343 = tpu.concatenate %216, %234, %252, %270, %288, %306, %324, %342 in 1 : vector<16x12xf32>, vector<16x12xf32>, vector<16x12xf32>, vector<16x12xf32>, vector<16x12xf32>, vector<16x12xf32>, vector<16x12xf32>, vector<16x12xf32> -> vector<16x96xf32>
    %c16_106 = arith.constant 16 : index
    %c0_107 = arith.constant 0 : index
    %344 = vector.load %arg17[%c16_106, %c0_107] : memref<32x96xf32, #tpu.memory_space<vmem>>, vector<16x96xf32>
    tpu.vector_store %arg17[%c16_106, %c0_107], %343 {strides = array<i32>} : memref<32x96xf32, #tpu.memory_space<vmem>>, vector<16x96xf32>,
    %c0_108 = arith.constant 0 : index
    %c0_109 = arith.constant 0 : index
    %345 = vector.load %arg15[%c0_108, %c0_109] : memref<32x96xf32, #tpu.memory_space<vmem>>, vector<32x96xf32>
    %c0_110 = arith.constant 0 : index
    %c0_111 = arith.constant 0 : index
    %346 = vector.load %arg17[%c0_110, %c0_111] : memref<32x96xf32, #tpu.memory_space<vmem>>, vector<32x96xf32>
    %347 = arith.truncf %346 : vector<32x96xf32> to vector<32x96xbf16>
    %c0_112 = arith.constant 0 : index
    %c0_113 = arith.constant 0 : index
    %c0_114 = arith.constant 0 : index
    %348 = vector.load %arg6[%c0_112, %c0_113, %c0_114] : memref<1x96x96xbf16, #tpu.memory_space<vmem>>, vector<1x96x96xbf16>
    %349 = vector.shape_cast %348 : vector<1x96x96xbf16> to vector<96x96xbf16>
    %cst_115 = arith.constant dense<0.000000e+00> : vector<32x96xf32>
    %350 = tpu.matmul %347, %349, %cst_115 {dimension_numbers = #tpu.dot_dimension_numbers<[1], [0], [0], [1], [0, 0, 1, 1], [], []>} : vector<32x96xbf16>, vector<96x96xbf16>, vector<32x96xf32> -> vector<32x96xf32>
    %351 = arith.addf %345, %350 : vector<32x96xf32>
    %c0_116 = arith.constant 0 : index
    %c0_117 = arith.constant 0 : index
    %c0_118 = arith.constant 0 : index
    %352 = vector.load %arg7[%c0_116, %c0_117, %c0_118] : memref<1x1x96xf32, #tpu.memory_space<vmem>>, vector<1x1x96xf32>
    %353 = vector.shape_cast %352 : vector<1x1x96xf32> to vector<1x96xf32>
    %354 = vector.broadcast %353 : vector<1x96xf32> to vector<32x96xf32>
    %355 = arith.addf %351, %354 : vector<32x96xf32>
    %c0_119 = arith.constant 0 : index
    %c0_120 = arith.constant 0 : index
    %356 = vector.load %arg15[%c0_119, %c0_120] : memref<32x96xf32, #tpu.memory_space<vmem>>, vector<32x96xf32>
    tpu.vector_store %arg15[%c0_119, %c0_120], %355 {strides = array<i32>} : memref<32x96xf32, #tpu.memory_space<vmem>>, vector<32x96xf32>,
    %c0_121 = arith.constant 0 : index
    %c0_122 = arith.constant 0 : index
    %357 = vector.load %arg15[%c0_121, %c0_122] : memref<32x96xf32, #tpu.memory_space<vmem>>, vector<32x96xf32>
    %cst_123 = arith.constant dense<0.000000e+00> : vector<32xf32>
    %358 = vector.multi_reduction <add>, %357, %cst_123 [1] : vector<32x96xf32> to vector<32xf32>
    %359 = vector.shape_cast %358 : vector<32xf32> to vector<32x1xf32>
    %cst_124 = arith.constant 9.600000e+01 : f32
    %360 = vector.broadcast %cst_124 : f32 to vector<32x1xf32>
    %361 = arith.divf %359, %360 : vector<32x1xf32>
    %362 = vector.broadcast %361 : vector<32x1xf32> to vector<32x96xf32>
    %363 = arith.subf %357, %362 : vector<32x96xf32>
    %364 = arith.mulf %363, %363 : vector<32x96xf32>
    %cst_125 = arith.constant dense<0.000000e+00> : vector<32xf32>
    %365 = vector.multi_reduction <add>, %364, %cst_125 [1] : vector<32x96xf32> to vector<32xf32>
    %366 = vector.shape_cast %365 : vector<32xf32> to vector<32x1xf32>
    %cst_126 = arith.constant 9.600000e+01 : f32
    %367 = vector.broadcast %cst_126 : f32 to vector<32x1xf32>
    %368 = arith.divf %366, %367 : vector<32x1xf32>
    %369 = vector.broadcast %361 : vector<32x1xf32> to vector<32x96xf32>
    %370 = arith.subf %357, %369 : vector<32x96xf32>
    %cst_127 = arith.constant 9.99999974E-6 : f32
    %371 = vector.broadcast %cst_127 : f32 to vector<32x1xf32>
    %372 = arith.addf %368, %371 : vector<32x1xf32>
    %373 = math.rsqrt %372 : vector<32x1xf32>
    %374 = vector.broadcast %373 : vector<32x1xf32> to vector<32x96xf32>
    %375 = arith.mulf %370, %374 : vector<32x96xf32>
    %c0_128 = arith.constant 0 : index
    %c0_129 = arith.constant 0 : index
    %c0_130 = arith.constant 0 : index
    %376 = vector.load %arg8[%c0_128, %c0_129, %c0_130] : memref<1x1x96xf32, #tpu.memory_space<vmem>>, vector<1x1x96xf32>
    %377 = vector.shape_cast %376 : vector<1x1x96xf32> to vector<1x96xf32>
    %378 = vector.broadcast %377 : vector<1x96xf32> to vector<32x96xf32>
    %379 = arith.mulf %375, %378 : vector<32x96xf32>
    %c0_131 = arith.constant 0 : index
    %c0_132 = arith.constant 0 : index
    %c0_133 = arith.constant 0 : index
    %380 = vector.load %arg9[%c0_131, %c0_132, %c0_133] : memref<1x1x96xf32, #tpu.memory_space<vmem>>, vector<1x1x96xf32>
    %381 = vector.shape_cast %380 : vector<1x1x96xf32> to vector<1x96xf32>
    %382 = vector.broadcast %381 : vector<1x96xf32> to vector<32x96xf32>
    %383 = arith.addf %379, %382 : vector<32x96xf32>
    %384 = arith.truncf %383 : vector<32x96xf32> to vector<32x96xbf16>
    %c0_134 = arith.constant 0 : index
    %c0_135 = arith.constant 0 : index
    %c0_136 = arith.constant 0 : index
    %385 = vector.load %arg10[%c0_134, %c0_135, %c0_136] : memref<1x96x384xbf16, #tpu.memory_space<vmem>>, vector<1x96x384xbf16>
    %386 = vector.shape_cast %385 : vector<1x96x384xbf16> to vector<96x384xbf16>
    %cst_137 = arith.constant dense<0.000000e+00> : vector<32x384xf32>
    %387 = tpu.matmul %384, %386, %cst_137 {dimension_numbers = #tpu.dot_dimension_numbers<[1], [0], [0], [1], [0, 0, 1, 1], [], []>} : vector<32x96xbf16>, vector<96x384xbf16>, vector<32x384xf32> -> vector<32x384xf32>
    %c0_138 = arith.constant 0 : index
    %c0_139 = arith.constant 0 : index
    %c0_140 = arith.constant 0 : index
    %388 = vector.load %arg11[%c0_138, %c0_139, %c0_140] : memref<1x1x384xf32, #tpu.memory_space<vmem>>, vector<1x1x384xf32>
    %389 = vector.shape_cast %388 : vector<1x1x384xf32> to vector<1x384xf32>
    %390 = vector.broadcast %389 : vector<1x384xf32> to vector<32x384xf32>
    %391 = arith.addf %387, %390 : vector<32x384xf32>
    %cst_141 = arith.constant 5.000000e-01 : f32
    %392 = vector.broadcast %cst_141 : f32 to vector<32x384xf32>
    %393 = arith.mulf %391, %392 : vector<32x384xf32>
    %cst_142 = arith.constant 0.707106769 : f32
    %394 = vector.broadcast %cst_142 : f32 to vector<32x384xf32>
    %395 = arith.mulf %391, %394 : vector<32x384xf32>
    %396 = math.erf %395 : vector<32x384xf32>
    %cst_143 = arith.constant 1.000000e+00 : f32
    %397 = vector.broadcast %cst_143 : f32 to vector<32x384xf32>
    %398 = arith.addf %397, %396 : vector<32x384xf32>
    %399 = arith.mulf %393, %398 : vector<32x384xf32>
    %c0_144 = arith.constant 0 : index
    %c0_145 = arith.constant 0 : index
    %400 = vector.load %arg18[%c0_144, %c0_145] : memref<32x384xf32, #tpu.memory_space<vmem>>, vector<32x384xf32>
    tpu.vector_store %arg18[%c0_144, %c0_145], %399 {strides = array<i32>} : memref<32x384xf32, #tpu.memory_space<vmem>>, vector<32x384xf32>,
    %c0_146 = arith.constant 0 : index
    %c0_147 = arith.constant 0 : index
    %401 = vector.load %arg15[%c0_146, %c0_147] : memref<32x96xf32, #tpu.memory_space<vmem>>, vector<32x96xf32>
    %c0_148 = arith.constant 0 : index
    %c0_149 = arith.constant 0 : index
    %402 = vector.load %arg18[%c0_148, %c0_149] : memref<32x384xf32, #tpu.memory_space<vmem>>, vector<32x384xf32>
    %403 = arith.truncf %402 : vector<32x384xf32> to vector<32x384xbf16>
    %c0_150 = arith.constant 0 : index
    %c0_151 = arith.constant 0 : index
    %c0_152 = arith.constant 0 : index
    %404 = vector.load %arg12[%c0_150, %c0_151, %c0_152] : memref<1x384x96xbf16, #tpu.memory_space<vmem>>, vector<1x384x96xbf16>
    %405 = vector.shape_cast %404 : vector<1x384x96xbf16> to vector<384x96xbf16>
    %cst_153 = arith.constant dense<0.000000e+00> : vector<32x96xf32>
    %406 = tpu.matmul %403, %405, %cst_153 {dimension_numbers = #tpu.dot_dimension_numbers<[1], [0], [0], [1], [0, 0, 1, 1], [], []>} : vector<32x384xbf16>, vector<384x96xbf16>, vector<32x96xf32> -> vector<32x96xf32>
    %407 = arith.addf %401, %406 : vector<32x96xf32>
    %c0_154 = arith.constant 0 : index
    %c0_155 = arith.constant 0 : index
    %c0_156 = arith.constant 0 : index
    %408 = vector.load %arg13[%c0_154, %c0_155, %c0_156] : memref<1x1x96xf32, #tpu.memory_space<vmem>>, vector<1x1x96xf32>
    %409 = vector.shape_cast %408 : vector<1x1x96xf32> to vector<1x96xf32>
    %410 = vector.broadcast %409 : vector<1x96xf32> to vector<32x96xf32>
    %411 = arith.addf %407, %410 : vector<32x96xf32>
    %c0_157 = arith.constant 0 : index
    %c0_158 = arith.constant 0 : index
    %412 = vector.load %arg15[%c0_157, %c0_158] : memref<32x96xf32, #tpu.memory_space<vmem>>, vector<32x96xf32>
    tpu.vector_store %arg15[%c0_157, %c0_158], %411 {strides = array<i32>} : memref<32x96xf32, #tpu.memory_space<vmem>>, vector<32x96xf32>,
    %c7_i32 = arith.constant 7 : i32
    %413 = arith.cmpi eq, %arg0, %c7_i32 : i32
    %414 = arith.extui %413 : i1 to i32
    %c0_i32_159 = arith.constant 0 : i32
    %415 = arith.cmpi ne, %414, %c0_i32_159 : i32
    scf.if %415 {
      %c0_160 = arith.constant 0 : index
      %c0_161 = arith.constant 0 : index
      %416 = vector.load %arg15[%c0_160, %c0_161] : memref<32x96xf32, #tpu.memory_space<vmem>>, vector<32x96xf32>
      %c0_162 = arith.constant 0 : index
      %c0_163 = arith.constant 0 : index
      %417 = vector.load %arg14[%c0_162, %c0_163] : memref<32x96xf32, #tpu.memory_space<vmem>>, vector<32x96xf32>
      tpu.vector_store %arg14[%c0_162, %c0_163], %416 {strides = array<i32>} : memref<32x96xf32, #tpu.memory_space<vmem>>, vector<32x96xf32>,
    } else {
    }
    return
  }
  func.func @transform_0(%arg0: i32) -> (i32, i32) {
    %c0_i32 = arith.constant 0 : i32
    %c0_i32_0 = arith.constant 0 : i32
    %c0_i32_1 = arith.constant 0 : i32
    return %c0_i32, %c0_i32_0 : i32, i32
  }
  func.func @transform_1(%arg0: i32) -> (i32, i32, i32) {
    %c0_i32 = arith.constant 0 : i32
    %c0_i32_0 = arith.constant 0 : i32
    %c0_i32_1 = arith.constant 0 : i32
    return %arg0, %c0_i32, %c0_i32_0 : i32, i32, i32
  }
  func.func @transform_2(%arg0: i32) -> (i32, i32, i32) {
    %c0_i32 = arith.constant 0 : i32
    %c0_i32_0 = arith.constant 0 : i32
    %c0_i32_1 = arith.constant 0 : i32
    return %arg0, %c0_i32, %c0_i32_0 : i32, i32, i32
  }
  func.func @transform_3(%arg0: i32) -> (i32, i32, i32) {
    %c0_i32 = arith.constant 0 : i32
    %c0_i32_0 = arith.constant 0 : i32
    %c0_i32_1 = arith.constant 0 : i32
    return %arg0, %c0_i32, %c0_i32_0 : i32, i32, i32
  }
  func.func @transform_4(%arg0: i32) -> (i32, i32, i32) {
    %c0_i32 = arith.constant 0 : i32
    %c0_i32_0 = arith.constant 0 : i32
    %c0_i32_1 = arith.constant 0 : i32
    return %arg0, %c0_i32, %c0_i32_0 : i32, i32, i32
  }
  func.func @transform_5(%arg0: i32) -> (i32, i32, i32) {
    %c0_i32 = arith.constant 0 : i32
    %c0_i32_0 = arith.constant 0 : i32
    %c0_i32_1 = arith.constant 0 : i32
    return %arg0, %c0_i32, %c0_i32_0 : i32, i32, i32
  }
  func.func @transform_6(%arg0: i32) -> (i32, i32, i32) {
    %c0_i32 = arith.constant 0 : i32
    %c0_i32_0 = arith.constant 0 : i32
    %c0_i32_1 = arith.constant 0 : i32
    return %arg0, %c0_i32, %c0_i32_0 : i32, i32, i32
  }
  func.func @transform_7(%arg0: i32) -> (i32, i32, i32) {
    %c0_i32 = arith.constant 0 : i32
    %c0_i32_0 = arith.constant 0 : i32
    %c0_i32_1 = arith.constant 0 : i32
    return %arg0, %c0_i32, %c0_i32_0 : i32, i32, i32
  }
  func.func @transform_8(%arg0: i32) -> (i32, i32, i32) {
    %c0_i32 = arith.constant 0 : i32
    %c0_i32_0 = arith.constant 0 : i32
    %c0_i32_1 = arith.constant 0 : i32
    return %arg0, %c0_i32, %c0_i32_0 : i32, i32, i32
  }
  func.func @transform_9(%arg0: i32) -> (i32, i32, i32) {
    %c0_i32 = arith.constant 0 : i32
    %c0_i32_0 = arith.constant 0 : i32
    %c0_i32_1 = arith.constant 0 : i32
    return %arg0, %c0_i32, %c0_i32_0 : i32, i32, i32
  }
  func.func @transform_10(%arg0: i32) -> (i32, i32, i32) {
    %c0_i32 = arith.constant 0 : i32
    %c0_i32_0 = arith.constant 0 : i32
    %c0_i32_1 = arith.constant 0 : i32
    return %arg0, %c0_i32, %c0_i32_0 : i32, i32, i32
  }
  func.func @transform_11(%arg0: i32) -> (i32, i32, i32) {
    %c0_i32 = arith.constant 0 : i32
    %c0_i32_0 = arith.constant 0 : i32
    %c0_i32_1 = arith.constant 0 : i32
    return %arg0, %c0_i32, %c0_i32_0 : i32, i32, i32
  }
  func.func @transform_12(%arg0: i32) -> (i32, i32, i32) {
    %c0_i32 = arith.constant 0 : i32
    %c0_i32_0 = arith.constant 0 : i32
    %c0_i32_1 = arith.constant 0 : i32
    return %arg0, %c0_i32, %c0_i32_0 : i32, i32, i32
  }
  func.func @transform_13(%arg0: i32) -> (i32, i32) {
    %c0_i32 = arith.constant 0 : i32
    %c0_i32_0 = arith.constant 0 : i32
    %c0_i32_1 = arith.constant 0 : i32
    return %c0_i32, %c0_i32_0 : i32, i32
  }
}

module attributes {stable_mosaic.version = 11 : i64} {
  func.func @_gemm_kernel(%arg0: i32, %arg1: memref<32x864xbf16, #tpu.memory_space<vmem>>, %arg2: memref<864x128xbf16, #tpu.memory_space<vmem>>, %arg3: memref<1x128xf32, #tpu.memory_space<vmem>>, %arg4: memref<1x128xf32, #tpu.memory_space<vmem>>, %arg5: memref<32x128xf32, #tpu.memory_space<vmem>>) attributes {dimension_semantics = [#tpu.dimension_semantics<parallel>], iteration_bounds = array<i64: 1>, scalar_prefetch = 0 : i64, scratch_operands = 0 : i64, tpu.core_type = #tpu.core_type<tc>, window_params = [{transform_indices = @transform_0, window_bounds = array<i64: 32, 864>}, {pipeline_mode = #tpu.pipeline_mode<synchronous>, transform_indices = @transform_1, window_bounds = array<i64: 864, 128>}, {pipeline_mode = #tpu.pipeline_mode<synchronous>, transform_indices = @transform_2, window_bounds = array<i64: 1, 128>}, {pipeline_mode = #tpu.pipeline_mode<synchronous>, transform_indices = @transform_3, window_bounds = array<i64: 1, 128>}, {transform_indices = @transform_4, window_bounds = array<i64: 32, 128>}]} {
    %c0 = arith.constant 0 : index
    %c0_0 = arith.constant 0 : index
    %0 = vector.load %arg1[%c0, %c0_0] : memref<32x864xbf16, #tpu.memory_space<vmem>>, vector<32x864xbf16>
    %c0_1 = arith.constant 0 : index
    %c0_2 = arith.constant 0 : index
    %1 = vector.load %arg2[%c0_1, %c0_2] : memref<864x128xbf16, #tpu.memory_space<vmem>>, vector<864x128xbf16>
    %cst = arith.constant dense<0.000000e+00> : vector<32x128xf32>
    %2 = tpu.matmul %0, %1, %cst {dimension_numbers = #tpu.dot_dimension_numbers<[1], [0], [0], [1], [0, 0, 1, 1], [], []>} : vector<32x864xbf16>, vector<864x128xbf16>, vector<32x128xf32> -> vector<32x128xf32>
    %c0_3 = arith.constant 0 : index
    %c0_4 = arith.constant 0 : index
    %3 = vector.load %arg3[%c0_3, %c0_4] : memref<1x128xf32, #tpu.memory_space<vmem>>, vector<1x128xf32>
    %4 = vector.broadcast %3 : vector<1x128xf32> to vector<32x128xf32>
    %5 = arith.mulf %2, %4 : vector<32x128xf32>
    %c0_5 = arith.constant 0 : index
    %c0_6 = arith.constant 0 : index
    %6 = vector.load %arg4[%c0_5, %c0_6] : memref<1x128xf32, #tpu.memory_space<vmem>>, vector<1x128xf32>
    %7 = vector.broadcast %6 : vector<1x128xf32> to vector<32x128xf32>
    %8 = arith.addf %5, %7 : vector<32x128xf32>
    %cst_7 = arith.constant 5.000000e-01 : f32
    %9 = vector.broadcast %cst_7 : f32 to vector<32x128xf32>
    %10 = arith.mulf %8, %9 : vector<32x128xf32>
    %cst_8 = arith.constant 0.707106769 : f32
    %11 = vector.broadcast %cst_8 : f32 to vector<32x128xf32>
    %12 = arith.mulf %8, %11 : vector<32x128xf32>
    %13 = math.erf %12 : vector<32x128xf32>
    %cst_9 = arith.constant 1.000000e+00 : f32
    %14 = vector.broadcast %cst_9 : f32 to vector<32x128xf32>
    %15 = arith.addf %14, %13 : vector<32x128xf32>
    %16 = arith.mulf %10, %15 : vector<32x128xf32>
    %c0_10 = arith.constant 0 : index
    %c0_11 = arith.constant 0 : index
    %17 = vector.load %arg5[%c0_10, %c0_11] : memref<32x128xf32, #tpu.memory_space<vmem>>, vector<32x128xf32>
    tpu.vector_store %arg5[%c0_10, %c0_11], %16 {strides = array<i32>} : memref<32x128xf32, #tpu.memory_space<vmem>>, vector<32x128xf32>,
    return
  }
  func.func @transform_0(%arg0: i32) -> (i32, i32) {
    %c0_i32 = arith.constant 0 : i32
    %c0_i32_0 = arith.constant 0 : i32
    return %arg0, %c0_i32 : i32, i32
  }
  func.func @transform_1(%arg0: i32) -> (i32, i32) {
    %c0_i32 = arith.constant 0 : i32
    %c0_i32_0 = arith.constant 0 : i32
    %c0_i32_1 = arith.constant 0 : i32
    return %c0_i32, %c0_i32_0 : i32, i32
  }
  func.func @transform_2(%arg0: i32) -> (i32, i32) {
    %c0_i32 = arith.constant 0 : i32
    %c0_i32_0 = arith.constant 0 : i32
    %c0_i32_1 = arith.constant 0 : i32
    return %c0_i32, %c0_i32_0 : i32, i32
  }
  func.func @transform_3(%arg0: i32) -> (i32, i32) {
    %c0_i32 = arith.constant 0 : i32
    %c0_i32_0 = arith.constant 0 : i32
    %c0_i32_1 = arith.constant 0 : i32
    return %c0_i32, %c0_i32_0 : i32, i32
  }
  func.func @transform_4(%arg0: i32) -> (i32, i32) {
    %c0_i32 = arith.constant 0 : i32
    %c0_i32_0 = arith.constant 0 : i32
    return %arg0, %c0_i32 : i32, i32
  }
}

module attributes {stable_mosaic.version = 11 : i64} {
  func.func @_gemm_kernel(%arg0: i32, %arg1: memref<128x864xbf16, #tpu.memory_space<vmem>>, %arg2: memref<864x128xbf16, #tpu.memory_space<vmem>>, %arg3: memref<1x128xf32, #tpu.memory_space<vmem>>, %arg4: memref<1x128xf32, #tpu.memory_space<vmem>>, %arg5: memref<128x128xf32, #tpu.memory_space<vmem>>) attributes {dimension_semantics = [#tpu.dimension_semantics<parallel>], iteration_bounds = array<i64: 1>, scalar_prefetch = 0 : i64, scratch_operands = 0 : i64, tpu.core_type = #tpu.core_type<tc>, window_params = [{transform_indices = @transform_0, window_bounds = array<i64: 128, 864>}, {pipeline_mode = #tpu.pipeline_mode<synchronous>, transform_indices = @transform_1, window_bounds = array<i64: 864, 128>}, {pipeline_mode = #tpu.pipeline_mode<synchronous>, transform_indices = @transform_2, window_bounds = array<i64: 1, 128>}, {pipeline_mode = #tpu.pipeline_mode<synchronous>, transform_indices = @transform_3, window_bounds = array<i64: 1, 128>}, {transform_indices = @transform_4, window_bounds = array<i64: 128, 128>}]} {
    %c0 = arith.constant 0 : index
    %c0_0 = arith.constant 0 : index
    %0 = vector.load %arg1[%c0, %c0_0] : memref<128x864xbf16, #tpu.memory_space<vmem>>, vector<128x864xbf16>
    %c0_1 = arith.constant 0 : index
    %c0_2 = arith.constant 0 : index
    %1 = vector.load %arg2[%c0_1, %c0_2] : memref<864x128xbf16, #tpu.memory_space<vmem>>, vector<864x128xbf16>
    %cst = arith.constant dense<0.000000e+00> : vector<128x128xf32>
    %2 = tpu.matmul %0, %1, %cst {dimension_numbers = #tpu.dot_dimension_numbers<[1], [0], [0], [1], [0, 0, 1, 1], [], []>} : vector<128x864xbf16>, vector<864x128xbf16>, vector<128x128xf32> -> vector<128x128xf32>
    %c0_3 = arith.constant 0 : index
    %c0_4 = arith.constant 0 : index
    %3 = vector.load %arg3[%c0_3, %c0_4] : memref<1x128xf32, #tpu.memory_space<vmem>>, vector<1x128xf32>
    %4 = vector.broadcast %3 : vector<1x128xf32> to vector<128x128xf32>
    %5 = arith.mulf %2, %4 : vector<128x128xf32>
    %c0_5 = arith.constant 0 : index
    %c0_6 = arith.constant 0 : index
    %6 = vector.load %arg4[%c0_5, %c0_6] : memref<1x128xf32, #tpu.memory_space<vmem>>, vector<1x128xf32>
    %7 = vector.broadcast %6 : vector<1x128xf32> to vector<128x128xf32>
    %8 = arith.addf %5, %7 : vector<128x128xf32>
    %cst_7 = arith.constant 5.000000e-01 : f32
    %9 = vector.broadcast %cst_7 : f32 to vector<128x128xf32>
    %10 = arith.mulf %8, %9 : vector<128x128xf32>
    %cst_8 = arith.constant 0.707106769 : f32
    %11 = vector.broadcast %cst_8 : f32 to vector<128x128xf32>
    %12 = arith.mulf %8, %11 : vector<128x128xf32>
    %13 = math.erf %12 : vector<128x128xf32>
    %cst_9 = arith.constant 1.000000e+00 : f32
    %14 = vector.broadcast %cst_9 : f32 to vector<128x128xf32>
    %15 = arith.addf %14, %13 : vector<128x128xf32>
    %16 = arith.mulf %10, %15 : vector<128x128xf32>
    %c0_10 = arith.constant 0 : index
    %c0_11 = arith.constant 0 : index
    %17 = vector.load %arg5[%c0_10, %c0_11] : memref<128x128xf32, #tpu.memory_space<vmem>>, vector<128x128xf32>
    tpu.vector_store %arg5[%c0_10, %c0_11], %16 {strides = array<i32>} : memref<128x128xf32, #tpu.memory_space<vmem>>, vector<128x128xf32>,
    return
  }
  func.func @transform_0(%arg0: i32) -> (i32, i32) {
    %c0_i32 = arith.constant 0 : i32
    %c0_i32_0 = arith.constant 0 : i32
    return %arg0, %c0_i32 : i32, i32
  }
  func.func @transform_1(%arg0: i32) -> (i32, i32) {
    %c0_i32 = arith.constant 0 : i32
    %c0_i32_0 = arith.constant 0 : i32
    %c0_i32_1 = arith.constant 0 : i32
    return %c0_i32, %c0_i32_0 : i32, i32
  }
  func.func @transform_2(%arg0: i32) -> (i32, i32) {
    %c0_i32 = arith.constant 0 : i32
    %c0_i32_0 = arith.constant 0 : i32
    %c0_i32_1 = arith.constant 0 : i32
    return %c0_i32, %c0_i32_0 : i32, i32
  }
  func.func @transform_3(%arg0: i32) -> (i32, i32) {
    %c0_i32 = arith.constant 0 : i32
    %c0_i32_0 = arith.constant 0 : i32
    %c0_i32_1 = arith.constant 0 : i32
    return %c0_i32, %c0_i32_0 : i32, i32
  }
  func.func @transform_4(%arg0: i32) -> (i32, i32) {
    %c0_i32 = arith.constant 0 : i32
    %c0_i32_0 = arith.constant 0 : i32
    return %arg0, %c0_i32 : i32, i32
  }
}

module attributes {stable_mosaic.version = 11 : i64} {
  func.func @_gemm_kernel(%arg0: i32, %arg1: memref<512x432xbf16, #tpu.memory_space<vmem>>, %arg2: memref<432x128xbf16, #tpu.memory_space<vmem>>, %arg3: memref<1x128xf32, #tpu.memory_space<vmem>>, %arg4: memref<1x128xf32, #tpu.memory_space<vmem>>, %arg5: memref<512x128xf32, #tpu.memory_space<vmem>>) attributes {dimension_semantics = [#tpu.dimension_semantics<parallel>], iteration_bounds = array<i64: 1>, scalar_prefetch = 0 : i64, scratch_operands = 0 : i64, tpu.core_type = #tpu.core_type<tc>, window_params = [{transform_indices = @transform_0, window_bounds = array<i64: 512, 432>}, {pipeline_mode = #tpu.pipeline_mode<synchronous>, transform_indices = @transform_1, window_bounds = array<i64: 432, 128>}, {pipeline_mode = #tpu.pipeline_mode<synchronous>, transform_indices = @transform_2, window_bounds = array<i64: 1, 128>}, {pipeline_mode = #tpu.pipeline_mode<synchronous>, transform_indices = @transform_3, window_bounds = array<i64: 1, 128>}, {transform_indices = @transform_4, window_bounds = array<i64: 512, 128>}]} {
    %c0 = arith.constant 0 : index
    %c0_0 = arith.constant 0 : index
    %0 = vector.load %arg1[%c0, %c0_0] : memref<512x432xbf16, #tpu.memory_space<vmem>>, vector<512x432xbf16>
    %c0_1 = arith.constant 0 : index
    %c0_2 = arith.constant 0 : index
    %1 = vector.load %arg2[%c0_1, %c0_2] : memref<432x128xbf16, #tpu.memory_space<vmem>>, vector<432x128xbf16>
    %cst = arith.constant dense<0.000000e+00> : vector<512x128xf32>
    %2 = tpu.matmul %0, %1, %cst {dimension_numbers = #tpu.dot_dimension_numbers<[1], [0], [0], [1], [0, 0, 1, 1], [], []>} : vector<512x432xbf16>, vector<432x128xbf16>, vector<512x128xf32> -> vector<512x128xf32>
    %c0_3 = arith.constant 0 : index
    %c0_4 = arith.constant 0 : index
    %3 = vector.load %arg3[%c0_3, %c0_4] : memref<1x128xf32, #tpu.memory_space<vmem>>, vector<1x128xf32>
    %4 = vector.broadcast %3 : vector<1x128xf32> to vector<512x128xf32>
    %5 = arith.mulf %2, %4 : vector<512x128xf32>
    %c0_5 = arith.constant 0 : index
    %c0_6 = arith.constant 0 : index
    %6 = vector.load %arg4[%c0_5, %c0_6] : memref<1x128xf32, #tpu.memory_space<vmem>>, vector<1x128xf32>
    %7 = vector.broadcast %6 : vector<1x128xf32> to vector<512x128xf32>
    %8 = arith.addf %5, %7 : vector<512x128xf32>
    %c0_7 = arith.constant 0 : index
    %c0_8 = arith.constant 0 : index
    %9 = vector.load %arg5[%c0_7, %c0_8] : memref<512x128xf32, #tpu.memory_space<vmem>>, vector<512x128xf32>
    tpu.vector_store %arg5[%c0_7, %c0_8], %8 {strides = array<i32>} : memref<512x128xf32, #tpu.memory_space<vmem>>, vector<512x128xf32>,
    return
  }
  func.func @transform_0(%arg0: i32) -> (i32, i32) {
    %c0_i32 = arith.constant 0 : i32
    %c0_i32_0 = arith.constant 0 : i32
    return %arg0, %c0_i32 : i32, i32
  }
  func.func @transform_1(%arg0: i32) -> (i32, i32) {
    %c0_i32 = arith.constant 0 : i32
    %c0_i32_0 = arith.constant 0 : i32
    %c0_i32_1 = arith.constant 0 : i32
    return %c0_i32, %c0_i32_0 : i32, i32
  }
  func.func @transform_2(%arg0: i32) -> (i32, i32) {
    %c0_i32 = arith.constant 0 : i32
    %c0_i32_0 = arith.constant 0 : i32
    %c0_i32_1 = arith.constant 0 : i32
    return %c0_i32, %c0_i32_0 : i32, i32
  }
  func.func @transform_3(%arg0: i32) -> (i32, i32) {
    %c0_i32 = arith.constant 0 : i32
    %c0_i32_0 = arith.constant 0 : i32
    %c0_i32_1 = arith.constant 0 : i32
    return %c0_i32, %c0_i32_0 : i32, i32
  }
  func.func @transform_4(%arg0: i32) -> (i32, i32) {
    %c0_i32 = arith.constant 0 : i32
    %c0_i32_0 = arith.constant 0 : i32
    return %arg0, %c0_i32 : i32, i32
  }
}

</mosaic_0001>

<bundles_post_ra>
// kernel: hybrid_transformer_forward.6
= control target key start
LH: loop header
LB: loop body
LE: loop exit
PB: predicated region body
PF: predicated region fallthrough
CT: control target
= control target key end

     0   :  { %vm346_vm0 = vcmask 1043456   ;;  %vm347_vm1 = vcmask 1044480   ;;  %vm249_vm2 = vcmask 72704   ;;  %v1504_v1 = vmov 65535   ;;  %s2274_s1 = inlined_call_operand.vmem [shape: bf16[9,128], index: 1, kind: input, shape index: {}]   ;;  %s2275_s0 = inlined_call_operand.vmem [shape: bf16[512,9], index: 0, kind: input, shape index: {}]   ;;  %s2276_s2 = inlined_call_operand.vmem [shape: f32[1,128], index: 2, kind: input, shape index: {}]   ;;  %s2277_s3 = inlined_call_operand.vmem [shape: f32[1,128], index: 3, kind: input, shape index: {}]   ;;  %s2278_s4 = inlined_call_operand.vmem [shape: f32[512,128], index: 4, kind: output, shape index: {}]  }
   0x1   :  { %v1341_v0 = vld [vmem:[%s2274_s1] sm:$0x1f]   ;;  %v348_v2 = vsel %vm346_vm0, 4294967295, %v1504_v1  ;;  %v1344_v7 = vld [vmem:[%s2275_s0 + $0x8] sm:$0xff]   ;;  %v1346_v9 = vld [vmem:[%s2275_s0 + $0x10] sm:$0xff]  }
   0x2   :  { %v1342_v3 = vld [vmem:[%s2275_s0] sm:$0xff]   ;;  %v349_v4 = vsel %vm347_vm1, %v348_v2, 0  ;;  %v1345_v8 = vld [vmem:[%s2275_s0 + $0x88] sm:$0xff]   ;;  %v1347_v10 = vld [vmem:[%s2275_s0 + $0x90] sm:$0xff]  }
   0x3   :  { %v1343_v5 = vld [vmem:[%s2275_s0 + $0x80] sm:$0xff]   ;;  %v351_v6 = vand.u32 %v1341_v0, %v349_v4  ;;  %1274 = vmatprep.mubr.msk.bf16.mxu0 %vm249_vm2, %v1342_v3  ;;  %v1348_v11 = vld [vmem:[%s2275_s0 + $0x18] sm:$0xff]   ;;  %v1352_v15 = vld [vmem:[%s2275_s0 + $0x28] sm:$0xff]  }
   0x4   :  { %1306 = vmatprep.mubr.msk.bf16.mxu1 %vm249_vm2, %v1343_v5  ;;  %v1349_v12 = vld [vmem:[%s2275_s0 + $0x98] sm:$0xff]   ;;  %v1350_v13 = vld [vmem:[%s2275_s0 + $0x20] sm:$0xff]   ;;  %v1353_v16 = vld [vmem:[%s2275_s0 + $0xa8] sm:$0xff]  }
   0x5   :  { %1272 = vmatprep.subr.bf16.mxu0 %v351_v6  ;;  %1338 = vmatprep.subr.bf16.mxu1 %v351_v6  ;;  %v1351_v14 = vld [vmem:[%s2275_s0 + $0xa0] sm:$0xff]   ;;  %v1354_v17 = vld [vmem:[%s2275_s0 + $0x30] sm:$0xff]   ;;  %v1356_v19 = vld [vmem:[%s2275_s0 + $0x38] sm:$0xff]  }
   0x6   :  { %1273 = vmatpush3.bf16.msra.mxu0 %v351_v6  ;;  %1339 = vmatpush3.bf16.msra.mxu1 %v351_v6  ;;  %v1355_v18 = vld [vmem:[%s2275_s0 + $0xb0] sm:$0xff]   ;;  %v1357_v20 = vld [vmem:[%s2275_s0 + $0xb8] sm:$0xff]   ;;  %v1358_v21 = vld [vmem:[%s2275_s0 + $0x40] sm:$0xff]  }
   0x7   :  { %v1359_v22 = vld [vmem:[%s2275_s0 + $0xc0] sm:$0xff]   ;;  %v1360_v23 = vld [vmem:[%s2275_s0 + $0x48] sm:$0xff]   ;;  %v1362_v25 = vld [vmem:[%s2275_s0 + $0x50] sm:$0xff]  }
   0x8   :  { %v1361_v24 = vld [vmem:[%s2275_s0 + $0xc8] sm:$0xff]   ;;  %v1363_v26 = vld [vmem:[%s2275_s0 + $0xd0] sm:$0xff]   ;;  %v1364_v27 = vld [vmem:[%s2275_s0 + $0x58] sm:$0xff]  }
   0x9   :  { %1275 = vmatmul.mubr.msk.bf16.vlgmr.msra.gmra.mrb[0].mxu0 %vm249_vm2, %v1344_v7  ;;  %1307 = vmatmul.mubr.msk.bf16.vlgmr.msra.gmra.mrb[0].mxu1 %vm249_vm2, %v1345_v8  ;;  %v1365_v28 = vld [vmem:[%s2275_s0 + $0xd8] sm:$0xff]   ;;  %v1366_v29 = vld [vmem:[%s2275_s0 + $0x60] sm:$0xff]   ;;  %v1368_v31 = vld [vmem:[%s2275_s0 + $0x68] sm:$0xff]  }
   0xa   :  { %1278 = vmatprep.mubr.msk.bf16.mxu0 %vm249_vm2, %v1346_v9  ;;  %1310 = vmatprep.mubr.msk.bf16.mxu1 %vm249_vm2, %v1347_v10  ;;  %v1367_v30 = vld [vmem:[%s2275_s0 + $0xe0] sm:$0xff]   ;;  %v1369_v32 = vld [vmem:[%s2275_s0 + $0xe8] sm:$0xff]   ;;  %v1370_v33 = vld [vmem:[%s2275_s0 + $0x70] sm:$0xff]  }
   0xb   :  { %v1371_v34 = vld [vmem:[%s2275_s0 + $0xf0] sm:$0xff]   ;;  %v1372_v35 = vld [vmem:[%s2275_s0 + $0x78] sm:$0xff]   ;;  %v1664_v37 = vld [vmem:[%s2276_s2] ss:$0 sm:$0xff] }
   0xc   :  { %v1373_v36 = vld [vmem:[%s2275_s0 + $0xf8] sm:$0xff]   ;;  %v1669_v39 = vld [vmem:[%s2277_s3] ss:$0 sm:$0xff] }
  0x11   :  { %1279 = vmatmul.mubr.msk.bf16.gmra.mrb[4].mxu0 %vm249_vm2, %v1348_v11  ;;  %1311 = vmatmul.mubr.msk.bf16.gmra.mrb[4].mxu1 %vm249_vm2, %v1349_v12 }
  0x12   :  { %1282 = vmatprep.mubr.msk.bf16.mxu0 %vm249_vm2, %v1350_v13  ;;  %1314 = vmatprep.mubr.msk.bf16.mxu1 %vm249_vm2, %v1351_v14 }
  0x19   :  { %1283 = vmatmul.mubr.msk.bf16.gmra.mrb[8].mxu0 %vm249_vm2, %v1352_v15  ;;  %1315 = vmatmul.mubr.msk.bf16.gmra.mrb[8].mxu1 %vm249_vm2, %v1353_v16 }
  0x1a   :  { %1286 = vmatprep.mubr.msk.bf16.mxu0 %vm249_vm2, %v1354_v17  ;;  %1318 = vmatprep.mubr.msk.bf16.mxu1 %vm249_vm2, %v1355_v18 }
  0x21   :  { %1287 = vmatmul.mubr.msk.bf16.gmra.mrb[12].mxu0 %vm249_vm2, %v1356_v19  ;;  %1319 = vmatmul.mubr.msk.bf16.gmra.mrb[12].mxu1 %vm249_vm2, %v1357_v20 }
  0x22   :  { %1290 = vmatprep.mubr.msk.bf16.mxu0 %vm249_vm2, %v1358_v21  ;;  %1322 = vmatprep.mubr.msk.bf16.mxu1 %vm249_vm2, %v1359_v22 }
  0x29   :  { %1291 = vmatmul.mubr.msk.bf16.gmra.mrb[16].mxu0 %vm249_vm2, %v1360_v23  ;;  %1323 = vmatmul.mubr.msk.bf16.gmra.mrb[16].mxu1 %vm249_vm2, %v1361_v24 }
  0x2a   :  { %1294 = vmatprep.mubr.msk.bf16.mxu0 %vm249_vm2, %v1362_v25  ;;  %1326 = vmatprep.mubr.msk.bf16.mxu1 %vm249_vm2, %v1363_v26 }
  0x31   :  { %1295 = vmatmul.mubr.msk.bf16.gmra.mrb[20].mxu0 %vm249_vm2, %v1364_v27  ;;  %1327 = vmatmul.mubr.msk.bf16.gmra.mrb[20].mxu1 %vm249_vm2, %v1365_v28 }
  0x32   :  { %1298 = vmatprep.mubr.msk.bf16.mxu0 %vm249_vm2, %v1366_v29  ;;  %1330 = vmatprep.mubr.msk.bf16.mxu1 %vm249_vm2, %v1367_v30 }
  0x39   :  { %1299 = vmatmul.mubr.msk.bf16.gmra.mrb[24].mxu0 %vm249_vm2, %v1368_v31  ;;  %1331 = vmatmul.mubr.msk.bf16.gmra.mrb[24].mxu1 %vm249_vm2, %v1369_v32 }
  0x3a   :  { %1302 = vmatprep.mubr.msk.bf16.mxu0 %vm249_vm2, %v1370_v33  ;;  %1334 = vmatprep.mubr.msk.bf16.mxu1 %vm249_vm2, %v1371_v34 }
  0x41   :  { %1303 = vmatmul.mubr.msk.bf16.gmra.mrb[28].mxu0 %vm249_vm2, %v1372_v35  ;;  %1335 = vmatmul.mubr.msk.bf16.gmra.mrb[28].mxu1 %vm249_vm2, %v1373_v36 }
  0xdc   :  { %v1276_v38 = vpop.f32.mrb[0].mxu0  ;;  %v1308_v40 = vpop.f32.mrb[0].mxu1 }
  0xdd   :  { %v651_v41 = vmul.f32 %v1276_v38, %v1664_v37  ;;  %v683_v42 = vmul.f32 %v1308_v40, %v1664_v37  ;;  %v387_v43 = vpop.f32.mrb[1].mxu0  ;;  %v515_v44 = vpop.f32.mrb[1].mxu1 }
  0xde   :  { %v649_v45 = vmul.f32 %v1664_v37, %v387_v43  ;;  %v681_v46 = vmul.f32 %v1664_v37, %v515_v44  ;;  %v1277_v47 = vpop.f32.mrb[2].mxu0  ;;  %v1309_v48 = vpop.f32.mrb[2].mxu1 }
  0xdf   :  { %v722_v49 = vadd.f32 %v1669_v39, %v651_v41  ;;  %v754_v50 = vadd.f32 %v1669_v39, %v683_v42  ;;  %v652_v51 = vmul.f32 %v1277_v47, %v1664_v37  ;;  %v684_v52 = vmul.f32 %v1309_v48, %v1664_v37  ;;  %v390_v53 = vpop.f32.mrb[3].mxu0  ;;  %v518_v54 = vpop.f32.mrb[3].mxu1 }
  0xe0   :  { %v720_v55 = vadd.f32 %v1669_v39, %v649_v45  ;;  %v752_v56 = vadd.f32 %v1669_v39, %v681_v46  ;;  %v650_v57 = vmul.f32 %v1664_v37, %v390_v53  ;;  %v682_v58 = vmul.f32 %v1664_v37, %v518_v54 }
  0xe1   :  { %v850_v59 = vmul.f32 0.70710677, %v722_v49  ;;  %v882_v60 = vmul.f32 0.70710677, %v754_v50  ;;  %v723_v63 = vadd.f32 %v1669_v39, %v652_v51  ;;  %v755_v0 = vadd.f32 %v1669_v39, %v684_v52 }
  0xe2   :  { %v848_v61 = vmul.f32 0.70710677, %v720_v55  ;;  %v880_v62 = vmul.f32 0.70710677, %v752_v56  ;;  %v721_v1 = vadd.f32 %v1669_v39, %v650_v57  ;;  %v753_v2 = vadd.f32 %v1669_v39, %v682_v58 }
  0xe3   :  { %1374 = verf.f32 %v850_v59  ;;  %v851_v5 = vmul.f32 0.70710677, %v723_v63  ;;  %v786_v8 = vmul.f32 0.5, %v722_v49  ;;  %v883_v9 = vmul.f32 0.70710677, %v755_v0 }
  0xe4   :  { %1376 = verf.f32 %v882_v60  ;;  %v1280_v3 = vpop.f32.mrb[4].mxu0  ;;  %v1312_v4 = vpop.f32.mrb[4].mxu1  ;;  %v849_v10 = vmul.f32 0.70710677, %v721_v1  ;;  %v818_v12 = vmul.f32 0.5, %v754_v50  ;;  %v784_v27 = vmul.f32 0.5, %v720_v55 }
  0xe5   :  { %1378 = verf.f32 %v848_v61  ;;  %v403_v6 = vpop.f32.mrb[5].mxu0  ;;  %v531_v7 = vpop.f32.mrb[5].mxu1  ;;  %v881_v13 = vmul.f32 0.70710677, %v753_v2  ;;  %v655_v14 = vmul.f32 %v1280_v3, %v1664_v37  ;;  %v687_v17 = vmul.f32 %v1312_v4, %v1664_v37 }
  0xe6   :  { %1380 = verf.f32 %v880_v62  ;;  %v1281_v11 = vpop.f32.mrb[6].mxu0  ;;  %v1313_v15 = vpop.f32.mrb[6].mxu1  ;;  %v653_v18 = vmul.f32 %v1664_v37, %v403_v6  ;;  %v685_v19 = vmul.f32 %v1664_v37, %v531_v7  ;;  %v816_v31 = vmul.f32 0.5, %v752_v56 }
  0xe7   :  { %1382 = verf.f32 %v851_v5  ;;  %v406_v16 = vpop.f32.mrb[7].mxu0  ;;  %v534_v20 = vpop.f32.mrb[7].mxu1  ;;  %v726_v21 = vadd.f32 %v1669_v39, %v655_v14  ;;  %v656_v22 = vmul.f32 %v1281_v11, %v1664_v37  ;;  %v688_v23 = vmul.f32 %v1313_v15, %v1664_v37 }
  0xe8   :  { %1384 = verf.f32 %v883_v9  ;;  %v758_v24 = vadd.f32 %v1669_v39, %v687_v17  ;;  %v1696_v25 = vadd.f32 %v1669_v39, %v653_v18  ;;  %v1699_v26 = vadd.f32 %v1669_v39, %v685_v19 }
  0xe9   :  { %1386 = verf.f32 %v849_v10  ;;  %v854_v28 = vmul.f32 0.70710677, %v726_v21  ;;  %v1702_v29 = vadd.f32 %v1669_v39, %v656_v22  ;;  %v1705_v30 = vadd.f32 %v1669_v39, %v688_v23 }
  0xea   :  { %1388 = verf.f32 %v881_v13  ;;  %v787_v32 = vmul.f32 0.5, %v723_v63  ;;  %v886_v33 = vmul.f32 0.70710677, %v758_v24  ;;  %v852_v34 = vmul.f32 0.70710677, %v1696_v25 }
  0xeb   :  { %v819_v36 = vmul.f32 0.5, %v755_v0  ;;  %v785_v38 = vmul.f32 0.5, %v721_v1  ;;  %1390 = verf.f32 %v854_v28  ;;  %v884_v40 = vmul.f32 0.70710677, %v1699_v26 }
  0xec   :  { %v1284_v41 = vpop.f32.mrb[8].mxu0  ;;  %v1316_v42 = vpop.f32.mrb[8].mxu1  ;;  %v817_v45 = vmul.f32 0.5, %v753_v2  ;;  %1392 = verf.f32 %v886_v33  ;;  %v855_v46 = vmul.f32 0.70710677, %v1702_v29  ;;  %v654_v52 = vmul.f32 %v1664_v37, %v406_v16 }
  0xed   :  { %v1375_v35 = vpop.eup %1374  ;;  %v419_v47 = vpop.f32.mrb[9].mxu0  ;;  %1394 = verf.f32 %v852_v34  ;;  %v887_v51 = vmul.f32 0.70710677, %v1705_v30  ;;  %v686_v58 = vmul.f32 %v1664_v37, %v534_v20  ;;  %v822_v13 = vmul.f32 0.5, %v758_v24 }
  0xee   :  { %v1377_v43 = vpop.eup %1376  ;;  %v978_v44 = vadd.f32 1.0, %v1375_v35  ;;  %v547_v48 = vpop.f32.mrb[9].mxu1  ;;  %1396 = verf.f32 %v884_v40  ;;  %v1722_v0 = vadd.f32 %v1669_v39, %v654_v52  ;;  %v659_v19 = vmul.f32 %v1284_v41, %v1664_v37 }
  0xef   :  { %v1379_v49 = vpop.eup %1378  ;;  %v1010_v50 = vadd.f32 1.0, %v1377_v43  ;;  %v1712_v53 = vpop.f32.mrb[10].mxu0  ;;  %1398 = verf.f32 %v855_v46  ;;  %v1728_v4 = vadd.f32 %v1669_v39, %v686_v58  ;;  %v691_v23 = vmul.f32 %v1316_v42, %v1664_v37 }
  0xf0   :  { %v1714_v54 = vpop.f32.mrb[10].mxu1  ;;  %v1381_v55 = vpop.eup %1380  ;;  %v1042_v56 = vmul.f32 %v978_v44, %v786_v8  ;;  %v976_v57 = vadd.f32 1.0, %v1379_v49  ;;  %1400 = verf.f32 %v887_v51  ;;  %v790_v8 = vmul.f32 0.5, %v726_v21 }
  0xf1   :  { %v1717_v59 = vpop.f32.mrb[11].mxu0  ;;  %v1719_v60 = vpop.f32.mrb[11].mxu1  ;;  %v1074_v62 = vmul.f32 %v1010_v50, %v818_v12  ;;  %v1008_v63 = vadd.f32 1.0, %v1381_v55  ;;  %v853_v9 = vmul.f32 0.70710677, %v1722_v0  ;;  %v657_v24 = vmul.f32 %v1664_v37, %v419_v47 }
  0xf2   :  { %v1383_v61 = vpop.eup %1382  ;;  %1106 = vst [vmem:[%s2278_s4 + $0x10] sm:$0xff] %v1042_v56  ;;  %v1040_v2 = vmul.f32 %v976_v57, %v784_v27  ;;  %v885_v14 = vmul.f32 0.70710677, %v1728_v4  ;;  %v788_v33 = vmul.f32 0.5, %v1696_v25  ;;  %v1764_v34 = vadd.f32 %v1669_v39, %v659_v19 }
  0xf3   :  { %v1385_v1 = vpop.eup %1384  ;;  %v979_v3 = vadd.f32 1.0, %v1383_v61  ;;  %1138 = vst [vmem:[%s2278_s4 + $0x110] sm:$0xff] %v1074_v62  ;;  %v1072_v6 = vmul.f32 %v1008_v63, %v816_v31  ;;  %1402 = verf.f32 %v853_v9  ;;  %v689_v35 = vmul.f32 %v1664_v37, %v547_v48 }
  0xf4   :  { %v1387_v5 = vpop.eup %1386  ;;  %v1011_v7 = vadd.f32 1.0, %v1385_v1  ;;  %1104 = vst [vmem:[%s2278_s4] sm:$0xff] %v1040_v2  ;;  %v1738_v15 = vpop.f32.mrb[12].mxu0  ;;  %1404 = verf.f32 %v885_v14  ;;  %v820_v42 = vmul.f32 0.5, %v1699_v26  ;;  %v1776_v43 = vadd.f32 %v1669_v39, %v691_v23 }
  0xf5   :  { %v1389_v10 = vpop.eup %1388  ;;  %v1043_v11 = vmul.f32 %v979_v3, %v787_v32  ;;  %v977_v12 = vadd.f32 1.0, %v1387_v5  ;;  %v1740_v16 = vpop.f32.mrb[12].mxu1  ;;  %1136 = vst [vmem:[%s2278_s4 + $0x100] sm:$0xff] %v1072_v6  ;;  %v1779_v25 = vadd.f32 %v1669_v39, %v657_v24  ;;  %v858_v46 = vmul.f32 0.70710677, %v1764_v34 }
  0xf6   :  { %v1075_v17 = vmul.f32 %v1011_v7, %v819_v36  ;;  %v1009_v18 = vadd.f32 1.0, %v1389_v10  ;;  %v1746_v20 = vpop.f32.mrb[13].mxu0  ;;  %v1748_v21 = vpop.f32.mrb[13].mxu1  ;;  %v1786_v47 = vadd.f32 %v1669_v39, %v689_v35  ;;  %v660_v26 = vmul.f32 %v1712_v53, %v1664_v37 }
  0xf7   :  { %1107 = vst [vmem:[%s2278_s4 + $0x18] sm:$0xff] %v1043_v11  ;;  %v1041_v22 = vmul.f32 %v977_v12, %v785_v38  ;;  %v1755_v27 = vpop.f32.mrb[14].mxu0  ;;  %v1757_v28 = vpop.f32.mrb[14].mxu1  ;;  %v890_v51 = vmul.f32 0.70710677, %v1776_v43  ;;  %v692_v52 = vmul.f32 %v1714_v54, %v1664_v37  ;;  %v791_v58 = vmul.f32 0.5, %v1702_v29 }
  0xf8   :  { %v1391_v31 = vpop.eup %1390  ;;  %1139 = vst [vmem:[%s2278_s4 + $0x118] sm:$0xff] %v1075_v17  ;;  %v1073_v32 = vmul.f32 %v1009_v18, %v817_v45  ;;  %v1767_v36 = vpop.f32.mrb[15].mxu0  ;;  %1406 = verf.f32 %v858_v46  ;;  %v856_v63 = vmul.f32 0.70710677, %v1779_v25  ;;  %v823_v54 = vmul.f32 0.5, %v1705_v30 }
  0xf9   :  { %v1769_v38 = vpop.f32.mrb[15].mxu1  ;;  %v1393_v40 = vpop.eup %1392  ;;  %1105 = vst [vmem:[%s2278_s4 + $0x8] sm:$0xff] %v1041_v22  ;;  %v982_v41 = vadd.f32 1.0, %v1391_v31  ;;  %1408 = verf.f32 %v890_v51  ;;  %v888_v5 = vmul.f32 0.70710677, %v1786_v47  ;;  %v1815_v9 = vadd.f32 %v1669_v39, %v660_v26 }
  0xfa   :  { %v1395_v44 = vpop.eup %1394  ;;  %1137 = vst [vmem:[%s2278_s4 + $0x108] sm:$0xff] %v1073_v32  ;;  %v1014_v45 = vadd.f32 1.0, %v1393_v40  ;;  %1410 = verf.f32 %v856_v63  ;;  %v1818_v10 = vadd.f32 %v1669_v39, %v692_v52  ;;  %v658_v14 = vmul.f32 %v1664_v37, %v1717_v59 }
  0xfb   :  { %v1397_v48 = vpop.eup %1396  ;;  %v1046_v49 = vmul.f32 %v982_v41, %v790_v8  ;;  %v980_v50 = vadd.f32 1.0, %v1395_v44  ;;  %1412 = verf.f32 %v888_v5  ;;  %v690_v17 = vmul.f32 %v1664_v37, %v1719_v60 }
  0xfc   :  { %v1399_v55 = vpop.eup %1398  ;;  %v1078_v56 = vmul.f32 %v1014_v45, %v822_v13  ;;  %v1012_v57 = vadd.f32 1.0, %v1397_v48  ;;  %v1798_v1 = vpop.f32.mrb[16].mxu0  ;;  %v789_v23 = vmul.f32 0.5, %v1722_v0  ;;  %v821_v31 = vmul.f32 0.5, %v1728_v4 }
  0xfd   :  { %v1401_v61 = vpop.eup %1400  ;;  %1110 = vst [vmem:[%s2278_s4 + $0x30] sm:$0xff] %v1046_v49  ;;  %v1044_v53 = vmul.f32 %v980_v50, %v788_v33  ;;  %v983_v62 = vadd.f32 1.0, %v1399_v55  ;;  %v1800_v2 = vpop.f32.mrb[16].mxu1  ;;  %v859_v32 = vmul.f32 0.70710677, %v1815_v9  ;;  %v729_v33 = vadd.f32 %v1669_v39, %v658_v14 }
  0xfe   :  { %1142 = vst [vmem:[%s2278_s4 + $0x130] sm:$0xff] %v1078_v56  ;;  %v1076_v29 = vmul.f32 %v1012_v57, %v820_v42  ;;  %v1015_v3 = vadd.f32 1.0, %v1401_v61  ;;  %v1807_v6 = vpop.f32.mrb[17].mxu0  ;;  %v1809_v7 = vpop.f32.mrb[17].mxu1  ;;  %v891_v60 = vmul.f32 0.70710677, %v1818_v10  ;;  %v1847_v35 = vadd.f32 %v1669_v39, %v690_v17 }
  0xff   :  { %1108 = vst [vmem:[%s2278_s4 + $0x20] sm:$0xff] %v1044_v53  ;;  %v1047_v8 = vmul.f32 %v983_v62, %v791_v58  ;;  %v1820_v30 = vpop.f32.mrb[18].mxu0  ;;  %v1822_v11 = vpop.f32.mrb[18].mxu1  ;;  %1414 = verf.f32 %v859_v32  ;;  %v663_v0 = vmul.f32 %v1738_v15, %v1664_v37  ;;  %v695_v4 = vmul.f32 %v1740_v16, %v1664_v37 }
 0x100   :  { %v1403_v12 = vpop.eup %1402  ;;  %1140 = vst [vmem:[%s2278_s4 + $0x120] sm:$0xff] %v1076_v29  ;;  %v1079_v13 = vmul.f32 %v1015_v3, %v823_v54  ;;  %v1831_v18 = vpop.f32.mrb[19].mxu0  ;;  %v794_v42 = vmul.f32 0.5, %v1764_v34  ;;  %1416 = verf.f32 %v891_v60  ;;  %v857_v44 = vmul.f32 0.70710677, %v729_v33 }
 0x101   :  { %v1833_v19 = vpop.f32.mrb[19].mxu1  ;;  %v1405_v22 = vpop.eup %1404  ;;  %1111 = vst [vmem:[%s2278_s4 + $0x38] sm:$0xff] %v1047_v8  ;;  %v981_v24 = vadd.f32 1.0, %v1403_v12  ;;  %v826_v45 = vmul.f32 0.5, %v1776_v43  ;;  %v889_v46 = vmul.f32 0.70710677, %v1847_v35  ;;  %v1860_v26 = vadd.f32 %v1669_v39, %v663_v0 }
 0x102   :  { %1143 = vst [vmem:[%s2278_s4 + $0x138] sm:$0xff] %v1079_v13  ;;  %v1013_v59 = vadd.f32 1.0, %v1405_v22  ;;  %v1863_v15 = vadd.f32 %v1669_v39, %v695_v4  ;;  %v1407_v34 = vpop.eup %1406  ;;  %1418 = verf.f32 %v857_v44  ;;  %v661_v43 = vmul.f32 %v1664_v37, %v1746_v20 }
 0x103   :  { %v1045_v40 = vmul.f32 %v981_v24, %v789_v23  ;;  %v693_v49 = vmul.f32 %v1664_v37, %v1748_v21  ;;  %v664_v50 = vmul.f32 %v1755_v27, %v1664_v37  ;;  %v1409_v55 = vpop.eup %1408  ;;  %v986_v56 = vadd.f32 1.0, %v1407_v34 }
 0x104   :  { %v1077_v41 = vmul.f32 %v1013_v59, %v821_v31  ;;  %v1865_v16 = vpop.f32.mrb[20].mxu0  ;;  %v1867_v48 = vpop.f32.mrb[20].mxu1  ;;  %v792_v57 = vmul.f32 0.5, %v1779_v25  ;;  %1420 = verf.f32 %v889_v46  ;;  %v862_v58 = vmul.f32 0.70710677, %v1860_v26 }
 0x105   :  { %1109 = vst [vmem:[%s2278_s4 + $0x28] sm:$0xff] %v1045_v40  ;;  %v1878_v51 = vpop.f32.mrb[21].mxu0  ;;  %v1880_v52 = vpop.f32.mrb[21].mxu1  ;;  %v1018_v53 = vadd.f32 1.0, %v1409_v55  ;;  %v824_v21 = vmul.f32 0.5, %v1786_v47  ;;  %v1891_v62 = vadd.f32 %v1669_v39, %v661_v43  ;;  %v1050_v54 = vmul.f32 %v986_v56, %v794_v42 }
 0x106   :  { %1141 = vst [vmem:[%s2278_s4 + $0x128] sm:$0xff] %v1077_v41  ;;  %v1884_v61 = vpop.f32.mrb[22].mxu0  ;;  %v1886_v20 = vpop.f32.mrb[22].mxu1  ;;  %v894_v27 = vmul.f32 0.70710677, %v1863_v15  ;;  %1422 = verf.f32 %v862_v58  ;;  %v1898_v3 = vadd.f32 %v1669_v39, %v693_v49  ;;  %v1901_v5 = vadd.f32 %v1669_v39, %v664_v50 }
 0x107   :  { %v1893_v63 = vpop.f32.mrb[23].mxu0  ;;  %v1895_v29 = vpop.f32.mrb[23].mxu1  ;;  %v1082_v47 = vmul.f32 %v1018_v53, %v826_v45  ;;  %v795_v13 = vmul.f32 0.5, %v1815_v9  ;;  %1114 = vst [vmem:[%s2278_s4 + $0x50] sm:$0xff] %v1050_v54  ;;  %v827_v17 = vmul.f32 0.5, %v1818_v10  ;;  %v793_v31 = vmul.f32 0.5, %v729_v33 }
 0x108   :  { %v1411_v25 = vpop.eup %1410  ;;  %1424 = verf.f32 %v894_v27  ;;  %v860_v22 = vmul.f32 0.70710677, %v1891_v62  ;;  %v892_v23 = vmul.f32 0.70710677, %v1898_v3  ;;  %v863_v9 = vmul.f32 0.70710677, %v1901_v5 }
 0x109   :  { %v1413_v8 = vpop.eup %1412  ;;  %v984_v12 = vadd.f32 1.0, %v1411_v25  ;;  %1146 = vst [vmem:[%s2278_s4 + $0x150] sm:$0xff] %v1082_v47  ;;  %v696_v32 = vmul.f32 %v1757_v28, %v1664_v37  ;;  %v662_v10 = vmul.f32 %v1664_v37, %v1767_v36  ;;  %v694_v40 = vmul.f32 %v1664_v37, %v1769_v38 }
 0x10a   :  { %v1016_v14 = vadd.f32 1.0, %v1413_v8  ;;  %v1415_v59 = vpop.eup %1414  ;;  %1426 = verf.f32 %v860_v22  ;;  %v667_v36 = vmul.f32 %v1798_v1, %v1664_v37  ;;  %v825_v50 = vmul.f32 0.5, %v1847_v35 }
 0x10b   :  { %v1048_v24 = vmul.f32 %v984_v12, %v792_v57  ;;  %v1417_v41 = vpop.eup %1416  ;;  %v987_v33 = vadd.f32 1.0, %v1415_v59  ;;  %1428 = verf.f32 %v892_v23  ;;  %v1928_v28 = vadd.f32 %v1669_v39, %v696_v32 }
 0x10c   :  { %v1080_v60 = vmul.f32 %v1016_v14, %v824_v21  ;;  %v1920_v0 = vpop.f32.mrb[24].mxu0  ;;  %v1922_v4 = vpop.f32.mrb[24].mxu1  ;;  %v1019_v44 = vadd.f32 1.0, %v1417_v41  ;;  %1430 = verf.f32 %v863_v9  ;;  %v1940_v45 = vadd.f32 %v1669_v39, %v662_v10 }
 0x10d   :  { %1112 = vst [vmem:[%s2278_s4 + $0x40] sm:$0xff] %v1048_v24  ;;  %v1932_v42 = vpop.f32.mrb[25].mxu0  ;;  %v1934_v38 = vpop.f32.mrb[25].mxu1  ;;  %v1943_v46 = vadd.f32 %v1669_v39, %v694_v40  ;;  %v1051_v49 = vmul.f32 %v987_v33, %v795_v13  ;;  %v895_v55 = vmul.f32 0.70710677, %v1928_v28  ;;  %v1952_v56 = vadd.f32 %v1669_v39, %v667_v36 }
 0x10e   :  { %1144 = vst [vmem:[%s2278_s4 + $0x140] sm:$0xff] %v1080_v60  ;;  %v1945_v34 = vpop.f32.mrb[26].mxu0  ;;  %v1947_v43 = vpop.f32.mrb[26].mxu1  ;;  %v1083_v21 = vmul.f32 %v1019_v44, %v827_v17  ;;  %v798_v25 = vmul.f32 0.5, %v1860_v26  ;;  %v861_v54 = vmul.f32 0.70710677, %v1940_v45  ;;  %v668_v10 = vmul.f32 %v1820_v30, %v1664_v37 }
 0x10f   :  { %v1419_v1 = vpop.eup %1418  ;;  %v1954_v57 = vpop.f32.mrb[27].mxu0  ;;  %1115 = vst [vmem:[%s2278_s4 + $0x58] sm:$0xff] %v1051_v49  ;;  %v830_v8 = vmul.f32 0.5, %v1863_v15  ;;  %1432 = verf.f32 %v895_v55  ;;  %v893_v47 = vmul.f32 0.70710677, %v1943_v46  ;;  %v796_v26 = vmul.f32 0.5, %v1891_v62 }
 0x110   :  { %v1956_v58 = vpop.f32.mrb[27].mxu1  ;;  %v1421_v53 = vpop.eup %1420  ;;  %v985_v27 = vadd.f32 1.0, %v1419_v1  ;;  %1147 = vst [vmem:[%s2278_s4 + $0x158] sm:$0xff] %v1083_v21  ;;  %1434 = verf.f32 %v861_v54  ;;  %v866_v14 = vmul.f32 0.70710677, %v1952_v56  ;;  %v699_v15 = vmul.f32 %v1800_v2, %v1664_v37 }
 0x111   :  { %v1017_v35 = vadd.f32 1.0, %v1421_v53  ;;  %v1423_v12 = vpop.eup %1422  ;;  %1436 = verf.f32 %v893_v47  ;;  %v697_v62 = vmul.f32 %v1664_v37, %v1809_v7  ;;  %v828_v59 = vmul.f32 0.5, %v1898_v3 }
 0x112   :  { %v1049_v13 = vmul.f32 %v985_v27, %v793_v31  ;;  %v1425_v17 = vpop.eup %1424  ;;  %v990_v23 = vadd.f32 1.0, %v1423_v12  ;;  %1438 = verf.f32 %v866_v14  ;;  %v665_v31 = vmul.f32 %v1664_v37, %v1807_v6 }
 0x113   :  { %v1081_v22 = vmul.f32 %v1017_v35, %v825_v50  ;;  %v1022_v24 = vadd.f32 1.0, %v1425_v17  ;;  %v770_v60 = vadd.f32 %v1669_v39, %v699_v15  ;;  %v1996_v36 = vadd.f32 %v1669_v39, %v697_v62 }
 0x114   :  { %1113 = vst [vmem:[%s2278_s4 + $0x48] sm:$0xff] %v1049_v13  ;;  %v1979_v9 = vpop.f32.mrb[28].mxu0  ;;  %v1981_v32 = vpop.f32.mrb[28].mxu1  ;;  %v1054_v2 = vmul.f32 %v990_v23, %v798_v25  ;;  %v736_v33 = vadd.f32 %v1669_v39, %v665_v31  ;;  %v700_v44 = vmul.f32 %v1822_v11, %v1664_v37  ;;  %v2008_v55 = vadd.f32 %v1669_v39, %v668_v10 }
 0x115   :  { %1145 = vst [vmem:[%s2278_s4 + $0x148] sm:$0xff] %v1081_v22  ;;  %v1990_v6 = vpop.f32.mrb[29].mxu0  ;;  %v1992_v40 = vpop.f32.mrb[29].mxu1  ;;  %v1086_v41 = vmul.f32 %v1022_v24, %v830_v8  ;;  %v898_v50 = vmul.f32 0.70710677, %v770_v60  ;;  %v666_v53 = vmul.f32 %v1664_v37, %v1831_v18  ;;  %v799_v54 = vmul.f32 0.5, %v1901_v5 }
 0x116   :  { %v1427_v7 = vpop.eup %1426  ;;  %v2000_v3 = vpop.f32.mrb[30].mxu0  ;;  %1118 = vst [vmem:[%s2278_s4 + $0x70] sm:$0xff] %v1054_v2  ;;  %v831_v35 = vmul.f32 0.5, %v1928_v28  ;;  %v864_v8 = vmul.f32 0.70710677, %v736_v33  ;;  %v797_v14 = vmul.f32 0.5, %v1940_v45  ;;  %v771_v28 = vadd.f32 %v1669_v39, %v700_v44 }
 0x117   :  { %v2002_v1 = vpop.f32.mrb[30].mxu1  ;;  %v1429_v49 = vpop.eup %1428  ;;  %v988_v30 = vadd.f32 1.0, %v1427_v7  ;;  %1150 = vst [vmem:[%s2278_s4 + $0x170] sm:$0xff] %v1086_v41  ;;  %1440 = verf.f32 %v898_v50  ;;  %v896_v18 = vmul.f32 0.70710677, %v1996_v36  ;;  %v698_v15 = vmul.f32 %v1664_v37, %v1833_v19 }
 0x118   :  { %v2012_v21 = vpop.f32.mrb[31].mxu0  ;;  %v2014_v11 = vpop.f32.mrb[31].mxu1  ;;  %v1020_v25 = vadd.f32 1.0, %v1429_v49  ;;  %1442 = verf.f32 %v864_v8  ;;  %v867_v17 = vmul.f32 0.70710677, %v2008_v55  ;;  %v671_v24 = vmul.f32 %v1865_v16, %v1664_v37 }
 0x119   :  { %v1431_v27 = vpop.eup %1430  ;;  %v1052_v47 = vmul.f32 %v988_v30, %v796_v26  ;;  %1444 = verf.f32 %v896_v18  ;;  %v2029_v26 = vadd.f32 %v1669_v39, %v666_v53  ;;  %v829_v2 = vmul.f32 0.5, %v1943_v46 }
 0x11a   :  { %v991_v12 = vadd.f32 1.0, %v1431_v27  ;;  %v1084_v13 = vmul.f32 %v1020_v25, %v828_v59  ;;  %v1433_v22 = vpop.eup %1432  ;;  %1446 = verf.f32 %v867_v17  ;;  %v802_v59 = vmul.f32 0.5, %v1952_v56 }
 0x11b   :  { %1116 = vst [vmem:[%s2278_s4 + $0x60] sm:$0xff] %v1052_v47  ;;  %v1435_v23 = vpop.eup %1434  ;;  %v1023_v45 = vadd.f32 1.0, %v1433_v22  ;;  %v899_v10 = vmul.f32 0.70710677, %v771_v28  ;;  %v865_v49 = vmul.f32 0.70710677, %v2029_v26  ;;  %v769_v19 = vadd.f32 %v1669_v39, %v698_v15 }
 0x11c   :  { %v1055_v5 = vmul.f32 %v991_v12, %v799_v54  ;;  %1148 = vst [vmem:[%s2278_s4 + $0x160] sm:$0xff] %v1084_v13  ;;  %v1437_v31 = vpop.eup %1436  ;;  %v989_v62 = vadd.f32 1.0, %v1435_v23  ;;  %v2046_v50 = vadd.f32 %v1669_v39, %v671_v24  ;;  %v834_v56 = vmul.f32 0.5, %v770_v60 }
 0x11d   :  { %v1439_v7 = vpop.eup %1438  ;;  %v1087_v41 = vmul.f32 %v1023_v45, %v831_v35  ;;  %v1021_v44 = vadd.f32 1.0, %v1437_v31  ;;  %1448 = verf.f32 %v899_v10  ;;  %v897_v53 = vmul.f32 0.70710677, %v769_v19 }
 0x11e   :  { %1119 = vst [vmem:[%s2278_s4 + $0x78] sm:$0xff] %v1055_v5  ;;  %v1053_v30 = vmul.f32 %v989_v62, %v797_v14  ;;  %v994_v16 = vadd.f32 1.0, %v1439_v7  ;;  %1450 = verf.f32 %v865_v49  ;;  %v800_v25 = vmul.f32 0.5, %v736_v33 }
 0x11f   :  { %1151 = vst [vmem:[%s2278_s4 + $0x178] sm:$0xff] %v1087_v41  ;;  %v1085_v46 = vmul.f32 %v1021_v44, %v829_v2  ;;  %v870_v54 = vmul.f32 0.70710677, %v2046_v50  ;;  %v703_v35 = vmul.f32 %v1867_v48, %v1664_v37  ;;  %1452 = verf.f32 %v897_v53 }
 0x120   :  { %1117 = vst [vmem:[%s2278_s4 + $0x68] sm:$0xff] %v1053_v30  ;;  %v1058_v27 = vmul.f32 %v994_v16, %v802_v59  ;;  %v669_v60 = vmul.f32 %v1664_v37, %v1878_v51  ;;  %v701_v8 = vmul.f32 %v1664_v37, %v1880_v52  ;;  %v672_v47 = vmul.f32 %v1884_v61, %v1664_v37 }
 0x121   :  { %1149 = vst [vmem:[%s2278_s4 + $0x168] sm:$0xff] %v1085_v46  ;;  %v1441_v33 = vpop.eup %1440  ;;  %v832_v48 = vmul.f32 0.5, %v1996_v36  ;;  %1454 = verf.f32 %v870_v54  ;;  %v774_v12 = vadd.f32 %v1669_v39, %v703_v35  ;;  %v704_v18 = vmul.f32 %v1886_v20, %v1664_v37 }
 0x122   :  { %1122 = vst [vmem:[%s2278_s4 + $0x90] sm:$0xff] %v1058_v27  ;;  %v1443_v51 = vpop.eup %1442  ;;  %v1026_v13 = vadd.f32 1.0, %v1441_v33  ;;  %v803_v52 = vmul.f32 0.5, %v2008_v55  ;;  %v740_v14 = vadd.f32 %v1669_v39, %v669_v60  ;;  %v772_v61 = vadd.f32 %v1669_v39, %v701_v8 }
 0x123   :  { %v1445_v17 = vpop.eup %1444  ;;  %v992_v22 = vadd.f32 1.0, %v1443_v51  ;;  %v902_v5 = vmul.f32 0.70710677, %v774_v12  ;;  %v2077_v23 = vadd.f32 %v1669_v39, %v672_v47  ;;  %v2080_v36 = vadd.f32 %v1669_v39, %v704_v18 }
 0x124   :  { %v1447_v45 = vpop.eup %1446  ;;  %v1090_v15 = vmul.f32 %v1026_v13, %v834_v56  ;;  %v1024_v20 = vadd.f32 1.0, %v1445_v17  ;;  %v868_v24 = vmul.f32 0.70710677, %v740_v14  ;;  %v670_v55 = vmul.f32 %v1664_v37, %v1893_v63 }
 0x125   :  { %v1056_v31 = vmul.f32 %v992_v22, %v800_v25  ;;  %v995_v62 = vadd.f32 1.0, %v1447_v45  ;;  %v835_v2 = vmul.f32 0.5, %v771_v28  ;;  %1456 = verf.f32 %v902_v5 }
 0x126   :  { %1154 = vst [vmem:[%s2278_s4 + $0x190] sm:$0xff] %v1090_v15  ;;  %v1088_v59 = vmul.f32 %v1024_v20, %v832_v48  ;;  %v801_v10 = vmul.f32 0.5, %v2029_v26  ;;  %1458 = verf.f32 %v868_v24  ;;  %v900_v7 = vmul.f32 0.70710677, %v772_v61 }
 0x127   :  { %v1449_v41 = vpop.eup %1448  ;;  %1120 = vst [vmem:[%s2278_s4 + $0x80] sm:$0xff] %v1056_v31  ;;  %v1059_v44 = vmul.f32 %v995_v62, %v803_v52  ;;  %v833_v63 = vmul.f32 0.5, %v769_v19  ;;  %v871_v49 = vmul.f32 0.70710677, %v2077_v23  ;;  %v903_v28 = vmul.f32 0.70710677, %v2080_v36 }
 0x128   :  { %v1451_v30 = vpop.eup %1450  ;;  %1152 = vst [vmem:[%s2278_s4 + $0x180] sm:$0xff] %v1088_v59  ;;  %v1027_v16 = vadd.f32 1.0, %v1449_v41  ;;  %1460 = verf.f32 %v900_v7  ;;  %v741_v26 = vadd.f32 %v1669_v39, %v670_v55  ;;  %v702_v46 = vmul.f32 %v1664_v37, %v1895_v29 }
 0x129   :  { %1123 = vst [vmem:[%s2278_s4 + $0x98] sm:$0xff] %v1059_v44  ;;  %v993_v19 = vadd.f32 1.0, %v1451_v30  ;;  %1462 = verf.f32 %v871_v49  ;;  %v675_v56 = vmul.f32 %v1920_v0, %v1664_v37  ;;  %v707_v53 = vmul.f32 %v1922_v4, %v1664_v37  ;;  %v1453_v27 = vpop.eup %1452 }
 0x12a   :  { %v1091_v25 = vmul.f32 %v1027_v16, %v835_v2  ;;  %v806_v54 = vmul.f32 0.5, %v2046_v50  ;;  %1464 = verf.f32 %v903_v28  ;;  %v869_v35 = vmul.f32 0.70710677, %v741_v26 }
 0x12b   :  { %v1455_v60 = vpop.eup %1454  ;;  %v1057_v29 = vmul.f32 %v993_v19, %v801_v10  ;;  %v1025_v8 = vadd.f32 1.0, %v1453_v27  ;;  %v773_v47 = vadd.f32 %v1669_v39, %v702_v46  ;;  %v746_v33 = vadd.f32 %v1669_v39, %v675_v56 }
 0x12c   :  { %1155 = vst [vmem:[%s2278_s4 + $0x198] sm:$0xff] %v1091_v25  ;;  %v998_v0 = vadd.f32 1.0, %v1455_v60  ;;  %1466 = verf.f32 %v869_v35  ;;  %v2113_v4 = vadd.f32 %v1669_v39, %v707_v53  ;;  %v673_v50 = vmul.f32 %v1664_v37, %v1932_v42  ;;  %v2169_v25 = vld [vmem:[%s2276_s2] ss:$0 sm:$0xff] }
 0x12d   :  { %1121 = vst [vmem:[%s2278_s4 + $0x88] sm:$0xff] %v1057_v29  ;;  %v1089_v48 = vmul.f32 %v1025_v8, %v833_v63  ;;  %v838_v18 = vmul.f32 0.5, %v774_v12  ;;  %v804_v51 = vmul.f32 0.5, %v740_v14  ;;  %v901_v13 = vmul.f32 0.70710677, %v773_v47 }
 0x12e   :  { %v1062_v52 = vmul.f32 %v998_v0, %v806_v54  ;;  %v836_v17 = vmul.f32 0.5, %v772_v61  ;;  %v874_v22 = vmul.f32 0.70710677, %v746_v33  ;;  %v906_v5 = vmul.f32 0.70710677, %v2113_v4 }
 0x12f   :  { %v1457_v45 = vpop.eup %1456  ;;  %1153 = vst [vmem:[%s2278_s4 + $0x188] sm:$0xff] %v1089_v48  ;;  %1468 = verf.f32 %v901_v13  ;;  %v2125_v42 = vadd.f32 %v1669_v39, %v673_v50  ;;  %v705_v15 = vmul.f32 %v1664_v37, %v1934_v38  ;;  %v676_v12 = vmul.f32 %v1945_v34, %v1664_v37 }
 0x130   :  { %v1459_v14 = vpop.eup %1458  ;;  %1126 = vst [vmem:[%s2278_s4 + $0xb0] sm:$0xff] %v1062_v52  ;;  %v1030_v61 = vadd.f32 1.0, %v1457_v45  ;;  %1470 = verf.f32 %v874_v22  ;;  %v708_v20 = vmul.f32 %v1947_v43, %v1664_v37  ;;  %v674_v24 = vmul.f32 %v1664_v37, %v1954_v57 }
 0x131   :  { %v996_v55 = vadd.f32 1.0, %v1459_v14  ;;  %v807_v31 = vmul.f32 0.5, %v2077_v23  ;;  %1472 = verf.f32 %v906_v5  ;;  %v872_v38 = vmul.f32 0.70710677, %v2125_v42 }
 0x132   :  { %v1461_v34 = vpop.eup %1460  ;;  %v1094_v62 = vmul.f32 %v1030_v61, %v838_v18  ;;  %v776_v2 = vadd.f32 %v1669_v39, %v705_v15  ;;  %v2142_v59 = vadd.f32 %v1669_v39, %v676_v12  ;;  %v2145_v10 = vadd.f32 %v1669_v39, %v708_v20 }
 0x133   :  { %v1463_v43 = vpop.eup %1462  ;;  %v1060_v7 = vmul.f32 %v996_v55, %v804_v51  ;;  %v1028_v41 = vadd.f32 1.0, %v1461_v34  ;;  %1474 = verf.f32 %v872_v38  ;;  %v2148_v37 = vadd.f32 %v1669_v39, %v674_v24 }
 0x134   :  { %v1465_v57 = vpop.eup %1464  ;;  %1158 = vst [vmem:[%s2278_s4 + $0x1b0] sm:$0xff] %v1094_v62  ;;  %v999_v23 = vadd.f32 1.0, %v1463_v43  ;;  %v839_v44 = vmul.f32 0.5, %v2080_v36  ;;  %v805_v63 = vmul.f32 0.5, %v741_v26  ;;  %v904_v49 = vmul.f32 0.70710677, %v776_v2 }
 0x135   :  { %1124 = vst [vmem:[%s2278_s4 + $0xa0] sm:$0xff] %v1060_v7  ;;  %v1092_v28 = vmul.f32 %v1028_v41, %v836_v17  ;;  %v1031_v30 = vadd.f32 1.0, %v1465_v57  ;;  %v837_v16 = vmul.f32 0.5, %v773_v47  ;;  %v875_v39 = vmul.f32 0.70710677, %v2142_v59 }
 0x136   :  { %v1467_v46 = vpop.eup %1466  ;;  %v1063_v19 = vmul.f32 %v999_v23, %v807_v31  ;;  %v810_v56 = vmul.f32 0.5, %v746_v33  ;;  %1476 = verf.f32 %v904_v49  ;;  %v907_v53 = vmul.f32 0.70710677, %v2145_v10 }
 0x137   :  { %1156 = vst [vmem:[%s2278_s4 + $0x1a0] sm:$0xff] %v1092_v28  ;;  %v1095_v36 = vmul.f32 %v1031_v30, %v839_v44  ;;  %v997_v26 = vadd.f32 1.0, %v1467_v46  ;;  %1478 = verf.f32 %v875_v39  ;;  %v873_v27 = vmul.f32 0.70710677, %v2148_v37 }
 0x138   :  { %1127 = vst [vmem:[%s2278_s4 + $0xb8] sm:$0xff] %v1063_v19  ;;  %1480 = verf.f32 %v907_v53  ;;  %v706_v54 = vmul.f32 %v2169_v25, %v1956_v58  ;;  %v679_v35 = vmul.f32 %v2169_v25, %v1979_v9  ;;  %v711_v60 = vmul.f32 %v2169_v25, %v1981_v32  ;;  %v1503_v9 = vld [vmem:[%s2277_s3] ss:$0 sm:$0xff] }
 0x139   :  { %v1469_v29 = vpop.eup %1468  ;;  %1159 = vst [vmem:[%s2278_s4 + $0x1b8] sm:$0xff] %v1095_v36  ;;  %v1061_v8 = vmul.f32 %v997_v26, %v805_v63  ;;  %1482 = verf.f32 %v873_v27  ;;  %v677_v47 = vmul.f32 %v2169_v25, %v1990_v6  ;;  %v709_v33 = vmul.f32 %v2169_v25, %v1992_v40 }
 0x13a   :  { %v1471_v58 = vpop.eup %1470  ;;  %v1029_v0 = vadd.f32 1.0, %v1469_v29  ;;  %v2187_v32 = vadd.f32 %v1503_v9, %v706_v54  ;;  %v2189_v50 = vadd.f32 %v1503_v9, %v679_v35  ;;  %v2191_v48 = vadd.f32 %v1503_v9, %v711_v60 }
 0x13b   :  { %v1473_v18 = vpop.eup %1472  ;;  %1125 = vst [vmem:[%s2278_s4 + $0xa8] sm:$0xff] %v1061_v8  ;;  %v1002_v6 = vadd.f32 1.0, %v1471_v58  ;;  %v842_v40 = vmul.f32 0.5, %v2113_v4  ;;  %v2197_v51 = vadd.f32 %v1503_v9, %v677_v47  ;;  %v2199_v13 = vadd.f32 %v1503_v9, %v709_v33 }
 0x13c   :  { %v1093_v52 = vmul.f32 %v1029_v0, %v837_v16  ;;  %v1034_v17 = vadd.f32 1.0, %v1473_v18  ;;  %v905_v22 = vmul.f32 0.70710677, %v2187_v32  ;;  %v680_v5 = vmul.f32 %v2169_v25, %v2000_v3 }
 0x13d   :  { %v1475_v45 = vpop.eup %1474  ;;  %v1066_v15 = vmul.f32 %v1002_v6, %v810_v56  ;;  %v808_v12 = vmul.f32 0.5, %v2125_v42  ;;  %v840_v14 = vmul.f32 0.5, %v776_v2  ;;  %v878_v61 = vmul.f32 0.70710677, %v2189_v50 }
 0x13e   :  { %1157 = vst [vmem:[%s2278_s4 + $0x1a8] sm:$0xff] %v1093_v52  ;;  %v1098_v4 = vmul.f32 %v1034_v17, %v842_v40  ;;  %v1000_v20 = vadd.f32 1.0, %v1475_v45  ;;  %1484 = verf.f32 %v905_v22  ;;  %v910_v24 = vmul.f32 0.70710677, %v2191_v48 }
 0x13f   :  { %1130 = vst [vmem:[%s2278_s4 + $0xd0] sm:$0xff] %v1066_v15  ;;  %v811_v3 = vmul.f32 0.5, %v2142_v59  ;;  %v843_v42 = vmul.f32 0.5, %v2145_v10  ;;  %1486 = verf.f32 %v878_v61  ;;  %v876_v55 = vmul.f32 0.70710677, %v2197_v51 }
 0x140   :  { %v1477_v31 = vpop.eup %1476  ;;  %1162 = vst [vmem:[%s2278_s4 + $0x1d0] sm:$0xff] %v1098_v4  ;;  %v1064_v38 = vmul.f32 %v1000_v20, %v808_v12  ;;  %1488 = verf.f32 %v910_v24  ;;  %v908_v34 = vmul.f32 0.70710677, %v2199_v13  ;;  %v751_v62 = vadd.f32 %v1503_v9, %v680_v5 }
 0x141   :  { %v1479_v2 = vpop.eup %1478  ;;  %v1032_v43 = vadd.f32 1.0, %v1477_v31  ;;  %1490 = verf.f32 %v876_v55  ;;  %v712_v59 = vmul.f32 %v2169_v25, %v2002_v1  ;;  %v678_v10 = vmul.f32 %v2169_v25, %v2012_v21 }
 0x142   :  { %v1481_v7 = vpop.eup %1480  ;;  %1128 = vst [vmem:[%s2278_s4 + $0xc0] sm:$0xff] %v1064_v38  ;;  %v1003_v41 = vadd.f32 1.0, %v1479_v2  ;;  %v809_v57 = vmul.f32 0.5, %v2148_v37  ;;  %1492 = verf.f32 %v908_v34  ;;  %v879_v23 = vmul.f32 0.70710677, %v751_v62 }
 0x143   :  { %v1483_v44 = vpop.eup %1482  ;;  %v1096_v63 = vmul.f32 %v1032_v43, %v840_v14  ;;  %v1035_v49 = vadd.f32 1.0, %v1481_v7  ;;  %v783_v28 = vadd.f32 %v1503_v9, %v712_v59  ;;  %v749_v30 = vadd.f32 %v1503_v9, %v678_v10 }
 0x144   :  { %v1067_v16 = vmul.f32 %v1003_v41, %v811_v3  ;;  %v1001_v1 = vadd.f32 1.0, %v1483_v44  ;;  %1494 = verf.f32 %v879_v23  ;;  %v710_v21 = vmul.f32 %v2169_v25, %v2014_v11 }
 0x145   :  { %1160 = vst [vmem:[%s2278_s4 + $0x1c0] sm:$0xff] %v1096_v63  ;;  %v1099_v39 = vmul.f32 %v1035_v49, %v843_v42  ;;  %v911_v46 = vmul.f32 0.70710677, %v783_v28  ;;  %v877_v19 = vmul.f32 0.70710677, %v749_v30  ;;  %v841_v26 = vmul.f32 0.5, %v2187_v32 }
 0x146   :  { %1131 = vst [vmem:[%s2278_s4 + $0xd8] sm:$0xff] %v1067_v16  ;;  %v1065_v37 = vmul.f32 %v1001_v1, %v809_v57  ;;  %v781_v56 = vadd.f32 %v1503_v9, %v710_v21  ;;  %v814_v54 = vmul.f32 0.5, %v2189_v50  ;;  %v846_v8 = vmul.f32 0.5, %v2191_v48 }
 0x147   :  { %1163 = vst [vmem:[%s2278_s4 + $0x1d8] sm:$0xff] %v1099_v39  ;;  %1496 = verf.f32 %v911_v46  ;;  %v812_v0 = vmul.f32 0.5, %v2197_v51  ;;  %v844_v18 = vmul.f32 0.5, %v2199_v13  ;;  %v815_v51 = vmul.f32 0.5, %v751_v62 }
 0x148   :  { %v1485_v53 = vpop.eup %1484  ;;  %1129 = vst [vmem:[%s2278_s4 + $0xc8] sm:$0xff] %v1065_v37  ;;  %1498 = verf.f32 %v877_v19  ;;  %v909_v11 = vmul.f32 0.70710677, %v781_v56  ;;  %v847_v5 = vmul.f32 0.5, %v783_v28  ;;  %v813_v15 = vmul.f32 0.5, %v749_v30 }
 0x149   :  { %v1487_v36 = vpop.eup %1486  ;;  %v1033_v27 = vadd.f32 1.0, %v1485_v53  ;;  %v845_v20 = vmul.f32 0.5, %v781_v56 }
 0x14a   :  { %v1489_v25 = vpop.eup %1488  ;;  %v1006_v35 = vadd.f32 1.0, %v1487_v36  ;;  %1500 = verf.f32 %v909_v11 }
 0x14b   :  { %v1491_v60 = vpop.eup %1490  ;;  %v1097_v29 = vmul.f32 %v1033_v27, %v841_v26  ;;  %v1038_v47 = vadd.f32 1.0, %v1489_v25 }
 0x14c   :  { %v1493_v33 = vpop.eup %1492  ;;  %v1070_v58 = vmul.f32 %v1006_v35, %v814_v54  ;;  %v1004_v9 = vadd.f32 1.0, %v1491_v60 }
 0x14d   :  { %1161 = vst [vmem:[%s2278_s4 + $0x1c8] sm:$0xff] %v1097_v29  ;;  %v1102_v32 = vmul.f32 %v1038_v47, %v846_v8  ;;  %v1036_v50 = vadd.f32 1.0, %v1493_v33 }
 0x14e   :  { %v1495_v6 = vpop.eup %1494  ;;  %1134 = vst [vmem:[%s2278_s4 + $0xf0] sm:$0xff] %v1070_v58  ;;  %v1068_v48 = vmul.f32 %v1004_v9, %v812_v0 }
 0x14f   :  { %1166 = vst [vmem:[%s2278_s4 + $0x1f0] sm:$0xff] %v1102_v32  ;;  %v1100_v40 = vmul.f32 %v1036_v50, %v844_v18  ;;  %v1007_v52 = vadd.f32 1.0, %v1495_v6 }
 0x150   :  { %1132 = vst [vmem:[%s2278_s4 + $0xe0] sm:$0xff] %v1068_v48 }
 0x151   :  { %v1497_v17 = vpop.eup %1496  ;;  %1164 = vst [vmem:[%s2278_s4 + $0x1e0] sm:$0xff] %v1100_v40  ;;  %v1071_v13 = vmul.f32 %v1007_v52, %v815_v51 }
 0x152   :  { %v1499_v22 = vpop.eup %1498  ;;  %v1039_v45 = vadd.f32 1.0, %v1497_v17 }
 0x153   :  { %1135 = vst [vmem:[%s2278_s4 + $0xf8] sm:$0xff] %v1071_v13  ;;  %v1005_v12 = vadd.f32 1.0, %v1499_v22 }
 0x154   :  { %v1501_v14 = vpop.eup %1500  ;;  %v1103_v61 = vmul.f32 %v1039_v45, %v847_v5 }
 0x155   :  { %v1069_v4 = vmul.f32 %v1005_v12, %v813_v15  ;;  %v1037_v24 = vadd.f32 1.0, %v1501_v14 }
 0x156   :  { %1167 = vst [vmem:[%s2278_s4 + $0x1f8] sm:$0xff] %v1103_v61 }
 0x157   :  { %1133 = vst [vmem:[%s2278_s4 + $0xe8] sm:$0xff] %v1069_v4  ;;  %v1101_v3 = vmul.f32 %v1037_v24, %v845_v20 }
 0x159   :  { %1165 = vst [vmem:[%s2278_s4 + $0x1e8] sm:$0xff] %v1101_v3 }

// kernel: hybrid_transformer_forward.7
= control target key start
LH: loop header
LB: loop body
LE: loop exit
PB: predicated region body
PF: predicated region fallthrough
CT: control target
= control target key end

     0   :  { %v1024_v0 = vmov 0   ;;  %vm418_vm0 = vcmask 392192   ;;  %s1336_s1 = inlined_call_operand.vmem [shape: bf16[432,128], index: 1, kind: input, shape index: {}]   ;;  %s1337_s0 = inlined_call_operand.vmem [shape: bf16[128,432], index: 0, kind: input, shape index: {}]   ;;  %s1338_s2 = inlined_call_operand.vmem [shape: f32[1,128], index: 2, kind: input, shape index: {}]   ;;  %s1339_s3 = inlined_call_operand.vmem [shape: f32[1,128], index: 3, kind: input, shape index: {}]   ;;  %s1340_s4 = inlined_call_operand.vmem [shape: f32[128,128], index: 4, kind: output, shape index: {}]  }
   0x1   :  { %540 = vmatprep.subr.bf16.mxu1 %v1024_v0  ;;  %v917_v1 = vld [vmem:[%s1336_s1 + $0x80] sm:$0xff]   ;;  %v918_v2 = vld [vmem:[%s1336_s1 + $0x88] sm:$0xff]   ;;  %v921_v5 = vld [vmem:[%s1336_s1 + $0x90] sm:$0xff]  }
   0x2   :  { %541 = vmatpush1.bf16.msra.mxu1 %v917_v1  ;;  %v919_v3 = vld [vmem:[%s1336_s1 + $0x40] sm:$0xff]   ;;  %v922_v6 = vld [vmem:[%s1336_s1 + $0x48] sm:$0xff]   ;;  %v925_v8 = vld [vmem:[%s1336_s1 + $0x50] sm:$0xff]  }
   0x3   :  { %542 = vmatprep.subr.bf16.mxu1 %v1024_v0  ;;  %v920_v4 = vld [vmem:[%s1336_s1] sm:$0xff]   ;;  %852 = vmatprep.subr.bf16.mxu0 %v919_v3  ;;  %v923_v7 = vld [vmem:[%s1336_s1 + $0x8] sm:$0xff]   ;;  %v926_v9 = vld [vmem:[%s1336_s1 + $0x10] sm:$0xff]  }
   0x4   :  { %853 = vmatpush3.bf16.msra.mxu0 %v920_v4  ;;  %v924_v10 = vld [vmem:[%s1336_s1 + $0x98] sm:$0xff]   ;;  %v927_v12 = vld [vmem:[%s1336_s1 + $0xa0] sm:$0xff]   ;;  %v930_v15 = vld [vmem:[%s1336_s1 + $0xa8] sm:$0xff]  }
   0x5   :  { %854 = vmatprep.subr.bf16.mxu0 %v922_v6  ;;  %v928_v11 = vld [vmem:[%s1336_s1 + $0x58] sm:$0xff]   ;;  %v931_v14 = vld [vmem:[%s1336_s1 + $0x60] sm:$0xff]   ;;  %v934_v17 = vld [vmem:[%s1336_s1 + $0x68] sm:$0xff]  }
   0x6   :  { %543 = vmatpush1.bf16.msra.mxu1 %v918_v2  ;;  %v929_v13 = vld [vmem:[%s1336_s1 + $0x18] sm:$0xff]   ;;  %v932_v16 = vld [vmem:[%s1336_s1 + $0x20] sm:$0xff]   ;;  %v933_v18 = vld [vmem:[%s1336_s1 + $0xb0] sm:$0xff]  }
   0x7   :  { %544 = vmatprep.subr.bf16.mxu1 %v1024_v0  ;;  %v935_v19 = vld [vmem:[%s1336_s1 + $0x28] sm:$0xff]   ;;  %v937_v20 = vld [vmem:[%s1336_s1 + $0x70] sm:$0xff]   ;;  %v936_v21 = vld [vmem:[%s1336_s1 + $0xb8] sm:$0xff]  }
   0x8   :  { %855 = vmatpush3.bf16.msra.mxu0 %v923_v7  ;;  %v938_v22 = vld [vmem:[%s1336_s1 + $0x30] sm:$0xff]   ;;  %v940_v23 = vld [vmem:[%s1336_s1 + $0x78] sm:$0xff]   ;;  %v939_v27 = vld [vmem:[%s1336_s1 + $0xc0] sm:$0xff]  }
   0x9   :  { %856 = vmatprep.subr.bf16.mxu0 %v925_v8  ;;  %v944_v24 = vld [vmem:[%s1337_s0 + $0x4] ss:$16 sps:$4 sm:$0xff]   ;;  %v941_v25 = vld [vmem:[%s1336_s1 + $0x38] sm:$0xff]   ;;  %v942_v28 = vld [vmem:[%s1337_s0] ss:$16 sps:$4 sm:$0xff]  }
   0xa   :  { %545 = vmatpush1.bf16.msra.mxu1 %v921_v5  ;;  %475 = vmatprep.mubr.bf16.mxu0 %v944_v24  ;;  %v949_v26 = vld [vmem:[%s1337_s0 + $0xc] ss:$16 sps:$4 sm:$0xff]   ;;  %v950_v29 = vld [vmem:[%s1337_s0 + $0x24] ss:$16 sps:$4 sm:$0xff]   ;;  %v952_v32 = vld [vmem:[%s1337_s0 + $0x20] ss:$16 sps:$4 sm:$0xff]  }
   0xb   :  { %546 = vmatprep.subr.bf16.mxu1 %v1024_v0  ;;  %842 = vmatprep.mubr.msk.bf16.mxu1 %vm418_vm0, %v949_v26  ;;  %v945_v30 = vld [vmem:[%s1336_s1 + $0xc8] sm:$0xff]   ;;  %v946_v31 = vld [vmem:[%s1336_s1 + $0xd0] sm:$0xff]   ;;  %v1249_v4 = vld [vmem:[%s1338_s2] ss:$0 sm:$0xff] }
   0xc   :  { %857 = vmatpush3.bf16.msra.mxu0 %v926_v9  ;;  %v947_v33 = vld [vmem:[%s1337_s0 + $0x8] ss:$16 sps:$4 sm:$0xff]   ;;  %v956_v34 = vld [vmem:[%s1337_s0 + $0x44] ss:$16 sps:$4 sm:$0xff]   ;;  %v953_v35 = vld [vmem:[%s1337_s0 + $0x2c] ss:$16 sps:$4 sm:$0xff]  }
   0xd   :  { %858 = vmatprep.subr.bf16.mxu0 %v928_v11  ;;  %v958_v36 = vld [vmem:[%s1337_s0 + $0x40] ss:$16 sps:$4 sm:$0xff]   ;;  %v955_v37 = vld [vmem:[%s1337_s0 + $0x28] ss:$16 sps:$4 sm:$0xff]   ;;  %v962_v38 = vld [vmem:[%s1337_s0 + $0x64] ss:$16 sps:$4 sm:$0xff]  }
   0xe   :  { %547 = vmatpush1.bf16.msra.mxu1 %v924_v10  ;;  %v959_v39 = vld [vmem:[%s1337_s0 + $0x4c] ss:$16 sps:$4 sm:$0xff]   ;;  %v964_v40 = vld [vmem:[%s1337_s0 + $0x60] ss:$16 sps:$4 sm:$0xff]   ;;  %v961_v41 = vld [vmem:[%s1337_s0 + $0x48] ss:$16 sps:$4 sm:$0xff]  }
   0xf   :  { %548 = vmatprep.subr.bf16.mxu1 %v1024_v0  ;;  %v968_v42 = vld [vmem:[%s1337_s0 + $0x84] ss:$16 sps:$4 sm:$0xff]   ;;  %v965_v43 = vld [vmem:[%s1337_s0 + $0x6c] ss:$16 sps:$4 sm:$0xff]   ;;  %v970_v44 = vld [vmem:[%s1337_s0 + $0x80] ss:$16 sps:$4 sm:$0xff]  }
  0x10   :  { %859 = vmatpush3.bf16.msra.mxu0 %v929_v13  ;;  %v967_v45 = vld [vmem:[%s1337_s0 + $0x68] ss:$16 sps:$4 sm:$0xff]   ;;  %v974_v46 = vld [vmem:[%s1337_s0 + $0xa4] ss:$16 sps:$4 sm:$0xff]   ;;  %v971_v47 = vld [vmem:[%s1337_s0 + $0x8c] ss:$16 sps:$4 sm:$0xff]  }
  0x11   :  { %860 = vmatprep.subr.bf16.mxu0 %v931_v14  ;;  %v976_v48 = vld [vmem:[%s1337_s0 + $0xa0] ss:$16 sps:$4 sm:$0xff]   ;;  %v973_v49 = vld [vmem:[%s1337_s0 + $0x88] ss:$16 sps:$4 sm:$0xff]   ;;  %v980_v50 = vld [vmem:[%s1337_s0 + $0xc4] ss:$16 sps:$4 sm:$0xff]  }
  0x12   :  { %549 = vmatpush1.bf16.msra.mxu1 %v927_v12  ;;  %v977_v51 = vld [vmem:[%s1337_s0 + $0xac] ss:$16 sps:$4 sm:$0xff]   ;;  %v982_v52 = vld [vmem:[%s1337_s0 + $0xc0] ss:$16 sps:$4 sm:$0xff]   ;;  %v979_v53 = vld [vmem:[%s1337_s0 + $0xa8] ss:$16 sps:$4 sm:$0xff]  }
  0x13   :  { %550 = vmatprep.subr.bf16.mxu1 %v1024_v0  ;;  %v986_v54 = vld [vmem:[%s1337_s0 + $0xe4] ss:$16 sps:$4 sm:$0xff]   ;;  %v983_v55 = vld [vmem:[%s1337_s0 + $0xcc] ss:$16 sps:$4 sm:$0xff]   ;;  %v988_v56 = vld [vmem:[%s1337_s0 + $0xe0] ss:$16 sps:$4 sm:$0xff]  }
  0x14   :  { %861 = vmatpush3.bf16.msra.mxu0 %v932_v16  ;;  %v985_v57 = vld [vmem:[%s1337_s0 + $0xc8] ss:$16 sps:$4 sm:$0xff]   ;;  %v989_v58 = vld [vmem:[%s1337_s0 + $0xec] ss:$16 sps:$4 sm:$0xff]   ;;  %v1254_v10 = vld [vmem:[%s1339_s3] ss:$0 sm:$0xff] }
  0x15   :  { %862 = vmatprep.subr.bf16.mxu0 %v934_v17  ;;  %v991_v59 = vld [vmem:[%s1337_s0 + $0xe8] ss:$16 sps:$4 sm:$0xff]  }
  0x16   :  { %551 = vmatpush1.bf16.msra.mxu1 %v930_v15 }
  0x17   :  { %552 = vmatprep.subr.bf16.mxu1 %v1024_v0 }
  0x18   :  { %863 = vmatpush3.bf16.msra.mxu0 %v935_v19 }
  0x19   :  { %864 = vmatprep.subr.bf16.mxu0 %v937_v20 }
  0x1a   :  { %553 = vmatpush1.bf16.msra.mxu1 %v933_v18 }
  0x1b   :  { %554 = vmatprep.subr.bf16.mxu1 %v1024_v0 }
  0x1c   :  { %865 = vmatpush3.bf16.msra.mxu0 %v938_v22 }
  0x1d   :  { %866 = vmatprep.subr.bf16.mxu0 %v940_v23 }
  0x1e   :  { %555 = vmatpush1.bf16.msra.mxu1 %v936_v21 }
  0x1f   :  { %556 = vmatprep.subr.bf16.mxu1 %v1024_v0 }
  0x20   :  { %867 = vmatpush3.bf16.msra.mxu0 %v941_v25 }
  0x22   :  { %557 = vmatpush1.bf16.msra.mxu1 %v939_v27 }
  0x23   :  { %558 = vmatprep.subr.bf16.mxu1 %v1024_v0  ;;  %476 = vmatmul.mubr.bf16.vlgmr.msra.gmra.mrb[0].mxu0 %v942_v28 }
  0x24   :  { %483 = vmatprep.mubr.bf16.mxu0 %v950_v29 }
  0x26   :  { %559 = vmatpush1.bf16.msra.mxu1 %v945_v30 }
  0x27   :  { %560 = vmatprep.subr.bf16.mxu1 %v1024_v0 }
  0x2a   :  { %561 = vmatpush1.bf16.msra.mxu1 %v946_v31 }
  0x2b   :  { %484 = vmatmul.mubr.bf16.gmra.mrb[4].mxu0 %v952_v32 }
  0x2c   :  { %491 = vmatprep.mubr.bf16.mxu0 %v956_v34 }
  0x2d   :  { %573 = vmatmul.mubr.bf16.vlgmr.msra.gmra.mrb[0].mxu1 %v947_v33 }
  0x2e   :  { %843 = vmatprep.mubr.msk.bf16.mxu1 %vm418_vm0, %v953_v35 }
  0x33   :  { %492 = vmatmul.mubr.bf16.gmra.mrb[8].mxu0 %v958_v36 }
  0x34   :  { %499 = vmatprep.mubr.bf16.mxu0 %v962_v38 }
  0x35   :  { %581 = vmatmul.mubr.bf16.gmra.mrb[4].mxu1 %v955_v37 }
  0x36   :  { %844 = vmatprep.mubr.msk.bf16.mxu1 %vm418_vm0, %v959_v39 }
  0x3b   :  { %500 = vmatmul.mubr.bf16.gmra.mrb[12].mxu0 %v964_v40 }
  0x3c   :  { %507 = vmatprep.mubr.bf16.mxu0 %v968_v42 }
  0x3d   :  { %589 = vmatmul.mubr.bf16.gmra.mrb[8].mxu1 %v961_v41 }
  0x3e   :  { %845 = vmatprep.mubr.msk.bf16.mxu1 %vm418_vm0, %v965_v43 }
  0x43   :  { %508 = vmatmul.mubr.bf16.gmra.mrb[16].mxu0 %v970_v44 }
  0x44   :  { %515 = vmatprep.mubr.bf16.mxu0 %v974_v46 }
  0x45   :  { %597 = vmatmul.mubr.bf16.gmra.mrb[12].mxu1 %v967_v45 }
  0x46   :  { %846 = vmatprep.mubr.msk.bf16.mxu1 %vm418_vm0, %v971_v47 }
  0x4b   :  { %516 = vmatmul.mubr.bf16.gmra.mrb[20].mxu0 %v976_v48 }
  0x4c   :  { %523 = vmatprep.mubr.bf16.mxu0 %v980_v50 }
  0x4d   :  { %605 = vmatmul.mubr.bf16.gmra.mrb[16].mxu1 %v973_v49 }
  0x4e   :  { %847 = vmatprep.mubr.msk.bf16.mxu1 %vm418_vm0, %v977_v51 }
  0x53   :  { %524 = vmatmul.mubr.bf16.gmra.mrb[24].mxu0 %v982_v52 }
  0x54   :  { %531 = vmatprep.mubr.bf16.mxu0 %v986_v54 }
  0x55   :  { %613 = vmatmul.mubr.bf16.gmra.mrb[20].mxu1 %v979_v53 }
  0x56   :  { %848 = vmatprep.mubr.msk.bf16.mxu1 %vm418_vm0, %v983_v55 }
  0x5b   :  { %532 = vmatmul.mubr.bf16.gmra.mrb[28].mxu0 %v988_v56 }
  0x5d   :  { %621 = vmatmul.mubr.bf16.gmra.mrb[24].mxu1 %v985_v57 }
  0x5e   :  { %849 = vmatprep.mubr.msk.bf16.mxu1 %vm418_vm0, %v989_v58 }
  0x65   :  { %629 = vmatmul.mubr.bf16.gmra.mrb[28].mxu1 %v991_v59 }
  0xf6   :  { %v868_v60 = vpop.f32.mrb[0].mxu0 }
  0xf7   :  { %v869_v61 = vpop.f32.mrb[1].mxu0 }
  0xf8   :  { %v870_v62 = vadd.f32 %v869_v61, %v868_v60  ;;  %v871_v63 = vpop.f32.mrb[2].mxu0 }
  0xf9   :  { %v872_v0 = vpop.f32.mrb[3].mxu0 }
  0xfa   :  { %v873_v1 = vadd.f32 %v872_v0, %v871_v63 }
  0xfe   :  { %v874_v2 = vpop.f32.mrb[4].mxu0 }
  0xff   :  { %v875_v5 = vpop.f32.mrb[5].mxu0 }
 0x100   :  { %v574_v3 = vpop.f32.mrb[0].mxu1  ;;  %v876_v8 = vadd.f32 %v875_v5, %v874_v2  ;;  %v877_v9 = vpop.f32.mrb[6].mxu0 }
 0x101   :  { %v575_v6 = vadd.f32 %v870_v62, %v574_v3  ;;  %v576_v7 = vpop.f32.mrb[1].mxu1  ;;  %v878_v12 = vpop.f32.mrb[7].mxu0 }
 0x102   :  { %v577_v11 = vpop.f32.mrb[2].mxu1  ;;  %v879_v16 = vadd.f32 %v878_v12, %v877_v9 }
 0x103   :  { %v644_v13 = vmul.f32 %v1249_v4, %v575_v6  ;;  %v578_v14 = vadd.f32 %v873_v1, %v577_v11  ;;  %v579_v15 = vpop.f32.mrb[3].mxu1 }
 0x105   :  { %v667_v17 = vadd.f32 %v1254_v10, %v644_v13  ;;  %v645_v18 = vmul.f32 %v1249_v4, %v578_v14 }
 0x106   :  { %v880_v21 = vpop.f32.mrb[8].mxu0 }
 0x107   :  { %v699_v19 = vmul.f32 0.70710677, %v667_v17  ;;  %v668_v20 = vadd.f32 %v1254_v10, %v645_v18  ;;  %v881_v23 = vpop.f32.mrb[9].mxu0  ;;  %v683_v54 = vmul.f32 0.5, %v667_v17 }
 0x108   :  { %v582_v22 = vpop.f32.mrb[4].mxu1  ;;  %v883_v27 = vpop.f32.mrb[10].mxu0  ;;  %v882_v29 = vadd.f32 %v881_v23, %v880_v21 }
 0x109   :  { %992 = verf.f32 %v699_v19  ;;  %v700_v24 = vmul.f32 0.70710677, %v668_v20  ;;  %v583_v25 = vadd.f32 %v876_v8, %v582_v22  ;;  %v584_v26 = vpop.f32.mrb[5].mxu1  ;;  %v884_v30 = vpop.f32.mrb[11].mxu0  ;;  %v684_v60 = vmul.f32 0.5, %v668_v20 }
 0x10a   :  { %v585_v28 = vpop.f32.mrb[6].mxu1  ;;  %v885_v34 = vadd.f32 %v884_v30, %v883_v27 }
 0x10b   :  { %994 = verf.f32 %v700_v24  ;;  %v646_v31 = vmul.f32 %v1249_v4, %v583_v25  ;;  %v586_v32 = vadd.f32 %v879_v16, %v585_v28  ;;  %v587_v33 = vpop.f32.mrb[7].mxu1 }
 0x10d   :  { %v669_v35 = vadd.f32 %v1254_v10, %v646_v31  ;;  %v647_v36 = vmul.f32 %v1249_v4, %v586_v32 }
 0x10e   :  { %v886_v39 = vpop.f32.mrb[12].mxu0 }
 0x10f   :  { %v701_v37 = vmul.f32 0.70710677, %v669_v35  ;;  %v670_v38 = vadd.f32 %v1254_v10, %v647_v36  ;;  %v887_v41 = vpop.f32.mrb[13].mxu0  ;;  %v685_v18 = vmul.f32 0.5, %v669_v35 }
 0x110   :  { %v590_v40 = vpop.f32.mrb[8].mxu1  ;;  %v889_v45 = vpop.f32.mrb[14].mxu0  ;;  %v888_v47 = vadd.f32 %v887_v41, %v886_v39 }
 0x111   :  { %996 = verf.f32 %v701_v37  ;;  %v702_v42 = vmul.f32 0.70710677, %v670_v38  ;;  %v591_v43 = vadd.f32 %v882_v29, %v590_v40  ;;  %v592_v44 = vpop.f32.mrb[9].mxu1  ;;  %v890_v48 = vpop.f32.mrb[15].mxu0  ;;  %v686_v24 = vmul.f32 0.5, %v670_v38 }
 0x112   :  { %v593_v46 = vpop.f32.mrb[10].mxu1  ;;  %v891_v53 = vadd.f32 %v890_v48, %v889_v45 }
 0x113   :  { %v993_v49 = vpop.eup %992  ;;  %998 = verf.f32 %v702_v42  ;;  %v648_v50 = vmul.f32 %v1249_v4, %v591_v43  ;;  %v594_v51 = vadd.f32 %v885_v34, %v593_v46  ;;  %v595_v52 = vpop.f32.mrb[11].mxu1 }
 0x114   :  { %v731_v55 = vadd.f32 1.0, %v993_v49 }
 0x115   :  { %v995_v56 = vpop.eup %994  ;;  %v671_v57 = vadd.f32 %v1254_v10, %v648_v50  ;;  %v649_v58 = vmul.f32 %v1249_v4, %v594_v51 }
 0x116   :  { %v747_v59 = vmul.f32 %v731_v55, %v683_v54  ;;  %v732_v61 = vadd.f32 1.0, %v995_v56  ;;  %v892_v0 = vpop.f32.mrb[16].mxu0 }
 0x117   :  { %v703_v62 = vmul.f32 0.70710677, %v671_v57  ;;  %v672_v63 = vadd.f32 %v1254_v10, %v649_v58  ;;  %v893_v3 = vpop.f32.mrb[17].mxu0  ;;  %v687_v44 = vmul.f32 0.5, %v671_v57 }
 0x118   :  { %763 = vst [vmem:[%s1340_s4] sm:$0xff] %v747_v59  ;;  %v748_v1 = vmul.f32 %v732_v61, %v684_v60  ;;  %v598_v2 = vpop.f32.mrb[12].mxu1  ;;  %v895_v8 = vpop.f32.mrb[18].mxu0  ;;  %v894_v11 = vadd.f32 %v893_v3, %v892_v0 }
 0x119   :  { %1000 = verf.f32 %v703_v62  ;;  %v704_v5 = vmul.f32 0.70710677, %v672_v63  ;;  %v599_v6 = vadd.f32 %v888_v47, %v598_v2  ;;  %v600_v7 = vpop.f32.mrb[13].mxu1  ;;  %v896_v12 = vpop.f32.mrb[19].mxu0  ;;  %v688_v50 = vmul.f32 0.5, %v672_v63 }
 0x11a   :  { %764 = vst [vmem:[%s1340_s4 + $0x8] sm:$0xff] %v748_v1  ;;  %v601_v9 = vpop.f32.mrb[14].mxu1  ;;  %v897_v17 = vadd.f32 %v896_v12, %v895_v8 }
 0x11b   :  { %v997_v13 = vpop.eup %996  ;;  %1002 = verf.f32 %v704_v5  ;;  %v650_v14 = vmul.f32 %v1249_v4, %v599_v6  ;;  %v602_v15 = vadd.f32 %v891_v53, %v601_v9  ;;  %v603_v16 = vpop.f32.mrb[15].mxu1 }
 0x11c   :  { %v733_v19 = vadd.f32 1.0, %v997_v13 }
 0x11d   :  { %v999_v20 = vpop.eup %998  ;;  %v673_v21 = vadd.f32 %v1254_v10, %v650_v14  ;;  %v651_v22 = vmul.f32 %v1249_v4, %v602_v15 }
 0x11e   :  { %v749_v23 = vmul.f32 %v733_v19, %v685_v18  ;;  %v734_v25 = vadd.f32 1.0, %v999_v20  ;;  %v898_v28 = vpop.f32.mrb[20].mxu0 }
 0x11f   :  { %v705_v26 = vmul.f32 0.70710677, %v673_v21  ;;  %v674_v27 = vadd.f32 %v1254_v10, %v651_v22  ;;  %v899_v31 = vpop.f32.mrb[21].mxu0  ;;  %v689_v7 = vmul.f32 0.5, %v673_v21 }
 0x120   :  { %765 = vst [vmem:[%s1340_s4 + $0x10] sm:$0xff] %v749_v23  ;;  %v750_v29 = vmul.f32 %v734_v25, %v686_v24  ;;  %v606_v30 = vpop.f32.mrb[16].mxu1  ;;  %v901_v35 = vpop.f32.mrb[22].mxu0  ;;  %v900_v37 = vadd.f32 %v899_v31, %v898_v28 }
 0x121   :  { %1004 = verf.f32 %v705_v26  ;;  %v706_v32 = vmul.f32 0.70710677, %v674_v27  ;;  %v607_v33 = vadd.f32 %v894_v11, %v606_v30  ;;  %v608_v34 = vpop.f32.mrb[17].mxu1  ;;  %v902_v38 = vpop.f32.mrb[23].mxu0  ;;  %v690_v14 = vmul.f32 0.5, %v674_v27 }
 0x122   :  { %766 = vst [vmem:[%s1340_s4 + $0x18] sm:$0xff] %v750_v29  ;;  %v609_v36 = vpop.f32.mrb[18].mxu1  ;;  %v903_v43 = vadd.f32 %v902_v38, %v901_v35 }
 0x123   :  { %v1001_v39 = vpop.eup %1000  ;;  %1006 = verf.f32 %v706_v32  ;;  %v652_v40 = vmul.f32 %v1249_v4, %v607_v33  ;;  %v610_v41 = vadd.f32 %v897_v17, %v609_v36  ;;  %v611_v42 = vpop.f32.mrb[19].mxu1 }
 0x124   :  { %v735_v45 = vadd.f32 1.0, %v1001_v39 }
 0x125   :  { %v1003_v46 = vpop.eup %1002  ;;  %v675_v47 = vadd.f32 %v1254_v10, %v652_v40  ;;  %v653_v48 = vmul.f32 %v1249_v4, %v610_v41 }
 0x126   :  { %v751_v49 = vmul.f32 %v735_v45, %v687_v44  ;;  %v736_v51 = vadd.f32 1.0, %v1003_v46  ;;  %v904_v54 = vpop.f32.mrb[24].mxu0 }
 0x127   :  { %v707_v52 = vmul.f32 0.70710677, %v675_v47  ;;  %v676_v53 = vadd.f32 %v1254_v10, %v653_v48  ;;  %v905_v57 = vpop.f32.mrb[25].mxu0  ;;  %v691_v34 = vmul.f32 0.5, %v675_v47 }
 0x128   :  { %767 = vst [vmem:[%s1340_s4 + $0x20] sm:$0xff] %v751_v49  ;;  %v752_v55 = vmul.f32 %v736_v51, %v688_v50  ;;  %v614_v56 = vpop.f32.mrb[20].mxu1  ;;  %v907_v61 = vpop.f32.mrb[26].mxu0  ;;  %v906_v63 = vadd.f32 %v905_v57, %v904_v54 }
 0x129   :  { %1008 = verf.f32 %v707_v52  ;;  %v708_v58 = vmul.f32 0.70710677, %v676_v53  ;;  %v615_v59 = vadd.f32 %v900_v37, %v614_v56  ;;  %v616_v60 = vpop.f32.mrb[21].mxu1  ;;  %v908_v0 = vpop.f32.mrb[27].mxu0  ;;  %v692_v40 = vmul.f32 0.5, %v676_v53 }
 0x12a   :  { %768 = vst [vmem:[%s1340_s4 + $0x28] sm:$0xff] %v752_v55  ;;  %v617_v62 = vpop.f32.mrb[22].mxu1  ;;  %v909_v6 = vadd.f32 %v908_v0, %v907_v61 }
 0x12b   :  { %v1005_v1 = vpop.eup %1004  ;;  %1010 = verf.f32 %v708_v58  ;;  %v654_v2 = vmul.f32 %v1249_v4, %v615_v59  ;;  %v618_v3 = vadd.f32 %v903_v43, %v617_v62  ;;  %v619_v5 = vpop.f32.mrb[23].mxu1 }
 0x12c   :  { %v737_v8 = vadd.f32 1.0, %v1005_v1 }
 0x12d   :  { %v1007_v9 = vpop.eup %1006  ;;  %v677_v11 = vadd.f32 %v1254_v10, %v654_v2  ;;  %v655_v12 = vmul.f32 %v1249_v4, %v618_v3 }
 0x12e   :  { %v753_v13 = vmul.f32 %v737_v8, %v689_v7  ;;  %v738_v15 = vadd.f32 1.0, %v1007_v9  ;;  %v910_v18 = vpop.f32.mrb[28].mxu0 }
 0x12f   :  { %v709_v16 = vmul.f32 0.70710677, %v677_v11  ;;  %v678_v17 = vadd.f32 %v1254_v10, %v655_v12  ;;  %v911_v21 = vpop.f32.mrb[29].mxu0  ;;  %v693_v54 = vmul.f32 0.5, %v677_v11 }
 0x130   :  { %769 = vst [vmem:[%s1340_s4 + $0x30] sm:$0xff] %v753_v13  ;;  %v754_v19 = vmul.f32 %v738_v15, %v690_v14  ;;  %v622_v20 = vpop.f32.mrb[24].mxu1  ;;  %v913_v25 = vpop.f32.mrb[30].mxu0  ;;  %v912_v27 = vadd.f32 %v911_v21, %v910_v18 }
 0x131   :  { %1012 = verf.f32 %v709_v16  ;;  %v710_v22 = vmul.f32 0.70710677, %v678_v17  ;;  %v623_v23 = vadd.f32 %v906_v63, %v622_v20  ;;  %v624_v24 = vpop.f32.mrb[25].mxu1  ;;  %v914_v28 = vpop.f32.mrb[31].mxu0  ;;  %v694_v60 = vmul.f32 0.5, %v678_v17 }
 0x132   :  { %770 = vst [vmem:[%s1340_s4 + $0x38] sm:$0xff] %v754_v19  ;;  %v625_v26 = vpop.f32.mrb[26].mxu1  ;;  %v915_v33 = vadd.f32 %v914_v28, %v913_v25 }
 0x133   :  { %v1009_v29 = vpop.eup %1008  ;;  %1014 = verf.f32 %v710_v22  ;;  %v656_v30 = vmul.f32 %v1249_v4, %v623_v23  ;;  %v626_v31 = vadd.f32 %v909_v6, %v625_v26  ;;  %v627_v32 = vpop.f32.mrb[27].mxu1 }
 0x134   :  { %v739_v35 = vadd.f32 1.0, %v1009_v29 }
 0x135   :  { %v1011_v36 = vpop.eup %1010  ;;  %v679_v37 = vadd.f32 %v1254_v10, %v656_v30  ;;  %v657_v38 = vmul.f32 %v1249_v4, %v626_v31 }
 0x136   :  { %v755_v39 = vmul.f32 %v739_v35, %v691_v34  ;;  %v740_v41 = vadd.f32 1.0, %v1011_v36 }
 0x137   :  { %v711_v42 = vmul.f32 0.70710677, %v679_v37  ;;  %v680_v43 = vadd.f32 %v1254_v10, %v657_v38 }
 0x138   :  { %771 = vst [vmem:[%s1340_s4 + $0x40] sm:$0xff] %v755_v39  ;;  %v756_v44 = vmul.f32 %v740_v41, %v692_v40  ;;  %v630_v45 = vpop.f32.mrb[28].mxu1 }
 0x139   :  { %1016 = verf.f32 %v711_v42  ;;  %v712_v46 = vmul.f32 0.70710677, %v680_v43  ;;  %v631_v47 = vadd.f32 %v912_v27, %v630_v45  ;;  %v632_v48 = vpop.f32.mrb[29].mxu1  ;;  %v696_v7 = vmul.f32 0.5, %v680_v43 }
 0x13a   :  { %772 = vst [vmem:[%s1340_s4 + $0x48] sm:$0xff] %v756_v44  ;;  %v633_v49 = vpop.f32.mrb[30].mxu1 }
 0x13b   :  { %v1013_v50 = vpop.eup %1012  ;;  %1018 = verf.f32 %v712_v46  ;;  %v658_v51 = vmul.f32 %v1249_v4, %v631_v47  ;;  %v634_v52 = vadd.f32 %v915_v33, %v633_v49  ;;  %v635_v53 = vpop.f32.mrb[31].mxu1 }
 0x13c   :  { %v741_v55 = vadd.f32 1.0, %v1013_v50 }
 0x13d   :  { %v1015_v56 = vpop.eup %1014  ;;  %v681_v57 = vadd.f32 %v1254_v10, %v658_v51  ;;  %v659_v58 = vmul.f32 %v1249_v4, %v634_v52  ;;  %v695_v4 = vmul.f32 0.5, %v679_v37 }
 0x13e   :  { %v757_v59 = vmul.f32 %v741_v55, %v693_v54  ;;  %v742_v61 = vadd.f32 1.0, %v1015_v56 }
 0x13f   :  { %v713_v62 = vmul.f32 0.70710677, %v681_v57  ;;  %v682_v63 = vadd.f32 %v1254_v10, %v659_v58  ;;  %v697_v11 = vmul.f32 0.5, %v681_v57 }
 0x140   :  { %773 = vst [vmem:[%s1340_s4 + $0x50] sm:$0xff] %v757_v59  ;;  %v758_v0 = vmul.f32 %v742_v61, %v694_v60 }
 0x141   :  { %1020 = verf.f32 %v713_v62  ;;  %v714_v1 = vmul.f32 0.70710677, %v682_v63  ;;  %v698_v15 = vmul.f32 0.5, %v682_v63 }
 0x142   :  { %774 = vst [vmem:[%s1340_s4 + $0x58] sm:$0xff] %v758_v0 }
 0x143   :  { %v1017_v2 = vpop.eup %1016  ;;  %1022 = verf.f32 %v714_v1 }
 0x144   :  { %v743_v3 = vadd.f32 1.0, %v1017_v2 }
 0x145   :  { %v1019_v5 = vpop.eup %1018 }
 0x146   :  { %v759_v6 = vmul.f32 %v743_v3, %v695_v4  ;;  %v744_v8 = vadd.f32 1.0, %v1019_v5 }
 0x148   :  { %775 = vst [vmem:[%s1340_s4 + $0x60] sm:$0xff] %v759_v6  ;;  %v760_v10 = vmul.f32 %v744_v8, %v696_v7 }
 0x14a   :  { %776 = vst [vmem:[%s1340_s4 + $0x68] sm:$0xff] %v760_v10 }
 0x14b   :  { %v1021_v9 = vpop.eup %1020 }
 0x14c   :  { %v745_v12 = vadd.f32 1.0, %v1021_v9 }
 0x14d   :  { %v1023_v13 = vpop.eup %1022 }
 0x14e   :  { %v761_v14 = vmul.f32 %v745_v12, %v697_v11  ;;  %v746_v16 = vadd.f32 1.0, %v1023_v13 }
 0x150   :  { %777 = vst [vmem:[%s1340_s4 + $0x70] sm:$0xff] %v761_v14  ;;  %v762_v17 = vmul.f32 %v746_v16, %v698_v15 }
 0x152   :  { %778 = vst [vmem:[%s1340_s4 + $0x78] sm:$0xff] %v762_v17 }

// kernel: hybrid_transformer_forward.9
= control target key start
LH: loop header
LB: loop body
LE: loop exit
PB: predicated region body
PF: predicated region fallthrough
CT: control target
= control target key end

     0   :  { %vm536_vm0 = vcmask 785408   ;;  %s1298_s1 = inlined_call_operand.vmem [shape: bf16[864,128], index: 1, kind: input, shape index: {}]   ;;  %s1299_s0 = inlined_call_operand.vmem [shape: bf16[32,864], index: 0, kind: input, shape index: {}]   ;;  %s1300_s2 = inlined_call_operand.vmem [shape: f32[1,128], index: 2, kind: input, shape index: {}]   ;;  %s1301_s3 = inlined_call_operand.vmem [shape: f32[1,128], index: 3, kind: input, shape index: {}]   ;;  %s1302_s4 = inlined_call_operand.vmem [shape: f32[32,128], index: 4, kind: output, shape index: {}]  }
   0x1   :  { %v969_v0 = vld [vmem:[%s1298_s1 + $0x40] sm:$0xff]   ;;  %v973_v4 = vld [vmem:[%s1298_s1 + $0x48] sm:$0xff]   ;;  %v977_v8 = vld [vmem:[%s1298_s1 + $0x50] sm:$0xff]  }
   0x2   :  { %v970_v1 = vld [vmem:[%s1298_s1 + $0xc0] sm:$0xff]   ;;  %861 = vmatprep.subr.bf16.mxu0 %v969_v0  ;;  %v974_v5 = vld [vmem:[%s1298_s1 + $0xc8] sm:$0xff]   ;;  %v978_v9 = vld [vmem:[%s1298_s1 + $0xd0] sm:$0xff]  }
   0x3   :  { %v971_v2 = vld [vmem:[%s1298_s1] sm:$0xff]   ;;  %889 = vmatprep.subr.bf16.mxu1 %v970_v1  ;;  %v975_v6 = vld [vmem:[%s1298_s1 + $0x8] sm:$0xff]   ;;  %v979_v10 = vld [vmem:[%s1298_s1 + $0x10] sm:$0xff]  }
   0x4   :  { %v972_v3 = vld [vmem:[%s1298_s1 + $0x80] sm:$0xff]   ;;  %862 = vmatpush3.bf16.msra.mxu0 %v971_v2  ;;  %v976_v7 = vld [vmem:[%s1298_s1 + $0x88] sm:$0xff]   ;;  %v980_v11 = vld [vmem:[%s1298_s1 + $0x90] sm:$0xff]  }
   0x5   :  { %890 = vmatpush3.bf16.msra.mxu1 %v972_v3  ;;  %863 = vmatprep.subr.bf16.mxu0 %v973_v4  ;;  %v981_v12 = vld [vmem:[%s1298_s1 + $0x58] sm:$0xff]   ;;  %v985_v16 = vld [vmem:[%s1298_s1 + $0x60] sm:$0xff]   ;;  %v989_v20 = vld [vmem:[%s1298_s1 + $0x68] sm:$0xff]  }
   0x6   :  { %891 = vmatprep.subr.bf16.mxu1 %v974_v5  ;;  %v982_v13 = vld [vmem:[%s1298_s1 + $0xd8] sm:$0xff]   ;;  %v986_v17 = vld [vmem:[%s1298_s1 + $0xe0] sm:$0xff]   ;;  %v990_v21 = vld [vmem:[%s1298_s1 + $0xe8] sm:$0xff]  }
   0x7   :  { %v983_v14 = vld [vmem:[%s1298_s1 + $0x18] sm:$0xff]   ;;  %v987_v18 = vld [vmem:[%s1298_s1 + $0x20] sm:$0xff]   ;;  %v991_v22 = vld [vmem:[%s1298_s1 + $0x28] sm:$0xff]  }
   0x8   :  { %864 = vmatpush3.bf16.msra.mxu0 %v975_v6  ;;  %v984_v15 = vld [vmem:[%s1298_s1 + $0x98] sm:$0xff]   ;;  %v988_v19 = vld [vmem:[%s1298_s1 + $0xa0] sm:$0xff]   ;;  %v992_v23 = vld [vmem:[%s1298_s1 + $0xa8] sm:$0xff]  }
   0x9   :  { %892 = vmatpush3.bf16.msra.mxu1 %v976_v7  ;;  %865 = vmatprep.subr.bf16.mxu0 %v977_v8  ;;  %v993_v24 = vld [vmem:[%s1298_s1 + $0x70] sm:$0xff]   ;;  %v997_v28 = vld [vmem:[%s1298_s1 + $0x78] sm:$0xff]   ;;  %v1003_v33 = vld [vmem:[%s1299_s0 + $0x4] ss:$28 sps:$4 sm:$0xff]  }
   0xa   :  { %893 = vmatprep.subr.bf16.mxu1 %v978_v9  ;;  %v994_v25 = vld [vmem:[%s1298_s1 + $0xf0] sm:$0xff]   ;;  %v998_v29 = vld [vmem:[%s1298_s1 + $0xf8] sm:$0xff]   ;;  %v1004_v34 = vld [vmem:[%s1299_s0 + $0x8] ss:$28 sps:$4 sm:$0xff]   ;;  %575 = vmatprep.mubr.bf16.mxu0 %v1003_v33 }
   0xb   :  { %v995_v26 = vld [vmem:[%s1298_s1 + $0x30] sm:$0xff]   ;;  %v999_v30 = vld [vmem:[%s1298_s1 + $0x38] sm:$0xff]   ;;  %v1006_v35 = vld [vmem:[%s1299_s0 + $0xc] ss:$28 sps:$4 sm:$0xff]  }
   0xc   :  { %866 = vmatpush3.bf16.msra.mxu0 %v979_v10  ;;  %v996_v27 = vld [vmem:[%s1298_s1 + $0xb0] sm:$0xff]   ;;  %v1000_v31 = vld [vmem:[%s1298_s1 + $0xb8] sm:$0xff]   ;;  %v1007_v36 = vld [vmem:[%s1298_s1 + $0x140] sm:$0xff]   ;;  %624 = vmatprep.mubr.bf16.mxu1 %v1006_v35 }
   0xd   :  { %894 = vmatpush3.bf16.msra.mxu1 %v980_v11  ;;  %867 = vmatprep.subr.bf16.mxu0 %v981_v12  ;;  %v1001_v32 = vld [vmem:[%s1299_s0] ss:$28 sps:$4 sm:$0xff]   ;;  %v1009_v38 = vld [vmem:[%s1298_s1 + $0x148] sm:$0xff]   ;;  %v1011_v40 = vld [vmem:[%s1298_s1 + $0x150] sm:$0xff]  }
   0xe   :  { %895 = vmatprep.subr.bf16.mxu1 %v982_v13  ;;  %v1008_v37 = vld [vmem:[%s1298_s1 + $0x100] sm:$0xff]   ;;  %v1010_v39 = vld [vmem:[%s1298_s1 + $0x108] sm:$0xff]   ;;  %v1012_v41 = vld [vmem:[%s1298_s1 + $0x110] sm:$0xff]  }
   0xf   :  { %v1014_v42 = vld [vmem:[%s1298_s1 + $0x180] sm:$0xff]   ;;  %v1013_v43 = vld [vmem:[%s1298_s1 + $0x158] sm:$0xff]   ;;  %v1017_v45 = vld [vmem:[%s1298_s1 + $0x188] sm:$0xff]  }
  0x10   :  { %868 = vmatpush3.bf16.msra.mxu0 %v983_v14  ;;  %v1015_v44 = vld [vmem:[%s1298_s1 + $0x118] sm:$0xff]   ;;  %v1016_v46 = vld [vmem:[%s1298_s1 + $0x160] sm:$0xff]   ;;  %v1023_v50 = vld [vmem:[%s1298_s1 + $0x168] sm:$0xff]  }
  0x11   :  { %896 = vmatpush3.bf16.msra.mxu1 %v984_v15  ;;  %869 = vmatprep.subr.bf16.mxu0 %v985_v16  ;;  %v1019_v47 = vld [vmem:[%s1299_s0 + $0x3c] ss:$28 sps:$4 sm:$0xff]   ;;  %v1018_v48 = vld [vmem:[%s1298_s1 + $0x120] sm:$0xff]   ;;  %v1024_v51 = vld [vmem:[%s1298_s1 + $0x190] sm:$0xff]  }
  0x12   :  { %897 = vmatprep.subr.bf16.mxu1 %v986_v17  ;;  %v1021_v49 = vld [vmem:[%s1299_s0 + $0x44] ss:$28 sps:$4 sm:$0xff]   ;;  %v1025_v52 = vld [vmem:[%s1299_s0 + $0x38] ss:$28 sps:$4 sm:$0xff]   ;;  %v1027_v54 = vld [vmem:[%s1298_s1 + $0x128] sm:$0xff]  }
  0x13   :  { %v1026_v53 = vld [vmem:[%s1299_s0 + $0x40] ss:$28 sps:$4 sm:$0xff]   ;;  %v1028_v56 = vld [vmem:[%s1298_s1 + $0x170] sm:$0xff]   ;;  %v1037_v61 = vld [vmem:[%s1298_s1 + $0x1a8] sm:$0xff]  }
  0x14   :  { %870 = vmatpush3.bf16.msra.mxu0 %v987_v18  ;;  %v1029_v55 = vld [vmem:[%s1298_s1 + $0x198] sm:$0xff]   ;;  %v1032_v57 = vld [vmem:[%s1298_s1 + $0x1a0] sm:$0xff]   ;;  %v1030_v58 = vld [vmem:[%s1298_s1 + $0x130] sm:$0xff]  }
  0x15   :  { %898 = vmatpush3.bf16.msra.mxu1 %v988_v19  ;;  %871 = vmatprep.subr.bf16.mxu0 %v989_v20  ;;  %v1031_v59 = vld [vmem:[%s1298_s1 + $0x178] sm:$0xff]   ;;  %v1036_v60 = vld [vmem:[%s1299_s0 + $0x14] ss:$28 sps:$4 sm:$0xff]   ;;  %v1040_v2 = vld [vmem:[%s1299_s0 + $0x4c] ss:$28 sps:$4 sm:$0xff]  }
  0x16   :  { %899 = vmatprep.subr.bf16.mxu1 %v990_v21  ;;  %v1038_v62 = vld [vmem:[%s1299_s0 + $0x18] ss:$28 sps:$4 sm:$0xff]   ;;  %v1034_v0 = vld [vmem:[%s1299_s0 + $0x10] ss:$28 sps:$4 sm:$0xff]   ;;  %v1042_v3 = vld [vmem:[%s1299_s0 + $0x48] ss:$28 sps:$4 sm:$0xff]  }
  0x17   :  { %v1033_v63 = vld [vmem:[%s1298_s1 + $0x138] sm:$0xff]   ;;  %v1039_v1 = vld [vmem:[%s1299_s0 + $0x50] ss:$28 sps:$4 sm:$0xff]  }
  0x18   :  { %872 = vmatpush3.bf16.msra.mxu0 %v991_v22 }
  0x19   :  { %900 = vmatpush3.bf16.msra.mxu1 %v992_v23  ;;  %873 = vmatprep.subr.bf16.mxu0 %v993_v24 }
  0x1a   :  { %901 = vmatprep.subr.bf16.mxu1 %v994_v25 }
  0x1c   :  { %874 = vmatpush3.bf16.msra.mxu0 %v995_v26 }
  0x1d   :  { %902 = vmatpush3.bf16.msra.mxu1 %v996_v27  ;;  %875 = vmatprep.subr.bf16.mxu0 %v997_v28 }
  0x1e   :  { %903 = vmatprep.subr.bf16.mxu1 %v998_v29 }
  0x20   :  { %876 = vmatpush3.bf16.msra.mxu0 %v999_v30 }
  0x21   :  { %904 = vmatpush3.bf16.msra.mxu1 %v1000_v31  ;;  %917 = vmatprep.subr.bf16.mxu0 %v1007_v36 }
  0x22   :  { %953 = vmatprep.subr.bf16.mxu1 %v1014_v42 }
  0x23   :  { %576 = vmatmul.mubr.bf16.vlgmr.msra.gmra.mrb[0].mxu0 %v1001_v32 }
  0x24   :  { %625 = vmatmul.mubr.bf16.vlgmr.msra.gmra.mrb[0].mxu1 %v1004_v34  ;;  %918 = vmatpush3.bf16.msra.mxu0 %v1008_v37 }
  0x25   :  { %919 = vmatprep.subr.bf16.mxu0 %v1009_v38  ;;  %954 = vmatpush3.bf16.msra.mxu1 %v1014_v42 }
  0x26   :  { %955 = vmatprep.subr.bf16.mxu1 %v1017_v45  ;;  %583 = vmatprep.mubr.bf16.mxu0 %v1019_v47 }
  0x27   :  { %632 = vmatprep.mubr.bf16.mxu1 %v1021_v49 }
  0x28   :  { %920 = vmatpush3.bf16.msra.mxu0 %v1010_v39 }
  0x29   :  { %921 = vmatprep.subr.bf16.mxu0 %v1011_v40  ;;  %956 = vmatpush3.bf16.msra.mxu1 %v1017_v45 }
  0x2a   :  { %957 = vmatprep.subr.bf16.mxu1 %v1024_v51 }
  0x2b   :  { %584 = vmatmul.mubr.bf16.gmra.mrb[4].mxu0 %v1025_v52 }
  0x2c   :  { %922 = vmatpush3.bf16.msra.mxu0 %v1012_v41  ;;  %633 = vmatmul.mubr.bf16.gmra.mrb[4].mxu1 %v1026_v53 }
  0x2d   :  { %923 = vmatprep.subr.bf16.mxu0 %v1013_v43  ;;  %958 = vmatpush3.bf16.msra.mxu1 %v1024_v51  ;;  %v859_v43 = vld [vmem:[%s1300_s2] ss:$0 sm:$0xff] }
  0x2e   :  { %959 = vmatprep.subr.bf16.mxu1 %v1029_v55  ;;  %673 = vmatprep.mubr.bf16.mxu0 %v1036_v60 }
  0x2f   :  { %965 = vmatprep.mubr.msk.bf16.mxu1 %vm536_vm0, %v1038_v62 }
  0x30   :  { %924 = vmatpush3.bf16.msra.mxu0 %v1015_v44 }
  0x31   :  { %925 = vmatprep.subr.bf16.mxu0 %v1016_v46  ;;  %960 = vmatpush3.bf16.msra.mxu1 %v1029_v55  ;;  %v860_v46 = vld [vmem:[%s1301_s3] ss:$0 sm:$0xff] }
  0x32   :  { %961 = vmatprep.subr.bf16.mxu1 %v1032_v57 }
  0x34   :  { %926 = vmatpush3.bf16.msra.mxu0 %v1018_v48 }
  0x35   :  { %927 = vmatprep.subr.bf16.mxu0 %v1023_v50  ;;  %962 = vmatpush3.bf16.msra.mxu1 %v1032_v57 }
  0x36   :  { %963 = vmatprep.subr.bf16.mxu1 %v1037_v61 }
  0x38   :  { %928 = vmatpush3.bf16.msra.mxu0 %v1027_v54 }
  0x39   :  { %929 = vmatprep.subr.bf16.mxu0 %v1028_v56  ;;  %964 = vmatpush3.bf16.msra.mxu1 %v1037_v61 }
  0x3c   :  { %930 = vmatpush3.bf16.msra.mxu0 %v1030_v58  ;;  %966 = vmatmul.mubr.msk.bf16.vlgmr.msra.gmra.mrb[8].mxu1 %vm536_vm0, %v1039_v1 }
  0x3d   :  { %931 = vmatprep.subr.bf16.mxu0 %v1031_v59 }
  0x40   :  { %932 = vmatpush3.bf16.msra.mxu0 %v1033_v63 }
  0x43   :  { %674 = vmatmul.mubr.bf16.vlgmr.msra.gmra.mrb[8].mxu0 %v1034_v0 }
  0x44   :  { %681 = vmatprep.mubr.bf16.mxu0 %v1040_v2 }
  0x4b   :  { %682 = vmatmul.mubr.bf16.gmra.mrb[12].mxu0 %v1042_v3 }
  0xf6   :  { %v877_v4 = vpop.f32.mrb[0].mxu0 }
  0xf7   :  { %v905_v5 = vpop.f32.mrb[0].mxu1  ;;  %v878_v6 = vpop.f32.mrb[1].mxu0 }
  0xf8   :  { %v879_v7 = vadd.f32 %v878_v6, %v877_v4  ;;  %v906_v8 = vpop.f32.mrb[1].mxu1  ;;  %v880_v9 = vpop.f32.mrb[2].mxu0 }
  0xf9   :  { %v907_v10 = vadd.f32 %v906_v8, %v905_v5  ;;  %v908_v11 = vpop.f32.mrb[2].mxu1  ;;  %v881_v12 = vpop.f32.mrb[3].mxu0 }
  0xfa   :  { %v882_v13 = vadd.f32 %v881_v12, %v880_v9  ;;  %v909_v14 = vpop.f32.mrb[3].mxu1 }
  0xfb   :  { %v627_v15 = vadd.f32 %v907_v10, %v879_v7  ;;  %v910_v16 = vadd.f32 %v909_v14, %v908_v11 }
  0xfd   :  { %v630_v17 = vadd.f32 %v910_v16, %v882_v13 }
  0xfe   :  { %v883_v18 = vpop.f32.mrb[4].mxu0 }
  0xff   :  { %v911_v19 = vpop.f32.mrb[4].mxu1  ;;  %v884_v20 = vpop.f32.mrb[5].mxu0 }
 0x100   :  { %v885_v21 = vadd.f32 %v884_v20, %v883_v18  ;;  %v912_v22 = vpop.f32.mrb[5].mxu1  ;;  %v886_v23 = vpop.f32.mrb[6].mxu0 }
 0x101   :  { %v913_v24 = vadd.f32 %v912_v22, %v911_v19  ;;  %v914_v25 = vpop.f32.mrb[6].mxu1  ;;  %v887_v26 = vpop.f32.mrb[7].mxu0 }
 0x102   :  { %v888_v27 = vadd.f32 %v887_v26, %v886_v23  ;;  %v915_v28 = vpop.f32.mrb[7].mxu1 }
 0x103   :  { %v635_v29 = vadd.f32 %v913_v24, %v885_v21  ;;  %v916_v30 = vadd.f32 %v915_v28, %v914_v25 }
 0x105   :  { %v638_v31 = vadd.f32 %v916_v30, %v888_v27 }
 0x10f   :  { %v967_v33 = vpop.f32.mrb[8].mxu1 }
 0x110   :  { %v724_v35 = vpop.f32.mrb[9].mxu1 }
 0x111   :  { %v968_v38 = vpop.f32.mrb[10].mxu1 }
 0x112   :  { %v727_v40 = vpop.f32.mrb[11].mxu1 }
 0x116   :  { %v933_v32 = vpop.f32.mrb[8].mxu0 }
 0x117   :  { %v934_v34 = vpop.f32.mrb[9].mxu0 }
 0x118   :  { %v935_v36 = vadd.f32 %v934_v34, %v933_v32  ;;  %v936_v37 = vpop.f32.mrb[10].mxu0 }
 0x119   :  { %v937_v39 = vpop.f32.mrb[11].mxu0 }
 0x11a   :  { %v938_v41 = vadd.f32 %v937_v39, %v936_v37  ;;  %v676_v42 = vadd.f32 %v935_v36, %v627_v15 }
 0x11c   :  { %v725_v44 = vadd.f32 %v724_v35, %v676_v42  ;;  %v679_v45 = vadd.f32 %v938_v41, %v630_v17 }
 0x11e   :  { %v746_v47 = vmul.f32 %v859_v43, %v725_v44  ;;  %v728_v48 = vadd.f32 %v727_v40, %v679_v45  ;;  %v939_v49 = vpop.f32.mrb[12].mxu0 }
 0x11f   :  { %v940_v50 = vpop.f32.mrb[13].mxu0 }
 0x120   :  { %v757_v51 = vadd.f32 %v860_v46, %v746_v47  ;;  %v747_v52 = vmul.f32 %v859_v43, %v728_v48  ;;  %v941_v53 = vadd.f32 %v940_v50, %v939_v49  ;;  %v942_v54 = vpop.f32.mrb[14].mxu0 }
 0x121   :  { %v943_v55 = vpop.f32.mrb[15].mxu0 }
 0x122   :  { %v765_v56 = vmul.f32 0.70710677, %v757_v51  ;;  %v758_v57 = vadd.f32 %v860_v46, %v747_v52  ;;  %v684_v58 = vadd.f32 %v941_v53, %v635_v29  ;;  %v944_v59 = vadd.f32 %v943_v55, %v942_v54 }
 0x123   :  { %v761_v7 = vmul.f32 0.5, %v757_v51 }
 0x124   :  { %1043 = verf.f32 %v765_v56  ;;  %v766_v60 = vmul.f32 0.70710677, %v758_v57  ;;  %v733_v61 = vadd.f32 %v967_v33, %v684_v58  ;;  %v687_v62 = vadd.f32 %v944_v59, %v638_v31 }
 0x125   :  { %v762_v11 = vmul.f32 0.5, %v758_v57 }
 0x126   :  { %1045 = verf.f32 %v766_v60  ;;  %v748_v63 = vmul.f32 %v859_v43, %v733_v61  ;;  %v736_v0 = vadd.f32 %v968_v38, %v687_v62 }
 0x128   :  { %v759_v1 = vadd.f32 %v860_v46, %v748_v63  ;;  %v749_v2 = vmul.f32 %v859_v43, %v736_v0 }
 0x12a   :  { %v767_v3 = vmul.f32 0.70710677, %v759_v1  ;;  %v760_v4 = vadd.f32 %v860_v46, %v749_v2  ;;  %v763_v15 = vmul.f32 0.5, %v759_v1 }
 0x12c   :  { %1047 = verf.f32 %v767_v3  ;;  %v768_v5 = vmul.f32 0.70710677, %v760_v4  ;;  %v764_v19 = vmul.f32 0.5, %v760_v4 }
 0x12e   :  { %v1044_v6 = vpop.eup %1043  ;;  %1049 = verf.f32 %v768_v5 }
 0x12f   :  { %v773_v8 = vadd.f32 1.0, %v1044_v6 }
 0x130   :  { %v1046_v9 = vpop.eup %1045 }
 0x131   :  { %v777_v10 = vmul.f32 %v773_v8, %v761_v7  ;;  %v774_v12 = vadd.f32 1.0, %v1046_v9 }
 0x133   :  { %781 = vst [vmem:[%s1302_s4] sm:$0xff] %v777_v10  ;;  %v778_v13 = vmul.f32 %v774_v12, %v762_v11 }
 0x135   :  { %782 = vst [vmem:[%s1302_s4 + $0x8] sm:$0xff] %v778_v13 }
 0x136   :  { %v1048_v14 = vpop.eup %1047 }
 0x137   :  { %v775_v16 = vadd.f32 1.0, %v1048_v14 }
 0x138   :  { %v1050_v17 = vpop.eup %1049 }
 0x139   :  { %v779_v18 = vmul.f32 %v775_v16, %v763_v15  ;;  %v776_v20 = vadd.f32 1.0, %v1050_v17 }
 0x13b   :  { %783 = vst [vmem:[%s1302_s4 + $0x10] sm:$0xff] %v779_v18  ;;  %v780_v21 = vmul.f32 %v776_v20, %v764_v19 }
 0x13d   :  { %784 = vst [vmem:[%s1302_s4 + $0x18] sm:$0xff] %v780_v21 }

// kernel: hybrid_transformer_forward.8
= control target key start
LH: loop header
LB: loop body
LE: loop exit
PB: predicated region body
PF: predicated region fallthrough
CT: control target
= control target key end

     0   :  { %s5040_s25 = smov 0   ;;  %s6019_s0 = inlined_call_operand.vmem [shape: f32[32,96], index: 0, kind: input, shape index: {}]   ;;  %s6020_s1 = inlined_call_operand.vmem [shape: f32[8,1,96], index: 1, kind: input, shape index: {}]   ;;  %s6021_s2 = inlined_call_operand.vmem [shape: f32[8,1,96], index: 2, kind: input, shape index: {}]   ;;  %s6022_s3 = inlined_call_operand.vmem [shape: bf16[8,96,288], index: 3, kind: input, shape index: {}]   ;;  %s6023_s4 = inlined_call_operand.vmem [shape: f32[8,1,288], index: 4, kind: input, shape index: {}]   ;;  %s6024_s5 = inlined_call_operand.vmem [shape: bf16[8,96,96], index: 5, kind: input, shape index: {}]   ;;  %s6025_s6 = inlined_call_operand.vmem [shape: f32[8,1,96], index: 6, kind: input, shape index: {}]   ;;  %s6026_s7 = inlined_call_operand.vmem [shape: f32[8,1,96], index: 7, kind: input, shape index: {}]   ;;  %s6027_s8 = inlined_call_operand.vmem [shape: f32[8,1,96], index: 8, kind: input, shape index: {}]   ;;  %s6028_s9 = inlined_call_operand.vmem [shape: bf16[8,96,384], index: 9, kind: input, shape index: {}]   ;;  %s6029_s10 = inlined_call_operand.vmem [shape: f32[8,1,384], index: 10, kind: input, shape index: {}]   ;;  %s6030_s11 = inlined_call_operand.vmem [shape: bf16[8,384,96], index: 11, kind: input, shape index: {}]   ;;  %s6031_s12 = inlined_call_operand.vmem [shape: f32[8,1,96], index: 12, kind: input, shape index: {}]   ;;  %s6032_s13 = inlined_call_operand.vmem [shape: f32[32,96], index: 13, kind: output, shape index: {}]  }
   0x1   :  { %6036 = sst [smem:[#allocation7_spill]] %s6020_s1 }
   0x2   :  { %6037 = sst [smem:[#allocation8_spill]] %s6022_s3 }
   0x3   :  { %6038 = sst [smem:[#allocation9_spill]] %s6023_s4 }
   0x4   :  { %6039 = sst [smem:[#allocation10_spill]] %s6026_s7 }
   0x5   :  { %6040 = sst [smem:[#allocation11_spill]] %s6032_s13 }
   0x6 LB: > { %6041 = sst [smem:[#allocation6_spill]] %s4935_s25  ;;  %s5046_s26 = sadd.s32 4294967295, %s4935_s25   ;;  %s4935_s25 = sphi %s5040_s25, %s23_s25  }
   0x7   : > { %p4129_p0 = scmp.ge.s32.totalorder %s4935_s25, 1  ;;  %p478_p1 = scmp.lt.s32.totalorder %s4935_s25, 9 }
   0x9   : > { %p479_p2 = pnand %p4129_p0, %p478_p1 }
   0xa   : > { %p558_p3 = scmp.lt.s32.totalorder (!%p479_p2), %s5046_s26, 7  ;;  %s6044_s3 = sld [smem:[#allocation8_spill]] (!%p479_p2) }
   0xb   : > { %482 = sbr.rel (%p479_p2) target bundleno = 2777 (0xad9), region = 72  ;;  %s6045_s4 = sld [smem:[#allocation9_spill]] (!%p479_p2) }
   0xc   : > { %p4134_p4 = scmp.ne.s32.totalorder (!%p479_p2), %s5046_s26, 0 }
  0x12   : > { %s5052_s27 = scalar_select %p558_p3, %s5046_s26, 7 }
  0x13   : > { %v609_v0 = vld [vmem:[%s6019_s0] sm:$0xff] (!%p4134_p4)  ;;  %vm613_vm0 = vcmask (!%p4134_p4), 785408   ;;  %v610_v1 = vld [vmem:[%s6019_s0 + $0x8] sm:$0xff] (!%p4134_p4)  ;;  %v611_v2 = vld [vmem:[%s6019_s0 + $0x10] sm:$0xff] (!%p4134_p4) }
  0x14   : > { %s4638_s17 = smul.u32 144, %s5052_s27  ;;  %s603_s16 = scalar_lea.vmem %s6031_s12, %s5052_s27  ;;  %614 = vst.msk [vmem:[#allocation2] sm:$0xff] (!%p4134_p4), %vm613_vm0, %v609_v0  ;;  %615 = vst.msk [vmem:[#allocation2 + $0x8] sm:$0xff] (!%p4134_p4), %vm613_vm0, %v610_v1  ;;  %v612_v3 = vld [vmem:[%s6019_s0 + $0x18] sm:$0xff] (!%p4134_p4) }
  0x15   : > { %s4639_s21 = smul.u32 3, %s5052_s27  ;;  %616 = vst.msk [vmem:[#allocation2 + $0x10] sm:$0xff] (!%p4134_p4), %vm613_vm0, %v611_v2  ;;  %617 = vst.msk [vmem:[#allocation2 + $0x18] sm:$0xff] (!%p4134_p4), %vm613_vm0, %v612_v3 }
  0x16   : > { %s5075_s25 = scalar_lea.vmem %s6044_s3, %s4638_s17  ;;  %s4640_s30 = smul.u32 48, %s5052_s27 }
  0x17   : > { %s5081_s14 = scalar_lea.vmem %s6045_s4, %s4639_s21  ;;  %s5095_s28 = scalar_lea.vmem %s6028_s9, %s4638_s17 }
  0x18   : > { %s5090_s22 = scalar_lea.vmem %s6024_s5, %s4640_s30  ;;  %s5100_s1 = scalar_lea.vmem %s6029_s10, %s4639_s21 }
  0x19   : > { %s4641_s13 = smul.u32 192, %s5052_s27 }
  0x1a   : > { %608 = sbr.rel (%p4134_p4) target bundleno = 33 (0x21), region = 76 }
  0x1b   : > { %s5110_s30 = scalar_lea.vmem %s6030_s11, %s4641_s13 }
  0x21 PF: > { %v618_v4 = vld [vmem:[#allocation2] sm:$0xff]  ;;  %vm622_vm1 = vcmask 785408   ;;  %v620_v5 = vld [vmem:[#allocation2 + $0x10] sm:$0xff]  ;;  %v619_v6 = vld [vmem:[#allocation2 + $0x8] sm:$0xff]  ;;  %v4937_v45 = vmov 0   ;;  %s6046_s23 = sld [smem:[#allocation7_spill]]  ;;  %s6048_s17 = scalar_lea.vmem %s6021_s2, %s5052_s27 }
  0x22   : > { %v623_v7 = vsel %vm622_vm1, %v618_v4, 0.0  ;;  %v629_v8 = vsel %vm622_vm1, %v620_v5, 0.0  ;;  %v621_v9 = vld [vmem:[#allocation2 + $0x18] sm:$0xff]  ;;  %v626_v10 = vsel %vm622_vm1, %v619_v6, 0.0  ;;  %v4683_v32 = vld [vmem:[%s5075_s25 + $0x4] ss:$12 sps:$4 sm:$0xff]   ;;  %875 = vmatprep.mubr.bf16.mxu0 %v4937_v45 }
  0x23   : > { %624 = vadd.xlane.f32.xlu0 %v623_v7  ;;  %630 = vadd.xlane.f32.xlu1 %v629_v8  ;;  %v632_v11 = vsel %vm622_vm1, %v621_v9, 0.0  ;;  %v4685_v33 = vld [vmem:[%s5075_s25] ss:$12 sps:$4 sm:$0xff]   ;;  %v4686_v34 = vld [vmem:[%s5075_s25 + $0x1c] ss:$12 sps:$4 sm:$0xff]   ;;  %vm4939_vm2 = vmmov 0  }
  0x24   : > { %843 = vmatprep.subr.bf16.mxu0 %v4683_v32  ;;  %v4688_v35 = vld [vmem:[%s5075_s25 + $0x8] ss:$12 sps:$4 sm:$0xff]   ;;  %v4689_v36 = vld [vmem:[%s5075_s25 + $0x18] ss:$12 sps:$4 sm:$0xff]   ;;  %v4692_v38 = vld [vmem:[%s5075_s25 + $0x20] ss:$12 sps:$4 sm:$0xff]  }
  0x25   : > { %844 = vmatpush1.bf16.msra.mxu0 %v4685_v33  ;;  %4378 = vmatprep.subr.bf16.mxu1 %v4688_v35  ;;  %v4690_v37 = vld [vmem:[%s5075_s25 + $0x34] ss:$12 sps:$4 sm:$0xff]   ;;  %v4693_v39 = vld [vmem:[%s5075_s25 + $0x30] ss:$12 sps:$4 sm:$0xff]   ;;  %v4694_v40 = vld [vmem:[%s5075_s25 + $0x4c] ss:$12 sps:$4 sm:$0xff]  }
  0x26   : > { %845 = vmatprep.subr.bf16.mxu0 %v4686_v34  ;;  %4379 = vmatpush3.bf16.msra.mxu1 %v4688_v35  ;;  %v4696_v41 = vld [vmem:[%s5075_s25 + $0x38] ss:$12 sps:$4 sm:$0xff]   ;;  %v4697_v42 = vld [vmem:[%s5075_s25 + $0x48] ss:$12 sps:$4 sm:$0xff]   ;;  %v4700_v44 = vld [vmem:[%s5075_s25 + $0x50] ss:$12 sps:$4 sm:$0xff]  }
  0x27   : > { %627 = vadd.xlane.f32.xlu0 %v626_v10  ;;  %633 = vadd.xlane.f32.xlu1 %v632_v11  ;;  %v4698_v43 = vld [vmem:[%s5075_s25 + $0x64] ss:$12 sps:$4 sm:$0xff]   ;;  %v4701_v46 = vld [vmem:[%s5075_s25 + $0x60] ss:$12 sps:$4 sm:$0xff]   ;;  %v4702_v47 = vld [vmem:[%s5075_s25 + $0x7c] ss:$12 sps:$4 sm:$0xff]   ;;  %s6047_s29 = scalar_lea.vmem %s6046_s23, %s5052_s27 }
  0x28   : > { %4380 = vmatprep.subr.bf16.mxu1 %v4692_v38  ;;  %v4704_v48 = vld [vmem:[%s5075_s25 + $0x68] ss:$12 sps:$4 sm:$0xff]   ;;  %v4705_v49 = vld [vmem:[%s5075_s25 + $0x78] ss:$12 sps:$4 sm:$0xff]   ;;  %v4706_v50 = vld [vmem:[%s5075_s25 + $0x80] ss:$12 sps:$4 sm:$0xff]  }
  0x29   : > { %846 = vmatpush1.bf16.msra.mxu0 %v4689_v36  ;;  %v4135_v1 = vld [vmem:[%s6047_s29] ss:$0 sm:$0xff]  ;;  %vm947_vm3 = vcmask 261120   ;;  %s4941_s20 = smov 32   ;;  %s4942_s3 = smov 8   ;;  %vm970_vm4 = vcmask 97280  }
  0x2a   : > { %847 = vmatprep.subr.bf16.mxu0 %v4690_v37  ;;  %4381 = vmatpush3.bf16.msra.mxu1 %v4692_v38  ;;  %s4943_s21 = smov 116   ;;  %s4944_s24 = smov 124   ;;  %vm1221_vm5 = vcmask 64512   ;;  %vm1020_vm6 = vcmask 130048   ;;  %vm1669_vm7 = vcmask 31744   ;;  %vm2020_vm8 = vcmask 195584  }
  0x2b   : > { %4382 = vmatprep.subr.bf16.mxu1 %v4696_v41  ;;  %s4945_s4 = smov 104   ;;  %s4946_s7 = smov 112   ;;  %vm2023_vm9 = vcmask 293888   ;;  %vm2026_vm10 = vcmask 392192   ;;  %vm2029_vm11 = vcmask 490496   ;;  %vm2032_vm12 = vcmask 588800  }
  0x2c   : > { %s4947_s18 = smov 92   ;;  %s4948_s25 = smov 100   ;;  %vm2035_vm13 = vcmask 687104  }
  0x2d   : > { %848 = vmatpush1.bf16.msra.mxu0 %v4693_v39  ;;  %s4949_s19 = smov 80   ;;  %s4950_s23 = smov 88  }
  0x2e   : > { %849 = vmatprep.subr.bf16.mxu0 %v4694_v40  ;;  %4383 = vmatpush3.bf16.msra.mxu1 %v4696_v41  ;;  %s4951_s29 = smov 68   ;;  %s4952_s13 = smov 76  }
  0x2f   : > { %4384 = vmatprep.subr.bf16.mxu1 %v4700_v44  ;;  %s4953_s15 = smov 56   ;;  %p4249_p5 = scmp.ne.s32.totalorder %s5046_s26, 7 }
  0x31   : > { %850 = vmatpush1.bf16.msra.mxu0 %v4697_v42 }
  0x32   : > { %851 = vmatprep.subr.bf16.mxu0 %v4698_v43  ;;  %4385 = vmatpush3.bf16.msra.mxu1 %v4700_v44 }
  0x33   : > { %4386 = vmatprep.subr.bf16.mxu1 %v4704_v48 }
  0x35   : > { %852 = vmatpush1.bf16.msra.mxu0 %v4701_v46 }
  0x36   : > { %853 = vmatprep.subr.bf16.mxu0 %v4702_v47  ;;  %4387 = vmatpush3.bf16.msra.mxu1 %v4704_v48 }
  0x37   : > { %4388 = vmatprep.subr.bf16.mxu1 %v4706_v50 }
  0x39   : > { %854 = vmatpush1.bf16.msra.mxu0 %v4705_v49 }
  0x3a   : > { %4389 = vmatpush3.bf16.msra.mxu1 %v4706_v50 }
  0xb0   : > { %v625_v12 = vpop.xlane.xlu0 %624  ;;  %v631_v13 = vpop.xlane.xlu1 %630 }
  0xb1   : > { %v636_v14 = vmul.f32 0.010416667, %v625_v12  ;;  %v638_v15 = vmul.f32 0.010416667, %v631_v13 }
  0xb3   : > { %v5129_v16 = vsub.f32 %v618_v4, %v636_v14  ;;  %v5131_v17 = vsub.f32 %v620_v5, %v638_v15 }
  0xb4   : > { %v628_v18 = vpop.xlane.xlu0 %627  ;;  %v634_v19 = vpop.xlane.xlu1 %633 }
  0xb5   : > { %v637_v20 = vmul.f32 0.010416667, %v628_v18  ;;  %v639_v21 = vmul.f32 0.010416667, %v634_v19  ;;  %v644_v22 = vmul.f32 %v5129_v16, %v5129_v16  ;;  %v646_v23 = vmul.f32 %v5131_v17, %v5131_v17 }
  0xb7   : > { %v5137_v24 = vsub.f32 %v619_v6, %v637_v20  ;;  %v5139_v25 = vsub.f32 %v621_v9, %v639_v21  ;;  %v648_v26 = vsel %vm622_vm1, %v644_v22, 0.0  ;;  %v654_v27 = vsel %vm622_vm1, %v646_v23, 0.0  ;;  %v4136_v6 = vld [vmem:[%s6048_s17] ss:$0 sm:$0xff]  ;;  %s4954_s17 = smov 44  }
  0xb8   : > { %649 = vadd.xlane.f32.xlu0 %v648_v26  ;;  %v724_v22 = vld [vmem:[%s5081_s14] sm:$0x7]  ;;  %s4940_s14 = smov 20  }
  0xb9   : > { %v645_v28 = vmul.f32 %v5137_v24, %v5137_v24  ;;  %v647_v29 = vmul.f32 %v5139_v25, %v5139_v25 }
  0xbb   : > { %v651_v30 = vsel %vm622_vm1, %v645_v28, 0.0  ;;  %v657_v31 = vsel %vm622_vm1, %v647_v29, 0.0 }
  0xbc   : > { %655 = vadd.xlane.f32.xlu0 %v654_v27  ;;  %652 = vadd.xlane.f32.xlu1 %v651_v30 }
  0xc0   : > { %658 = vadd.xlane.f32.xlu1 %v657_v31 }
 0x145   : > { %v650_v51 = vpop.xlane.xlu0 %649 }
 0x146   : > { %v660_v52 = vmul.f32 0.010416667, %v650_v51 }
 0x148   : > { %v664_v53 = vadd.f32 1e-05, %v660_v52 }
 0x149   : > { %v653_v54 = vpop.xlane.xlu1 %652  ;;  %v656_v55 = vpop.xlane.xlu0 %655 }
 0x14a   : > { %4761 = vrsqrt.f32 %v664_v53  ;;  %v661_v56 = vmul.f32 0.010416667, %v653_v54  ;;  %v662_v57 = vmul.f32 0.010416667, %v656_v55 }
 0x14c   : > { %v665_v58 = vadd.f32 1e-05, %v661_v56  ;;  %v666_v59 = vadd.f32 1e-05, %v662_v57 }
 0x14d   : > { %v659_v60 = vpop.xlane.xlu1 %658 }
 0x14e   : > { %4763 = vrsqrt.f32 %v665_v58  ;;  %v663_v61 = vmul.f32 0.010416667, %v659_v60 }
 0x14f   : > { %4765 = vrsqrt.f32 %v666_v59 }
 0x150   : > { %v667_v62 = vadd.f32 1e-05, %v663_v61 }
 0x152   : > { %4767 = vrsqrt.f32 %v667_v62 }
 0x154   : > { %v4762_v63 = vpop.eup %4761 }
 0x155   : > { %v672_v0 = vmul.f32 %v4762_v63, %v5129_v16 }
 0x157   : > { %v683_v5 = vmul.f32 %v4135_v1, %v672_v0 }
 0x158   : > { %v4764_v2 = vpop.eup %4763 }
 0x159   : > { %v4766_v3 = vpop.eup %4765  ;;  %v673_v4 = vmul.f32 %v4764_v2, %v5137_v24  ;;  %v694_v10 = vadd.f32 %v4136_v6, %v683_v5  ;;  %v4938_v24 = vmov 0.0  }
 0x15a   : > { %v674_v7 = vmul.f32 %v4766_v3, %v5131_v17  ;;  %v726_v17 = vlaneseq  ;;  %4394 = vmatprep.subr.bf16.mxu1 %v4938_v24  ;;  %4400 = vmatprep.subr.bf16.mxu0 %v4938_v24 }
 0x15b   : > { %v684_v8 = vmul.f32 %v4135_v1, %v673_v4 }
 0x15c   : > { %v4768_v9 = vpop.eup %4767  ;;  %v685_v13 = vmul.f32 %v4135_v1, %v674_v7  ;;  %v5187_v20 = vshrl.u32 %v726_v17, 7 }
 0x15d   : > { %v695_v11 = vadd.f32 %v4136_v6, %v684_v8  ;;  %v675_v12 = vmul.f32 %v4768_v9, %v5139_v25 }
 0x15e   : > { %v696_v16 = vadd.f32 %v4136_v6, %v685_v13  ;;  %v728_v21 = vsub.s32 0, %v5187_v20  ;;  %v732_v23 = vsub.s32 1, %v5187_v20  ;;  %v6035_v26 = vsub.s32 2, %v5187_v20 }
 0x15f   : > { %v698_v14 = vpack.c.bf16 %v695_v11, %v694_v10  ;;  %v686_v15 = vmul.f32 %v4135_v1, %v675_v12 }
 0x160   : > { %v729_v25 = vrot.slane %v724_v22, %v728_v21  ;;  %v733_v27 = vrot.slane %v724_v22, %v732_v23  ;;  %v737_v31 = vrot.slane %v724_v22, %v6035_v26 }
 0x161   : > { %4155 = vmatmul.mubr.msk.bf16.vlgmr.msra.gmra.mrb[0].mxu0 %vm622_vm1, %v698_v14  ;;  %4390 = vmatprep.mubr.msk.bf16.mxu1 %vm622_vm1, %v698_v14  ;;  %v697_v18 = vadd.f32 %v4136_v6, %v686_v15 }
 0x162   : > { %885 = vmatprep.mubr.bf16.mxu0 %v4937_v45 }
 0x163   : > { %v699_v19 = vpack.c.bf16 %v697_v18, %v696_v16 }
 0x165   : > { %4391 = vmatmul.mubr.msk.bf16.vlgmr.msra.gmra.mrb[0].mxu1 %vm622_vm1, %v699_v19 }
 0x166   : > { %4396 = vmatprep.mubr.msk.bf16.mxu1 %vm4939_vm2, %v4938_v24 }
 0x169   : > { %4156 = vmatmul.mubr.msk.bf16.gmra.mrb[4].mxu0 %vm622_vm1, %v699_v19 }
 0x16a   : > { %4402 = vmatprep.mubr.msk.bf16.mxu0 %vm4939_vm2, %v4938_v24 }
 0x234   : > { %v877_v28 = vpop.f32.mrb[0].mxu0 }
 0x235   : > { %v878_v29 = vadd.f32 %v877_v28, %v729_v25  ;;  %v879_v30 = vpop.f32.mrb[1].mxu0 }
 0x236   : > { %v880_v32 = vadd.f32 %v879_v30, %v733_v27  ;;  %v881_v33 = vpop.f32.mrb[2].mxu0 }
 0x237   : > { %v882_v34 = vadd.f32 %v881_v33, %v729_v25  ;;  %v883_v35 = vpop.f32.mrb[3].mxu0 }
 0x238   : > { %v884_v36 = vadd.f32 %v883_v35, %v733_v27  ;;  %v4392_v37 = vpop.f32.mrb[0].mxu1 }
 0x239   : > { %v5205_v38 = vpack.c.bf16 %v882_v34, %v878_v29  ;;  %v939_v39 = vadd.f32 %v4392_v37, %v737_v31  ;;  %v930_v40 = vpop.f32.mrb[1].mxu1 }
 0x23a   : > { %v5207_v41 = vpack.c.bf16 %v884_v36, %v880_v32  ;;  %v931_v42 = vadd.f32 %v930_v40, %v737_v31  ;;  %v4393_v43 = vpop.f32.mrb[2].mxu1 }
 0x23b   : > { %954 = vst.msk [vmem:[#allocation3 + $0x40] sm:$0xff] %vm947_vm3, %v939_v39  ;;  %v942_v44 = vadd.f32 %v4393_v43, %v737_v31  ;;  %v933_v46 = vpop.f32.mrb[3].mxu1  ;;  %1094 = vrot.lane.b32.xlu1 %v5205_v38, %s4940_s14  ;;  %968 = vrot.lane.b32.xlu0 %v5205_v38, %s4941_s20 }
 0x23c   : > { %948 = vst.msk [vmem:[#allocation3 + $0x10] sm:$0xff] %vm947_vm3, %v931_v42  ;;  %v934_v47 = vadd.f32 %v933_v46, %v737_v31  ;;  %v887_v48 = vpop.f32.mrb[4].mxu0 }
 0x23d   : > { %957 = vst.msk [vmem:[#allocation3 + $0x58] sm:$0xff] %vm947_vm3, %v942_v44  ;;  %v888_v49 = vadd.f32 %v887_v48, %v729_v25  ;;  %v889_v50 = vpop.f32.mrb[5].mxu0 }
 0x23e   : > { %951 = vst.msk [vmem:[#allocation3 + $0x28] sm:$0xff] %vm947_vm3, %v934_v47  ;;  %v890_v51 = vadd.f32 %v889_v50, %v733_v27  ;;  %v891_v52 = vpop.f32.mrb[6].mxu0 }
 0x23f   : > { %v892_v53 = vadd.f32 %v891_v52, %v729_v25  ;;  %v893_v54 = vpop.f32.mrb[7].mxu0  ;;  %1217 = vrot.lane.b32.xlu1 %v5205_v38, %s4942_s3  ;;  %1092 = vrot.lane.b32.xlu0 %v5205_v38, %s4943_s21 }
 0x240   : > { %v894_v55 = vadd.f32 %v893_v54, %v733_v27 }
 0x241   : > { %v5221_v56 = vpack.c.bf16 %v892_v53, %v888_v49 }
 0x242   : > { %v5223_v57 = vpack.c.bf16 %v894_v55, %v890_v51 }
 0x243   : > { %1219 = vrot.lane.b32.xlu1 %v5207_v41, %s4942_s3  ;;  %1344 = vrot.lane.b32.xlu0 %v5207_v41, %s4944_s24  ;;  %v960_v59 = vld [vmem:[#allocation3 + $0x10] sm:$0xff] }
 0x245   : > { %v963_v58 = vld [vmem:[#allocation3 + $0x28] sm:$0xff] }
 0x246   : > { %v966_v60 = vpack.c.bf16 %v963_v58, %v960_v59 }
 0x247   : > { %1215 = vrot.lane.b32.xlu1 %v5205_v38, %s4945_s4  ;;  %1467 = vrot.lane.b32.xlu0 %v5207_v41, %s4946_s7 }
 0x24b   : > { %1342 = vrot.lane.b32.xlu1 %v5205_v38, %s4947_s18  ;;  %1590 = vrot.lane.b32.xlu0 %v5207_v41, %s4948_s25 }
 0x24f   : > { %1465 = vrot.lane.b32.xlu1 %v5205_v38, %s4949_s19  ;;  %1718 = vrot.lane.b32.xlu0 %v5207_v41, %s4950_s23 }
 0x253   : > { %1588 = vrot.lane.b32.xlu1 %v5205_v38, %s4951_s29  ;;  %1841 = vrot.lane.b32.xlu0 %v5207_v41, %s4952_s13 }
 0x257   : > { %1716 = vrot.lane.b32.xlu1 %v5205_v38, %s4953_s15  ;;  %2050 = vrot.lane.b32.xlu0 %v5221_v56, %s4941_s20  ;;  %s4956_s20 = smov 40  }
 0x25b   : > { %1839 = vrot.lane.b32.xlu1 %v5205_v38, %s4954_s17  ;;  %2297 = vrot.lane.b32.xlu0 %v5221_v56, %s4942_s3 }
 0x25f   : > { %2174 = vrot.lane.b32.xlu1 %v5221_v56, %s4940_s14  ;;  %2172 = vrot.lane.b32.xlu0 %v5221_v56, %s4943_s21  ;;  %s4955_s14 = smov 64   ;;  %s4958_s21 = smov 28  }
 0x263   : > { %2299 = vrot.lane.b32.xlu1 %v5223_v57, %s4942_s3  ;;  %2423 = vrot.lane.b32.xlu0 %v5223_v57, %s4944_s24  ;;  %s4957_s3 = smov 52   ;;  %s4959_s24 = smov 16  }
 0x267   : > { %2295 = vrot.lane.b32.xlu1 %v5221_v56, %s4945_s4  ;;  %2546 = vrot.lane.b32.xlu0 %v5223_v57, %s4946_s7  ;;  %s4960_s4 = smov 4   ;;  %s4961_s7 = smov 120  }
 0x26b   : > { %2421 = vrot.lane.b32.xlu1 %v5221_v56, %s4947_s18  ;;  %2669 = vrot.lane.b32.xlu0 %v5223_v57, %s4948_s25  ;;  %s4962_s18 = smov 108   ;;  %s4963_s25 = smov 12  }
 0x26f   : > { %2544 = vrot.lane.b32.xlu1 %v5221_v56, %s4949_s19  ;;  %2796 = vrot.lane.b32.xlu0 %v5223_v57, %s4950_s23  ;;  %s4964_s19 = smov 24   ;;  %s4965_s23 = smov 36  }
 0x273   : > { %2667 = vrot.lane.b32.xlu1 %v5221_v56, %s4951_s29  ;;  %2919 = vrot.lane.b32.xlu0 %v5223_v57, %s4952_s13  ;;  %s4966_s29 = smov 48   ;;  %s4967_s13 = smov 60  }
 0x277   : > { %2794 = vrot.lane.b32.xlu1 %v5221_v56, %s4953_s15  ;;  %1045 = vrot.lane.b32.xlu0 %v5207_v41, %s4955_s14  ;;  %s4968_s15 = smov 72  }
 0x27b   : > { %2917 = vrot.lane.b32.xlu1 %v5221_v56, %s4954_s17  ;;  %1295 = vrot.lane.b32.xlu0 %v5207_v41, %s4956_s20  ;;  %s4969_s17 = smov 84  }
 0x27f   : > { %1168 = vrot.lane.b32.xlu1 %v5207_v41, %s4957_s3  ;;  %1418 = vrot.lane.b32.xlu0 %v5207_v41, %s4958_s21 }
 0x283   : > { %1541 = vrot.lane.b32.xlu1 %v5207_v41, %s4959_s24  ;;  %1665 = vrot.lane.b32.xlu0 %v5207_v41, %s4960_s4 }
 0x287   : > { %1667 = vrot.lane.b32.xlu1 %v966_v60, %s4960_s4  ;;  %1792 = vrot.lane.b32.xlu0 %v966_v60, %s4961_s7 }
 0x28b   : > { %1915 = vrot.lane.b32.xlu1 %v966_v60, %s4962_s18  ;;  %2125 = vrot.lane.b32.xlu0 %v5223_v57, %s4955_s14 }
 0x28f   : > { %2248 = vrot.lane.b32.xlu1 %v5223_v57, %s4957_s3  ;;  %2374 = vrot.lane.b32.xlu0 %v5223_v57, %s4956_s20  ;;  %s6049_s20 = scalar_lea.vmem %s6025_s6, %s5052_s27 }
 0x2ad   : > { %v1095_v61 = vpop.permute.xlu1 %1094  ;;  %v969_v62 = vpop.permute.xlu0 %968 }
 0x2ae   : > { %v975_v63 = vsel %vm970_vm4, %v969_v62, 0  ;;  %v1100_v3 = vsel %vm970_vm4, %v1095_v61, 0 }
 0x2af   : > { %4395 = vmatpush3.bf16.xpose.msra.mxu1 %v975_v63 }
 0x2b0   : > { %4406 = vmatprep.subr.bf16.mxu1 %v4938_v24 }
 0x2b1   : > { %v1093_v0 = vpop.permute.xlu0 %1092  ;;  %v1218_v1 = vpop.permute.xlu1 %1217 }
 0x2b5   : > { %v1345_v2 = vpop.permute.xlu0 %1344  ;;  %v1220_v4 = vpop.permute.xlu1 %1219 }
 0x2b6   : > { %4397 = vmatmul.mubr.msk.bf16.vlgmr.msra.gmra.mrb[4].mxu1 %vm970_vm4, %v5205_v38  ;;  %v1222_v6 = vsel %vm1221_vm5, %v1218_v1, %v1220_v4  ;;  %v1350_v12 = vsel %vm970_vm4, %v1345_v2, 0 }
 0x2b7   : > { %4407 = vmatpush3.bf16.xpose.msra.mxu1 %v1100_v3  ;;  %4408 = vmatprep.mubr.msk.bf16.mxu1 %vm4939_vm2, %v4938_v24  ;;  %v1227_v8 = vsel %vm970_vm4, %v1222_v6, 0 }
 0x2b8   : > { %4418 = vmatprep.subr.bf16.mxu1 %v4938_v24 }
 0x2b9   : > { %v1468_v5 = vpop.permute.xlu0 %1467  ;;  %v1216_v10 = vpop.permute.xlu1 %1215 }
 0x2ba   : > { %v1473_v16 = vsel %vm970_vm4, %v1468_v5, 0 }
 0x2bd   : > { %v1591_v7 = vpop.permute.xlu0 %1590  ;;  %v1343_v14 = vpop.permute.xlu1 %1342 }
 0x2be   : > { %4409 = vmatmul.mubr.msk.bf16.vlgmr.msra.gmra.mrb[8].mxu1 %vm970_vm4, %v1093_v0  ;;  %v1596_v22 = vsel %vm970_vm4, %v1591_v7, 0 }
 0x2bf   : > { %4419 = vmatpush3.bf16.xpose.msra.mxu1 %v1227_v8  ;;  %4420 = vmatprep.mubr.msk.bf16.mxu1 %vm4939_vm2, %v4938_v24 }
 0x2c0   : > { %4430 = vmatprep.subr.bf16.mxu1 %v4938_v24 }
 0x2c1   : > { %v1719_v9 = vpop.permute.xlu0 %1718  ;;  %v1466_v19 = vpop.permute.xlu1 %1465 }
 0x2c2   : > { %v1724_v29 = vsel %vm970_vm4, %v1719_v9, 0 }
 0x2c5   : > { %v1842_v11 = vpop.permute.xlu0 %1841  ;;  %v1589_v27 = vpop.permute.xlu1 %1588 }
 0x2c6   : > { %4421 = vmatmul.mubr.msk.bf16.vlgmr.msra.gmra.mrb[12].mxu1 %vm970_vm4, %v1216_v10  ;;  %v1847_v33 = vsel %vm970_vm4, %v1842_v11, 0 }
 0x2c7   : > { %4431 = vmatpush3.bf16.xpose.msra.mxu1 %v1350_v12  ;;  %4432 = vmatprep.mubr.msk.bf16.mxu1 %vm4939_vm2, %v4938_v24 }
 0x2c8   : > { %4442 = vmatprep.subr.bf16.mxu1 %v4938_v24 }
 0x2c9   : > { %v2051_v13 = vpop.permute.xlu0 %2050  ;;  %v1717_v31 = vpop.permute.xlu1 %1716 }
 0x2ca   : > { %v2056_v36 = vsel %vm970_vm4, %v2051_v13, 0 }
 0x2cd   : > { %v2298_v15 = vpop.permute.xlu0 %2297  ;;  %v1840_v35 = vpop.permute.xlu1 %1839 }
 0x2ce   : > { %4433 = vmatmul.mubr.msk.bf16.vlgmr.msra.gmra.mrb[16].mxu1 %vm970_vm4, %v1343_v14 }
 0x2cf   : > { %4443 = vmatpush3.bf16.xpose.msra.mxu1 %v1473_v16  ;;  %4444 = vmatprep.mubr.msk.bf16.mxu1 %vm4939_vm2, %v4938_v24 }
 0x2d0   : > { %4454 = vmatprep.subr.bf16.mxu1 %v4938_v24 }
 0x2d1   : > { %v2173_v18 = vpop.permute.xlu0 %2172  ;;  %v2175_v37 = vpop.permute.xlu1 %2174 }
 0x2d2   : > { %v2180_v38 = vsel %vm970_vm4, %v2175_v37, 0 }
 0x2d5   : > { %v2424_v17 = vpop.permute.xlu0 %2423  ;;  %v2300_v39 = vpop.permute.xlu1 %2299 }
 0x2d6   : > { %4445 = vmatmul.mubr.msk.bf16.vlgmr.msra.gmra.mrb[20].mxu1 %vm970_vm4, %v1466_v19  ;;  %v2301_v40 = vsel %vm1221_vm5, %v2298_v15, %v2300_v39  ;;  %v2429_v43 = vsel %vm970_vm4, %v2424_v17, 0 }
 0x2d7   : > { %4455 = vmatpush3.bf16.xpose.msra.mxu1 %v1596_v22  ;;  %4456 = vmatprep.mubr.msk.bf16.mxu1 %vm4939_vm2, %v4938_v24  ;;  %v2306_v41 = vsel %vm970_vm4, %v2301_v40, 0 }
 0x2d8   : > { %4466 = vmatprep.subr.bf16.mxu1 %v4938_v24 }
 0x2d9   : > { %v2547_v25 = vpop.permute.xlu0 %2546  ;;  %v2296_v42 = vpop.permute.xlu1 %2295 }
 0x2da   : > { %v2552_v46 = vsel %vm970_vm4, %v2547_v25, 0 }
 0x2dd   : > { %v2670_v28 = vpop.permute.xlu0 %2669  ;;  %v2422_v44 = vpop.permute.xlu1 %2421 }
 0x2de   : > { %4457 = vmatmul.mubr.msk.bf16.vlgmr.msra.gmra.mrb[24].mxu1 %vm970_vm4, %v1589_v27  ;;  %v2675_v48 = vsel %vm970_vm4, %v2670_v28, 0 }
 0x2df   : > { %4467 = vmatpush3.bf16.xpose.msra.mxu1 %v1724_v29  ;;  %4468 = vmatprep.mubr.msk.bf16.mxu1 %vm4939_vm2, %v4938_v24 }
 0x2e0   : > { %4478 = vmatprep.subr.bf16.mxu1 %v4938_v24 }
 0x2e1   : > { %v2797_v30 = vpop.permute.xlu0 %2796  ;;  %v2545_v47 = vpop.permute.xlu1 %2544 }
 0x2e2   : > { %v2802_v50 = vsel %vm970_vm4, %v2797_v30, 0 }
 0x2e5   : > { %v2920_v32 = vpop.permute.xlu0 %2919  ;;  %v2668_v49 = vpop.permute.xlu1 %2667 }
 0x2e6   : > { %4469 = vmatmul.mubr.msk.bf16.vlgmr.msra.gmra.mrb[28].mxu1 %vm970_vm4, %v1717_v31  ;;  %v2925_v52 = vsel %vm970_vm4, %v2920_v32, 0 }
 0x2e7   : > { %4479 = vmatpush3.bf16.xpose.msra.mxu1 %v1847_v33  ;;  %4480 = vmatprep.mubr.msk.bf16.mxu1 %vm4939_vm2, %v4938_v24 }
 0x2e8   : > { %4490 = vmatprep.subr.bf16.mxu1 %v4938_v24 }
 0x2e9   : > { %v1046_v34 = vpop.permute.xlu0 %1045  ;;  %v2795_v51 = vpop.permute.xlu1 %2794 }
 0x2ea   : > { %4401 = vmatpush3.bf16.msra.mxu0 %v1046_v34 }
 0x2eb   : > { %4412 = vmatprep.subr.bf16.mxu0 %v4938_v24 }
 0x2ed   : > { %v2918_v53 = vpop.permute.xlu1 %2917 }
 0x2ee   : > { %4481 = vmatmul.mubr.msk.bf16.vlgmr.msra.gmra.mrb[32].mxu1 %vm970_vm4, %v1840_v35 }
 0x2ef   : > { %4491 = vmatpush3.bf16.xpose.msra.mxu1 %v2056_v36  ;;  %4492 = vmatprep.mubr.msk.bf16.mxu1 %vm4939_vm2, %v4938_v24 }
 0x2f0   : > { %4502 = vmatprep.subr.bf16.mxu1 %v4938_v24 }
 0x2f6   : > { %4493 = vmatmul.mubr.msk.bf16.vlgmr.msra.gmra.mrb[36].mxu1 %vm970_vm4, %v5221_v56 }
 0x2f7   : > { %4503 = vmatpush3.bf16.xpose.msra.mxu1 %v2180_v38  ;;  %4504 = vmatprep.mubr.msk.bf16.mxu1 %vm4939_vm2, %v4938_v24 }
 0x2f8   : > { %4514 = vmatprep.subr.bf16.mxu1 %v4938_v24 }
 0x2fe   : > { %4505 = vmatmul.mubr.msk.bf16.vlgmr.msra.gmra.mrb[40].mxu1 %vm970_vm4, %v2173_v18 }
 0x2ff   : > { %4515 = vmatpush3.bf16.xpose.msra.mxu1 %v2306_v41  ;;  %4516 = vmatprep.mubr.msk.bf16.mxu1 %vm4939_vm2, %v4938_v24 }
 0x300   : > { %4526 = vmatprep.subr.bf16.mxu1 %v4938_v24 }
 0x306   : > { %4517 = vmatmul.mubr.msk.bf16.vlgmr.msra.gmra.mrb[44].mxu1 %vm970_vm4, %v2296_v42 }
 0x307   : > { %4527 = vmatpush3.bf16.xpose.msra.mxu1 %v2429_v43  ;;  %4528 = vmatprep.mubr.msk.bf16.mxu1 %vm4939_vm2, %v4938_v24 }
 0x308   : > { %4538 = vmatprep.subr.bf16.mxu1 %v4938_v24 }
 0x30e   : > { %4529 = vmatmul.mubr.msk.bf16.vlgmr.msra.gmra.mrb[48].mxu1 %vm970_vm4, %v2422_v44 }
 0x30f   : > { %4539 = vmatpush3.bf16.xpose.msra.mxu1 %v2552_v46  ;;  %4540 = vmatprep.mubr.msk.bf16.mxu1 %vm4939_vm2, %v4938_v24 }
 0x310   : > { %4550 = vmatprep.subr.bf16.mxu1 %v4938_v24 }
 0x316   : > { %4541 = vmatmul.mubr.msk.bf16.vlgmr.msra.gmra.mrb[52].mxu1 %vm970_vm4, %v2545_v47 }
 0x317   : > { %4551 = vmatpush3.bf16.xpose.msra.mxu1 %v2675_v48  ;;  %4552 = vmatprep.mubr.msk.bf16.mxu1 %vm4939_vm2, %v4938_v24 }
 0x318   : > { %4562 = vmatprep.subr.bf16.mxu1 %v4938_v24 }
 0x31e   : > { %4553 = vmatmul.mubr.msk.bf16.vlgmr.msra.gmra.mrb[56].mxu1 %vm970_vm4, %v2668_v49 }
 0x31f   : > { %4563 = vmatpush3.bf16.xpose.msra.mxu1 %v2802_v50  ;;  %4564 = vmatprep.mubr.msk.bf16.mxu1 %vm4939_vm2, %v4938_v24 }
 0x320   : > { %4574 = vmatprep.subr.bf16.mxu1 %v4938_v24 }
 0x326   : > { %4565 = vmatmul.mubr.msk.bf16.vlgmr.msra.gmra.mrb[60].mxu1 %vm970_vm4, %v2795_v51 }
 0x327   : > { %4575 = vmatpush3.bf16.xpose.msra.mxu1 %v2925_v52  ;;  %4576 = vmatprep.mubr.msk.bf16.mxu1 %vm4939_vm2, %v4938_v24 }
 0x32e   : > { %4577 = vmatmul.mubr.msk.bf16.vlgmr.msra.gmra.mrb[64].mxu1 %vm970_vm4, %v2918_v53 }
 0x389   : > { %v1011_v54 = vpop.f32.mrb[4].mxu1 }
 0x38a   : > { %v5356_v55 = vmul.f32 0.28867513, %v1011_v54  ;;  %v4398_v56 = vpop.f32.mrb[5].mxu1 }
 0x38b   : > { %v1014_v58 = vpop.f32.mrb[6].mxu1 }
 0x38c   : > { %v5358_v59 = vmul.f32 0.28867513, %v1014_v58  ;;  %v4399_v60 = vpop.f32.mrb[7].mxu1  ;;  %v1021_v61 = vsel %vm1020_vm6, %v5356_v55, -inf }
 0x38d   : > { %1022 = vmax.xlane.f32.xlu0 %v1021_v61 }
 0x38e   : > { %v1024_v62 = vsel %vm1020_vm6, %v5358_v59, -inf }
 0x38f   : > { %1025 = vmax.xlane.f32.xlu1 %v1024_v62 }
 0x391   : > { %v1136_v63 = vpop.f32.mrb[8].mxu1 }
 0x392   : > { %v5364_v0 = vmul.f32 0.28867513, %v1136_v63  ;;  %v4410_v1 = vpop.f32.mrb[9].mxu1 }
 0x393   : > { %v1139_v2 = vpop.f32.mrb[10].mxu1 }
 0x394   : > { %v5366_v3 = vmul.f32 0.28867513, %v1139_v2  ;;  %v4411_v4 = vpop.f32.mrb[11].mxu1  ;;  %v1145_v5 = vsel %vm1020_vm6, %v5364_v0, -inf }
 0x395   : > { %1146 = vmax.xlane.f32.xlu0 %v1145_v5 }
 0x396   : > { %v1148_v6 = vsel %vm1020_vm6, %v5366_v3, -inf }
 0x399   : > { %1149 = vmax.xlane.f32.xlu0 %v1148_v6  ;;  %v1263_v7 = vpop.f32.mrb[12].mxu1 }
 0x39a   : > { %v5372_v8 = vmul.f32 0.28867513, %v1263_v7  ;;  %v4422_v9 = vpop.f32.mrb[13].mxu1 }
 0x39b   : > { %v1266_v10 = vpop.f32.mrb[14].mxu1 }
 0x39c   : > { %v5374_v11 = vmul.f32 0.28867513, %v1266_v10  ;;  %v4423_v12 = vpop.f32.mrb[15].mxu1  ;;  %v1272_v13 = vsel %vm1020_vm6, %v5372_v8, -inf }
 0x39d   : > { %1273 = vmax.xlane.f32.xlu0 %v1272_v13 }
 0x39e   : > { %v1275_v14 = vsel %vm1020_vm6, %v5374_v11, -inf }
 0x39f   : > { %1276 = vmax.xlane.f32.xlu1 %v1275_v14 }
 0x3a1   : > { %v1386_v15 = vpop.f32.mrb[16].mxu1 }
 0x3a2   : > { %v5380_v16 = vmul.f32 0.28867513, %v1386_v15  ;;  %v4434_v18 = vpop.f32.mrb[17].mxu1 }
 0x3a3   : > { %v1389_v19 = vpop.f32.mrb[18].mxu1 }
 0x3a4   : > { %v5382_v17 = vmul.f32 0.28867513, %v1389_v19  ;;  %v4435_v22 = vpop.f32.mrb[19].mxu1  ;;  %v1395_v25 = vsel %vm1020_vm6, %v5380_v16, -inf }
 0x3a5   : > { %1396 = vmax.xlane.f32.xlu0 %v1395_v25 }
 0x3a6   : > { %v1398_v27 = vsel %vm1020_vm6, %v5382_v17, -inf }
 0x3a7   : > { %1399 = vmax.xlane.f32.xlu1 %v1398_v27 }
 0x3a9   : > { %v1509_v28 = vpop.f32.mrb[20].mxu1 }
 0x3aa   : > { %v5388_v29 = vmul.f32 0.28867513, %v1509_v28  ;;  %v4446_v30 = vpop.f32.mrb[21].mxu1 }
 0x3ab   : > { %v1512_v31 = vpop.f32.mrb[22].mxu1 }
 0x3ac   : > { %v5390_v32 = vmul.f32 0.28867513, %v1512_v31  ;;  %v4447_v33 = vpop.f32.mrb[23].mxu1  ;;  %v1518_v34 = vsel %vm1020_vm6, %v5388_v29, -inf }
 0x3ad   : > { %1519 = vmax.xlane.f32.xlu0 %v1518_v34 }
 0x3ae   : > { %v1521_v35 = vsel %vm1020_vm6, %v5390_v32, -inf }
 0x3af   : > { %1522 = vmax.xlane.f32.xlu1 %v1521_v35 }
 0x3b1   : > { %v1632_v36 = vpop.f32.mrb[24].mxu1 }
 0x3b2   : > { %v5396_v37 = vmul.f32 0.28867513, %v1632_v36  ;;  %v4458_v38 = vpop.f32.mrb[25].mxu1 }
 0x3b3   : > { %v1635_v39 = vpop.f32.mrb[26].mxu1 }
 0x3b4   : > { %v5398_v40 = vmul.f32 0.28867513, %v1635_v39  ;;  %v4459_v41 = vpop.f32.mrb[27].mxu1  ;;  %v1641_v42 = vsel %vm1020_vm6, %v5396_v37, -inf }
 0x3b5   : > { %1642 = vmax.xlane.f32.xlu0 %v1641_v42 }
 0x3b6   : > { %v1644_v43 = vsel %vm1020_vm6, %v5398_v40, -inf }
 0x3b7   : > { %1645 = vmax.xlane.f32.xlu1 %v1644_v43 }
 0x3b9   : > { %v1760_v44 = vpop.f32.mrb[28].mxu1 }
 0x3ba   : > { %v5404_v46 = vmul.f32 0.28867513, %v1760_v44  ;;  %v4470_v47 = vpop.f32.mrb[29].mxu1 }
 0x3bb   : > { %v1763_v48 = vpop.f32.mrb[30].mxu1 }
 0x3bc   : > { %v5406_v49 = vmul.f32 0.28867513, %v1763_v48  ;;  %v4471_v50 = vpop.f32.mrb[31].mxu1  ;;  %v1769_v51 = vsel %vm1020_vm6, %v5404_v46, -inf }
 0x3bd   : > { %1770 = vmax.xlane.f32.xlu0 %v1769_v51 }
 0x3be   : > { %v1772_v52 = vsel %vm1020_vm6, %v5406_v49, -inf }
 0x3bf   : > { %1773 = vmax.xlane.f32.xlu1 %v1772_v52 }
 0x3c1   : > { %v1883_v53 = vpop.f32.mrb[32].mxu1 }
 0x3c2   : > { %v5412_v54 = vmul.f32 0.28867513, %v1883_v53  ;;  %v4482_v56 = vpop.f32.mrb[33].mxu1 }
 0x3c3   : > { %v1886_v58 = vpop.f32.mrb[34].mxu1 }
 0x3c4   : > { %v5414_v60 = vmul.f32 0.28867513, %v1886_v58  ;;  %v4483_v61 = vpop.f32.mrb[35].mxu1  ;;  %v1892_v62 = vsel %vm1020_vm6, %v5412_v54, -inf }
 0x3c5   : > { %1893 = vmax.xlane.f32.xlu0 %v1892_v62 }
 0x3c6   : > { %v1895_v63 = vsel %vm1020_vm6, %v5414_v60, -inf }
 0x3c7   : > { %1896 = vmax.xlane.f32.xlu1 %v1895_v63 }
 0x3c9   : > { %v2092_v1 = vpop.f32.mrb[36].mxu1 }
 0x3ca   : > { %v5420_v2 = vmul.f32 0.28867513, %v2092_v1  ;;  %v4494_v4 = vpop.f32.mrb[37].mxu1 }
 0x3cb   : > { %v2095_v5 = vpop.f32.mrb[38].mxu1 }
 0x3cc   : > { %v5422_v6 = vmul.f32 0.28867513, %v2095_v5  ;;  %v4495_v7 = vpop.f32.mrb[39].mxu1  ;;  %v2101_v9 = vsel %vm1020_vm6, %v5420_v2, -inf }
 0x3cd   : > { %2102 = vmax.xlane.f32.xlu0 %v2101_v9 }
 0x3ce   : > { %v2104_v10 = vsel %vm1020_vm6, %v5422_v6, -inf }
 0x3cf   : > { %2105 = vmax.xlane.f32.xlu1 %v2104_v10 }
 0x3d1   : > { %v2216_v12 = vpop.f32.mrb[40].mxu1 }
 0x3d2   : > { %v5428_v13 = vmul.f32 0.28867513, %v2216_v12  ;;  %v4506_v14 = vpop.f32.mrb[41].mxu1 }
 0x3d3   : > { %v2219_v15 = vpop.f32.mrb[42].mxu1  ;;  %v5468_v14 = vpop.permute.xlu0 %1295 }
 0x3d4   : > { %v5430_v18 = vmul.f32 0.28867513, %v2219_v15  ;;  %v4507_v19 = vpop.f32.mrb[43].mxu1  ;;  %v2225_v22 = vsel %vm1020_vm6, %v5428_v13, -inf }
 0x3d5   : > { %2226 = vmax.xlane.f32.xlu0 %v2225_v22 }
 0x3d6   : > { %v2228_v25 = vsel %vm1020_vm6, %v5430_v18, -inf }
 0x3d7   : > { %2229 = vmax.xlane.f32.xlu1 %v2228_v25 }
 0x3d9   : > { %v2342_v27 = vpop.f32.mrb[44].mxu1 }
 0x3da   : > { %v5436_v28 = vmul.f32 0.28867513, %v2342_v27  ;;  %v4518_v30 = vpop.f32.mrb[45].mxu1 }
 0x3db   : > { %v2345_v31 = vpop.f32.mrb[46].mxu1 }
 0x3dc   : > { %v5438_v33 = vmul.f32 0.28867513, %v2345_v31  ;;  %v4519_v34 = vpop.f32.mrb[47].mxu1  ;;  %v2351_v35 = vsel %vm1020_vm6, %v5436_v28, -inf }
 0x3dd   : > { %2352 = vmax.xlane.f32.xlu0 %v2351_v35  ;;  %v5476_v34 = vpop.permute.xlu0 %1418 }
 0x3de   : > { %v2354_v36 = vsel %vm1020_vm6, %v5438_v33, -inf }
 0x3df   : > { %2355 = vmax.xlane.f32.xlu1 %v2354_v36  ;;  %v5480_v36 = vpop.permute.xlu1 %1168 }
 0x3e1   : > { %v2465_v38 = vpop.f32.mrb[48].mxu1 }
 0x3e2   : > { %v5444_v39 = vmul.f32 0.28867513, %v2465_v38  ;;  %v4530_v41 = vpop.f32.mrb[49].mxu1 }
 0x3e3   : > { %v2468_v42 = vpop.f32.mrb[50].mxu1 }
 0x3e4   : > { %v5446_v43 = vmul.f32 0.28867513, %v2468_v42  ;;  %v4531_v44 = vpop.f32.mrb[51].mxu1  ;;  %v2474_v47 = vsel %vm1020_vm6, %v5444_v39, -inf }
 0x3e5   : > { %2475 = vmax.xlane.f32.xlu0 %v2474_v47  ;;  %v5484_v47 = vpop.permute.xlu0 %1665 }
 0x3e6   : > { %v2477_v48 = vsel %vm1020_vm6, %v5446_v43, -inf }
 0x3e7   : > { %2478 = vmax.xlane.f32.xlu1 %v2477_v48 }
 0x3e9   : > { %v2588_v50 = vpop.f32.mrb[52].mxu1 }
 0x3ea   : > { %v5452_v51 = vmul.f32 0.28867513, %v2588_v50  ;;  %v4542_v52 = vpop.f32.mrb[53].mxu1 }
 0x3eb   : > { %v2591_v53 = vpop.f32.mrb[54].mxu1 }
 0x3ec   : > { %v5454_v56 = vmul.f32 0.28867513, %v2591_v53  ;;  %v4543_v58 = vpop.f32.mrb[55].mxu1  ;;  %v2597_v61 = vsel %vm1020_vm6, %v5452_v51, -inf  ;;  %v5490_v53 = vpop.permute.xlu1 %1541 }
 0x3ed   : > { %2598 = vmax.xlane.f32.xlu0 %v2597_v61  ;;  %v5494_v61 = vpop.permute.xlu0 %1792 }
 0x3ee   : > { %v2600_v62 = vsel %vm1020_vm6, %v5454_v56, -inf }
 0x3ef   : > { %2601 = vmax.xlane.f32.xlu1 %v2600_v62 }
 0x3f0   : > { %v5496_v62 = vpop.permute.xlu1 %1667 }
 0x3f1   : > { %v2711_v63 = vpop.f32.mrb[56].mxu1 }
 0x3f2   : > { %v5460_v1 = vmul.f32 0.28867513, %v2711_v63  ;;  %v4554_v4 = vpop.f32.mrb[57].mxu1  ;;  %v5498_v63 = vpop.permute.xlu0 %2125 }
 0x3f3   : > { %v2714_v5 = vpop.f32.mrb[58].mxu1 }
 0x3f4   : > { %v5462_v7 = vmul.f32 0.28867513, %v2714_v5  ;;  %v4555_v9 = vpop.f32.mrb[59].mxu1  ;;  %v2720_v10 = vsel %vm1020_vm6, %v5460_v1, -inf  ;;  %v5500_v4 = vpop.permute.xlu1 %1915 }
 0x3f5   : > { %2721 = vmax.xlane.f32.xlu0 %v2720_v10 }
 0x3f6   : > { %v2723_v12 = vsel %vm1020_vm6, %v5462_v7, -inf  ;;  %v5502_v5 = vpop.permute.xlu0 %2374 }
 0x3f7   : > { %2724 = vmax.xlane.f32.xlu1 %v2723_v12 }
 0x3f8   : > { %v5504_v9 = vpop.permute.xlu1 %2248 }
 0x3f9   : > { %v2838_v15 = vpop.f32.mrb[60].mxu1 }
 0x3fa   : > { %v5470_v19 = vmul.f32 0.28867513, %v2838_v15  ;;  %v4566_v22 = vpop.f32.mrb[61].mxu1 }
 0x3fb   : > { %v2841_v25 = vpop.f32.mrb[62].mxu1 }
 0x3fc   : > { %v5472_v27 = vmul.f32 0.28867513, %v2841_v25  ;;  %v4567_v30 = vpop.f32.mrb[63].mxu1  ;;  %v2847_v31 = vsel %vm1020_vm6, %v5470_v19, -inf }
 0x3fd   : > { %2848 = vmax.xlane.f32.xlu0 %v2847_v31 }
 0x3fe   : > { %v2850_v35 = vsel %vm1020_vm6, %v5472_v27, -inf }
 0x3ff   : > { %2851 = vmax.xlane.f32.xlu1 %v2850_v35 }
 0x401   : > { %v2961_v38 = vpop.f32.mrb[64].mxu1 }
 0x402   : > { %v5482_v41 = vmul.f32 0.28867513, %v2961_v38  ;;  %v4578_v42 = vpop.f32.mrb[65].mxu1 }
 0x403   : > { %v2964_v44 = vpop.f32.mrb[66].mxu1 }
 0x404   : > { %v5486_v48 = vmul.f32 0.28867513, %v2964_v44  ;;  %v4579_v50 = vpop.f32.mrb[67].mxu1  ;;  %v2970_v52 = vsel %vm1020_vm6, %v5482_v41, -inf }
 0x405   : > { %2971 = vmax.xlane.f32.xlu1 %v2970_v52 }
 0x406   : > { %v2973_v58 = vsel %vm1020_vm6, %v5486_v48, -inf }
 0x409   : > { %2974 = vmax.xlane.f32.xlu1 %v2973_v58 }
 0x41a   : > { %v1023_v10 = vpop.xlane.xlu0 %1022 }
 0x41b   : > { %v1027_v12 = vsub.f32 %v5356_v55, %v1023_v10 }
 0x41c   : > { %v1026_v15 = vpop.xlane.xlu1 %1025 }
 0x41d   : > { %v1029_v22 = vmul.f32 1.442695, %v1027_v12  ;;  %v1028_v25 = vsub.f32 %v5358_v59, %v1026_v15 }
 0x41f   : > { %4769 = vpow2.f32 %v1029_v22  ;;  %v1031_v30 = vmul.f32 1.442695, %v1028_v25 }
 0x421   : > { %4771 = vpow2.f32 %v1031_v30 }
 0x422   : > { %v1147_v31 = vpop.xlane.xlu0 %1146 }
 0x423   : > { %v1151_v35 = vsub.f32 %v5364_v0, %v1147_v31 }
 0x425   : > { %v1153_v38 = vmul.f32 1.442695, %v1151_v35 }
 0x426   : > { %v1150_v42 = vpop.xlane.xlu0 %1149 }
 0x427   : > { %4773 = vpow2.f32 %v1153_v38  ;;  %v1152_v44 = vsub.f32 %v5366_v3, %v1150_v42 }
 0x429   : > { %v5510_v50 = vpop.eup %4769  ;;  %v1155_v52 = vmul.f32 1.442695, %v1152_v44 }
 0x42a   : > { %v1274_v58 = vpop.xlane.xlu0 %1273  ;;  %v1033_v55 = vsel %vm1020_vm6, %v5510_v50, 0.0 }
 0x42b   : > { %v5514_v10 = vpop.eup %4771  ;;  %4775 = vpow2.f32 %v1155_v52  ;;  %v1278_v59 = vsub.f32 %v5372_v8, %v1274_v58  ;;  %1034 = vadd.xlane.f32.xlu0 %v1033_v55 }
 0x42c   : > { %v1277_v12 = vpop.xlane.xlu1 %1276  ;;  %v1036_v0 = vsel %vm1020_vm6, %v5514_v10, 0.0 }
 0x42d   : > { %v1280_v15 = vmul.f32 1.442695, %v1278_v59  ;;  %v1279_v3 = vsub.f32 %v5374_v11, %v1277_v12  ;;  %1037 = vadd.xlane.f32.xlu1 %v1036_v0 }
 0x42f   : > { %4777 = vpow2.f32 %v1280_v15  ;;  %v1282_v22 = vmul.f32 1.442695, %v1279_v3 }
 0x431   : > { %v5520_v25 = vpop.eup %4773  ;;  %4779 = vpow2.f32 %v1282_v22 }
 0x432   : > { %v1397_v30 = vpop.xlane.xlu0 %1396  ;;  %v1157_v31 = vsel %vm1020_vm6, %v5520_v25, 0.0 }
 0x433   : > { %v1401_v8 = vsub.f32 %v5380_v16, %v1397_v30  ;;  %1158 = vadd.xlane.f32.xlu0 %v1157_v31 }
 0x434   : > { %v1400_v35 = vpop.xlane.xlu1 %1399 }
 0x435   : > { %v5525_v38 = vpop.eup %4775  ;;  %v1403_v42 = vmul.f32 1.442695, %v1401_v8  ;;  %v1402_v44 = vsub.f32 %v5382_v17, %v1400_v35 }
 0x436   : > { %v1160_v11 = vsel %vm1020_vm6, %v5525_v38, 0.0 }
 0x437   : > { %4781 = vpow2.f32 %v1403_v42  ;;  %v1405_v52 = vmul.f32 1.442695, %v1402_v44  ;;  %1161 = vadd.xlane.f32.xlu1 %v1160_v11 }
 0x439   : > { %v5530_v58 = vpop.eup %4777  ;;  %4783 = vpow2.f32 %v1405_v52 }
 0x43a   : > { %v1520_v55 = vpop.xlane.xlu0 %1519  ;;  %v1284_v16 = vsel %vm1020_vm6, %v5530_v58, 0.0 }
 0x43b   : > { %v5534_v59 = vpop.eup %4779  ;;  %v1524_v12 = vsub.f32 %v5388_v29, %v1520_v55  ;;  %1285 = vadd.xlane.f32.xlu0 %v1284_v16 }
 0x43c   : > { %v1523_v0 = vpop.xlane.xlu1 %1522  ;;  %v1287_v17 = vsel %vm1020_vm6, %v5534_v59, 0.0 }
 0x43d   : > { %v1526_v15 = vmul.f32 1.442695, %v1524_v12  ;;  %v1525_v3 = vsub.f32 %v5390_v32, %v1523_v0  ;;  %1288 = vadd.xlane.f32.xlu1 %v1287_v17 }
 0x43f   : > { %4785 = vpow2.f32 %v1526_v15  ;;  %v1528_v22 = vmul.f32 1.442695, %v1525_v3 }
 0x441   : > { %v5540_v30 = vpop.eup %4781  ;;  %4787 = vpow2.f32 %v1528_v22 }
 0x442   : > { %v1643_v31 = vpop.xlane.xlu0 %1642  ;;  %v1407_v8 = vsel %vm1020_vm6, %v5540_v30, 0.0 }
 0x443   : > { %v5544_v35 = vpop.eup %4783  ;;  %v1647_v29 = vsub.f32 %v5396_v37, %v1643_v31  ;;  %1408 = vadd.xlane.f32.xlu0 %v1407_v8 }
 0x444   : > { %v1646_v42 = vpop.xlane.xlu1 %1645  ;;  %v1410_v44 = vsel %vm1020_vm6, %v5544_v35, 0.0 }
 0x445   : > { %v1649_v32 = vmul.f32 1.442695, %v1647_v29  ;;  %v1648_v11 = vsub.f32 %v5398_v40, %v1646_v42  ;;  %1411 = vadd.xlane.f32.xlu1 %v1410_v44 }
 0x447   : > { %4789 = vpow2.f32 %v1649_v32  ;;  %v1651_v52 = vmul.f32 1.442695, %v1648_v11 }
 0x449   : > { %v5550_v55 = vpop.eup %4785  ;;  %4791 = vpow2.f32 %v1651_v52 }
 0x44a   : > { %v1771_v16 = vpop.xlane.xlu0 %1770  ;;  %v1530_v12 = vsel %vm1020_vm6, %v5550_v55, 0.0 }
 0x44b   : > { %v5554_v0 = vpop.eup %4787  ;;  %v1775_v37 = vsub.f32 %v5404_v46, %v1771_v16  ;;  %1531 = vadd.xlane.f32.xlu1 %v1530_v12 }
 0x44c   : > { %v1774_v17 = vpop.xlane.xlu1 %1773  ;;  %v1533_v40 = vsel %vm1020_vm6, %v5554_v0, 0.0 }
 0x44d   : > { %v1777_v15 = vmul.f32 1.442695, %v1775_v37  ;;  %v1776_v3 = vsub.f32 %v5406_v49, %v1774_v17 }
 0x44f   : > { %4793 = vpow2.f32 %v1777_v15  ;;  %v1779_v22 = vmul.f32 1.442695, %v1776_v3  ;;  %1534 = vadd.xlane.f32.xlu1 %v1533_v40 }
 0x451   : > { %v5560_v31 = vpop.eup %4789  ;;  %4795 = vpow2.f32 %v1779_v22 }
 0x452   : > { %v1894_v8 = vpop.xlane.xlu0 %1893  ;;  %v1653_v29 = vsel %vm1020_vm6, %v5560_v31, 0.0 }
 0x453   : > { %v5564_v42 = vpop.eup %4791  ;;  %v1898_v46 = vsub.f32 %v5412_v54, %v1894_v8  ;;  %1654 = vadd.xlane.f32.xlu0 %v1653_v29 }
 0x454   : > { %v1897_v44 = vpop.xlane.xlu1 %1896  ;;  %v1656_v49 = vsel %vm1020_vm6, %v5564_v42, 0.0 }
 0x455   : > { %v1900_v32 = vmul.f32 1.442695, %v1898_v46  ;;  %v1899_v11 = vsub.f32 %v5414_v60, %v1897_v44  ;;  %1657 = vadd.xlane.f32.xlu1 %v1656_v49 }
 0x457   : > { %4797 = vpow2.f32 %v1900_v32  ;;  %v1902_v52 = vmul.f32 1.442695, %v1899_v11 }
 0x459   : > { %v5570_v16 = vpop.eup %4793  ;;  %4799 = vpow2.f32 %v1902_v52 }
 0x45a   : > { %v2103_v12 = vpop.xlane.xlu0 %2102  ;;  %v1781_v37 = vsel %vm1020_vm6, %v5570_v16, 0.0 }
 0x45b   : > { %v5574_v17 = vpop.eup %4795  ;;  %v2107_v54 = vsub.f32 %v5420_v2, %v2103_v12  ;;  %1782 = vadd.xlane.f32.xlu1 %v1781_v37 }
 0x45c   : > { %v1784_v3 = vsel %vm1020_vm6, %v5574_v17, 0.0  ;;  %v2106_v46 = vpop.xlane.xlu1 %2105 }
 0x45d   : > { %v2109_v15 = vmul.f32 1.442695, %v2107_v54  ;;  %v2108_v44 = vsub.f32 %v5422_v6, %v2106_v46 }
 0x45f   : > { %4801 = vpow2.f32 %v2109_v15  ;;  %1785 = vadd.xlane.f32.xlu1 %v1784_v3  ;;  %v2111_v11 = vmul.f32 1.442695, %v2108_v44 }
 0x461   : > { %v5579_v60 = vpop.eup %4797  ;;  %4803 = vpow2.f32 %v2111_v11 }
 0x462   : > { %v1904_v40 = vsel %vm1020_vm6, %v5579_v60, 0.0  ;;  %v2227_v49 = vpop.xlane.xlu0 %2226 }
 0x463   : > { %v5583_v22 = vpop.eup %4799  ;;  %1905 = vadd.xlane.f32.xlu1 %v1904_v40  ;;  %v2231_v52 = vsub.f32 %v5428_v13, %v2227_v49 }
 0x464   : > { %v1907_v8 = vsel %vm1020_vm6, %v5583_v22, 0.0  ;;  %v2230_v32 = vpop.xlane.xlu1 %2229 }
 0x465   : > { %1908 = vadd.xlane.f32.xlu0 %v1907_v8  ;;  %v2232_v37 = vsub.f32 %v5430_v18, %v2230_v32  ;;  %v2233_v15 = vmul.f32 1.442695, %v2231_v52 }
 0x467   : > { %v2235_v8 = vmul.f32 1.442695, %v2232_v37  ;;  %4805 = vpow2.f32 %v2233_v15 }
 0x469   : > { %v5587_v2 = vpop.eup %4801  ;;  %4807 = vpow2.f32 %v2235_v8 }
 0x46a   : > { %v2113_v29 = vsel %vm1020_vm6, %v5587_v2, 0.0  ;;  %v2353_v54 = vpop.xlane.xlu0 %2352 }
 0x46b   : > { %2114 = vadd.xlane.f32.xlu1 %v2113_v29  ;;  %v2357_v29 = vsub.f32 %v5436_v28, %v2353_v54  ;;  %v5603_v52 = vpop.eup %4803 }
 0x46c   : > { %v2356_v12 = vpop.xlane.xlu1 %2355 }
 0x46d   : > { %v2358_v3 = vsub.f32 %v5438_v33, %v2356_v12  ;;  %v2359_v13 = vmul.f32 1.442695, %v2357_v29 }
 0x46f   : > { %v2361_v6 = vmul.f32 1.442695, %v2358_v3 }
 0x471   : > { %4809 = vpow2.f32 %v2361_v6 }
 0x472   : > { %v2476_v26 = vpop.xlane.xlu0 %2475  ;;  %4811 = vpow2.f32 %v2359_v13 }
 0x473   : > { %v2480_v49 = vsub.f32 %v5444_v39, %v2476_v26  ;;  %v2116_v26 = vsel %vm1020_vm6, %v5603_v52, 0.0  ;;  %v5609_v39 = vpop.eup %4805 }
 0x474   : > { %v2479_v40 = vpop.xlane.xlu1 %2478  ;;  %v5612_v8 = vpop.eup %4807 }
 0x475   : > { %v2481_v46 = vsub.f32 %v5446_v43, %v2479_v40  ;;  %v2482_v28 = vmul.f32 1.442695, %v2480_v49 }
 0x477   : > { %v2484_v32 = vmul.f32 1.442695, %v2481_v46 }
 0x479   : > { %4813 = vpow2.f32 %v2484_v32 }
 0x47a   : > { %v2599_v18 = vpop.xlane.xlu0 %2598  ;;  %4815 = vpow2.f32 %v2482_v28 }
 0x47b   : > { %2620 = vrot.lane.b32.xlu0 %v5223_v57, %s4959_s24  ;;  %v2603_v12 = vsub.f32 %v5452_v51, %v2599_v18  ;;  %v5617_v6 = vpop.eup %4809 }
 0x47c   : > { %2497 = vrot.lane.b32.xlu1 %v5223_v57, %s4958_s21  ;;  %v2602_v44 = vpop.xlane.xlu1 %2601  ;;  %v5622_v49 = vpop.eup %4811  ;;  %s6050_s21 = sld [smem:[#allocation10_spill]] }
 0x47d   : > { %v2604_v11 = vsub.f32 %v5454_v56, %v2602_v44  ;;  %v2605_v56 = vmul.f32 1.442695, %v2603_v12 }
 0x47f   : > { %v2607_v43 = vmul.f32 1.442695, %v2604_v11 }
 0x481   : > { %4817 = vpow2.f32 %v2607_v43 }
 0x482   : > { %v2722_v37 = vpop.xlane.xlu0 %2721  ;;  %4819 = vpow2.f32 %v2605_v56  ;;  %s6051_s24 = scalar_lea.vmem %s6050_s21, %s5052_s27 }
 0x483   : > { %v2726_v3 = vsub.f32 %v5460_v1, %v2722_v37  ;;  %v2240_v1 = vsel %vm1020_vm6, %v5612_v8, 0.0  ;;  %v5626_v32 = vpop.eup %4813 }
 0x484   : > { %v2725_v33 = vpop.xlane.xlu1 %2724  ;;  %v5631_v28 = vpop.eup %4815  ;;  %v2489_v12 = vsel %vm1020_vm6, %v5626_v32, 0.0 }
 0x485   : > { %v2727_v54 = vsub.f32 %v5462_v7, %v2725_v33  ;;  %v2237_v7 = vsel %vm1020_vm6, %v5609_v39, 0.0  ;;  %v2728_v46 = vmul.f32 1.442695, %v2726_v3 }
 0x487   : > { %v2730_v51 = vmul.f32 1.442695, %v2727_v54  ;;  %v2486_v54 = vsel %vm1020_vm6, %v5631_v28, 0.0 }
 0x489   : > { %4821 = vpow2.f32 %v2730_v51 }
 0x48a   : > { %v2849_v40 = vpop.xlane.xlu0 %2848  ;;  %4823 = vpow2.f32 %v2728_v46 }
 0x48b   : > { %v2853_v44 = vsub.f32 %v5470_v19, %v2849_v40  ;;  %v2363_v19 = vsel %vm1020_vm6, %v5622_v49, 0.0  ;;  %v5635_v37 = vpop.eup %4817 }
 0x48c   : > { %v2852_v15 = vpop.xlane.xlu1 %2851 }
 0x48d   : > { %v2854_v29 = vsub.f32 %v5472_v27, %v2852_v15  ;;  %v2366_v27 = vsel %vm1020_vm6, %v5617_v6, 0.0  ;;  %v2855_v11 = vmul.f32 1.442695, %v2853_v44  ;;  %v2612_v15 = vsel %vm1020_vm6, %v5635_v37, 0.0 }
 0x48f   : > { %v2857_v18 = vmul.f32 1.442695, %v2854_v29 }
 0x491   : > { %4825 = vpow2.f32 %v2857_v18 }
 0x492   : > { %v2972_v13 = vpop.xlane.xlu1 %2971  ;;  %4827 = vpow2.f32 %v2855_v11 }
 0x493   : > { %v2976_v33 = vsub.f32 %v5482_v41, %v2972_v13  ;;  %v5639_v41 = vpop.eup %4819 }
 0x494   : > { %v2609_v56 = vsel %vm1020_vm6, %v5639_v41, 0.0 }
 0x495   : > { %v2978_v43 = vmul.f32 1.442695, %v2976_v33 }
 0x497   : > { %4829 = vpow2.f32 %v2978_v43 }
 0x49a   : > { %2117 = vadd.xlane.f32.xlu0 %v2116_v26  ;;  %v5643_v26 = vpop.eup %4821 }
 0x49b   : > { %v5647_v3 = vpop.eup %4823  ;;  %v2735_v40 = vsel %vm1020_vm6, %v5643_v26, 0.0 }
 0x49c   : > { %v5651_v51 = vpop.eup %4825  ;;  %v2732_v29 = vsel %vm1020_vm6, %v5647_v3, 0.0 }
 0x49d   : > { %v2862_v46 = vsel %vm1020_vm6, %v5651_v51, 0.0 }
 0x49e   : > { %2238 = vadd.xlane.f32.xlu0 %v2237_v7  ;;  %v5655_v7 = vpop.eup %4827 }
 0x49f   : > { %v2859_v44 = vsel %vm1020_vm6, %v5655_v7, 0.0 }
 0x4a0   : > { %2241 = vadd.xlane.f32.xlu1 %v2240_v1  ;;  %v2975_v1 = vpop.xlane.xlu1 %2974 }
 0x4a1   : > { %v5661_v13 = vpop.eup %4829 }
 0x4a2   : > { %2367 = vadd.xlane.f32.xlu0 %v2366_v27  ;;  %v2982_v18 = vsel %vm1020_vm6, %v5661_v13, 0.0 }
 0x4a4   : > { %2364 = vadd.xlane.f32.xlu1 %v2363_v19 }
 0x4a6   : > { %2490 = vadd.xlane.f32.xlu0 %v2489_v12  ;;  %v2045_v12 = vld [vmem:[#allocation3 + $0x58] sm:$0xff] }
 0x4a8   : > { %2487 = vadd.xlane.f32.xlu1 %v2486_v54 }
 0x4aa   : > { %2613 = vadd.xlane.f32.xlu0 %v2612_v15  ;;  %v2042_v15 = vld [vmem:[#allocation3 + $0x40] sm:$0xff] }
 0x4ac   : > { %2610 = vadd.xlane.f32.xlu1 %v2609_v56 }
 0x4ae   : > { %2736 = vadd.xlane.f32.xlu0 %v2735_v40 }
 0x4b0   : > { %2733 = vadd.xlane.f32.xlu1 %v2732_v29  ;;  %v5667_v29 = vpack.c.bf16 %v2045_v12, %v2042_v15  ;;  %v2977_v12 = vsub.f32 %v5486_v48, %v2975_v1 }
 0x4b2   : > { %2863 = vadd.xlane.f32.xlu0 %v2862_v46 }
 0x4b4   : > { %2860 = vadd.xlane.f32.xlu1 %v2859_v44 }
 0x4b8   : > { %2983 = vadd.xlane.f32.xlu1 %v2982_v18  ;;  %v1035_v27 = vpop.xlane.xlu0 %1034 }
 0x4b9   : > { %4831 = vrcp.f32 %v1035_v27 }
 0x4ba   : > { %v1038_v11 = vpop.xlane.xlu1 %1037 }
 0x4bb   : > { %4833 = vrcp.f32 %v1038_v11 }
 0x4c0   : > { %v1159_v33 = vpop.xlane.xlu0 %1158 }
 0x4c1   : > { %4835 = vrcp.f32 %v1159_v33 }
 0x4c3   : > { %v4832_v19 = vpop.eup %4831 }
 0x4c4   : > { %v1162_v43 = vpop.xlane.xlu1 %1161  ;;  %v1041_v56 = vmul.f32 %v4832_v19, %v5510_v50 }
 0x4c5   : > { %v4834_v54 = vpop.eup %4833  ;;  %4837 = vrcp.f32 %v1162_v43 }
 0x4c6   : > { %v1042_v40 = vmul.f32 %v4834_v54, %v5514_v10 }
 0x4c8   : > { %v1043_v46 = vpack.c.bf16 %v1042_v40, %v1041_v56  ;;  %2746 = vrot.lane.b32.xlu0 %v5667_v29, %s4960_s4  ;;  %v1286_v44 = vpop.xlane.xlu0 %1285 }
 0x4c9   : > { %2744 = vrot.lane.b32.xlu1 %v5223_v57, %s4960_s4  ;;  %4839 = vrcp.f32 %v1286_v44 }
 0x4ca   : > { %v1289_v18 = vpop.xlane.xlu1 %1288  ;;  %4403 = vmatmul.mubr.msk.bf16.vlgmr.msra.gmra.mrb[8].mxu0 %vm1020_vm6, %v1043_v46 }
 0x4cb   : > { %4841 = vrcp.f32 %v1289_v18  ;;  %4413 = vmatpush3.bf16.msra.mxu0 %v5480_v36  ;;  %4414 = vmatprep.mubr.msk.bf16.mxu0 %vm4939_vm2, %v4938_v24  ;;  %v4836_v50 = vpop.eup %4835 }
 0x4cc   : > { %2870 = vrot.lane.b32.xlu0 %v5667_v29, %s4961_s7  ;;  %4424 = vmatprep.subr.bf16.mxu0 %v4938_v24  ;;  %v1165_v27 = vmul.f32 %v4836_v50, %v5520_v25 }
 0x4cf   : > { %v4838_v10 = vpop.eup %4837 }
 0x4d0   : > { %v1166_v57 = vmul.f32 %v4838_v10, %v5525_v38  ;;  %v1409_v11 = vpop.xlane.xlu0 %1408  ;;  %v2980_v38 = vmul.f32 1.442695, %v2977_v12 }
 0x4d1   : > { %4843 = vrcp.f32 %v1409_v11  ;;  %v1670_v11 = vsel %vm1669_vm7, %v5484_v47, %v5496_v62 }
 0x4d2   : > { %v1412_v33 = vpop.xlane.xlu1 %1411  ;;  %v1167_v19 = vpack.c.bf16 %v1166_v57, %v1165_v27 }
 0x4d3   : > { %4845 = vrcp.f32 %v1412_v33  ;;  %v4840_v36 = vpop.eup %4839 }
 0x4d4   : > { %4415 = vmatmul.mubr.msk.bf16.vlgmr.msra.gmra.mrb[12].mxu0 %vm1020_vm6, %v1167_v19  ;;  %v1292_v54 = vmul.f32 %v4840_v36, %v5530_v58 }
 0x4d5   : > { %v4842_v43 = vpop.eup %4841  ;;  %4425 = vmatpush3.bf16.msra.mxu0 %v5468_v14  ;;  %4426 = vmatprep.mubr.msk.bf16.mxu0 %vm4939_vm2, %v4938_v24 }
 0x4d6   : > { %v1293_v25 = vmul.f32 %v4842_v43, %v5534_v59  ;;  %4436 = vmatprep.subr.bf16.mxu0 %v4938_v24 }
 0x4d8   : > { %v1532_v15 = vpop.xlane.xlu1 %1531  ;;  %v1294_v56 = vpack.c.bf16 %v1293_v25, %v1292_v54 }
 0x4d9   : > { %4847 = vrcp.f32 %v1532_v15 }
 0x4da   : > { %4849 = vpow2.f32 %v2980_v38 }
 0x4db   : > { %v4844_v40 = vpop.eup %4843 }
 0x4dc   : > { %v1535_v48 = vpop.xlane.xlu1 %1534  ;;  %4427 = vmatmul.mubr.msk.bf16.vlgmr.msra.gmra.mrb[16].mxu0 %vm1020_vm6, %v1294_v56  ;;  %v1415_v58 = vmul.f32 %v4844_v40, %v5540_v30 }
 0x4dd   : > { %v4846_v1 = vpop.eup %4845  ;;  %4851 = vrcp.f32 %v1535_v48  ;;  %4437 = vmatpush3.bf16.msra.mxu0 %v5476_v34  ;;  %4438 = vmatprep.mubr.msk.bf16.mxu0 %vm4939_vm2, %v4938_v24 }
 0x4de   : > { %v1416_v14 = vmul.f32 %v4846_v1, %v5544_v35  ;;  %4448 = vmatprep.subr.bf16.mxu0 %v4938_v24 }
 0x4e0   : > { %v1655_v59 = vpop.xlane.xlu0 %1654  ;;  %v1417_v44 = vpack.c.bf16 %v1416_v14, %v1415_v58 }
 0x4e1   : > { %4853 = vrcp.f32 %v1655_v59 }
 0x4e2   : > { %v1658_v46 = vpop.xlane.xlu1 %1657 }
 0x4e3   : > { %4855 = vrcp.f32 %v1658_v46  ;;  %v4848_v18 = vpop.eup %4847 }
 0x4e4   : > { %4439 = vmatmul.mubr.msk.bf16.vlgmr.msra.gmra.mrb[20].mxu0 %vm1020_vm6, %v1417_v44  ;;  %v5701_v34 = vpop.eup %4849  ;;  %v1538_v30 = vmul.f32 %v4848_v18, %v5550_v55 }
 0x4e5   : > { %4449 = vmatpush3.bf16.msra.mxu0 %v5490_v53  ;;  %4450 = vmatprep.mubr.msk.bf16.mxu0 %vm4939_vm2, %v4938_v24  ;;  %v2985_v27 = vsel %vm1020_vm6, %v5701_v34, 0.0 }
 0x4e6   : > { %4460 = vmatprep.subr.bf16.mxu0 %v4938_v24 }
 0x4e7   : > { %v4852_v35 = vpop.eup %4851 }
 0x4e8   : > { %v1539_v50 = vmul.f32 %v4852_v35, %v5554_v0  ;;  %v1783_v10 = vpop.xlane.xlu1 %1782 }
 0x4e9   : > { %4857 = vrcp.f32 %v1783_v10 }
 0x4ea   : > { %v1540_v57 = vpack.c.bf16 %v1539_v50, %v1538_v30 }
 0x4eb   : > { %2986 = vadd.xlane.f32.xlu0 %v2985_v27  ;;  %v4854_v53 = vpop.eup %4853 }
 0x4ec   : > { %v1786_v33 = vpop.xlane.xlu1 %1785  ;;  %4451 = vmatmul.mubr.msk.bf16.vlgmr.msra.gmra.mrb[24].mxu0 %vm1020_vm6, %v1540_v57  ;;  %v1661_v0 = vmul.f32 %v4854_v53, %v5560_v31 }
 0x4ed   : > { %v4856_v19 = vpop.eup %4855  ;;  %4859 = vrcp.f32 %v1786_v33  ;;  %4461 = vmatpush3.bf16.msra.mxu0 %v1670_v11  ;;  %4462 = vmatprep.mubr.msk.bf16.mxu0 %vm4939_vm2, %v4938_v24 }
 0x4ee   : > { %v1662_v55 = vmul.f32 %v4856_v19, %v5564_v42  ;;  %4472 = vmatprep.subr.bf16.mxu0 %v4938_v24 }
 0x4f0   : > { %v1906_v36 = vpop.xlane.xlu1 %1905  ;;  %v1663_v43 = vpack.c.bf16 %v1662_v55, %v1661_v0 }
 0x4f1   : > { %4861 = vrcp.f32 %v1906_v36 }
 0x4f2   : > { %v1909_v12 = vpop.xlane.xlu0 %1908 }
 0x4f3   : > { %4863 = vrcp.f32 %v1909_v12  ;;  %v4858_v47 = vpop.eup %4857 }
 0x4f4   : > { %4463 = vmatmul.mubr.msk.bf16.vlgmr.msra.gmra.mrb[28].mxu0 %vm1020_vm6, %v1663_v43  ;;  %v1789_v42 = vmul.f32 %v4858_v47, %v5570_v16 }
 0x4f5   : > { %4473 = vmatpush3.bf16.msra.mxu0 %v5494_v61  ;;  %4474 = vmatprep.mubr.msk.bf16.mxu0 %vm4939_vm2, %v4938_v24 }
 0x4f6   : > { %4484 = vmatprep.subr.bf16.mxu0 %v4938_v24 }
 0x4f7   : > { %v4860_v62 = vpop.eup %4859 }
 0x4f8   : > { %v1790_v31 = vmul.f32 %v4860_v62, %v5574_v17  ;;  %v2115_v17 = vpop.xlane.xlu1 %2114 }
 0x4f9   : > { %4865 = vrcp.f32 %v2115_v17 }
 0x4fa   : > { %v1791_v25 = vpack.c.bf16 %v1790_v31, %v1789_v42 }
 0x4fb   : > { %v4862_v38 = vpop.eup %4861 }
 0x4fc   : > { %4475 = vmatmul.mubr.msk.bf16.vlgmr.msra.gmra.mrb[32].mxu0 %vm1020_vm6, %v1791_v25  ;;  %v1912_v15 = vmul.f32 %v4862_v38, %v5579_v60  ;;  %v2498_v60 = vpop.permute.xlu1 %2497 }
 0x4fd   : > { %v4864_v54 = vpop.eup %4863  ;;  %4485 = vmatpush3.bf16.msra.mxu0 %v5500_v4  ;;  %4486 = vmatprep.mubr.msk.bf16.mxu0 %vm4939_vm2, %v4938_v24  ;;  %v5738_v4 = vpop.permute.xlu0 %2620 }
 0x4fe   : > { %v1913_v61 = vmul.f32 %v4864_v54, %v5583_v22  ;;  %4496 = vmatprep.subr.bf16.mxu0 %v4938_v24 }
 0x500   : > { %v1914_v16 = vpack.c.bf16 %v1913_v61, %v1912_v15 }
 0x501   : > { %2993 = vrot.lane.b32.xlu0 %v5667_v29, %s4962_s18  ;;  %s6052_s18 = scalar_lea.vmem %s6027_s8, %s5052_s27 }
 0x503   : > { %v4866_v40 = vpop.eup %4865 }
 0x504   : > { %4487 = vmatmul.mubr.msk.bf16.vlgmr.msra.gmra.mrb[36].mxu0 %vm1020_vm6, %v1914_v16 }
 0x505   : > { %4497 = vmatpush3.bf16.msra.mxu0 %v5498_v63  ;;  %4498 = vmatprep.mubr.msk.bf16.mxu0 %vm4939_vm2, %v4938_v24  ;;  %v2121_v63 = vmul.f32 %v4866_v40, %v5587_v2 }
 0x506   : > { %4508 = vmatprep.subr.bf16.mxu0 %v4938_v24 }
 0x527   : > { %v2118_v22 = vpop.xlane.xlu0 %2117 }
 0x528   : > { %4867 = vrcp.f32 %v2118_v22 }
 0x52b   : > { %v2239_v56 = vpop.xlane.xlu0 %2238 }
 0x52c   : > { %4869 = vrcp.f32 %v2239_v56 }
 0x52d   : > { %v2242_v29 = vpop.xlane.xlu1 %2241 }
 0x52e   : > { %4871 = vrcp.f32 %v2242_v29 }
 0x52f   : > { %v2368_v58 = vpop.xlane.xlu0 %2367 }
 0x531   : > { %v2365_v48 = vpop.xlane.xlu1 %2364 }
 0x532   : > { %v4868_v1 = vpop.eup %4867  ;;  %4873 = vrcp.f32 %v2365_v48 }
 0x533   : > { %v2122_v14 = vmul.f32 %v4868_v1, %v5603_v52  ;;  %4875 = vrcp.f32 %v2368_v58  ;;  %v2491_v52 = vpop.xlane.xlu0 %2490 }
 0x535   : > { %v2123_v59 = vpack.c.bf16 %v2122_v14, %v2121_v63  ;;  %v2488_v46 = vpop.xlane.xlu1 %2487 }
 0x536   : > { %v4870_v44 = vpop.eup %4869  ;;  %4877 = vrcp.f32 %v2488_v46 }
 0x537   : > { %4499 = vmatmul.mubr.msk.bf16.vlgmr.msra.gmra.mrb[40].mxu0 %vm1020_vm6, %v2123_v59  ;;  %v2245_v2 = vmul.f32 %v4870_v44, %v5609_v39  ;;  %4879 = vrcp.f32 %v2491_v52  ;;  %v2614_v57 = vpop.xlane.xlu0 %2613 }
 0x538   : > { %v4872_v18 = vpop.eup %4871  ;;  %4509 = vmatpush3.bf16.msra.mxu0 %v5504_v9  ;;  %4510 = vmatprep.mubr.msk.bf16.mxu0 %vm4939_vm2, %v4938_v24 }
 0x539   : > { %v2246_v35 = vmul.f32 %v4872_v18, %v5612_v8  ;;  %4520 = vmatprep.subr.bf16.mxu0 %v4938_v24  ;;  %v2611_v30 = vpop.xlane.xlu1 %2610 }
 0x53a   : > { %4881 = vrcp.f32 %v2611_v30 }
 0x53b   : > { %v2247_v50 = vpack.c.bf16 %v2246_v35, %v2245_v2  ;;  %4883 = vrcp.f32 %v2614_v57 }
 0x53c   : > { %v4874_v10 = vpop.eup %4873 }
 0x53d   : > { %v4876_v27 = vpop.eup %4875  ;;  %v2371_v9 = vmul.f32 %v4874_v10, %v5622_v49  ;;  %v2734_v8 = vpop.xlane.xlu1 %2733 }
 0x53e   : > { %v2372_v39 = vmul.f32 %v4876_v27, %v5617_v6  ;;  %v2737_v49 = vpop.xlane.xlu0 %2736  ;;  %4885 = vrcp.f32 %v2734_v8 }
 0x53f   : > { %4511 = vmatmul.mubr.msk.bf16.vlgmr.msra.gmra.mrb[44].mxu0 %vm1020_vm6, %v2247_v50  ;;  %4887 = vrcp.f32 %v2737_v49 }
 0x540   : > { %4521 = vmatpush3.bf16.msra.mxu0 %v5502_v5  ;;  %4522 = vmatprep.mubr.msk.bf16.mxu0 %vm4939_vm2, %v4938_v24  ;;  %v2373_v53 = vpack.c.bf16 %v2372_v39, %v2371_v9  ;;  %v4878_v11 = vpop.eup %4877 }
 0x541   : > { %4532 = vmatprep.subr.bf16.mxu0 %v4938_v24  ;;  %v4880_v33 = vpop.eup %4879  ;;  %v2861_v19 = vpop.xlane.xlu1 %2860  ;;  %v2494_v5 = vmul.f32 %v4878_v11, %v5631_v28 }
 0x542   : > { %v2495_v6 = vmul.f32 %v4880_v33, %v5626_v32  ;;  %v2864_v43 = vpop.xlane.xlu0 %2863  ;;  %4889 = vrcp.f32 %v2861_v19 }
 0x543   : > { %4891 = vrcp.f32 %v2864_v43 }
 0x544   : > { %v2496_v55 = vpack.c.bf16 %v2495_v6, %v2494_v5  ;;  %v4882_v0 = vpop.eup %4881 }
 0x545   : > { %v2984_v36 = vpop.xlane.xlu1 %2983  ;;  %v4884_v12 = vpop.eup %4883  ;;  %v2617_v28 = vmul.f32 %v4882_v0, %v5639_v41 }
 0x546   : > { %v2618_v32 = vmul.f32 %v4884_v12, %v5635_v37  ;;  %v2747_v31 = vpop.permute.xlu0 %2746  ;;  %4893 = vrcp.f32 %v2984_v36 }
 0x547   : > { %4523 = vmatmul.mubr.msk.bf16.vlgmr.msra.gmra.mrb[48].mxu0 %vm1020_vm6, %v2373_v53 }
 0x548   : > { %4533 = vmatpush3.bf16.msra.mxu0 %v2498_v60  ;;  %4534 = vmatprep.mubr.msk.bf16.mxu0 %vm4939_vm2, %v4938_v24  ;;  %v2619_v62 = vpack.c.bf16 %v2618_v32, %v2617_v28  ;;  %v4886_v42 = vpop.eup %4885 }
 0x549   : > { %4544 = vmatprep.subr.bf16.mxu0 %v4938_v24  ;;  %v2745_v47 = vpop.permute.xlu1 %2744  ;;  %v4888_v38 = vpop.eup %4887  ;;  %v2740_v41 = vmul.f32 %v4886_v42, %v5647_v3 }
 0x54a   : > { %v2748_v25 = vsel %vm1669_vm7, %v2745_v47, %v2747_v31  ;;  %v2741_v37 = vmul.f32 %v4888_v38, %v5643_v26  ;;  %v2871_v15 = vpop.permute.xlu0 %2870 }
 0x54c   : > { %v2742_v54 = vpack.c.bf16 %v2741_v37, %v2740_v41  ;;  %v4890_v61 = vpop.eup %4889 }
 0x54d   : > { %v4892_v16 = vpop.eup %4891 }
 0x54e   : > { %v2868_v3 = vmul.f32 %v4892_v16, %v5651_v51 }
 0x54f   : > { %4535 = vmatmul.mubr.msk.bf16.vlgmr.msra.gmra.mrb[52].mxu0 %vm1020_vm6, %v2496_v55 }
 0x550   : > { %4545 = vmatpush3.bf16.msra.mxu0 %v5738_v4  ;;  %4546 = vmatprep.mubr.msk.bf16.mxu0 %vm4939_vm2, %v4938_v24  ;;  %v2867_v4 = vmul.f32 %v4890_v61, %v5655_v7  ;;  %v4894_v60 = vpop.eup %4893 }
 0x551   : > { %4556 = vmatprep.subr.bf16.mxu0 %v4938_v24  ;;  %v2990_v29 = vmul.f32 %v4894_v60, %v5661_v13 }
 0x552   : > { %v2869_v17 = vpack.c.bf16 %v2868_v3, %v2867_v4 }
 0x557   : > { %4547 = vmatmul.mubr.msk.bf16.vlgmr.msra.gmra.mrb[56].mxu0 %vm1020_vm6, %v2619_v62 }
 0x558   : > { %4557 = vmatpush3.bf16.msra.mxu0 %v2748_v25  ;;  %4558 = vmatprep.mubr.msk.bf16.mxu0 %vm4939_vm2, %v4938_v24 }
 0x559   : > { %4568 = vmatprep.subr.bf16.mxu0 %v4938_v24 }
 0x55f   : > { %4559 = vmatmul.mubr.msk.bf16.vlgmr.msra.gmra.mrb[60].mxu0 %vm1020_vm6, %v2742_v54 }
 0x560   : > { %4569 = vmatpush3.bf16.msra.mxu0 %v2871_v15  ;;  %4570 = vmatprep.mubr.msk.bf16.mxu0 %vm4939_vm2, %v4938_v24 }
 0x561   : > { %4580 = vmatprep.subr.bf16.mxu0 %v4938_v24 }
 0x567   : > { %4571 = vmatmul.mubr.msk.bf16.vlgmr.msra.gmra.mrb[64].mxu0 %vm1020_vm6, %v2869_v17  ;;  %v4707_v17 = vld [vmem:[%s5090_s22] sm:$0xff]  }
 0x568   : > { %4582 = vmatprep.mubr.msk.bf16.mxu0 %vm4939_vm2, %v4938_v24  ;;  %4586 = vmatprep.subr.bf16.mxu1 %v4707_v17 }
 0x569   : > { %4587 = vmatpush3.bf16.msra.mxu1 %v4707_v17 }
 0x578   : > { %v2987_v26 = vpop.xlane.xlu0 %2986 }
 0x579   : > { %4895 = vrcp.f32 %v2987_v26  ;;  %v4708_v26 = vld [vmem:[%s5090_s22 + $0x8] sm:$0xff]  }
 0x57a   : > { %4588 = vmatprep.subr.bf16.mxu1 %v4708_v26 }
 0x57b   : > { %4589 = vmatpush3.bf16.msra.mxu1 %v4708_v26 }
 0x57c   : > { %v2994_v22 = vpop.permute.xlu0 %2993 }
 0x57d   : > { %4581 = vmatpush3.bf16.msra.mxu0 %v2994_v22 }
 0x583   : > { %v4896_v56 = vpop.eup %4895 }
 0x584   : > { %v2991_v7 = vmul.f32 %v4896_v56, %v5701_v34 }
 0x586   : > { %v2992_v40 = vpack.c.bf16 %v2991_v7, %v2990_v29 }
 0x588   : > { %4583 = vmatmul.mubr.msk.bf16.vlgmr.msra.gmra.mrb[68].mxu0 %vm1020_vm6, %v2992_v40  ;;  %v4709_v40 = vld [vmem:[%s5090_s22 + $0x10] sm:$0xff]  }
 0x589   : > { %3499 = vmatprep.mubr.bf16.mxu0 %v4937_v45  ;;  %4590 = vmatprep.subr.bf16.mxu1 %v4709_v40 }
 0x58a   : > { %4591 = vmatpush3.bf16.msra.mxu1 %v4709_v40 }
 0x59d   : > { %v5789_v51 = vpop.f32.mrb[8].mxu0 }
 0x59e   : > { %v4404_v48 = vpop.f32.mrb[9].mxu0 }
 0x59f   : > { %v5791_v24 = vpop.f32.mrb[10].mxu0 }
 0x5a0   : > { %v4405_v1 = vpop.f32.mrb[11].mxu0 }
 0x5a7   : > { %v1208_v63 = vpop.f32.mrb[12].mxu0 }
 0x5a8   : > { %1964 = vrot.lane.b32.xlu0 %v1208_v63, %s4963_s25  ;;  %v4416_v14 = vpop.f32.mrb[13].mxu0 }
 0x5a9   : > { %v1211_v58 = vpop.f32.mrb[14].mxu0 }
 0x5aa   : > { %1966 = vrot.lane.b32.xlu1 %v1211_v58, %s4963_s25  ;;  %v4417_v13 = vpop.f32.mrb[15].mxu0 }
 0x5af   : > { %v1335_v34 = vpop.f32.mrb[16].mxu0 }
 0x5b0   : > { %1972 = vrot.lane.b32.xlu0 %v1335_v34, %s4964_s19  ;;  %v4428_v59 = vpop.f32.mrb[17].mxu0 }
 0x5b1   : > { %v1338_v46 = vpop.f32.mrb[18].mxu0 }
 0x5b2   : > { %1974 = vrot.lane.b32.xlu1 %v1338_v46, %s4964_s19  ;;  %v4429_v44 = vpop.f32.mrb[19].mxu0 }
 0x5b7   : > { %v1458_v18 = vpop.f32.mrb[20].mxu0 }
 0x5b8   : > { %1980 = vrot.lane.b32.xlu0 %v1458_v18, %s4965_s23  ;;  %v4440_v35 = vpop.f32.mrb[21].mxu0 }
 0x5b9   : > { %v1461_v2 = vpop.f32.mrb[22].mxu0 }
 0x5ba   : > { %1982 = vrot.lane.b32.xlu1 %v1461_v2, %s4965_s23  ;;  %v4441_v52 = vpop.f32.mrb[23].mxu0 }
 0x5bf   : > { %v1581_v30 = vpop.f32.mrb[24].mxu0 }
 0x5c0   : > { %1988 = vrot.lane.b32.xlu0 %v1581_v30, %s4966_s29  ;;  %v4452_v50 = vpop.f32.mrb[25].mxu0 }
 0x5c1   : > { %v1584_v10 = vpop.f32.mrb[26].mxu0 }
 0x5c2   : > { %1990 = vrot.lane.b32.xlu1 %v1584_v10, %s4966_s29  ;;  %v4453_v27 = vpop.f32.mrb[27].mxu0 }
 0x5c7   : > { %v1709_v9 = vpop.f32.mrb[28].mxu0 }
 0x5c8   : > { %1996 = vrot.lane.b32.xlu0 %v1709_v9, %s4967_s13  ;;  %v4464_v8 = vpop.f32.mrb[29].mxu0 }
 0x5c9   : > { %v1712_v39 = vpop.f32.mrb[30].mxu0 }
 0x5ca   : > { %1998 = vrot.lane.b32.xlu1 %v1712_v39, %s4967_s13  ;;  %v4465_v57 = vpop.f32.mrb[31].mxu0 }
 0x5cf   : > { %v1832_v53 = vpop.f32.mrb[32].mxu0 }
 0x5d0   : > { %2004 = vrot.lane.b32.xlu0 %v1832_v53, %s4968_s15  ;;  %v4476_v11 = vpop.f32.mrb[33].mxu0 }
 0x5d1   : > { %v1835_v33 = vpop.f32.mrb[34].mxu0 }
 0x5d2   : > { %2006 = vrot.lane.b32.xlu1 %v1835_v33, %s4968_s15  ;;  %v4477_v19 = vpop.f32.mrb[35].mxu0 }
 0x5d7   : > { %v1955_v5 = vpop.f32.mrb[36].mxu0 }
 0x5d8   : > { %2012 = vrot.lane.b32.xlu0 %v1955_v5, %s4969_s17  ;;  %v4488_v49 = vpop.f32.mrb[37].mxu0 }
 0x5d9   : > { %v1958_v6 = vpop.f32.mrb[38].mxu0 }
 0x5da   : > { %2014 = vrot.lane.b32.xlu1 %v1958_v6, %s4969_s17  ;;  %v4489_v55 = vpop.f32.mrb[39].mxu0 }
 0x5db   : > { %v4710_v55 = vld [vmem:[%s5090_s22 + $0x18] sm:$0xff]  }
 0x5dc   : > { %4592 = vmatprep.subr.bf16.mxu1 %v4710_v55 }
 0x5dd   : > { %4593 = vmatpush3.bf16.msra.mxu1 %v4710_v55 }
 0x60a   : > { %v5807_v0 = vpop.f32.mrb[40].mxu0 }
 0x60b   : > { %v4500_v36 = vpop.f32.mrb[41].mxu0 }
 0x60c   : > { %v5809_v12 = vpop.f32.mrb[42].mxu0  ;;  %v4711_v36 = vld [vmem:[%s5090_s22 + $0x20] sm:$0xff]  }
 0x60d   : > { %v4501_v43 = vpop.f32.mrb[43].mxu0  ;;  %4594 = vmatprep.subr.bf16.mxu1 %v4711_v36 }
 0x60e   : > { %v4712_v43 = vld [vmem:[%s5090_s22 + $0x28] sm:$0xff]   ;;  %4595 = vmatpush3.bf16.msra.mxu1 %v4711_v36 }
 0x60f   : > { %4596 = vmatprep.subr.bf16.mxu1 %v4712_v43 }
 0x612   : > { %v2288_v28 = vpop.f32.mrb[44].mxu0  ;;  %4597 = vmatpush3.bf16.msra.mxu1 %v4712_v43 }
 0x613   : > { %3042 = vrot.lane.b32.xlu0 %v2288_v28, %s4963_s25  ;;  %v4512_v32 = vpop.f32.mrb[45].mxu0 }
 0x614   : > { %v2291_v47 = vpop.f32.mrb[46].mxu0 }
 0x615   : > { %3044 = vrot.lane.b32.xlu1 %v2291_v47, %s4963_s25  ;;  %v4513_v62 = vpop.f32.mrb[47].mxu0  ;;  %s6054_s25 = sld [smem:[#allocation11_spill]] (!%p4249_p5) }
 0x61a   : > { %v2414_v42 = vpop.f32.mrb[48].mxu0  ;;  %v1965_v22 = vpop.permute.xlu0 %1964 }
 0x61b   : > { %3050 = vrot.lane.b32.xlu0 %v2414_v42, %s4964_s19  ;;  %v4524_v31 = vpop.f32.mrb[49].mxu0  ;;  %v2018_v52 = vsel %vm970_vm4, %v5789_v51, %v1965_v22 }
 0x61c   : > { %v2417_v25 = vpop.f32.mrb[50].mxu0  ;;  %v1967_v29 = vpop.permute.xlu1 %1966 }
 0x61d   : > { %3052 = vrot.lane.b32.xlu1 %v2417_v25, %s4964_s19  ;;  %v4525_v38 = vpop.f32.mrb[51].mxu0  ;;  %v2019_v10 = vsel %vm970_vm4, %v5791_v24, %v1967_v29  ;;  %s6055_s19 = smov (!%p4249_p5), %s6054_s25 }
 0x622   : > { %v2537_v41 = vpop.f32.mrb[52].mxu0  ;;  %v1973_v1 = vpop.permute.xlu0 %1972 }
 0x623   : > { %3058 = vrot.lane.b32.xlu0 %v2537_v41, %s4965_s23  ;;  %v4536_v37 = vpop.f32.mrb[53].mxu0  ;;  %v2021_v30 = vsel %vm2020_vm8, %v2018_v52, %v1973_v1  ;;  %v3112_v52 = vld [vmem:[#allocation2] sm:$0xff] }
 0x624   : > { %v2540_v54 = vpop.f32.mrb[54].mxu0  ;;  %v1975_v63 = vpop.permute.xlu1 %1974 }
 0x625   : > { %3060 = vrot.lane.b32.xlu1 %v2540_v54, %s4965_s23  ;;  %v4537_v61 = vpop.f32.mrb[55].mxu0  ;;  %v2022_v9 = vsel %vm2020_vm8, %v2019_v10, %v1975_v63  ;;  %v3115_v10 = vld [vmem:[#allocation2 + $0x18] sm:$0xff] }
 0x62a   : > { %v2660_v15 = vpop.f32.mrb[56].mxu0  ;;  %v1981_v14 = vpop.permute.xlu0 %1980 }
 0x62b   : > { %3066 = vrot.lane.b32.xlu0 %v2660_v15, %s4966_s29  ;;  %v4548_v16 = vpop.f32.mrb[57].mxu0  ;;  %v2024_v27 = vsel %vm2023_vm9, %v2021_v30, %v1981_v14 }
 0x62c   : > { %v2663_v4 = vpop.f32.mrb[58].mxu0  ;;  %v1983_v34 = vpop.permute.xlu1 %1982 }
 0x62d   : > { %3068 = vrot.lane.b32.xlu1 %v2663_v4, %s4966_s29  ;;  %v4549_v3 = vpop.f32.mrb[59].mxu0  ;;  %v2025_v51 = vsel %vm2023_vm9, %v2022_v9, %v1983_v34 }
 0x632   : > { %v2787_v60 = vpop.f32.mrb[60].mxu0  ;;  %v1989_v44 = vpop.permute.xlu0 %1988 }
 0x633   : > { %3074 = vrot.lane.b32.xlu0 %v2787_v60, %s4967_s13  ;;  %v4560_v56 = vpop.f32.mrb[61].mxu0  ;;  %v2027_v8 = vsel %vm2026_vm10, %v2024_v27, %v1989_v44 }
 0x634   : > { %v2790_v7 = vpop.f32.mrb[62].mxu0  ;;  %v1991_v18 = vpop.permute.xlu1 %1990 }
 0x635   : > { %3076 = vrot.lane.b32.xlu1 %v2790_v7, %s4967_s13  ;;  %v4561_v48 = vpop.f32.mrb[63].mxu0  ;;  %v2028_v53 = vsel %vm2026_vm10, %v2025_v51, %v1991_v18 }
 0x63a   : > { %v2910_v58 = vpop.f32.mrb[64].mxu0  ;;  %v1997_v35 = vpop.permute.xlu0 %1996 }
 0x63b   : > { %3082 = vrot.lane.b32.xlu0 %v2910_v58, %s4968_s15  ;;  %v4572_v13 = vpop.f32.mrb[65].mxu0  ;;  %v2030_v57 = vsel %vm2029_vm11, %v2027_v8, %v1997_v35  ;;  %v3113_v8 = vld [vmem:[#allocation2 + $0x8] sm:$0xff] }
 0x63c   : > { %v2913_v59 = vpop.f32.mrb[66].mxu0  ;;  %v1999_v2 = vpop.permute.xlu1 %1998 }
 0x63d   : > { %3084 = vrot.lane.b32.xlu1 %v2913_v59, %s4968_s15  ;;  %v4573_v46 = vpop.f32.mrb[67].mxu0  ;;  %v2031_v33 = vsel %vm2029_vm11, %v2028_v53, %v1999_v2  ;;  %v3114_v2 = vld [vmem:[#allocation2 + $0x10] sm:$0xff] }
 0x642   : > { %v2005_v50 = vpop.permute.xlu0 %2004 }
 0x643   : > { %v2033_v24 = vsel %vm2032_vm12, %v2030_v57, %v2005_v50  ;;  %v4199_v50 = vld [vmem:[%s6049_s20] ss:$0 sm:$0xff] }
 0x644   : > { %v2007_v39 = vpop.permute.xlu1 %2006 }
 0x645   : > { %v2034_v5 = vsel %vm2032_vm12, %v2031_v33, %v2007_v39 }
 0x64a   : > { %v2013_v11 = vpop.permute.xlu0 %2012 }
 0x64b   : > { %v2036_v19 = vsel %vm2035_vm13, %v2033_v24, %v2013_v11 }
 0x64c   : > { %2038 = vst.msk [vmem:[#allocation4] sm:$0xff] %vm622_vm1, %v2036_v19  ;;  %v2015_v49 = vpop.permute.xlu1 %2014 }
 0x64d   : > { %v2037_v6 = vsel %vm2035_vm13, %v2034_v5, %v2015_v49 }
 0x64e   : > { %2039 = vst.msk [vmem:[#allocation4 + $0x8] sm:$0xff] %vm622_vm1, %v2037_v6 }
 0x653   : > { %v3116_v28 = vld [vmem:[#allocation4] sm:$0xff] }
 0x655   : > { %v3117_v32 = vld [vmem:[#allocation4 + $0x8] sm:$0xff] }
 0x656   : > { %v3120_v47 = vpack.c.bf16 %v3117_v32, %v3116_v28 }
 0x658   : > { %4598 = vmatprep.mubr.msk.bf16.mxu1 %vm622_vm1, %v3120_v47 }
 0x65b   : > { %v3033_v62 = vpop.f32.mrb[68].mxu0 }
 0x65c   : > { %3090 = vrot.lane.b32.xlu0 %v3033_v62, %s4969_s17  ;;  %v4584_v42 = vpop.f32.mrb[69].mxu0 }
 0x65d   : > { %v3036_v31 = vpop.f32.mrb[70].mxu0 }
 0x65e   : > { %3092 = vrot.lane.b32.xlu1 %v3036_v31, %s4969_s17  ;;  %v4585_v25 = vpop.f32.mrb[71].mxu0 }
 0x685   : > { %v3043_v38 = vpop.permute.xlu0 %3042 }
 0x686   : > { %v3096_v26 = vsel %vm970_vm4, %v5807_v0, %v3043_v38 }
 0x687   : > { %v3045_v41 = vpop.permute.xlu1 %3044 }
 0x688   : > { %v3097_v56 = vsel %vm970_vm4, %v5809_v12, %v3045_v41 }
 0x68d   : > { %v3051_v37 = vpop.permute.xlu0 %3050 }
 0x68e   : > { %v3098_v22 = vsel %vm2020_vm8, %v3096_v26, %v3051_v37 }
 0x68f   : > { %v3053_v54 = vpop.permute.xlu1 %3052 }
 0x690   : > { %v3099_v7 = vsel %vm2020_vm8, %v3097_v56, %v3053_v54 }
 0x695   : > { %v3059_v61 = vpop.permute.xlu0 %3058 }
 0x696   : > { %v3100_v29 = vsel %vm2023_vm9, %v3098_v22, %v3059_v61 }
 0x697   : > { %v3061_v15 = vpop.permute.xlu1 %3060 }
 0x698   : > { %v3101_v1 = vsel %vm2023_vm9, %v3099_v7, %v3061_v15 }
 0x69d   : > { %v3067_v16 = vpop.permute.xlu0 %3066 }
 0x69e   : > { %v3102_v40 = vsel %vm2026_vm10, %v3100_v29, %v3067_v16 }
 0x69f   : > { %v3069_v4 = vpop.permute.xlu1 %3068 }
 0x6a0   : > { %v3103_v14 = vsel %vm2026_vm10, %v3101_v1, %v3069_v4  ;;  %v4718_v1 = vld [vmem:[%s5095_s28 + $0x1c] ss:$12 sps:$4 sm:$0xff]  }
 0x6a5   : > { %v3075_v3 = vpop.permute.xlu0 %3074 }
 0x6a6   : > { %v3104_v63 = vsel %vm2029_vm11, %v3102_v40, %v3075_v3  ;;  %v4715_v40 = vld [vmem:[%s5095_s28 + $0x4] ss:$12 sps:$4 sm:$0xff]  }
 0x6a7   : > { %v3077_v17 = vpop.permute.xlu1 %3076  ;;  %3467 = vmatprep.subr.bf16.mxu0 %v4715_v40  ;;  %v4744_v40 = vld [vmem:[%s5110_s30 + $0x88] sm:$0xff]  }
 0x6a8   : > { %v3105_v13 = vsel %vm2029_vm11, %v3103_v14, %v3077_v17  ;;  %v4719_v14 = vld [vmem:[%s5095_s28 + $0x8] ss:$12 sps:$4 sm:$0xff]  }
 0x6a9   : > { %4602 = vmatprep.subr.bf16.mxu1 %v4719_v14 }
 0x6ad   : > { %v3083_v60 = vpop.permute.xlu0 %3082 }
 0x6ae   : > { %v3106_v0 = vsel %vm2032_vm12, %v3104_v63, %v3083_v60  ;;  %v4716_v63 = vld [vmem:[%s5095_s28 + $0x18] ss:$12 sps:$4 sm:$0xff]  }
 0x6af   : > { %v3085_v48 = vpop.permute.xlu1 %3084 }
 0x6b0   : > { %v3107_v34 = vsel %vm2032_vm12, %v3105_v13, %v3085_v48  ;;  %v4713_v48 = vld [vmem:[%s5095_s28] ss:$12 sps:$4 sm:$0xff]  }
 0x6b1   : > { %3468 = vmatpush1.bf16.msra.mxu0 %v4713_v48  ;;  %v4723_v13 = vld [vmem:[%s5095_s28 + $0x20] ss:$12 sps:$4 sm:$0xff]   ;;  %v4745_v48 = vld [vmem:[%s5110_s30 + $0x58] sm:$0xff]  }
 0x6b2   : > { %3469 = vmatprep.subr.bf16.mxu0 %v4718_v1  ;;  %v4746_v1 = vld [vmem:[%s5110_s30 + $0x18] sm:$0xff]  }
 0x6b5   : > { %3470 = vmatpush1.bf16.msra.mxu0 %v4716_v63  ;;  %v4747_v63 = vld [vmem:[%s5110_s30 + $0x90] sm:$0xff]  }
 0x6ce   : > { %v3091_v58 = vpop.permute.xlu0 %3090 }
 0x6cf   : > { %v3108_v12 = vsel %vm2035_vm13, %v3106_v0, %v3091_v58  ;;  %v4722_v0 = vld [vmem:[%s5095_s28 + $0x34] ss:$12 sps:$4 sm:$0xff]   ;;  %v4720_v58 = vld [vmem:[%s5095_s28 + $0x30] ss:$12 sps:$4 sm:$0xff]  }
 0x6d0   : > { %3110 = vst.msk [vmem:[#allocation4 + $0x10] sm:$0xff] %vm622_vm1, %v3108_v12  ;;  %v3093_v59 = vpop.permute.xlu1 %3092  ;;  %3471 = vmatprep.subr.bf16.mxu0 %v4722_v0  ;;  %v4726_v12 = vld [vmem:[%s5095_s28 + $0x4c] ss:$12 sps:$4 sm:$0xff]   ;;  %v4749_v0 = vld [vmem:[%s5110_s30 + $0x20] sm:$0xff]  }
 0x6d1   : > { %v3109_v46 = vsel %vm2035_vm13, %v3107_v34, %v3093_v59  ;;  %3472 = vmatpush1.bf16.msra.mxu0 %v4720_v58  ;;  %v4724_v34 = vld [vmem:[%s5095_s28 + $0x48] ss:$12 sps:$4 sm:$0xff]   ;;  %v4727_v59 = vld [vmem:[%s5095_s28 + $0x38] ss:$12 sps:$4 sm:$0xff]  }
 0x6d2   : > { %3111 = vst.msk [vmem:[#allocation4 + $0x18] sm:$0xff] %vm622_vm1, %v3109_v46  ;;  %3473 = vmatprep.subr.bf16.mxu0 %v4726_v12  ;;  %v4730_v46 = vld [vmem:[%s5095_s28 + $0x64] ss:$12 sps:$4 sm:$0xff]   ;;  %v4750_v58 = vld [vmem:[%s5110_s30 + $0x98] sm:$0xff]   ;;  %v4752_v12 = vld [vmem:[%s5110_s30 + $0x28] sm:$0xff]  }
 0x6d5   : > { %3474 = vmatpush1.bf16.msra.mxu0 %v4724_v34  ;;  %v4753_v34 = vld [vmem:[%s5110_s30 + $0xa0] sm:$0xff]  }
 0x6d6   : > { %3475 = vmatprep.subr.bf16.mxu0 %v4730_v46  ;;  %v4755_v46 = vld [vmem:[%s5110_s30 + $0x30] sm:$0xff]  }
 0x6d7   : > { %v3118_v44 = vld [vmem:[#allocation4 + $0x10] sm:$0xff] }
 0x6d9   : > { %v3119_v18 = vld [vmem:[#allocation4 + $0x18] sm:$0xff] }
 0x6da   : > { %v3121_v35 = vpack.c.bf16 %v3119_v18, %v3118_v44  ;;  %v4728_v44 = vld [vmem:[%s5095_s28 + $0x60] ss:$12 sps:$4 sm:$0xff]   ;;  %v4731_v18 = vld [vmem:[%s5095_s28 + $0x50] ss:$12 sps:$4 sm:$0xff]  }
 0x6db   : > { %3476 = vmatpush1.bf16.msra.mxu0 %v4728_v44  ;;  %v4756_v44 = vld [vmem:[%s5110_s30 + $0xa8] sm:$0xff]  }
 0x6dc   : > { %4599 = vmatmul.mubr.msk.bf16.vlgmr.msra.gmra.mrb[68].mxu1 %vm622_vm1, %v3121_v35  ;;  %v4734_v35 = vld [vmem:[%s5095_s28 + $0x7c] ss:$12 sps:$4 sm:$0xff]  }
 0x6dd   : > { %4603 = vmatpush3.bf16.msra.mxu1 %v4719_v14  ;;  %3477 = vmatprep.subr.bf16.mxu0 %v4734_v35  ;;  %v4748_v14 = vld [vmem:[%s5110_s30 + $0x60] sm:$0xff]   ;;  %v4758_v35 = vld [vmem:[%s5110_s30 + $0x38] sm:$0xff]  }
 0x6de   : > { %4604 = vmatprep.subr.bf16.mxu1 %v4723_v13 }
 0x6e1   : > { %4605 = vmatpush3.bf16.msra.mxu1 %v4723_v13  ;;  %v4751_v13 = vld [vmem:[%s5110_s30 + $0x68] sm:$0xff]  }
 0x6e2   : > { %4606 = vmatprep.subr.bf16.mxu1 %v4727_v59 }
 0x6e5   : > { %4607 = vmatpush3.bf16.msra.mxu1 %v4727_v59  ;;  %v4754_v59 = vld [vmem:[%s5110_s30 + $0x70] sm:$0xff]  }
 0x6e6   : > { %4608 = vmatprep.subr.bf16.mxu1 %v4731_v18 }
 0x6e9   : > { %4609 = vmatpush3.bf16.msra.mxu1 %v4731_v18  ;;  %v4757_v18 = vld [vmem:[%s5110_s30 + $0x78] sm:$0xff]  }
 0x7af   : > { %v4600_v30 = vpop.f32.mrb[68].mxu1 }
 0x7b0   : > { %v3227_v27 = vadd.f32 %v4600_v30, %v3114_v2  ;;  %v3210_v9 = vpop.f32.mrb[69].mxu1  ;;  %v4732_v2 = vld [vmem:[%s5095_s28 + $0x78] ss:$12 sps:$4 sm:$0xff]   ;;  %v4736_v30 = vld [vmem:[%s5095_s28 + $0x80] ss:$12 sps:$4 sm:$0xff]  }
 0x7b1   : > { %v3225_v39 = vadd.f32 %v3210_v9, %v3112_v52  ;;  %v4601_v51 = vpop.f32.mrb[70].mxu1  ;;  %v4735_v52 = vld [vmem:[%s5095_s28 + $0x68] ss:$12 sps:$4 sm:$0xff]   ;;  %3478 = vmatpush1.bf16.msra.mxu0 %v4732_v2 }
 0x7b2   : > { %v3238_v57 = vadd.f32 %v4199_v50, %v3227_v27  ;;  %v3228_v53 = vadd.f32 %v4601_v51, %v3115_v10  ;;  %v3213_v24 = vpop.f32.mrb[71].mxu1  ;;  %4610 = vmatprep.subr.bf16.mxu1 %v4735_v52  ;;  %v4759_v2 = vld [vmem:[%s5110_s30 + $0xb0] sm:$0xff]  }
 0x7b3   : > { %v3236_v11 = vadd.f32 %v4199_v50, %v3225_v39  ;;  %v3226_v33 = vadd.f32 %v3213_v24, %v3113_v8  ;;  %4611 = vmatpush3.bf16.msra.mxu1 %v4735_v52  ;;  %v4760_v52 = vld [vmem:[%s5110_s30 + $0xb8] sm:$0xff]  }
 0x7b4   : > { %3242 = vst.msk [vmem:[#allocation2 + $0x10] sm:$0xff] %vm622_vm1, %v3238_v57  ;;  %v3239_v19 = vadd.f32 %v4199_v50, %v3228_v53  ;;  %4612 = vmatprep.subr.bf16.mxu1 %v4736_v30 }
 0x7b5   : > { %3240 = vst.msk [vmem:[#allocation2] sm:$0xff] %vm622_vm1, %v3236_v11  ;;  %v3237_v5 = vadd.f32 %v4199_v50, %v3226_v33  ;;  %v4737_v50 = vld [vmem:[%s5110_s30 + $0x40] sm:$0xff]  }
 0x7b6   : > { %3243 = vst.msk [vmem:[#allocation2 + $0x18] sm:$0xff] %vm622_vm1, %v3239_v19  ;;  %4340 = vmatprep.subr.bf16.mxu0 %v4737_v50 }
 0x7b7   : > { %3241 = vst.msk [vmem:[#allocation2 + $0x8] sm:$0xff] %vm622_vm1, %v3237_v5  ;;  %4613 = vmatpush3.bf16.msra.mxu1 %v4736_v30  ;;  %v3348_v30 = vld [vmem:[%s5100_s1] sm:$0x7] }
 0x7b8   : > { %v3353_v50 = vrot.slane %v3348_v30, %v728_v21 }
 0x7bb   : > { %v5884_v36 = vld [vmem:[#allocation2 + $0x10] sm:$0xff] }
 0x7bc   : > { %v5878_v49 = vld [vmem:[#allocation2] sm:$0xff]  ;;  %v3254_v28 = vsel %vm622_vm1, %v5884_v36, 0.0 }
 0x7bd   : > { %v3248_v6 = vsel %vm622_vm1, %v5878_v49, 0.0  ;;  %v5890_v32 = vld [vmem:[#allocation2 + $0x18] sm:$0xff] }
 0x7be   : > { %3249 = vadd.xlane.f32.xlu0 %v3248_v6  ;;  %v5882_v55 = vld [vmem:[#allocation2 + $0x8] sm:$0xff]  ;;  %v3257_v47 = vsel %vm622_vm1, %v5890_v32, 0.0  ;;  %v4200_v6 = vld [vmem:[%s6051_s24] ss:$0 sm:$0xff] }
 0x7bf   : > { %v3251_v43 = vsel %vm622_vm1, %v5882_v55, 0.0 }
 0x7c0   : > { %3252 = vadd.xlane.f32.xlu1 %v3251_v43 }
 0x7c2   : > { %3255 = vadd.xlane.f32.xlu0 %v3254_v28 }
 0x7c6   : > { %3258 = vadd.xlane.f32.xlu0 %v3257_v47 }
 0x84b   : > { %v3250_v62 = vpop.xlane.xlu0 %3249 }
 0x84c   : > { %v3260_v42 = vmul.f32 0.010416667, %v3250_v62 }
 0x84d   : > { %v3253_v31 = vpop.xlane.xlu1 %3252 }
 0x84e   : > { %v5895_v25 = vsub.f32 %v5878_v49, %v3260_v42  ;;  %v3261_v38 = vmul.f32 0.010416667, %v3253_v31  ;;  %v4201_v31 = vld [vmem:[%s6052_s18] ss:$0 sm:$0xff] }
 0x84f   : > { %v3256_v41 = vpop.xlane.xlu0 %3255 }
 0x850   : > { %v5898_v37 = vsub.f32 %v5882_v55, %v3261_v38  ;;  %v3262_v54 = vmul.f32 0.010416667, %v3256_v41  ;;  %v3268_v61 = vmul.f32 %v5895_v25, %v5895_v25 }
 0x852   : > { %v5903_v15 = vsub.f32 %v5884_v36, %v3262_v54  ;;  %v3272_v16 = vsel %vm622_vm1, %v3268_v61, 0.0  ;;  %v3269_v4 = vmul.f32 %v5898_v37, %v5898_v37 }
 0x853   : > { %3273 = vadd.xlane.f32.xlu0 %v3272_v16  ;;  %v3259_v3 = vpop.xlane.xlu0 %3258 }
 0x854   : > { %v3263_v17 = vmul.f32 0.010416667, %v3259_v3  ;;  %v3275_v26 = vsel %vm622_vm1, %v3269_v4, 0.0  ;;  %v3270_v22 = vmul.f32 %v5903_v15, %v5903_v15  ;;  %v4738_v4 = vld [vmem:[%s5110_s30] sm:$0xff]  }
 0x855   : > { %3276 = vadd.xlane.f32.xlu1 %v3275_v26 }
 0x856   : > { %v5912_v60 = vsub.f32 %v5890_v32, %v3263_v17  ;;  %v3278_v56 = vsel %vm622_vm1, %v3270_v22, 0.0 }
 0x857   : > { %3279 = vadd.xlane.f32.xlu0 %v3278_v56 }
 0x858   : > { %v3271_v29 = vmul.f32 %v5912_v60, %v5912_v60 }
 0x85a   : > { %v3281_v7 = vsel %vm622_vm1, %v3271_v29, 0.0  ;;  %v4741_v29 = vld [vmem:[%s5110_s30 + $0x80] sm:$0xff]  }
 0x85b   : > { %3282 = vadd.xlane.f32.xlu1 %v3281_v7  ;;  %4618 = vmatprep.subr.bf16.mxu1 %v4741_v29  ;;  %v4742_v7 = vld [vmem:[%s5110_s30 + $0x50] sm:$0xff]  }
 0x8e0   : > { %v3274_v10 = vpop.xlane.xlu0 %3273 }
 0x8e1   : > { %v3284_v27 = vmul.f32 0.010416667, %v3274_v10  ;;  %v3357_v10 = vrot.slane %v3348_v30, %v732_v23 }
 0x8e2   : > { %v3277_v9 = vpop.xlane.xlu1 %3276 }
 0x8e3   : > { %v3288_v8 = vadd.f32 1e-05, %v3284_v27  ;;  %v3285_v39 = vmul.f32 0.010416667, %v3277_v9 }
 0x8e4   : > { %v3280_v51 = vpop.xlane.xlu0 %3279 }
 0x8e5   : > { %4897 = vrsqrt.f32 %v3288_v8  ;;  %v3289_v57 = vadd.f32 1e-05, %v3285_v39  ;;  %v3286_v53 = vmul.f32 0.010416667, %v3280_v51 }
 0x8e7   : > { %4899 = vrsqrt.f32 %v3289_v57  ;;  %v3290_v24 = vadd.f32 1e-05, %v3286_v53 }
 0x8e8   : > { %v3283_v11 = vpop.xlane.xlu1 %3282 }
 0x8e9   : > { %4901 = vrsqrt.f32 %v3290_v24  ;;  %v3287_v33 = vmul.f32 0.010416667, %v3283_v11  ;;  %v6053_v11 = vsub.s32 2, %v5187_v20 }
 0x8eb   : > { %v3291_v19 = vadd.f32 1e-05, %v3287_v33  ;;  %v3361_v33 = vrot.slane %v3348_v30, %v6053_v11 }
 0x8ed   : > { %4903 = vrsqrt.f32 %v3291_v19 }
 0x8ef   : > { %v4898_v5 = vpop.eup %4897 }
 0x8f0   : > { %v3296_v43 = vmul.f32 %v4898_v5, %v5895_v25 }
 0x8f1   : > { %v4900_v28 = vpop.eup %4899 }
 0x8f2   : > { %v3307_v47 = vmul.f32 %v4200_v6, %v3296_v43  ;;  %v3297_v62 = vmul.f32 %v4900_v28, %v5898_v37  ;;  %v4739_v37 = vld [vmem:[%s5110_s30 + $0x48] sm:$0xff]  }
 0x8f3   : > { %v4902_v42 = vpop.eup %4901 }
 0x8f4   : > { %v3308_v38 = vmul.f32 %v4200_v6, %v3297_v62  ;;  %v3298_v41 = vmul.f32 %v4902_v42, %v5903_v15  ;;  %v3318_v54 = vadd.f32 %v4201_v31, %v3307_v47  ;;  %v4740_v15 = vld [vmem:[%s5110_s30 + $0x8] sm:$0xff]  }
 0x8f6   : > { %v3319_v61 = vadd.f32 %v4201_v31, %v3308_v38  ;;  %v3309_v3 = vmul.f32 %v4200_v6, %v3298_v41 }
 0x8f7   : > { %v4904_v16 = vpop.eup %4903 }
 0x8f8   : > { %v3299_v25 = vmul.f32 %v4904_v16, %v5912_v60  ;;  %v3322_v17 = vpack.c.bf16 %v3319_v61, %v3318_v54  ;;  %v3320_v22 = vadd.f32 %v4201_v31, %v3309_v3 }
 0x8fa   : > { %v3310_v26 = vmul.f32 %v4200_v6, %v3299_v25  ;;  %4220 = vmatmul.mubr.msk.bf16.vlgmr.msra.gmra.mrb[72].mxu0 %vm622_vm1, %v3322_v17  ;;  %4614 = vmatprep.mubr.msk.bf16.mxu1 %vm622_vm1, %v3322_v17 }
 0x8fb   : > { %3509 = vmatprep.mubr.bf16.mxu0 %v4937_v45  ;;  %4341 = vmatpush3.bf16.msra.mxu0 %v4738_v4  ;;  %v4743_v45 = vld [vmem:[%s5110_s30 + $0x10] sm:$0xff]  }
 0x8fc   : > { %v3321_v56 = vadd.f32 %v4201_v31, %v3310_v26  ;;  %4342 = vmatprep.subr.bf16.mxu0 %v4739_v37 }
 0x8fe   : > { %v3323_v60 = vpack.c.bf16 %v3321_v56, %v3320_v22 }
 0x8ff   : > { %4343 = vmatpush3.bf16.msra.mxu0 %v4740_v15 }
 0x900   : > { %4615 = vmatmul.mubr.msk.bf16.vlgmr.msra.gmra.mrb[72].mxu1 %vm622_vm1, %v3323_v60  ;;  %4344 = vmatprep.subr.bf16.mxu0 %v4742_v7 }
 0x901   : > { %4619 = vmatpush3.bf16.msra.mxu1 %v4741_v29 }
 0x902   : > { %4221 = vmatmul.mubr.msk.bf16.gmra.mrb[76].mxu0 %vm622_vm1, %v3323_v60  ;;  %4620 = vmatprep.subr.bf16.mxu1 %v4744_v40 }
 0x903   : > { %4345 = vmatpush3.bf16.msra.mxu0 %v4743_v45 }
 0x904   : > { %4346 = vmatprep.subr.bf16.mxu0 %v4745_v48 }
 0x905   : > { %4621 = vmatpush3.bf16.msra.mxu1 %v4744_v40 }
 0x906   : > { %4622 = vmatprep.subr.bf16.mxu1 %v4747_v63 }
 0x907   : > { %4347 = vmatpush3.bf16.msra.mxu0 %v4746_v1 }
 0x908   : > { %4348 = vmatprep.subr.bf16.mxu0 %v4748_v14 }
 0x909   : > { %4623 = vmatpush3.bf16.msra.mxu1 %v4747_v63 }
 0x90a   : > { %4624 = vmatprep.subr.bf16.mxu1 %v4750_v58 }
 0x90b   : > { %4349 = vmatpush3.bf16.msra.mxu0 %v4749_v0 }
 0x90c   : > { %4350 = vmatprep.subr.bf16.mxu0 %v4751_v13 }
 0x90d   : > { %4625 = vmatpush3.bf16.msra.mxu1 %v4750_v58 }
 0x90e   : > { %4626 = vmatprep.subr.bf16.mxu1 %v4753_v34 }
 0x90f   : > { %4351 = vmatpush3.bf16.msra.mxu0 %v4752_v12 }
 0x910   : > { %4352 = vmatprep.subr.bf16.mxu0 %v4754_v59 }
 0x911   : > { %4627 = vmatpush3.bf16.msra.mxu1 %v4753_v34 }
 0x912   : > { %4628 = vmatprep.subr.bf16.mxu1 %v4756_v44 }
 0x913   : > { %4353 = vmatpush3.bf16.msra.mxu0 %v4755_v46 }
 0x914   : > { %4354 = vmatprep.subr.bf16.mxu0 %v4757_v18 }
 0x915   : > { %4629 = vmatpush3.bf16.msra.mxu1 %v4756_v44 }
 0x916   : > { %4630 = vmatprep.subr.bf16.mxu1 %v4759_v2 }
 0x917   : > { %4355 = vmatpush3.bf16.msra.mxu0 %v4758_v35 }
 0x919   : > { %4631 = vmatpush3.bf16.msra.mxu1 %v4759_v2 }
 0x91a   : > { %4632 = vmatprep.subr.bf16.mxu1 %v4760_v52 }
 0x91d   : > { %4633 = vmatpush3.bf16.msra.mxu1 %v4760_v52 }
 0x9cd   : > { %v3501_v27 = vpop.f32.mrb[72].mxu0 }
 0x9ce   : > { %v3502_v9 = vadd.f32 %v3501_v27, %v3353_v50  ;;  %v3503_v8 = vpop.f32.mrb[73].mxu0 }
 0x9cf   : > { %v3504_v39 = vadd.f32 %v3503_v8, %v3357_v10  ;;  %v3505_v51 = vpop.f32.mrb[74].mxu0 }
 0x9d0   : > { %v3581_v57 = vmul.f32 0.70710677, %v3502_v9  ;;  %v3506_v53 = vadd.f32 %v3505_v51, %v3353_v50  ;;  %v3507_v24 = vpop.f32.mrb[75].mxu0  ;;  %v3569_v14 = vmul.f32 0.5, %v3502_v9 }
 0x9d1   : > { %v3582_v19 = vmul.f32 0.70710677, %v3504_v39  ;;  %v3508_v5 = vadd.f32 %v3507_v24, %v3357_v10  ;;  %v3570_v13 = vmul.f32 0.5, %v3504_v39 }
 0x9d2   : > { %4905 = verf.f32 %v3581_v57  ;;  %v3584_v6 = vmul.f32 0.70710677, %v3506_v53  ;;  %v3572_v0 = vmul.f32 0.5, %v3506_v53 }
 0x9d3   : > { %4907 = verf.f32 %v3582_v19  ;;  %v3585_v21 = vmul.f32 0.70710677, %v3508_v5  ;;  %v4616_v43 = vpop.f32.mrb[72].mxu1  ;;  %v3573_v12 = vmul.f32 0.5, %v3508_v5 }
 0x9d4   : > { %4909 = verf.f32 %v3584_v6  ;;  %v3563_v23 = vadd.f32 %v4616_v43, %v3361_v33  ;;  %v3554_v28 = vpop.f32.mrb[73].mxu1 }
 0x9d5   : > { %4911 = verf.f32 %v3585_v21  ;;  %v3555_v47 = vadd.f32 %v3554_v28, %v3361_v33  ;;  %v3511_v62 = vpop.f32.mrb[76].mxu0  ;;  %v4617_v42 = vpop.f32.mrb[74].mxu1 }
 0x9d6   : > { %v3589_v31 = vmul.f32 0.70710677, %v3563_v23  ;;  %v3512_v38 = vadd.f32 %v3511_v62, %v3353_v50  ;;  %v3566_v41 = vadd.f32 %v4617_v42, %v3361_v33  ;;  %v3513_v54 = vpop.f32.mrb[77].mxu0  ;;  %v3557_v20 = vpop.f32.mrb[75].mxu1  ;;  %v3577_v51 = vmul.f32 0.5, %v3563_v23 }
 0x9d7   : > { %v3583_v61 = vmul.f32 0.70710677, %v3555_v47  ;;  %v3514_v16 = vadd.f32 %v3513_v54, %v3357_v10  ;;  %v3558_v4 = vadd.f32 %v3557_v20, %v3361_v33  ;;  %v3515_v3 = vpop.f32.mrb[78].mxu0  ;;  %v3571_v24 = vmul.f32 0.5, %v3555_v47 }
 0x9d8   : > { %4913 = verf.f32 %v3589_v31  ;;  %v3587_v25 = vmul.f32 0.70710677, %v3512_v38  ;;  %v3517_v17 = vpop.f32.mrb[79].mxu0  ;;  %v3592_v37 = vmul.f32 0.70710677, %v3566_v41  ;;  %v3516_v22 = vadd.f32 %v3515_v3, %v3353_v50 }
 0x9d9   : > { %4915 = verf.f32 %v3583_v61  ;;  %v3588_v26 = vmul.f32 0.70710677, %v3514_v16  ;;  %v3586_v15 = vmul.f32 0.70710677, %v3558_v4  ;;  %v3518_v56 = vadd.f32 %v3517_v17, %v3357_v10 }
 0x9da   : > { %4917 = verf.f32 %v3587_v25  ;;  %v3590_v29 = vmul.f32 0.70710677, %v3516_v22  ;;  %v3580_v57 = vmul.f32 0.5, %v3566_v41  ;;  %v3575_v11 = vmul.f32 0.5, %v3512_v38 }
 0x9db   : > { %4919 = verf.f32 %v3592_v37  ;;  %v3591_v40 = vmul.f32 0.70710677, %v3518_v56  ;;  %v3574_v19 = vmul.f32 0.5, %v3558_v4  ;;  %v3576_v42 = vmul.f32 0.5, %v3514_v16 }
 0x9dc   : > { %v4906_v60 = vpop.eup %4905  ;;  %4921 = verf.f32 %v3588_v26  ;;  %v3578_v31 = vmul.f32 0.5, %v3516_v22  ;;  %v3579_v23 = vmul.f32 0.5, %v3518_v56 }
 0x9dd   : > { %v4908_v7 = vpop.eup %4907  ;;  %v3605_v45 = vadd.f32 1.0, %v4906_v60  ;;  %4923 = verf.f32 %v3586_v15 }
 0x9de   : > { %v4910_v48 = vpop.eup %4909  ;;  %v3606_v1 = vadd.f32 1.0, %v4908_v7  ;;  %4925 = verf.f32 %v3590_v29 }
 0x9df   : > { %v4912_v63 = vpop.eup %4911  ;;  %v3608_v58 = vadd.f32 1.0, %v4910_v48  ;;  %4927 = verf.f32 %v3591_v40  ;;  %v3617_v59 = vmul.f32 %v3605_v45, %v3569_v14 }
 0x9e0   : > { %v3609_v34 = vadd.f32 1.0, %v4912_v63  ;;  %v3618_v18 = vmul.f32 %v3606_v1, %v3570_v13  ;;  %v4248_v63 = vld [vmem:[%s603_s16] ss:$0 sm:$0xff] }
 0x9e1   : > { %v3620_v46 = vmul.f32 %v3608_v58, %v3572_v0 }
 0x9e2   : > { %v4914_v44 = vpop.eup %4913  ;;  %v3621_v35 = vmul.f32 %v3609_v34, %v3573_v12 }
 0x9e3   : > { %v4916_v2 = vpop.eup %4915  ;;  %v3657_v52 = vpack.c.bf16 %v3620_v46, %v3617_v59  ;;  %v3613_v50 = vadd.f32 1.0, %v4914_v44 }
 0x9e4   : > { %v4918_v30 = vpop.eup %4917  ;;  %v3658_v10 = vpack.c.bf16 %v3621_v35, %v3618_v18  ;;  %v3607_v9 = vadd.f32 1.0, %v4916_v2 }
 0x9e5   : > { %v4920_v27 = vpop.eup %4919  ;;  %v3611_v33 = vadd.f32 1.0, %v4918_v30  ;;  %v3625_v6 = vmul.f32 %v3613_v50, %v3577_v51 }
 0x9e6   : > { %v4922_v8 = vpop.eup %4921  ;;  %v3616_v53 = vadd.f32 1.0, %v4920_v27  ;;  %3887 = vmatprep.mubr.bf16.mxu0 %v3658_v10  ;;  %v3619_v20 = vmul.f32 %v3607_v9, %v3571_v24 }
 0x9e7   : > { %v4924_v39 = vpop.eup %4923  ;;  %3888 = vmatmul.mubr.bf16.vlgmr.msra.gmra.mrb[80].mxu0 %v3657_v52  ;;  %v3612_v43 = vadd.f32 1.0, %v4922_v8  ;;  %v3623_v25 = vmul.f32 %v3611_v33, %v3575_v11 }
 0x9e8   : > { %v4926_v5 = vpop.eup %4925  ;;  %v3628_v21 = vmul.f32 %v3616_v53, %v3580_v57  ;;  %v3610_v28 = vadd.f32 1.0, %v4924_v39 }
 0x9e9   : > { %v4928_v62 = vpop.eup %4927  ;;  %v3614_v54 = vadd.f32 1.0, %v4926_v5  ;;  %v3624_v38 = vmul.f32 %v3612_v43, %v3576_v42 }
 0x9ea   : > { %v3662_v41 = vpack.c.bf16 %v3628_v21, %v3625_v6  ;;  %v3622_v61 = vmul.f32 %v3610_v28, %v3574_v19  ;;  %v3615_v3 = vadd.f32 1.0, %v4928_v62 }
 0x9eb   : > { %v3626_v47 = vmul.f32 %v3614_v54, %v3578_v31 }
 0x9ec   : > { %v3627_v17 = vmul.f32 %v3615_v3, %v3579_v23  ;;  %v3659_v4 = vpack.c.bf16 %v3622_v61, %v3619_v20 }
 0x9ed   : > { %v3660_v37 = vpack.c.bf16 %v3626_v47, %v3623_v25 }
 0x9ee   : > { %4634 = vmatprep.mubr.bf16.mxu1 %v3659_v4  ;;  %v3661_v26 = vpack.c.bf16 %v3627_v17, %v3624_v38 }
 0x9ef   : > { %4635 = vmatmul.mubr.bf16.vlgmr.msra.gmra.mrb[76].mxu1 %v3662_v41 }
 0x9f0   : > { %3895 = vmatprep.mubr.bf16.mxu0 %v3661_v26 }
 0x9f1   : > { %3896 = vmatmul.mubr.bf16.gmra.mrb[84].mxu0 %v3660_v37 }
 0xaba   : > { %v4356_v16 = vpop.f32.mrb[80].mxu0 }
 0xabb   : > { %v4357_v15 = vpop.f32.mrb[81].mxu0 }
 0xabc   : > { %v4358_v22 = vadd.f32 %v4357_v15, %v4356_v16  ;;  %v4359_v56 = vpop.f32.mrb[82].mxu0 }
 0xabd   : > { %v4360_v60 = vpop.f32.mrb[83].mxu0 }
 0xabe   : > { %v4361_v29 = vadd.f32 %v4360_v60, %v4359_v56 }
 0xac2   : > { %v4636_v7 = vpop.f32.mrb[76].mxu1 }
 0xac3   : > { %v3938_v45 = vpop.f32.mrb[77].mxu1 }
 0xac4   : > { %v3939_v40 = vadd.f32 %v4358_v22, %v3938_v45  ;;  %v4362_v48 = vpop.f32.mrb[84].mxu0  ;;  %v4637_v1 = vpop.f32.mrb[78].mxu1 }
 0xac5   : > { %v4363_v14 = vpop.f32.mrb[85].mxu0  ;;  %v3941_v0 = vpop.f32.mrb[79].mxu1 }
 0xac6   : > { %v3953_v58 = vadd.f32 %v3939_v40, %v5878_v49  ;;  %v4364_v13 = vadd.f32 %v4363_v14, %v4362_v48  ;;  %v3942_v12 = vadd.f32 %v4361_v29, %v3941_v0  ;;  %v4365_v34 = vpop.f32.mrb[86].mxu0 }
 0xac7   : > { %v4366_v59 = vpop.f32.mrb[87].mxu0 }
 0xac8   : > { %v3964_v46 = vadd.f32 %v4248_v63, %v3953_v58  ;;  %v3947_v44 = vadd.f32 %v4636_v7, %v4364_v13  ;;  %v3954_v18 = vadd.f32 %v3942_v12, %v5882_v55  ;;  %v4367_v35 = vadd.f32 %v4366_v59, %v4365_v34 }
 0xaca   : > { %3968 = vst.msk [vmem:[#allocation2] sm:$0xff] %vm622_vm1, %v3964_v46  ;;  %v3955_v2 = vadd.f32 %v3947_v44, %v5884_v36  ;;  %v3965_v52 = vadd.f32 %v4248_v63, %v3954_v18  ;;  %v3950_v30 = vadd.f32 %v4637_v1, %v4367_v35  ;;  %3975 = sbr.rel (%p4249_p5) target bundleno = 2777 (0xad9), region = 80 }
 0xacc   : > { %v3966_v50 = vadd.f32 %v4248_v63, %v3955_v2  ;;  %3969 = vst.msk [vmem:[#allocation2 + $0x8] sm:$0xff] %vm622_vm1, %v3965_v52  ;;  %v3956_v49 = vadd.f32 %v3950_v30, %v5890_v32 }
 0xace   : > { %3970 = vst.msk [vmem:[#allocation2 + $0x10] sm:$0xff] %vm622_vm1, %v3966_v50  ;;  %v3967_v10 = vadd.f32 %v4248_v63, %v3956_v49 }
 0xad0   : > { %3971 = vst.msk [vmem:[#allocation2 + $0x18] sm:$0xff] %vm622_vm1, %v3967_v10 }
 0xad1   : > { %v3976_v55 = vld [vmem:[#allocation2] sm:$0xff] }
 0xad2   : > { %3980 = vst.msk [vmem:[%s6054_s25] sm:$0xff] %vm622_vm1, %v3976_v55 }
 0xad3   : > { %v3977_v27 = vld [vmem:[#allocation2 + $0x8] sm:$0xff] }
 0xad4   : > { %3981 = vst.msk [vmem:[%s6055_s19 + $0x8] sm:$0xff] %vm622_vm1, %v3977_v27 }
 0xad5   : > { %v3978_v8 = vld [vmem:[#allocation2 + $0x10] sm:$0xff] }
 0xad6   : > { %3982 = vst.msk [vmem:[%s6055_s19 + $0x10] sm:$0xff] %vm622_vm1, %v3978_v8 }
 0xad7   : > { %v3979_v36 = vld [vmem:[#allocation2 + $0x18] sm:$0xff] }
 0xad8   : > { %3983 = vst.msk [vmem:[%s6055_s19 + $0x18] sm:$0xff] %vm622_vm1, %v3979_v36 }
 0xad9 PF: > { %s6056_s22 = sld [smem:[#allocation6_spill]] }
 0xadf   : > { %s23_s25 = sadd.s32 1, %s6056_s22  }
 0xae0   : > { %p20_p6 = scmp.ge.s32.totalorder %s23_s25, 10  }
 0xae2   :  { %22 = sbr.rel (!%p20_p6) target bundleno = 6 (0x6), region = 139 }

// kernel: hybrid_transformer_forward.10
= control target key start
LH: loop header
LB: loop body
LE: loop exit
PB: predicated region body
PF: predicated region fallthrough
CT: control target
= control target key end

     0   :  { %vm794_vm0 = vcmask 785408   ;;  %s2404_s1 = inlined_call_operand.vmem [shape: bf16[864,128], index: 1, kind: input, shape index: {}]   ;;  %s2405_s0 = inlined_call_operand.vmem [shape: bf16[128,864], index: 0, kind: input, shape index: {}]   ;;  %s2406_s2 = inlined_call_operand.vmem [shape: f32[1,128], index: 2, kind: input, shape index: {}]   ;;  %s2407_s3 = inlined_call_operand.vmem [shape: f32[1,128], index: 3, kind: input, shape index: {}]   ;;  %s2408_s4 = inlined_call_operand.vmem [shape: f32[128,128], index: 4, kind: output, shape index: {}]  }
   0x1   :  { %v1707_v0 = vld [vmem:[%s2404_s1 + $0x40] sm:$0xff]   ;;  %v1711_v4 = vld [vmem:[%s2404_s1 + $0x48] sm:$0xff]   ;;  %v1715_v8 = vld [vmem:[%s2404_s1 + $0x50] sm:$0xff]  }
   0x2   :  { %v1708_v1 = vld [vmem:[%s2404_s1 + $0xc0] sm:$0xff]   ;;  %1473 = vmatprep.subr.bf16.mxu0 %v1707_v0  ;;  %v1712_v5 = vld [vmem:[%s2404_s1 + $0xc8] sm:$0xff]   ;;  %v1716_v9 = vld [vmem:[%s2404_s1 + $0xd0] sm:$0xff]  }
   0x3   :  { %v1709_v2 = vld [vmem:[%s2404_s1] sm:$0xff]   ;;  %1537 = vmatprep.subr.bf16.mxu1 %v1708_v1  ;;  %v1713_v6 = vld [vmem:[%s2404_s1 + $0x8] sm:$0xff]   ;;  %v1717_v10 = vld [vmem:[%s2404_s1 + $0x10] sm:$0xff]  }
   0x4   :  { %v1710_v3 = vld [vmem:[%s2404_s1 + $0x80] sm:$0xff]   ;;  %1474 = vmatpush3.bf16.msra.mxu0 %v1709_v2  ;;  %v1714_v7 = vld [vmem:[%s2404_s1 + $0x88] sm:$0xff]   ;;  %v1718_v11 = vld [vmem:[%s2404_s1 + $0x90] sm:$0xff]  }
   0x5   :  { %1538 = vmatpush3.bf16.msra.mxu1 %v1710_v3  ;;  %1475 = vmatprep.subr.bf16.mxu0 %v1711_v4  ;;  %v1719_v12 = vld [vmem:[%s2404_s1 + $0x58] sm:$0xff]   ;;  %v1723_v16 = vld [vmem:[%s2404_s1 + $0x60] sm:$0xff]   ;;  %v1727_v20 = vld [vmem:[%s2404_s1 + $0x68] sm:$0xff]  }
   0x6   :  { %1539 = vmatprep.subr.bf16.mxu1 %v1712_v5  ;;  %v1720_v13 = vld [vmem:[%s2404_s1 + $0xd8] sm:$0xff]   ;;  %v1724_v17 = vld [vmem:[%s2404_s1 + $0xe0] sm:$0xff]   ;;  %v1728_v21 = vld [vmem:[%s2404_s1 + $0xe8] sm:$0xff]  }
   0x7   :  { %v1721_v14 = vld [vmem:[%s2404_s1 + $0x18] sm:$0xff]   ;;  %v1725_v18 = vld [vmem:[%s2404_s1 + $0x20] sm:$0xff]   ;;  %v1729_v22 = vld [vmem:[%s2404_s1 + $0x28] sm:$0xff]  }
   0x8   :  { %1476 = vmatpush3.bf16.msra.mxu0 %v1713_v6  ;;  %v1722_v15 = vld [vmem:[%s2404_s1 + $0x98] sm:$0xff]   ;;  %v1726_v19 = vld [vmem:[%s2404_s1 + $0xa0] sm:$0xff]   ;;  %v1730_v23 = vld [vmem:[%s2404_s1 + $0xa8] sm:$0xff]  }
   0x9   :  { %1540 = vmatpush3.bf16.msra.mxu1 %v1714_v7  ;;  %1477 = vmatprep.subr.bf16.mxu0 %v1715_v8  ;;  %v1731_v24 = vld [vmem:[%s2404_s1 + $0x70] sm:$0xff]   ;;  %v1735_v28 = vld [vmem:[%s2404_s1 + $0x78] sm:$0xff]   ;;  %v1741_v33 = vld [vmem:[%s2405_s0 + $0x4] ss:$28 sps:$4 sm:$0xff]  }
   0xa   :  { %1541 = vmatprep.subr.bf16.mxu1 %v1716_v9  ;;  %v1732_v25 = vld [vmem:[%s2404_s1 + $0xf0] sm:$0xff]   ;;  %v1736_v29 = vld [vmem:[%s2404_s1 + $0xf8] sm:$0xff]   ;;  %v1742_v34 = vld [vmem:[%s2405_s0 + $0x8] ss:$28 sps:$4 sm:$0xff]   ;;  %851 = vmatprep.mubr.bf16.mxu0 %v1741_v33 }
   0xb   :  { %v1733_v26 = vld [vmem:[%s2404_s1 + $0x30] sm:$0xff]   ;;  %v1737_v30 = vld [vmem:[%s2404_s1 + $0x38] sm:$0xff]   ;;  %v1744_v35 = vld [vmem:[%s2405_s0 + $0xc] ss:$28 sps:$4 sm:$0xff]  }
   0xc   :  { %1478 = vmatpush3.bf16.msra.mxu0 %v1717_v10  ;;  %v1734_v27 = vld [vmem:[%s2404_s1 + $0xb0] sm:$0xff]   ;;  %v1738_v31 = vld [vmem:[%s2404_s1 + $0xb8] sm:$0xff]   ;;  %v1745_v36 = vld [vmem:[%s2404_s1 + $0x140] sm:$0xff]   ;;  %948 = vmatprep.mubr.bf16.mxu1 %v1744_v35 }
   0xd   :  { %1542 = vmatpush3.bf16.msra.mxu1 %v1718_v11  ;;  %1479 = vmatprep.subr.bf16.mxu0 %v1719_v12  ;;  %v1739_v32 = vld [vmem:[%s2405_s0] ss:$28 sps:$4 sm:$0xff]   ;;  %v1751_v40 = vld [vmem:[%s2405_s0 + $0x38] ss:$28 sps:$4 sm:$0xff]   ;;  %v1753_v42 = vld [vmem:[%s2404_s1 + $0x148] sm:$0xff]  }
   0xe   :  { %1543 = vmatprep.subr.bf16.mxu1 %v1720_v13  ;;  %v1746_v37 = vld [vmem:[%s2404_s1 + $0x100] sm:$0xff]   ;;  %v1747_v38 = vld [vmem:[%s2405_s0 + $0x3c] ss:$28 sps:$4 sm:$0xff]   ;;  %v1754_v43 = vld [vmem:[%s2404_s1 + $0x108] sm:$0xff]  }
   0xf   :  { %v1749_v39 = vld [vmem:[%s2405_s0 + $0x44] ss:$28 sps:$4 sm:$0xff]   ;;  %v1755_v44 = vld [vmem:[%s2405_s0 + $0x74] ss:$28 sps:$4 sm:$0xff]   ;;  %v1757_v45 = vld [vmem:[%s2405_s0 + $0x7c] ss:$28 sps:$4 sm:$0xff]  }
  0x10   :  { %1480 = vmatpush3.bf16.msra.mxu0 %v1721_v14  ;;  %v1752_v41 = vld [vmem:[%s2405_s0 + $0x40] ss:$28 sps:$4 sm:$0xff]   ;;  %v1761_v46 = vld [vmem:[%s2404_s1 + $0x150] sm:$0xff]   ;;  %v1763_v50 = vld [vmem:[%s2405_s0 + $0xac] ss:$28 sps:$4 sm:$0xff]  }
  0x11   :  { %1544 = vmatpush3.bf16.msra.mxu1 %v1722_v15  ;;  %1481 = vmatprep.subr.bf16.mxu0 %v1723_v16  ;;  %v1762_v47 = vld [vmem:[%s2404_s1 + $0x110] sm:$0xff]   ;;  %v1769_v52 = vld [vmem:[%s2404_s1 + $0x158] sm:$0xff]   ;;  %v1767_v54 = vld [vmem:[%s2405_s0 + $0xa8] ss:$28 sps:$4 sm:$0xff]  }
  0x12   :  { %1545 = vmatprep.subr.bf16.mxu1 %v1724_v17  ;;  %v1759_v48 = vld [vmem:[%s2405_s0 + $0x70] ss:$28 sps:$4 sm:$0xff]   ;;  %v1760_v49 = vld [vmem:[%s2405_s0 + $0x78] ss:$28 sps:$4 sm:$0xff]   ;;  %v1777_v55 = vld [vmem:[%s2404_s1 + $0x160] sm:$0xff]  }
  0x13   :  { %v1765_v51 = vld [vmem:[%s2405_s0 + $0xb4] ss:$28 sps:$4 sm:$0xff]   ;;  %v1770_v53 = vld [vmem:[%s2404_s1 + $0x118] sm:$0xff]   ;;  %v1778_v57 = vld [vmem:[%s2404_s1 + $0x120] sm:$0xff]  }
  0x14   :  { %1482 = vmatpush3.bf16.msra.mxu0 %v1725_v18  ;;  %v1768_v56 = vld [vmem:[%s2405_s0 + $0xb0] ss:$28 sps:$4 sm:$0xff]   ;;  %v1779_v58 = vld [vmem:[%s2404_s1 + $0x180] sm:$0xff]   ;;  %v1780_v2 = vld [vmem:[%s2405_s0 + $0x11c] ss:$28 sps:$4 sm:$0xff]  }
  0x15   :  { %1546 = vmatpush3.bf16.msra.mxu1 %v1726_v19  ;;  %1483 = vmatprep.subr.bf16.mxu0 %v1727_v20  ;;  %v1771_v59 = vld [vmem:[%s2405_s0 + $0xe4] ss:$28 sps:$4 sm:$0xff]   ;;  %v1773_v60 = vld [vmem:[%s2405_s0 + $0xec] ss:$28 sps:$4 sm:$0xff]   ;;  %v1795_v4 = vld [vmem:[%s2404_s1 + $0x170] sm:$0xff]  }
  0x16   :  { %1547 = vmatprep.subr.bf16.mxu1 %v1728_v21  ;;  %v1786_v61 = vld [vmem:[%s2404_s1 + $0x168] sm:$0xff]   ;;  %v1775_v63 = vld [vmem:[%s2405_s0 + $0xe0] ss:$28 sps:$4 sm:$0xff]   ;;  %v1796_v5 = vld [vmem:[%s2404_s1 + $0x130] sm:$0xff]  }
  0x17   :  { %v1787_v62 = vld [vmem:[%s2404_s1 + $0x128] sm:$0xff]   ;;  %v1782_v3 = vld [vmem:[%s2405_s0 + $0x124] ss:$28 sps:$4 sm:$0xff]   ;;  %v1797_v6 = vld [vmem:[%s2404_s1 + $0x190] sm:$0xff]  }
  0x18   :  { %1484 = vmatpush3.bf16.msra.mxu0 %v1729_v22  ;;  %v1776_v0 = vld [vmem:[%s2405_s0 + $0xe8] ss:$28 sps:$4 sm:$0xff]   ;;  %v1784_v7 = vld [vmem:[%s2405_s0 + $0x118] ss:$28 sps:$4 sm:$0xff]   ;;  %v1785_v8 = vld [vmem:[%s2405_s0 + $0x120] ss:$28 sps:$4 sm:$0xff]  }
  0x19   :  { %1548 = vmatpush3.bf16.msra.mxu1 %v1730_v23  ;;  %1485 = vmatprep.subr.bf16.mxu0 %v1731_v24  ;;  %v1792_v1 = vld [vmem:[%s2404_s1 + $0x188] sm:$0xff]   ;;  %v1788_v9 = vld [vmem:[%s2405_s0 + $0x154] ss:$28 sps:$4 sm:$0xff]   ;;  %v1804_v10 = vld [vmem:[%s2404_s1 + $0x178] sm:$0xff]  }
  0x1a   :  { %1549 = vmatprep.subr.bf16.mxu1 %v1732_v25  ;;  %v1790_v11 = vld [vmem:[%s2405_s0 + $0x15c] ss:$28 sps:$4 sm:$0xff]   ;;  %v1807_v14 = vld [vmem:[%s2404_s1 + $0x1a0] sm:$0xff]   ;;  %v1811_v15 = vld [vmem:[%s2404_s1 + $0x1a8] sm:$0xff]  }
  0x1b   :  { %v1805_v12 = vld [vmem:[%s2404_s1 + $0x198] sm:$0xff]   ;;  %v1793_v16 = vld [vmem:[%s2405_s0 + $0x150] ss:$28 sps:$4 sm:$0xff]   ;;  %v1802_v20 = vld [vmem:[%s2405_s0 + $0x188] ss:$28 sps:$4 sm:$0xff]  }
  0x1c   :  { %1486 = vmatpush3.bf16.msra.mxu0 %v1733_v26  ;;  %v1806_v13 = vld [vmem:[%s2404_s1 + $0x138] sm:$0xff]   ;;  %v1798_v18 = vld [vmem:[%s2405_s0 + $0x18c] ss:$28 sps:$4 sm:$0xff]   ;;  %v1800_v19 = vld [vmem:[%s2405_s0 + $0x194] ss:$28 sps:$4 sm:$0xff]  }
  0x1d   :  { %1550 = vmatpush3.bf16.msra.mxu1 %v1734_v27  ;;  %1487 = vmatprep.subr.bf16.mxu0 %v1735_v28  ;;  %v1794_v17 = vld [vmem:[%s2405_s0 + $0x158] ss:$28 sps:$4 sm:$0xff]   ;;  %v1803_v21 = vld [vmem:[%s2405_s0 + $0x190] ss:$28 sps:$4 sm:$0xff]   ;;  %v1820_v27 = vld [vmem:[%s2405_s0 + $0x88] ss:$28 sps:$4 sm:$0xff]  }
  0x1e   :  { %1551 = vmatprep.subr.bf16.mxu1 %v1736_v29  ;;  %v1810_v22 = vld [vmem:[%s2405_s0 + $0x14] ss:$28 sps:$4 sm:$0xff]   ;;  %v1814_v26 = vld [vmem:[%s2405_s0 + $0x4c] ss:$28 sps:$4 sm:$0xff]   ;;  %v1817_v29 = vld [vmem:[%s2405_s0 + $0x84] ss:$28 sps:$4 sm:$0xff]  }
  0x1f   :  { %v1812_v23 = vld [vmem:[%s2405_s0 + $0x18] ss:$28 sps:$4 sm:$0xff]   ;;  %v1808_v24 = vld [vmem:[%s2405_s0 + $0x10] ss:$28 sps:$4 sm:$0xff]   ;;  %v1816_v28 = vld [vmem:[%s2405_s0 + $0x48] ss:$28 sps:$4 sm:$0xff]  }
  0x20   :  { %1488 = vmatpush3.bf16.msra.mxu0 %v1737_v30  ;;  %v1813_v25 = vld [vmem:[%s2405_s0 + $0x50] ss:$28 sps:$4 sm:$0xff]   ;;  %v1821_v30 = vld [vmem:[%s2405_s0 + $0xc0] ss:$28 sps:$4 sm:$0xff]   ;;  %v1836_v35 = vld [vmem:[%s2405_s0 + $0x168] ss:$28 sps:$4 sm:$0xff]  }
  0x21   :  { %1552 = vmatpush3.bf16.msra.mxu1 %v1738_v31  ;;  %1601 = vmatprep.subr.bf16.mxu0 %v1745_v36  ;;  %v1828_v31 = vld [vmem:[%s2405_s0 + $0xf8] ss:$28 sps:$4 sm:$0xff]  }
  0x22   :  { %1679 = vmatprep.subr.bf16.mxu1 %v1779_v58  ;;  %v1822_v33 = vld [vmem:[%s2405_s0 + $0xbc] ss:$28 sps:$4 sm:$0xff]  }
  0x23   :  { %852 = vmatmul.mubr.bf16.vlgmr.msra.gmra.mrb[0].mxu0 %v1739_v32  ;;  %v1819_v32 = vld [vmem:[%s2405_s0 + $0x80] ss:$28 sps:$4 sm:$0xff]   ;;  %v1824_v36 = vld [vmem:[%s2405_s0 + $0xb8] ss:$28 sps:$4 sm:$0xff]  }
  0x24   :  { %949 = vmatmul.mubr.bf16.vlgmr.msra.gmra.mrb[0].mxu1 %v1742_v34  ;;  %1602 = vmatpush3.bf16.msra.mxu0 %v1746_v37  ;;  %v1829_v34 = vld [vmem:[%s2405_s0 + $0x130] ss:$28 sps:$4 sm:$0xff]  }
  0x25   :  { %859 = vmatprep.mubr.bf16.mxu0 %v1747_v38  ;;  %956 = vmatprep.mubr.bf16.mxu1 %v1749_v39  ;;  %v1825_v37 = vld [vmem:[%s2405_s0 + $0xf4] ss:$28 sps:$4 sm:$0xff]   ;;  %v1837_v38 = vld [vmem:[%s2405_s0 + $0x1a0] ss:$28 sps:$4 sm:$0xff]  }
  0x26   :  { %1603 = vmatprep.subr.bf16.mxu0 %v1753_v42  ;;  %1680 = vmatpush3.bf16.msra.mxu1 %v1779_v58  ;;  %v1827_v39 = vld [vmem:[%s2405_s0 + $0xf0] ss:$28 sps:$4 sm:$0xff]   ;;  %v1833_v42 = vld [vmem:[%s2405_s0 + $0x164] ss:$28 sps:$4 sm:$0xff]  }
  0x27   :  { %1681 = vmatprep.subr.bf16.mxu1 %v1792_v1 }
  0x28   :  { %1604 = vmatpush3.bf16.msra.mxu0 %v1754_v43  ;;  %v1835_v43 = vld [vmem:[%s2405_s0 + $0x160] ss:$28 sps:$4 sm:$0xff]  }
  0x29   :  { %1605 = vmatprep.subr.bf16.mxu0 %v1761_v46 }
  0x2a   :  { %1682 = vmatpush3.bf16.msra.mxu1 %v1792_v1 }
  0x2b   :  { %860 = vmatmul.mubr.bf16.gmra.mrb[4].mxu0 %v1751_v40  ;;  %1683 = vmatprep.subr.bf16.mxu1 %v1797_v6  ;;  %v1830_v40 = vld [vmem:[%s2405_s0 + $0x12c] ss:$28 sps:$4 sm:$0xff]  }
  0x2c   :  { %957 = vmatmul.mubr.bf16.gmra.mrb[4].mxu1 %v1752_v41  ;;  %867 = vmatprep.mubr.bf16.mxu0 %v1755_v44  ;;  %v1832_v41 = vld [vmem:[%s2405_s0 + $0x128] ss:$28 sps:$4 sm:$0xff]   ;;  %v1838_v44 = vld [vmem:[%s2405_s0 + $0x19c] ss:$28 sps:$4 sm:$0xff]  }
  0x2d   :  { %964 = vmatprep.mubr.bf16.mxu1 %v1757_v45  ;;  %1606 = vmatpush3.bf16.msra.mxu0 %v1762_v47  ;;  %v1840_v45 = vld [vmem:[%s2405_s0 + $0x198] ss:$28 sps:$4 sm:$0xff]  }
  0x2e   :  { %1607 = vmatprep.subr.bf16.mxu0 %v1769_v52  ;;  %1684 = vmatpush3.bf16.msra.mxu1 %v1797_v6 }
  0x2f   :  { %1685 = vmatprep.subr.bf16.mxu1 %v1805_v12 }
  0x31   :  { %1608 = vmatpush3.bf16.msra.mxu0 %v1770_v53 }
  0x32   :  { %1609 = vmatprep.subr.bf16.mxu0 %v1777_v55  ;;  %1686 = vmatpush3.bf16.msra.mxu1 %v1805_v12 }
  0x33   :  { %868 = vmatmul.mubr.bf16.gmra.mrb[8].mxu0 %v1759_v48  ;;  %1687 = vmatprep.subr.bf16.mxu1 %v1807_v14 }
  0x34   :  { %965 = vmatmul.mubr.bf16.gmra.mrb[8].mxu1 %v1760_v49  ;;  %875 = vmatprep.mubr.bf16.mxu0 %v1763_v50 }
  0x35   :  { %972 = vmatprep.mubr.bf16.mxu1 %v1765_v51  ;;  %1610 = vmatpush3.bf16.msra.mxu0 %v1778_v57 }
  0x36   :  { %1611 = vmatprep.subr.bf16.mxu0 %v1786_v61  ;;  %1688 = vmatpush3.bf16.msra.mxu1 %v1807_v14 }
  0x37   :  { %1689 = vmatprep.subr.bf16.mxu1 %v1811_v15 }
  0x39   :  { %1612 = vmatpush3.bf16.msra.mxu0 %v1787_v62 }
  0x3a   :  { %1613 = vmatprep.subr.bf16.mxu0 %v1795_v4  ;;  %1690 = vmatpush3.bf16.msra.mxu1 %v1811_v15 }
  0x3b   :  { %876 = vmatmul.mubr.bf16.gmra.mrb[12].mxu0 %v1767_v54 }
  0x3c   :  { %973 = vmatmul.mubr.bf16.gmra.mrb[12].mxu1 %v1768_v56  ;;  %883 = vmatprep.mubr.bf16.mxu0 %v1771_v59 }
  0x3d   :  { %980 = vmatprep.mubr.bf16.mxu1 %v1773_v60  ;;  %1614 = vmatpush3.bf16.msra.mxu0 %v1796_v5 }
  0x3e   :  { %1615 = vmatprep.subr.bf16.mxu0 %v1804_v10 }
  0x41   :  { %1616 = vmatpush3.bf16.msra.mxu0 %v1806_v13 }
  0x43   :  { %884 = vmatmul.mubr.bf16.gmra.mrb[16].mxu0 %v1775_v63 }
  0x44   :  { %981 = vmatmul.mubr.bf16.gmra.mrb[16].mxu1 %v1776_v0  ;;  %891 = vmatprep.mubr.bf16.mxu0 %v1780_v2 }
  0x45   :  { %988 = vmatprep.mubr.bf16.mxu1 %v1782_v3 }
  0x4b   :  { %892 = vmatmul.mubr.bf16.gmra.mrb[20].mxu0 %v1784_v7 }
  0x4c   :  { %989 = vmatmul.mubr.bf16.gmra.mrb[20].mxu1 %v1785_v8  ;;  %899 = vmatprep.mubr.bf16.mxu0 %v1788_v9 }
  0x4d   :  { %996 = vmatprep.mubr.bf16.mxu1 %v1790_v11 }
  0x53   :  { %900 = vmatmul.mubr.bf16.gmra.mrb[24].mxu0 %v1793_v16 }
  0x54   :  { %997 = vmatmul.mubr.bf16.gmra.mrb[24].mxu1 %v1794_v17  ;;  %907 = vmatprep.mubr.bf16.mxu0 %v1798_v18 }
  0x55   :  { %1004 = vmatprep.mubr.bf16.mxu1 %v1800_v19 }
  0x5b   :  { %908 = vmatmul.mubr.bf16.gmra.mrb[28].mxu0 %v1802_v20 }
  0x5c   :  { %1005 = vmatmul.mubr.bf16.gmra.mrb[28].mxu1 %v1803_v21  ;;  %1045 = vmatprep.mubr.bf16.mxu0 %v1810_v22 }
  0x5d   :  { %1691 = vmatprep.mubr.msk.bf16.mxu1 %vm794_vm0, %v1812_v23 }
  0x63   :  { %1046 = vmatmul.mubr.bf16.vlgmr.msra.gmra.mrb[32].mxu0 %v1808_v24 }
  0x64   :  { %1692 = vmatmul.mubr.msk.bf16.vlgmr.msra.gmra.mrb[32].mxu1 %vm794_vm0, %v1813_v25  ;;  %1053 = vmatprep.mubr.bf16.mxu0 %v1814_v26 }
  0x65   :  { %1695 = vmatprep.mubr.msk.bf16.mxu1 %vm794_vm0, %v1820_v27 }
  0x6b   :  { %1054 = vmatmul.mubr.bf16.gmra.mrb[36].mxu0 %v1816_v28 }
  0x6c   :  { %1061 = vmatprep.mubr.bf16.mxu0 %v1817_v29  ;;  %1696 = vmatmul.mubr.msk.bf16.gmra.mrb[36].mxu1 %vm794_vm0, %v1821_v30 }
  0x6d   :  { %1699 = vmatprep.mubr.msk.bf16.mxu1 %vm794_vm0, %v1828_v31 }
  0x73   :  { %1062 = vmatmul.mubr.bf16.gmra.mrb[40].mxu0 %v1819_v32 }
  0x74   :  { %1069 = vmatprep.mubr.bf16.mxu0 %v1822_v33  ;;  %1700 = vmatmul.mubr.msk.bf16.gmra.mrb[40].mxu1 %vm794_vm0, %v1829_v34 }
  0x75   :  { %1703 = vmatprep.mubr.msk.bf16.mxu1 %vm794_vm0, %v1836_v35 }
  0x7b   :  { %1070 = vmatmul.mubr.bf16.gmra.mrb[44].mxu0 %v1824_v36 }
  0x7c   :  { %1077 = vmatprep.mubr.bf16.mxu0 %v1825_v37  ;;  %1704 = vmatmul.mubr.msk.bf16.gmra.mrb[44].mxu1 %vm794_vm0, %v1837_v38 }
  0x83   :  { %1078 = vmatmul.mubr.bf16.gmra.mrb[48].mxu0 %v1827_v39 }
  0x84   :  { %1085 = vmatprep.mubr.bf16.mxu0 %v1830_v40 }
  0x8b   :  { %1086 = vmatmul.mubr.bf16.gmra.mrb[52].mxu0 %v1832_v41 }
  0x8c   :  { %1093 = vmatprep.mubr.bf16.mxu0 %v1833_v42 }
  0x93   :  { %1094 = vmatmul.mubr.bf16.gmra.mrb[56].mxu0 %v1835_v43 }
  0x94   :  { %1101 = vmatprep.mubr.bf16.mxu0 %v1838_v44 }
  0x9b   :  { %1102 = vmatmul.mubr.bf16.gmra.mrb[60].mxu0 %v1840_v45 }
  0xf6   :  { %v1489_v46 = vpop.f32.mrb[0].mxu0 }
  0xf7   :  { %v1553_v47 = vpop.f32.mrb[0].mxu1  ;;  %v1490_v48 = vpop.f32.mrb[1].mxu0 }
  0xf8   :  { %v1491_v49 = vadd.f32 %v1490_v48, %v1489_v46  ;;  %v1554_v50 = vpop.f32.mrb[1].mxu1  ;;  %v1492_v51 = vpop.f32.mrb[2].mxu0 }
  0xf9   :  { %v1555_v52 = vadd.f32 %v1554_v50, %v1553_v47  ;;  %v1556_v53 = vpop.f32.mrb[2].mxu1  ;;  %v1493_v54 = vpop.f32.mrb[3].mxu0 }
  0xfa   :  { %v1494_v55 = vadd.f32 %v1493_v54, %v1492_v51  ;;  %v1557_v56 = vpop.f32.mrb[3].mxu1 }
  0xfb   :  { %v2236_v57 = vadd.f32 %v1555_v52, %v1491_v49  ;;  %v1558_v58 = vadd.f32 %v1557_v56, %v1556_v53 }
  0xfd   :  { %v2238_v59 = vadd.f32 %v1558_v58, %v1494_v55 }
  0xfe   :  { %v1495_v60 = vpop.f32.mrb[4].mxu0 }
  0xff   :  { %v1559_v61 = vpop.f32.mrb[4].mxu1  ;;  %v1496_v62 = vpop.f32.mrb[5].mxu0 }
 0x100   :  { %v1497_v63 = vadd.f32 %v1496_v62, %v1495_v60  ;;  %v1560_v0 = vpop.f32.mrb[5].mxu1  ;;  %v1498_v1 = vpop.f32.mrb[6].mxu0 }
 0x101   :  { %v1561_v2 = vadd.f32 %v1560_v0, %v1559_v61  ;;  %v1562_v3 = vpop.f32.mrb[6].mxu1  ;;  %v1499_v4 = vpop.f32.mrb[7].mxu0 }
 0x102   :  { %v1500_v5 = vadd.f32 %v1499_v4, %v1498_v1  ;;  %v1563_v6 = vpop.f32.mrb[7].mxu1 }
 0x103   :  { %v2240_v7 = vadd.f32 %v1561_v2, %v1497_v63  ;;  %v1564_v8 = vadd.f32 %v1563_v6, %v1562_v3 }
 0x105   :  { %v2242_v9 = vadd.f32 %v1564_v8, %v1500_v5 }
 0x106   :  { %v1501_v10 = vpop.f32.mrb[8].mxu0 }
 0x107   :  { %v1565_v11 = vpop.f32.mrb[8].mxu1  ;;  %v1502_v12 = vpop.f32.mrb[9].mxu0 }
 0x108   :  { %v1503_v13 = vadd.f32 %v1502_v12, %v1501_v10  ;;  %v1566_v14 = vpop.f32.mrb[9].mxu1  ;;  %v1504_v15 = vpop.f32.mrb[10].mxu0 }
 0x109   :  { %v1567_v16 = vadd.f32 %v1566_v14, %v1565_v11  ;;  %v1568_v17 = vpop.f32.mrb[10].mxu1  ;;  %v1505_v18 = vpop.f32.mrb[11].mxu0 }
 0x10a   :  { %v1506_v19 = vadd.f32 %v1505_v18, %v1504_v15  ;;  %v1569_v20 = vpop.f32.mrb[11].mxu1 }
 0x10b   :  { %v2244_v21 = vadd.f32 %v1567_v16, %v1503_v13  ;;  %v1570_v22 = vadd.f32 %v1569_v20, %v1568_v17 }
 0x10d   :  { %v2246_v23 = vadd.f32 %v1570_v22, %v1506_v19 }
 0x10e   :  { %v1507_v24 = vpop.f32.mrb[12].mxu0 }
 0x10f   :  { %v1571_v25 = vpop.f32.mrb[12].mxu1  ;;  %v1508_v26 = vpop.f32.mrb[13].mxu0 }
 0x110   :  { %v1509_v27 = vadd.f32 %v1508_v26, %v1507_v24  ;;  %v1572_v28 = vpop.f32.mrb[13].mxu1  ;;  %v1510_v29 = vpop.f32.mrb[14].mxu0 }
 0x111   :  { %v1573_v30 = vadd.f32 %v1572_v28, %v1571_v25  ;;  %v1574_v31 = vpop.f32.mrb[14].mxu1  ;;  %v1511_v32 = vpop.f32.mrb[15].mxu0 }
 0x112   :  { %v1512_v33 = vadd.f32 %v1511_v32, %v1510_v29  ;;  %v1575_v34 = vpop.f32.mrb[15].mxu1 }
 0x113   :  { %v2248_v35 = vadd.f32 %v1573_v30, %v1509_v27  ;;  %v1576_v36 = vadd.f32 %v1575_v34, %v1574_v31 }
 0x115   :  { %v2250_v37 = vadd.f32 %v1576_v36, %v1512_v33 }
 0x116   :  { %v1513_v38 = vpop.f32.mrb[16].mxu0 }
 0x117   :  { %v1577_v39 = vpop.f32.mrb[16].mxu1  ;;  %v1514_v40 = vpop.f32.mrb[17].mxu0 }
 0x118   :  { %v1515_v41 = vadd.f32 %v1514_v40, %v1513_v38  ;;  %v1578_v42 = vpop.f32.mrb[17].mxu1  ;;  %v1516_v43 = vpop.f32.mrb[18].mxu0 }
 0x119   :  { %v1579_v44 = vadd.f32 %v1578_v42, %v1577_v39  ;;  %v1580_v45 = vpop.f32.mrb[18].mxu1  ;;  %v1517_v46 = vpop.f32.mrb[19].mxu0 }
 0x11a   :  { %v1518_v47 = vadd.f32 %v1517_v46, %v1516_v43  ;;  %v1581_v48 = vpop.f32.mrb[19].mxu1 }
 0x11b   :  { %v2252_v49 = vadd.f32 %v1579_v44, %v1515_v41  ;;  %v1582_v50 = vadd.f32 %v1581_v48, %v1580_v45 }
 0x11d   :  { %v2254_v51 = vadd.f32 %v1582_v50, %v1518_v47  ;;  %v2272_v50 = vld [vmem:[%s2406_s2] ss:$0 sm:$0xff] }
 0x11e   :  { %v1519_v52 = vpop.f32.mrb[20].mxu0 }
 0x11f   :  { %v1583_v53 = vpop.f32.mrb[20].mxu1  ;;  %v1520_v54 = vpop.f32.mrb[21].mxu0 }
 0x120   :  { %v1521_v55 = vadd.f32 %v1520_v54, %v1519_v52  ;;  %v1584_v56 = vpop.f32.mrb[21].mxu1  ;;  %v1522_v58 = vpop.f32.mrb[22].mxu0  ;;  %v2278_v54 = vld [vmem:[%s2407_s3] ss:$0 sm:$0xff] }
 0x121   :  { %v1585_v60 = vadd.f32 %v1584_v56, %v1583_v53  ;;  %v1586_v61 = vpop.f32.mrb[22].mxu1  ;;  %v1523_v62 = vpop.f32.mrb[23].mxu0 }
 0x122   :  { %v1524_v63 = vadd.f32 %v1523_v62, %v1522_v58  ;;  %v1587_v0 = vpop.f32.mrb[23].mxu1 }
 0x123   :  { %v2256_v1 = vadd.f32 %v1585_v60, %v1521_v55  ;;  %v1588_v2 = vadd.f32 %v1587_v0, %v1586_v61 }
 0x125   :  { %v2258_v3 = vadd.f32 %v1588_v2, %v1524_v63 }
 0x126   :  { %v1525_v4 = vpop.f32.mrb[24].mxu0 }
 0x127   :  { %v1589_v5 = vpop.f32.mrb[24].mxu1  ;;  %v1526_v6 = vpop.f32.mrb[25].mxu0 }
 0x128   :  { %v1527_v8 = vadd.f32 %v1526_v6, %v1525_v4  ;;  %v1590_v10 = vpop.f32.mrb[25].mxu1  ;;  %v1528_v11 = vpop.f32.mrb[26].mxu0 }
 0x129   :  { %v1591_v12 = vadd.f32 %v1590_v10, %v1589_v5  ;;  %v1592_v13 = vpop.f32.mrb[26].mxu1  ;;  %v1529_v14 = vpop.f32.mrb[27].mxu0 }
 0x12a   :  { %v1530_v15 = vadd.f32 %v1529_v14, %v1528_v11  ;;  %v1593_v16 = vpop.f32.mrb[27].mxu1 }
 0x12b   :  { %v2260_v17 = vadd.f32 %v1591_v12, %v1527_v8  ;;  %v1594_v18 = vadd.f32 %v1593_v16, %v1592_v13 }
 0x12d   :  { %v2262_v19 = vadd.f32 %v1594_v18, %v1530_v15 }
 0x12e   :  { %v1531_v20 = vpop.f32.mrb[28].mxu0 }
 0x12f   :  { %v1595_v22 = vpop.f32.mrb[28].mxu1  ;;  %v1532_v24 = vpop.f32.mrb[29].mxu0 }
 0x130   :  { %v1533_v25 = vadd.f32 %v1532_v24, %v1531_v20  ;;  %v1596_v26 = vpop.f32.mrb[29].mxu1  ;;  %v1534_v27 = vpop.f32.mrb[30].mxu0 }
 0x131   :  { %v1597_v28 = vadd.f32 %v1596_v26, %v1595_v22  ;;  %v1598_v29 = vpop.f32.mrb[30].mxu1  ;;  %v1535_v30 = vpop.f32.mrb[31].mxu0 }
 0x132   :  { %v1536_v31 = vadd.f32 %v1535_v30, %v1534_v27  ;;  %v1599_v32 = vpop.f32.mrb[31].mxu1 }
 0x133   :  { %v2264_v33 = vadd.f32 %v1597_v28, %v1533_v25  ;;  %v1600_v34 = vadd.f32 %v1599_v32, %v1598_v29 }
 0x135   :  { %v2266_v36 = vadd.f32 %v1600_v34, %v1536_v31 }
 0x136   :  { %v1617_v38 = vpop.f32.mrb[32].mxu0 }
 0x137   :  { %v1618_v39 = vpop.f32.mrb[33].mxu0  ;;  %v1693_v40 = vpop.f32.mrb[32].mxu1 }
 0x138   :  { %v1619_v41 = vadd.f32 %v1618_v39, %v1617_v38  ;;  %v1620_v42 = vpop.f32.mrb[34].mxu0  ;;  %v1144_v43 = vpop.f32.mrb[33].mxu1 }
 0x139   :  { %v1621_v44 = vpop.f32.mrb[35].mxu0  ;;  %v1694_v45 = vpop.f32.mrb[34].mxu1 }
 0x13a   :  { %v1622_v46 = vadd.f32 %v1621_v44, %v1620_v42  ;;  %v1048_v47 = vadd.f32 %v1619_v41, %v2236_v57  ;;  %v1147_v48 = vpop.f32.mrb[35].mxu1 }
 0x13c   :  { %v1145_v52 = vadd.f32 %v1144_v43, %v1048_v47  ;;  %v1051_v53 = vadd.f32 %v1622_v46, %v2238_v59 }
 0x13e   :  { %v1214_v55 = vmul.f32 %v2272_v50, %v1145_v52  ;;  %v1148_v56 = vadd.f32 %v1147_v48, %v1051_v53  ;;  %v1623_v58 = vpop.f32.mrb[36].mxu0 }
 0x13f   :  { %v1624_v60 = vpop.f32.mrb[37].mxu0  ;;  %v2281_v57 = vpop.f32.mrb[36].mxu1 }
 0x140   :  { %v1237_v61 = vadd.f32 %v2278_v54, %v1214_v55  ;;  %v1215_v62 = vmul.f32 %v2272_v50, %v1148_v56  ;;  %v1625_v63 = vadd.f32 %v1624_v60, %v1623_v58  ;;  %v1626_v0 = vpop.f32.mrb[38].mxu0  ;;  %v1160_v2 = vpop.f32.mrb[37].mxu1 }
 0x141   :  { %v1627_v59 = vpop.f32.mrb[39].mxu0  ;;  %v2285_v4 = vpop.f32.mrb[38].mxu1 }
 0x142   :  { %v1269_v5 = vmul.f32 0.70710677, %v1237_v61  ;;  %v1238_v6 = vadd.f32 %v2278_v54, %v1215_v62  ;;  %v1056_v8 = vadd.f32 %v1625_v63, %v2240_v7  ;;  %v1163_v10 = vpop.f32.mrb[39].mxu1  ;;  %v1628_v11 = vadd.f32 %v1627_v59, %v1626_v0 }
 0x144   :  { %1841 = verf.f32 %v1269_v5  ;;  %v1270_v12 = vmul.f32 0.70710677, %v1238_v6  ;;  %v1153_v13 = vadd.f32 %v1693_v40, %v1056_v8  ;;  %v1059_v14 = vadd.f32 %v1628_v11, %v2242_v9 }
 0x145   :  { %v1254_v60 = vmul.f32 0.5, %v1238_v6 }
 0x146   :  { %1843 = verf.f32 %v1270_v12  ;;  %v1216_v15 = vmul.f32 %v2272_v50, %v1153_v13  ;;  %v1629_v16 = vpop.f32.mrb[40].mxu0  ;;  %v1156_v18 = vadd.f32 %v1694_v45, %v1059_v14  ;;  %v1253_v45 = vmul.f32 0.5, %v1237_v61 }
 0x147   :  { %v1630_v20 = vpop.f32.mrb[41].mxu0  ;;  %v2291_v22 = vpop.f32.mrb[40].mxu1 }
 0x148   :  { %v1239_v24 = vadd.f32 %v2278_v54, %v1216_v15  ;;  %v1631_v25 = vadd.f32 %v1630_v20, %v1629_v16  ;;  %v1632_v26 = vpop.f32.mrb[42].mxu0  ;;  %v2294_v7 = vpop.f32.mrb[41].mxu1  ;;  %v1217_v27 = vmul.f32 %v2272_v50, %v1156_v18 }
 0x149   :  { %v1633_v28 = vpop.f32.mrb[43].mxu0  ;;  %v2297_v29 = vpop.f32.mrb[42].mxu1 }
 0x14a   :  { %v1271_v9 = vmul.f32 0.70710677, %v1239_v24  ;;  %v1634_v30 = vadd.f32 %v1633_v28, %v1632_v26  ;;  %v1064_v31 = vadd.f32 %v1631_v25, %v2244_v21  ;;  %v2300_v32 = vpop.f32.mrb[43].mxu1  ;;  %v1240_v34 = vadd.f32 %v2278_v54, %v1217_v27 }
 0x14b   :  { %v1255_v15 = vmul.f32 0.5, %v1239_v24 }
 0x14c   :  { %1845 = verf.f32 %v1271_v9  ;;  %v1161_v38 = vadd.f32 %v1160_v2, %v1064_v31  ;;  %v1067_v39 = vadd.f32 %v1634_v30, %v2246_v23  ;;  %v1272_v40 = vmul.f32 0.70710677, %v1240_v34 }
 0x14e   :  { %v1842_v41 = vpop.eup %1841  ;;  %v1218_v42 = vmul.f32 %v2272_v50, %v1161_v38  ;;  %v1164_v43 = vadd.f32 %v1163_v10, %v1067_v39  ;;  %v1635_v44 = vpop.f32.mrb[44].mxu0  ;;  %1847 = verf.f32 %v1272_v40 }
 0x14f   :  { %v1301_v46 = vadd.f32 1.0, %v1842_v41  ;;  %v1636_v47 = vpop.f32.mrb[45].mxu0  ;;  %v2305_v48 = vpop.f32.mrb[44].mxu1 }
 0x150   :  { %v1844_v21 = vpop.eup %1843  ;;  %v1241_v52 = vadd.f32 %v2278_v54, %v1218_v42  ;;  %v1219_v53 = vmul.f32 %v2272_v50, %v1164_v43  ;;  %v1637_v55 = vadd.f32 %v1636_v47, %v1635_v44  ;;  %v1638_v56 = vpop.f32.mrb[46].mxu0 }
 0x151   :  { %v2309_v23 = vpop.f32.mrb[45].mxu1  ;;  %v1317_v58 = vmul.f32 %v1301_v46, %v1253_v45  ;;  %v1302_v62 = vadd.f32 1.0, %v1844_v21  ;;  %v1639_v63 = vpop.f32.mrb[47].mxu0 }
 0x152   :  { %v2311_v0 = vpop.f32.mrb[46].mxu1  ;;  %v1273_v61 = vmul.f32 0.70710677, %v1241_v52  ;;  %v1242_v2 = vadd.f32 %v2278_v54, %v1219_v53  ;;  %v1072_v59 = vadd.f32 %v1637_v55, %v2248_v35  ;;  %v1640_v10 = vadd.f32 %v1639_v63, %v1638_v56 }
 0x153   :  { %v2315_v5 = vpop.f32.mrb[47].mxu1  ;;  %1333 = vst [vmem:[%s2408_s4] sm:$0xff] %v1317_v58  ;;  %v1318_v8 = vmul.f32 %v1302_v62, %v1254_v60  ;;  %v1257_v46 = vmul.f32 0.5, %v1241_v52 }
 0x154   :  { %1849 = verf.f32 %v1273_v61  ;;  %v1274_v11 = vmul.f32 0.70710677, %v1242_v2  ;;  %v1169_v6 = vadd.f32 %v2281_v57, %v1072_v59  ;;  %v1075_v12 = vadd.f32 %v1640_v10, %v2250_v37 }
 0x155   :  { %1334 = vst [vmem:[%s2408_s4 + $0x8] sm:$0xff] %v1318_v8  ;;  %v1256_v37 = vmul.f32 0.5, %v1240_v34  ;;  %v1258_v58 = vmul.f32 0.5, %v1242_v2 }
 0x156   :  { %v1846_v13 = vpop.eup %1845  ;;  %1851 = verf.f32 %v1274_v11  ;;  %v1220_v35 = vmul.f32 %v2272_v50, %v1169_v6  ;;  %v1641_v14 = vpop.f32.mrb[48].mxu0  ;;  %v1172_v18 = vadd.f32 %v2285_v4, %v1075_v12 }
 0x157   :  { %v1303_v16 = vadd.f32 1.0, %v1846_v13  ;;  %v1642_v20 = vpop.f32.mrb[49].mxu0 }
 0x158   :  { %v1243_v25 = vadd.f32 %v2278_v54, %v1220_v35  ;;  %v1643_v26 = vadd.f32 %v1642_v20, %v1641_v14  ;;  %v1644_v57 = vpop.f32.mrb[50].mxu0  ;;  %v1848_v27 = vpop.eup %1847  ;;  %v1221_v9 = vmul.f32 %v2272_v50, %v1172_v18 }
 0x159   :  { %v1319_v28 = vmul.f32 %v1303_v16, %v1255_v15  ;;  %v1645_v30 = vpop.f32.mrb[51].mxu0  ;;  %v1304_v31 = vadd.f32 1.0, %v1848_v27 }
 0x15a   :  { %v1275_v38 = vmul.f32 0.70710677, %v1243_v25  ;;  %v1646_v39 = vadd.f32 %v1645_v30, %v1644_v57  ;;  %v1244_v4 = vadd.f32 %v2278_v54, %v1221_v9  ;;  %v1080_v24 = vadd.f32 %v1643_v26, %v2252_v49 }
 0x15b   :  { %1335 = vst [vmem:[%s2408_s4 + $0x10] sm:$0xff] %v1319_v28  ;;  %v1320_v40 = vmul.f32 %v1304_v31, %v1256_v37  ;;  %v1259_v35 = vmul.f32 0.5, %v1243_v25 }
 0x15c   :  { %1853 = verf.f32 %v1275_v38  ;;  %v1083_v41 = vadd.f32 %v1646_v39, %v2254_v51  ;;  %v1276_v42 = vmul.f32 0.70710677, %v1244_v4  ;;  %v1177_v43 = vadd.f32 %v2294_v7, %v1080_v24 }
 0x15d   :  { %1336 = vst [vmem:[%s2408_s4 + $0x18] sm:$0xff] %v1320_v40  ;;  %v1260_v27 = vmul.f32 0.5, %v1244_v4 }
 0x15e   :  { %v1850_v44 = vpop.eup %1849  ;;  %v1180_v34 = vadd.f32 %v2300_v32, %v1083_v41  ;;  %v1647_v45 = vpop.f32.mrb[52].mxu0  ;;  %1855 = verf.f32 %v1276_v42  ;;  %v1222_v49 = vmul.f32 %v2272_v50, %v1177_v43 }
 0x15f   :  { %v1305_v47 = vadd.f32 1.0, %v1850_v44  ;;  %v1648_v21 = vpop.f32.mrb[53].mxu0 }
 0x160   :  { %v1852_v53 = vpop.eup %1851  ;;  %v1223_v51 = vmul.f32 %v2272_v50, %v1180_v34  ;;  %v1649_v55 = vadd.f32 %v1648_v21, %v1647_v45  ;;  %v1650_v56 = vpop.f32.mrb[54].mxu0  ;;  %v1245_v62 = vadd.f32 %v2278_v54, %v1222_v49 }
 0x161   :  { %v1321_v7 = vmul.f32 %v1305_v47, %v1257_v46  ;;  %v1306_v60 = vadd.f32 1.0, %v1852_v53  ;;  %v1651_v63 = vpop.f32.mrb[55].mxu0 }
 0x162   :  { %v1246_v32 = vadd.f32 %v2278_v54, %v1223_v51  ;;  %v1088_v52 = vadd.f32 %v1649_v55, %v2256_v1  ;;  %v1652_v61 = vadd.f32 %v1651_v63, %v1650_v56  ;;  %v1277_v8 = vmul.f32 0.70710677, %v1245_v62 }
 0x163   :  { %1337 = vst [vmem:[%s2408_s4 + $0x20] sm:$0xff] %v1321_v7  ;;  %v1322_v59 = vmul.f32 %v1306_v60, %v1258_v58  ;;  %v1261_v43 = vmul.f32 0.5, %v1245_v62 }
 0x164   :  { %v1278_v10 = vmul.f32 0.70710677, %v1246_v32  ;;  %v1185_v11 = vadd.f32 %v2291_v22, %v1088_v52  ;;  %v1091_v2 = vadd.f32 %v1652_v61, %v2258_v3  ;;  %1857 = verf.f32 %v1277_v8 }
 0x165   :  { %1338 = vst [vmem:[%s2408_s4 + $0x28] sm:$0xff] %v1322_v59 }
 0x166   :  { %v1854_v6 = vpop.eup %1853  ;;  %1859 = verf.f32 %v1278_v10  ;;  %v1224_v1 = vmul.f32 %v2272_v50, %v1185_v11  ;;  %v1188_v12 = vadd.f32 %v2297_v29, %v1091_v2  ;;  %v1653_v13 = vpop.f32.mrb[56].mxu0 }
 0x167   :  { %v1307_v14 = vadd.f32 1.0, %v1854_v6  ;;  %v1654_v15 = vpop.f32.mrb[57].mxu0 }
 0x168   :  { %v1247_v16 = vadd.f32 %v2278_v54, %v1224_v1  ;;  %v1225_v22 = vmul.f32 %v2272_v50, %v1188_v12  ;;  %v1655_v3 = vadd.f32 %v1654_v15, %v1653_v13  ;;  %v1656_v18 = vpop.f32.mrb[58].mxu0  ;;  %v1856_v20 = vpop.eup %1855 }
 0x169   :  { %v1323_v26 = vmul.f32 %v1307_v14, %v1259_v35  ;;  %v1657_v57 = vpop.f32.mrb[59].mxu0  ;;  %v1308_v28 = vadd.f32 1.0, %v1856_v20 }
 0x16a   :  { %v1279_v9 = vmul.f32 0.70710677, %v1247_v16  ;;  %v1248_v30 = vadd.f32 %v2278_v54, %v1225_v22  ;;  %v1658_v29 = vadd.f32 %v1657_v57, %v1656_v18  ;;  %v1096_v25 = vadd.f32 %v1655_v3, %v2260_v17 }
 0x16b   :  { %1339 = vst [vmem:[%s2408_s4 + $0x30] sm:$0xff] %v1323_v26  ;;  %v1324_v37 = vmul.f32 %v1308_v28, %v1260_v27 }
 0x16c   :  { %1861 = verf.f32 %v1279_v9  ;;  %v1280_v31 = vmul.f32 0.70710677, %v1248_v30  ;;  %v1193_v38 = vadd.f32 %v2309_v23, %v1096_v25  ;;  %v1099_v39 = vadd.f32 %v1658_v29, %v2262_v19 }
 0x16d   :  { %1340 = vst [vmem:[%s2408_s4 + $0x38] sm:$0xff] %v1324_v37  ;;  %v1262_v23 = vmul.f32 0.5, %v1246_v32  ;;  %v1263_v32 = vmul.f32 0.5, %v1247_v16  ;;  %v1264_v8 = vmul.f32 0.5, %v1248_v30 }
 0x16e   :  { %1863 = verf.f32 %v1280_v31  ;;  %v1659_v4 = vpop.f32.mrb[60].mxu0  ;;  %v1858_v24 = vpop.eup %1857  ;;  %v1226_v40 = vmul.f32 %v2272_v50, %v1193_v38  ;;  %v1196_v41 = vadd.f32 %v2315_v5, %v1099_v39 }
 0x16f   :  { %v1660_v42 = vpop.f32.mrb[61].mxu0  ;;  %v1309_v44 = vadd.f32 1.0, %v1858_v24 }
 0x170   :  { %v1860_v17 = vpop.eup %1859  ;;  %v1661_v34 = vadd.f32 %v1660_v42, %v1659_v4  ;;  %v1662_v45 = vpop.f32.mrb[62].mxu0  ;;  %v1249_v19 = vadd.f32 %v2278_v54, %v1226_v40  ;;  %v1227_v47 = vmul.f32 %v2272_v50, %v1196_v41 }
 0x171   :  { %v1310_v46 = vadd.f32 1.0, %v1860_v17  ;;  %v1663_v49 = vpop.f32.mrb[63].mxu0  ;;  %v1325_v21 = vmul.f32 %v1309_v44, %v1261_v43 }
 0x172   :  { %v1104_v53 = vadd.f32 %v1661_v34, %v2264_v33  ;;  %v1664_v51 = vadd.f32 %v1663_v49, %v1662_v45  ;;  %v1281_v56 = vmul.f32 0.70710677, %v1249_v19  ;;  %v1250_v5 = vadd.f32 %v2278_v54, %v1227_v47 }
 0x173   :  { %v1326_v55 = vmul.f32 %v1310_v46, %v1262_v23  ;;  %1341 = vst [vmem:[%s2408_s4 + $0x40] sm:$0xff] %v1325_v21 }
 0x174   :  { %v1201_v7 = vadd.f32 %v2305_v48, %v1104_v53  ;;  %v1107_v58 = vadd.f32 %v1664_v51, %v2266_v36  ;;  %1865 = verf.f32 %v1281_v56  ;;  %v1282_v60 = vmul.f32 0.70710677, %v1250_v5 }
 0x175   :  { %1342 = vst [vmem:[%s2408_s4 + $0x48] sm:$0xff] %v1326_v55  ;;  %v1266_v14 = vmul.f32 0.5, %v1250_v5 }
 0x176   :  { %v1862_v33 = vpop.eup %1861  ;;  %v1228_v62 = vmul.f32 %v2272_v50, %v1201_v7  ;;  %v1204_v63 = vadd.f32 %v2311_v0, %v1107_v58  ;;  %1867 = verf.f32 %v1282_v60 }
 0x177   :  { %v1311_v52 = vadd.f32 1.0, %v1862_v33 }
 0x178   :  { %v1864_v61 = vpop.eup %1863  ;;  %v1251_v59 = vadd.f32 %v2278_v54, %v1228_v62  ;;  %v1229_v48 = vmul.f32 %v2272_v50, %v1204_v63  ;;  %v1265_v50 = vmul.f32 0.5, %v1249_v19 }
 0x179   :  { %v1327_v36 = vmul.f32 %v1311_v52, %v1263_v32  ;;  %v1312_v10 = vadd.f32 1.0, %v1864_v61 }
 0x17a   :  { %v1283_v11 = vmul.f32 0.70710677, %v1251_v59  ;;  %v1252_v2 = vadd.f32 %v2278_v54, %v1229_v48  ;;  %v1267_v22 = vmul.f32 0.5, %v1251_v59 }
 0x17b   :  { %1343 = vst [vmem:[%s2408_s4 + $0x50] sm:$0xff] %v1327_v36  ;;  %v1328_v6 = vmul.f32 %v1312_v10, %v1264_v8 }
 0x17c   :  { %1869 = verf.f32 %v1283_v11  ;;  %v1284_v0 = vmul.f32 0.70710677, %v1252_v2  ;;  %v1268_v26 = vmul.f32 0.5, %v1252_v2 }
 0x17d   :  { %1344 = vst [vmem:[%s2408_s4 + $0x58] sm:$0xff] %v1328_v6 }
 0x17e   :  { %1871 = verf.f32 %v1284_v0  ;;  %v1866_v1 = vpop.eup %1865 }
 0x17f   :  { %v1313_v12 = vadd.f32 1.0, %v1866_v1 }
 0x180   :  { %v1868_v13 = vpop.eup %1867 }
 0x181   :  { %v1329_v35 = vmul.f32 %v1313_v12, %v1265_v50  ;;  %v1314_v15 = vadd.f32 1.0, %v1868_v13 }
 0x183   :  { %1345 = vst [vmem:[%s2408_s4 + $0x60] sm:$0xff] %v1329_v35  ;;  %v1330_v54 = vmul.f32 %v1314_v15, %v1266_v14 }
 0x185   :  { %1346 = vst [vmem:[%s2408_s4 + $0x68] sm:$0xff] %v1330_v54 }
 0x186   :  { %v1870_v16 = vpop.eup %1869 }
 0x187   :  { %v1315_v3 = vadd.f32 1.0, %v1870_v16 }
 0x188   :  { %v1872_v18 = vpop.eup %1871 }
 0x189   :  { %v1331_v20 = vmul.f32 %v1315_v3, %v1267_v22  ;;  %v1316_v57 = vadd.f32 1.0, %v1872_v18 }
 0x18b   :  { %1347 = vst [vmem:[%s2408_s4 + $0x70] sm:$0xff] %v1331_v20  ;;  %v1332_v27 = vmul.f32 %v1316_v57, %v1268_v26 }
 0x18d   :  { %1348 = vst [vmem:[%s2408_s4 + $0x78] sm:$0xff] %v1332_v27 }

// kernel: hybrid_transformer_forward.11
= control target key start
LH: loop header
LB: loop body
LE: loop exit
PB: predicated region body
PF: predicated region fallthrough
CT: control target
= control target key end

     0   :  { %v2330_v0 = vmov 0   ;;  %vm970_vm0 = vcmask 392192   ;;  %s3208_s1 = inlined_call_operand.vmem [shape: bf16[432,128], index: 1, kind: input, shape index: {}]   ;;  %s3209_s0 = inlined_call_operand.vmem [shape: bf16[512,432], index: 0, kind: input, shape index: {}]   ;;  %s3210_s2 = inlined_call_operand.vmem [shape: f32[1,128], index: 2, kind: input, shape index: {}]   ;;  %s3211_s3 = inlined_call_operand.vmem [shape: f32[1,128], index: 3, kind: input, shape index: {}]   ;;  %s3212_s4 = inlined_call_operand.vmem [shape: f32[512,128], index: 4, kind: output, shape index: {}]  }
   0x1   :  { %1067 = vmatprep.subr.bf16.mxu1 %v2330_v0  ;;  %v2109_v1 = vld [vmem:[%s3208_s1] sm:$0xff]   ;;  %1356 = vmatprep.subr.bf16.mxu0 %v2330_v0  ;;  %v2110_v2 = vld [vmem:[%s3208_s1 + $0x8] sm:$0xff]   ;;  %v2111_v4 = vld [vmem:[%s3208_s1 + $0x10] sm:$0xff]  }
   0x2   :  { %1068 = vmatpush1.bf16.msra.mxu1 %v2109_v1  ;;  %v2114_v3 = vld [vmem:[%s3208_s1 + $0x80] sm:$0xff]   ;;  %v2116_v5 = vld [vmem:[%s3208_s1 + $0x88] sm:$0xff]   ;;  %v2112_v6 = vld [vmem:[%s3208_s1 + $0x18] sm:$0xff]  }
   0x3   :  { %1069 = vmatprep.subr.bf16.mxu1 %v2330_v0  ;;  %1357 = vmatpush1.bf16.msra.mxu0 %v2114_v3  ;;  %v2118_v7 = vld [vmem:[%s3208_s1 + $0x90] sm:$0xff]   ;;  %v2113_v8 = vld [vmem:[%s3208_s1 + $0x20] sm:$0xff]   ;;  %v2120_v9 = vld [vmem:[%s3208_s1 + $0x98] sm:$0xff]  }
   0x4   :  { %1358 = vmatprep.subr.bf16.mxu0 %v2330_v0  ;;  %v2115_v10 = vld [vmem:[%s3208_s1 + $0x28] sm:$0xff]   ;;  %v2122_v11 = vld [vmem:[%s3208_s1 + $0xa0] sm:$0xff]   ;;  %v2117_v12 = vld [vmem:[%s3208_s1 + $0x30] sm:$0xff]  }
   0x5   :  { %v2124_v13 = vld [vmem:[%s3208_s1 + $0xa8] sm:$0xff]   ;;  %v2119_v14 = vld [vmem:[%s3208_s1 + $0x38] sm:$0xff]   ;;  %v2126_v15 = vld [vmem:[%s3208_s1 + $0xb0] sm:$0xff]  }
   0x6   :  { %1070 = vmatpush1.bf16.msra.mxu1 %v2110_v2  ;;  %v2137_v16 = vld [vmem:[%s3209_s0 + $0xc] ss:$16 sps:$4 sm:$0xff]   ;;  %v2141_v17 = vld [vmem:[%s3209_s0 + $0x4] ss:$16 sps:$4 sm:$0xff]   ;;  %v2135_v27 = vld [vmem:[%s3209_s0 + $0x8] ss:$16 sps:$4 sm:$0xff]  }
   0x7   :  { %1071 = vmatprep.subr.bf16.mxu1 %v2330_v0  ;;  %1359 = vmatpush1.bf16.msra.mxu0 %v2116_v5  ;;  %v2121_v18 = vld [vmem:[%s3208_s1 + $0x40] sm:$0xff]   ;;  %v2128_v19 = vld [vmem:[%s3208_s1 + $0xb8] sm:$0xff]   ;;  %v2123_v20 = vld [vmem:[%s3208_s1 + $0x48] sm:$0xff]  }
   0x8   :  { %1360 = vmatprep.subr.bf16.mxu0 %v2330_v0  ;;  %2010 = vmatprep.mubr.msk.bf16.mxu0 %vm970_vm0, %v2137_v16  ;;  %v2130_v21 = vld [vmem:[%s3208_s1 + $0xc0] sm:$0xff]   ;;  %v2125_v22 = vld [vmem:[%s3208_s1 + $0x50] sm:$0xff]   ;;  %v2132_v23 = vld [vmem:[%s3208_s1 + $0xc8] sm:$0xff]  }
   0x9   :  { %1099 = vmatprep.mubr.bf16.mxu1 %v2141_v17  ;;  %v2127_v24 = vld [vmem:[%s3208_s1 + $0x58] sm:$0xff]   ;;  %v2134_v25 = vld [vmem:[%s3208_s1 + $0xd0] sm:$0xff]   ;;  %v2129_v26 = vld [vmem:[%s3208_s1 + $0x60] sm:$0xff]  }
   0xa   :  { %1072 = vmatpush1.bf16.msra.mxu1 %v2111_v4  ;;  %v2142_v28 = vld [vmem:[%s3209_s0 + $0x2c] ss:$16 sps:$4 sm:$0xff]   ;;  %v2133_v30 = vld [vmem:[%s3208_s1 + $0x70] sm:$0xff]   ;;  %v2144_v31 = vld [vmem:[%s3209_s0 + $0x28] ss:$16 sps:$4 sm:$0xff]  }
   0xb   :  { %1073 = vmatprep.subr.bf16.mxu1 %v2330_v0  ;;  %1361 = vmatpush1.bf16.msra.mxu0 %v2118_v7  ;;  %v2131_v29 = vld [vmem:[%s3208_s1 + $0x68] sm:$0xff]   ;;  %v2138_v33 = vld [vmem:[%s3208_s1 + $0x78] sm:$0xff]   ;;  %v2139_v34 = vld [vmem:[%s3209_s0] ss:$16 sps:$4 sm:$0xff]  }
   0xc   :  { %1362 = vmatprep.subr.bf16.mxu0 %v2330_v0  ;;  %v2148_v32 = vld [vmem:[%s3209_s0 + $0x4c] ss:$16 sps:$4 sm:$0xff]   ;;  %v2145_v35 = vld [vmem:[%s3209_s0 + $0x24] ss:$16 sps:$4 sm:$0xff]   ;;  %v2150_v36 = vld [vmem:[%s3209_s0 + $0x48] ss:$16 sps:$4 sm:$0xff]  }
   0xd   :  { %v2154_v37 = vld [vmem:[%s3209_s0 + $0x6c] ss:$16 sps:$4 sm:$0xff]   ;;  %v2147_v38 = vld [vmem:[%s3209_s0 + $0x20] ss:$16 sps:$4 sm:$0xff]   ;;  %v2151_v39 = vld [vmem:[%s3209_s0 + $0x44] ss:$16 sps:$4 sm:$0xff]  }
   0xe   :  { %1074 = vmatpush1.bf16.msra.mxu1 %v2112_v6  ;;  %v2156_v40 = vld [vmem:[%s3209_s0 + $0x68] ss:$16 sps:$4 sm:$0xff]   ;;  %v2160_v41 = vld [vmem:[%s3209_s0 + $0x8c] ss:$16 sps:$4 sm:$0xff]   ;;  %v2153_v42 = vld [vmem:[%s3209_s0 + $0x40] ss:$16 sps:$4 sm:$0xff]  }
   0xf   :  { %1075 = vmatprep.subr.bf16.mxu1 %v2330_v0  ;;  %1363 = vmatpush1.bf16.msra.mxu0 %v2120_v9  ;;  %v2157_v43 = vld [vmem:[%s3209_s0 + $0x64] ss:$16 sps:$4 sm:$0xff]   ;;  %v2162_v44 = vld [vmem:[%s3209_s0 + $0x88] ss:$16 sps:$4 sm:$0xff]   ;;  %v2166_v45 = vld [vmem:[%s3209_s0 + $0xac] ss:$16 sps:$4 sm:$0xff]  }
  0x10   :  { %1364 = vmatprep.subr.bf16.mxu0 %v2330_v0  ;;  %v2159_v46 = vld [vmem:[%s3209_s0 + $0x60] ss:$16 sps:$4 sm:$0xff]   ;;  %v2163_v47 = vld [vmem:[%s3209_s0 + $0x84] ss:$16 sps:$4 sm:$0xff]   ;;  %v2168_v48 = vld [vmem:[%s3209_s0 + $0xa8] ss:$16 sps:$4 sm:$0xff]  }
  0x11   :  { %v2172_v49 = vld [vmem:[%s3209_s0 + $0xcc] ss:$16 sps:$4 sm:$0xff]   ;;  %v2165_v50 = vld [vmem:[%s3209_s0 + $0x80] ss:$16 sps:$4 sm:$0xff]   ;;  %v2169_v51 = vld [vmem:[%s3209_s0 + $0xa4] ss:$16 sps:$4 sm:$0xff]  }
  0x12   :  { %1076 = vmatpush1.bf16.msra.mxu1 %v2113_v8  ;;  %v2174_v52 = vld [vmem:[%s3209_s0 + $0xc8] ss:$16 sps:$4 sm:$0xff]   ;;  %v2178_v53 = vld [vmem:[%s3209_s0 + $0xec] ss:$16 sps:$4 sm:$0xff]   ;;  %v2171_v54 = vld [vmem:[%s3209_s0 + $0xa0] ss:$16 sps:$4 sm:$0xff]  }
  0x13   :  { %1077 = vmatprep.subr.bf16.mxu1 %v2330_v0  ;;  %1365 = vmatpush1.bf16.msra.mxu0 %v2122_v11  ;;  %v2175_v55 = vld [vmem:[%s3209_s0 + $0xc4] ss:$16 sps:$4 sm:$0xff]   ;;  %v2180_v56 = vld [vmem:[%s3209_s0 + $0xe8] ss:$16 sps:$4 sm:$0xff]   ;;  %v2184_v57 = vld [vmem:[%s3209_s0 + $0x10c] ss:$16 sps:$4 sm:$0xff]  }
  0x14   :  { %1366 = vmatprep.subr.bf16.mxu0 %v2330_v0  ;;  %v2177_v58 = vld [vmem:[%s3209_s0 + $0xc0] ss:$16 sps:$4 sm:$0xff]   ;;  %v2181_v59 = vld [vmem:[%s3209_s0 + $0xe4] ss:$16 sps:$4 sm:$0xff]   ;;  %v2186_v60 = vld [vmem:[%s3209_s0 + $0x108] ss:$16 sps:$4 sm:$0xff]  }
  0x15   :  { %v2190_v61 = vld [vmem:[%s3209_s0 + $0x12c] ss:$16 sps:$4 sm:$0xff]   ;;  %v2183_v62 = vld [vmem:[%s3209_s0 + $0xe0] ss:$16 sps:$4 sm:$0xff]   ;;  %v2187_v63 = vld [vmem:[%s3209_s0 + $0x104] ss:$16 sps:$4 sm:$0xff]  }
  0x16   :  { %1078 = vmatpush1.bf16.msra.mxu1 %v2115_v10  ;;  %v2196_v1 = vld [vmem:[%s3209_s0 + $0x14c] ss:$16 sps:$4 sm:$0xff]   ;;  %v2189_v2 = vld [vmem:[%s3209_s0 + $0x100] ss:$16 sps:$4 sm:$0xff]   ;;  %v2193_v3 = vld [vmem:[%s3209_s0 + $0x124] ss:$16 sps:$4 sm:$0xff]  }
  0x17   :  { %1079 = vmatprep.subr.bf16.mxu1 %v2330_v0  ;;  %1367 = vmatpush1.bf16.msra.mxu0 %v2124_v13  ;;  %v2198_v4 = vld [vmem:[%s3209_s0 + $0x148] ss:$16 sps:$4 sm:$0xff]   ;;  %v2202_v5 = vld [vmem:[%s3209_s0 + $0x16c] ss:$16 sps:$4 sm:$0xff]   ;;  %v2195_v6 = vld [vmem:[%s3209_s0 + $0x120] ss:$16 sps:$4 sm:$0xff]  }
  0x18   :  { %1368 = vmatprep.subr.bf16.mxu0 %v2330_v0  ;;  %v2199_v7 = vld [vmem:[%s3209_s0 + $0x144] ss:$16 sps:$4 sm:$0xff]   ;;  %v2204_v8 = vld [vmem:[%s3209_s0 + $0x168] ss:$16 sps:$4 sm:$0xff]   ;;  %v2208_v9 = vld [vmem:[%s3209_s0 + $0x18c] ss:$16 sps:$4 sm:$0xff]  }
  0x19   :  { %v2201_v10 = vld [vmem:[%s3209_s0 + $0x140] ss:$16 sps:$4 sm:$0xff]   ;;  %v2205_v11 = vld [vmem:[%s3209_s0 + $0x164] ss:$16 sps:$4 sm:$0xff]   ;;  %v2214_v13 = vld [vmem:[%s3209_s0 + $0x1ac] ss:$16 sps:$4 sm:$0xff]  }
  0x1a   :  { %1080 = vmatpush1.bf16.msra.mxu1 %v2117_v12  ;;  %v2210_v12 = vld [vmem:[%s3209_s0 + $0x188] ss:$16 sps:$4 sm:$0xff]   ;;  %v2220_v17 = vld [vmem:[%s3209_s0 + $0x1cc] ss:$16 sps:$4 sm:$0xff]  }
  0x1b   :  { %1081 = vmatprep.subr.bf16.mxu1 %v2330_v0  ;;  %1369 = vmatpush1.bf16.msra.mxu0 %v2126_v15  ;;  %v2211_v15 = vld [vmem:[%s3209_s0 + $0x184] ss:$16 sps:$4 sm:$0xff]   ;;  %v2216_v16 = vld [vmem:[%s3209_s0 + $0x1a8] ss:$16 sps:$4 sm:$0xff]  }
  0x1c   :  { %1370 = vmatprep.subr.bf16.mxu0 %v2330_v0 }
  0x1e   :  { %1082 = vmatpush1.bf16.msra.mxu1 %v2119_v14  ;;  %v2207_v14 = vld [vmem:[%s3209_s0 + $0x160] ss:$16 sps:$4 sm:$0xff]  }
  0x1f   :  { %1083 = vmatprep.subr.bf16.mxu1 %v2330_v0  ;;  %1371 = vmatpush1.bf16.msra.mxu0 %v2128_v19  ;;  %v2217_v19 = vld [vmem:[%s3209_s0 + $0x1a4] ss:$16 sps:$4 sm:$0xff]  }
  0x20   :  { %1372 = vmatprep.subr.bf16.mxu0 %v2330_v0 }
  0x22   :  { %1084 = vmatpush1.bf16.msra.mxu1 %v2121_v18  ;;  %v2213_v18 = vld [vmem:[%s3209_s0 + $0x180] ss:$16 sps:$4 sm:$0xff]  }
  0x23   :  { %1085 = vmatprep.subr.bf16.mxu1 %v2330_v0  ;;  %1373 = vmatpush1.bf16.msra.mxu0 %v2130_v21  ;;  %v2226_v21 = vld [vmem:[%s3209_s0 + $0x1ec] ss:$16 sps:$4 sm:$0xff]  }
  0x24   :  { %1374 = vmatprep.subr.bf16.mxu0 %v2330_v0 }
  0x26   :  { %1086 = vmatpush1.bf16.msra.mxu1 %v2123_v20  ;;  %v2222_v20 = vld [vmem:[%s3209_s0 + $0x1c8] ss:$16 sps:$4 sm:$0xff]  }
  0x27   :  { %1087 = vmatprep.subr.bf16.mxu1 %v2330_v0  ;;  %1375 = vmatpush1.bf16.msra.mxu0 %v2132_v23  ;;  %v2223_v23 = vld [vmem:[%s3209_s0 + $0x1c4] ss:$16 sps:$4 sm:$0xff]  }
  0x28   :  { %1376 = vmatprep.subr.bf16.mxu0 %v2330_v0 }
  0x2a   :  { %1088 = vmatpush1.bf16.msra.mxu1 %v2125_v22  ;;  %v2219_v22 = vld [vmem:[%s3209_s0 + $0x1a0] ss:$16 sps:$4 sm:$0xff]  }
  0x2b   :  { %1089 = vmatprep.subr.bf16.mxu1 %v2330_v0  ;;  %1377 = vmatpush1.bf16.msra.mxu0 %v2134_v25  ;;  %v2232_v25 = vld [vmem:[%s3209_s0 + $0x20c] ss:$16 sps:$4 sm:$0xff]  }
  0x2e   :  { %1090 = vmatpush1.bf16.msra.mxu1 %v2127_v24  ;;  %1389 = vmatmul.mubr.bf16.vlgmr.msra.gmra.mrb[0].mxu0 %v2135_v27  ;;  %v2228_v24 = vld [vmem:[%s3209_s0 + $0x1e8] ss:$16 sps:$4 sm:$0xff]   ;;  %v2229_v27 = vld [vmem:[%s3209_s0 + $0x1e4] ss:$16 sps:$4 sm:$0xff]  }
  0x2f   :  { %1091 = vmatprep.subr.bf16.mxu1 %v2330_v0  ;;  %2011 = vmatprep.mubr.msk.bf16.mxu0 %vm970_vm0, %v2142_v28  ;;  %v2234_v28 = vld [vmem:[%s3209_s0 + $0x208] ss:$16 sps:$4 sm:$0xff]  }
  0x32   :  { %1092 = vmatpush1.bf16.msra.mxu1 %v2129_v26  ;;  %v2225_v26 = vld [vmem:[%s3209_s0 + $0x1c0] ss:$16 sps:$4 sm:$0xff]  }
  0x33   :  { %1093 = vmatprep.subr.bf16.mxu1 %v2330_v0 }
  0x36   :  { %1094 = vmatpush1.bf16.msra.mxu1 %v2131_v29  ;;  %1397 = vmatmul.mubr.bf16.gmra.mrb[4].mxu0 %v2144_v31  ;;  %v2238_v29 = vld [vmem:[%s3209_s0 + $0x22c] ss:$16 sps:$4 sm:$0xff]   ;;  %v2235_v31 = vld [vmem:[%s3209_s0 + $0x204] ss:$16 sps:$4 sm:$0xff]  }
  0x37   :  { %1095 = vmatprep.subr.bf16.mxu1 %v2330_v0  ;;  %2012 = vmatprep.mubr.msk.bf16.mxu0 %vm970_vm0, %v2148_v32  ;;  %v2240_v32 = vld [vmem:[%s3209_s0 + $0x228] ss:$16 sps:$4 sm:$0xff]  }
  0x3a   :  { %1096 = vmatpush1.bf16.msra.mxu1 %v2133_v30  ;;  %v2231_v30 = vld [vmem:[%s3209_s0 + $0x1e0] ss:$16 sps:$4 sm:$0xff]  }
  0x3b   :  { %1097 = vmatprep.subr.bf16.mxu1 %v2330_v0  ;;  %v2192_v0 = vld [vmem:[%s3209_s0 + $0x128] ss:$16 sps:$4 sm:$0xff]  }
  0x3e   :  { %1098 = vmatpush1.bf16.msra.mxu1 %v2138_v33  ;;  %1405 = vmatmul.mubr.bf16.gmra.mrb[8].mxu0 %v2150_v36  ;;  %v2244_v33 = vld [vmem:[%s3209_s0 + $0x24c] ss:$16 sps:$4 sm:$0xff]   ;;  %v2246_v36 = vld [vmem:[%s3209_s0 + $0x248] ss:$16 sps:$4 sm:$0xff]  }
  0x3f   :  { %2013 = vmatprep.mubr.msk.bf16.mxu0 %vm970_vm0, %v2154_v37  ;;  %v2250_v37 = vld [vmem:[%s3209_s0 + $0x26c] ss:$16 sps:$4 sm:$0xff]  }
  0x41   :  { %1100 = vmatmul.mubr.bf16.vlgmr.msra.gmra.mrb[0].mxu1 %v2139_v34  ;;  %v2237_v34 = vld [vmem:[%s3209_s0 + $0x200] ss:$16 sps:$4 sm:$0xff]  }
  0x42   :  { %1107 = vmatprep.mubr.bf16.mxu1 %v2145_v35  ;;  %v2241_v35 = vld [vmem:[%s3209_s0 + $0x224] ss:$16 sps:$4 sm:$0xff]  }
  0x46   :  { %1413 = vmatmul.mubr.bf16.gmra.mrb[12].mxu0 %v2156_v40  ;;  %v2252_v40 = vld [vmem:[%s3209_s0 + $0x268] ss:$16 sps:$4 sm:$0xff]  }
  0x47   :  { %2014 = vmatprep.mubr.msk.bf16.mxu0 %vm970_vm0, %v2160_v41  ;;  %v2256_v41 = vld [vmem:[%s3209_s0 + $0x28c] ss:$16 sps:$4 sm:$0xff]  }
  0x49   :  { %1108 = vmatmul.mubr.bf16.gmra.mrb[4].mxu1 %v2147_v38  ;;  %v2243_v38 = vld [vmem:[%s3209_s0 + $0x220] ss:$16 sps:$4 sm:$0xff]  }
  0x4a   :  { %1115 = vmatprep.mubr.bf16.mxu1 %v2151_v39  ;;  %v2247_v39 = vld [vmem:[%s3209_s0 + $0x244] ss:$16 sps:$4 sm:$0xff]  }
  0x4e   :  { %1421 = vmatmul.mubr.bf16.gmra.mrb[16].mxu0 %v2162_v44  ;;  %v2258_v44 = vld [vmem:[%s3209_s0 + $0x288] ss:$16 sps:$4 sm:$0xff]  }
  0x4f   :  { %2015 = vmatprep.mubr.msk.bf16.mxu0 %vm970_vm0, %v2166_v45  ;;  %v2262_v45 = vld [vmem:[%s3209_s0 + $0x2ac] ss:$16 sps:$4 sm:$0xff]  }
  0x51   :  { %1116 = vmatmul.mubr.bf16.gmra.mrb[8].mxu1 %v2153_v42  ;;  %v2249_v42 = vld [vmem:[%s3209_s0 + $0x240] ss:$16 sps:$4 sm:$0xff]  }
  0x52   :  { %1123 = vmatprep.mubr.bf16.mxu1 %v2157_v43  ;;  %v2253_v43 = vld [vmem:[%s3209_s0 + $0x264] ss:$16 sps:$4 sm:$0xff]  }
  0x56   :  { %1429 = vmatmul.mubr.bf16.gmra.mrb[20].mxu0 %v2168_v48  ;;  %v2264_v48 = vld [vmem:[%s3209_s0 + $0x2a8] ss:$16 sps:$4 sm:$0xff]  }
  0x57   :  { %2016 = vmatprep.mubr.msk.bf16.mxu0 %vm970_vm0, %v2172_v49  ;;  %v2268_v49 = vld [vmem:[%s3209_s0 + $0x2cc] ss:$16 sps:$4 sm:$0xff]  }
  0x59   :  { %1124 = vmatmul.mubr.bf16.gmra.mrb[12].mxu1 %v2159_v46  ;;  %v2255_v46 = vld [vmem:[%s3209_s0 + $0x260] ss:$16 sps:$4 sm:$0xff]  }
  0x5a   :  { %1131 = vmatprep.mubr.bf16.mxu1 %v2163_v47  ;;  %v2259_v47 = vld [vmem:[%s3209_s0 + $0x284] ss:$16 sps:$4 sm:$0xff]  }
  0x5e   :  { %1437 = vmatmul.mubr.bf16.gmra.mrb[24].mxu0 %v2174_v52  ;;  %v2270_v52 = vld [vmem:[%s3209_s0 + $0x2c8] ss:$16 sps:$4 sm:$0xff]  }
  0x5f   :  { %2017 = vmatprep.mubr.msk.bf16.mxu0 %vm970_vm0, %v2178_v53  ;;  %v2274_v53 = vld [vmem:[%s3209_s0 + $0x2ec] ss:$16 sps:$4 sm:$0xff]  }
  0x61   :  { %1132 = vmatmul.mubr.bf16.gmra.mrb[16].mxu1 %v2165_v50  ;;  %v2261_v50 = vld [vmem:[%s3209_s0 + $0x280] ss:$16 sps:$4 sm:$0xff]  }
  0x62   :  { %1139 = vmatprep.mubr.bf16.mxu1 %v2169_v51  ;;  %v2265_v51 = vld [vmem:[%s3209_s0 + $0x2a4] ss:$16 sps:$4 sm:$0xff]  }
  0x66   :  { %1445 = vmatmul.mubr.bf16.gmra.mrb[28].mxu0 %v2180_v56  ;;  %v2276_v56 = vld [vmem:[%s3209_s0 + $0x2e8] ss:$16 sps:$4 sm:$0xff]  }
  0x67   :  { %2018 = vmatprep.mubr.msk.bf16.mxu0 %vm970_vm0, %v2184_v57  ;;  %v2280_v57 = vld [vmem:[%s3209_s0 + $0x30c] ss:$16 sps:$4 sm:$0xff]  }
  0x69   :  { %1140 = vmatmul.mubr.bf16.gmra.mrb[20].mxu1 %v2171_v54  ;;  %v2267_v54 = vld [vmem:[%s3209_s0 + $0x2a0] ss:$16 sps:$4 sm:$0xff]  }
  0x6a   :  { %1147 = vmatprep.mubr.bf16.mxu1 %v2175_v55  ;;  %v2271_v55 = vld [vmem:[%s3209_s0 + $0x2c4] ss:$16 sps:$4 sm:$0xff]  }
  0x6e   :  { %1453 = vmatmul.mubr.bf16.gmra.mrb[32].mxu0 %v2186_v60  ;;  %v2282_v60 = vld [vmem:[%s3209_s0 + $0x308] ss:$16 sps:$4 sm:$0xff]  }
  0x6f   :  { %2019 = vmatprep.mubr.msk.bf16.mxu0 %vm970_vm0, %v2190_v61  ;;  %v2286_v61 = vld [vmem:[%s3209_s0 + $0x32c] ss:$16 sps:$4 sm:$0xff]  }
  0x71   :  { %1148 = vmatmul.mubr.bf16.gmra.mrb[24].mxu1 %v2177_v58  ;;  %v2273_v58 = vld [vmem:[%s3209_s0 + $0x2c0] ss:$16 sps:$4 sm:$0xff]  }
  0x72   :  { %1155 = vmatprep.mubr.bf16.mxu1 %v2181_v59  ;;  %v2277_v59 = vld [vmem:[%s3209_s0 + $0x2e4] ss:$16 sps:$4 sm:$0xff]  }
  0x76   :  { %1461 = vmatmul.mubr.bf16.gmra.mrb[36].mxu0 %v2192_v0  ;;  %v2288_v0 = vld [vmem:[%s3209_s0 + $0x328] ss:$16 sps:$4 sm:$0xff]  }
  0x77   :  { %2020 = vmatprep.mubr.msk.bf16.mxu0 %vm970_vm0, %v2196_v1  ;;  %v2292_v1 = vld [vmem:[%s3209_s0 + $0x34c] ss:$16 sps:$4 sm:$0xff]  }
  0x79   :  { %1156 = vmatmul.mubr.bf16.gmra.mrb[28].mxu1 %v2183_v62  ;;  %v2279_v62 = vld [vmem:[%s3209_s0 + $0x2e0] ss:$16 sps:$4 sm:$0xff]  }
  0x7a   :  { %1163 = vmatprep.mubr.bf16.mxu1 %v2187_v63  ;;  %v2283_v63 = vld [vmem:[%s3209_s0 + $0x304] ss:$16 sps:$4 sm:$0xff]  }
  0x7e   :  { %1469 = vmatmul.mubr.bf16.gmra.mrb[40].mxu0 %v2198_v4  ;;  %v2294_v4 = vld [vmem:[%s3209_s0 + $0x348] ss:$16 sps:$4 sm:$0xff]  }
  0x7f   :  { %2021 = vmatprep.mubr.msk.bf16.mxu0 %vm970_vm0, %v2202_v5  ;;  %v2298_v5 = vld [vmem:[%s3209_s0 + $0x36c] ss:$16 sps:$4 sm:$0xff]  }
  0x81   :  { %1164 = vmatmul.mubr.bf16.gmra.mrb[32].mxu1 %v2189_v2  ;;  %v2285_v2 = vld [vmem:[%s3209_s0 + $0x300] ss:$16 sps:$4 sm:$0xff]  }
  0x82   :  { %1171 = vmatprep.mubr.bf16.mxu1 %v2193_v3  ;;  %v2289_v3 = vld [vmem:[%s3209_s0 + $0x324] ss:$16 sps:$4 sm:$0xff]  }
  0x86   :  { %1477 = vmatmul.mubr.bf16.gmra.mrb[44].mxu0 %v2204_v8  ;;  %v2295_v8 = vld [vmem:[%s3209_s0 + $0x344] ss:$16 sps:$4 sm:$0xff]  }
  0x87   :  { %2022 = vmatprep.mubr.msk.bf16.mxu0 %vm970_vm0, %v2208_v9 }
  0x89   :  { %1172 = vmatmul.mubr.bf16.gmra.mrb[36].mxu1 %v2195_v6  ;;  %v2291_v6 = vld [vmem:[%s3209_s0 + $0x320] ss:$16 sps:$4 sm:$0xff]  }
  0x8a   :  { %1179 = vmatprep.mubr.bf16.mxu1 %v2199_v7 }
  0x8e   :  { %1485 = vmatmul.mubr.bf16.gmra.mrb[48].mxu0 %v2210_v12  ;;  %v2304_v12 = vld [vmem:[%s3209_s0 + $0x38c] ss:$16 sps:$4 sm:$0xff]  }
  0x8f   :  { %2023 = vmatprep.mubr.msk.bf16.mxu0 %vm970_vm0, %v2214_v13 }
  0x91   :  { %1180 = vmatmul.mubr.bf16.gmra.mrb[40].mxu1 %v2201_v10  ;;  %v2300_v10 = vld [vmem:[%s3209_s0 + $0x368] ss:$16 sps:$4 sm:$0xff]  }
  0x92   :  { %1187 = vmatprep.mubr.bf16.mxu1 %v2205_v11 }
  0x96   :  { %1493 = vmatmul.mubr.bf16.gmra.mrb[52].mxu0 %v2216_v16  ;;  %v2301_v16 = vld [vmem:[%s3209_s0 + $0x364] ss:$16 sps:$4 sm:$0xff]  }
  0x97   :  { %2024 = vmatprep.mubr.msk.bf16.mxu0 %vm970_vm0, %v2220_v17 }
  0x99   :  { %1188 = vmatmul.mubr.bf16.gmra.mrb[44].mxu1 %v2207_v14  ;;  %v2297_v14 = vld [vmem:[%s3209_s0 + $0x340] ss:$16 sps:$4 sm:$0xff]  }
  0x9a   :  { %1195 = vmatprep.mubr.bf16.mxu1 %v2211_v15 }
  0x9e   :  { %1501 = vmatmul.mubr.bf16.gmra.mrb[56].mxu0 %v2222_v20  ;;  %v2310_v20 = vld [vmem:[%s3209_s0 + $0x3ac] ss:$16 sps:$4 sm:$0xff]  }
  0x9f   :  { %2025 = vmatprep.mubr.msk.bf16.mxu0 %vm970_vm0, %v2226_v21 }
  0xa1   :  { %1196 = vmatmul.mubr.bf16.gmra.mrb[48].mxu1 %v2213_v18  ;;  %v2306_v18 = vld [vmem:[%s3209_s0 + $0x388] ss:$16 sps:$4 sm:$0xff]  }
  0xa2   :  { %1203 = vmatprep.mubr.bf16.mxu1 %v2217_v19 }
  0xa6   :  { %1509 = vmatmul.mubr.bf16.gmra.mrb[60].mxu0 %v2228_v24 }
  0xa7   :  { %2026 = vmatprep.mubr.msk.bf16.mxu0 %vm970_vm0, %v2232_v25  ;;  %v2844_v25 = vld [vmem:[%s3211_s3] ss:$0 sm:$0xff] }
  0xa9   :  { %1204 = vmatmul.mubr.bf16.gmra.mrb[52].mxu1 %v2219_v22 }
  0xaa   :  { %1211 = vmatprep.mubr.bf16.mxu1 %v2223_v23  ;;  %v2839_v23 = vld [vmem:[%s3210_s2] ss:$0 sm:$0xff] }
  0xae   :  { %1517 = vmatmul.mubr.bf16.gmra.mrb[64].mxu0 %v2234_v28 }
  0xaf   :  { %2027 = vmatprep.mubr.msk.bf16.mxu0 %vm970_vm0, %v2238_v29 }
  0xb1   :  { %1212 = vmatmul.mubr.bf16.gmra.mrb[56].mxu1 %v2225_v26 }
  0xb2   :  { %1219 = vmatprep.mubr.bf16.mxu1 %v2229_v27  ;;  %v2303_v27 = vld [vmem:[%s3209_s0 + $0x360] ss:$16 sps:$4 sm:$0xff]  }
  0xb6   :  { %1525 = vmatmul.mubr.bf16.gmra.mrb[68].mxu0 %v2240_v32  ;;  %v2312_v32 = vld [vmem:[%s3209_s0 + $0x3a8] ss:$16 sps:$4 sm:$0xff]  }
  0xb7   :  { %2028 = vmatprep.mubr.msk.bf16.mxu0 %vm970_vm0, %v2244_v33 }
  0xb9   :  { %1220 = vmatmul.mubr.bf16.gmra.mrb[60].mxu1 %v2231_v30  ;;  %v2307_v30 = vld [vmem:[%s3209_s0 + $0x384] ss:$16 sps:$4 sm:$0xff]  }
  0xba   :  { %1227 = vmatprep.mubr.bf16.mxu1 %v2235_v31 }
  0xbe   :  { %1533 = vmatmul.mubr.bf16.gmra.mrb[72].mxu0 %v2246_v36 }
  0xbf   :  { %2029 = vmatprep.mubr.msk.bf16.mxu0 %vm970_vm0, %v2250_v37  ;;  %v2316_v37 = vld [vmem:[%s3209_s0 + $0x3cc] ss:$16 sps:$4 sm:$0xff]  }
  0xc1   :  { %1228 = vmatmul.mubr.bf16.gmra.mrb[64].mxu1 %v2237_v34 }
  0xc2   :  { %1235 = vmatprep.mubr.bf16.mxu1 %v2241_v35 }
  0xc6   :  { %1541 = vmatmul.mubr.bf16.gmra.mrb[76].mxu0 %v2252_v40 }
  0xc7   :  { %2030 = vmatprep.mubr.msk.bf16.mxu0 %vm970_vm0, %v2256_v41 }
  0xc9   :  { %1236 = vmatmul.mubr.bf16.gmra.mrb[68].mxu1 %v2243_v38 }
  0xca   :  { %1243 = vmatprep.mubr.bf16.mxu1 %v2247_v39 }
  0xce   :  { %1549 = vmatmul.mubr.bf16.gmra.mrb[80].mxu0 %v2258_v44 }
  0xcf   :  { %2031 = vmatprep.mubr.msk.bf16.mxu0 %vm970_vm0, %v2262_v45  ;;  %v2309_v45 = vld [vmem:[%s3209_s0 + $0x380] ss:$16 sps:$4 sm:$0xff]  }
  0xd1   :  { %1244 = vmatmul.mubr.bf16.gmra.mrb[72].mxu1 %v2249_v42 }
  0xd2   :  { %1251 = vmatprep.mubr.bf16.mxu1 %v2253_v43 }
  0xd6   :  { %1557 = vmatmul.mubr.bf16.gmra.mrb[84].mxu0 %v2264_v48  ;;  %v2313_v48 = vld [vmem:[%s3209_s0 + $0x3a4] ss:$16 sps:$4 sm:$0xff]  }
  0xd7   :  { %2032 = vmatprep.mubr.msk.bf16.mxu0 %vm970_vm0, %v2268_v49 }
  0xd9   :  { %1252 = vmatmul.mubr.bf16.gmra.mrb[76].mxu1 %v2255_v46 }
  0xda   :  { %1259 = vmatprep.mubr.bf16.mxu1 %v2259_v47 }
  0xde   :  { %1565 = vmatmul.mubr.bf16.gmra.mrb[88].mxu0 %v2270_v52 }
  0xdf   :  { %2033 = vmatprep.mubr.msk.bf16.mxu0 %vm970_vm0, %v2274_v53 }
  0xe1   :  { %1260 = vmatmul.mubr.bf16.gmra.mrb[80].mxu1 %v2261_v50  ;;  %v2318_v50 = vld [vmem:[%s3209_s0 + $0x3c8] ss:$16 sps:$4 sm:$0xff]  }
  0xe2   :  { %1267 = vmatprep.mubr.bf16.mxu1 %v2265_v51 }
  0xe6   :  { %1573 = vmatmul.mubr.bf16.gmra.mrb[92].mxu0 %v2276_v56 }
  0xe7   :  { %2034 = vmatprep.mubr.msk.bf16.mxu0 %vm970_vm0, %v2280_v57 }
  0xe9   :  { %1268 = vmatmul.mubr.bf16.gmra.mrb[84].mxu1 %v2267_v54 }
  0xea   :  { %1275 = vmatprep.mubr.bf16.mxu1 %v2271_v55  ;;  %v2322_v55 = vld [vmem:[%s3209_s0 + $0x3ec] ss:$16 sps:$4 sm:$0xff]  }
  0xee   :  { %1581 = vmatmul.mubr.bf16.gmra.mrb[96].mxu0 %v2282_v60 }
  0xef   :  { %2035 = vmatprep.mubr.msk.bf16.mxu0 %vm970_vm0, %v2286_v61 }
  0xf1   :  { %1276 = vmatmul.mubr.bf16.gmra.mrb[88].mxu1 %v2273_v58 }
  0xf2   :  { %1283 = vmatprep.mubr.bf16.mxu1 %v2277_v59 }
  0xf6   :  { %1589 = vmatmul.mubr.bf16.gmra.mrb[100].mxu0 %v2288_v0 }
  0xf7   :  { %2036 = vmatprep.mubr.msk.bf16.mxu0 %vm970_vm0, %v2292_v1 }
  0xf9   :  { %1284 = vmatmul.mubr.bf16.gmra.mrb[92].mxu1 %v2279_v62 }
  0xfa   :  { %1291 = vmatprep.mubr.bf16.mxu1 %v2283_v63  ;;  %v2315_v63 = vld [vmem:[%s3209_s0 + $0x3a0] ss:$16 sps:$4 sm:$0xff]  }
  0xfe   :  { %1597 = vmatmul.mubr.bf16.gmra.mrb[104].mxu0 %v2294_v4  ;;  %v2324_v4 = vld [vmem:[%s3209_s0 + $0x3e8] ss:$16 sps:$4 sm:$0xff]  }
  0xff   :  { %2037 = vmatprep.mubr.msk.bf16.mxu0 %vm970_vm0, %v2298_v5 }
 0x101   :  { %1292 = vmatmul.mubr.bf16.gmra.mrb[96].mxu1 %v2285_v2  ;;  %v1390_v7 = vpop.f32.mrb[0].mxu0  ;;  %v2319_v2 = vld [vmem:[%s3209_s0 + $0x3c4] ss:$16 sps:$4 sm:$0xff]  }
 0x102   :  { %1299 = vmatprep.mubr.bf16.mxu1 %v2289_v3  ;;  %v1392_v9 = vpop.f32.mrb[1].mxu0 }
 0x103   :  { %v1393_v11 = vpop.f32.mrb[2].mxu0 }
 0x104   :  { %v1395_v13 = vpop.f32.mrb[3].mxu0 }
 0x106   :  { %1605 = vmatmul.mubr.bf16.gmra.mrb[108].mxu0 %v2300_v10 }
 0x107   :  { %2038 = vmatprep.mubr.msk.bf16.mxu0 %vm970_vm0, %v2304_v12 }
 0x109   :  { %1300 = vmatmul.mubr.bf16.gmra.mrb[100].mxu1 %v2291_v6  ;;  %v1398_v15 = vpop.f32.mrb[4].mxu0 }
 0x10a   :  { %1307 = vmatprep.mubr.bf16.mxu1 %v2295_v8  ;;  %v1400_v17 = vpop.f32.mrb[5].mxu0 }
 0x10b   :  { %v1401_v19 = vpop.f32.mrb[6].mxu0 }
 0x10c   :  { %v1403_v21 = vpop.f32.mrb[7].mxu0 }
 0x10e   :  { %1613 = vmatmul.mubr.bf16.gmra.mrb[112].mxu0 %v2306_v18 }
 0x10f   :  { %2039 = vmatprep.mubr.msk.bf16.mxu0 %vm970_vm0, %v2310_v20 }
 0x111   :  { %1308 = vmatmul.mubr.bf16.gmra.mrb[104].mxu1 %v2297_v14  ;;  %v1406_v28 = vpop.f32.mrb[8].mxu0 }
 0x112   :  { %1315 = vmatprep.mubr.bf16.mxu1 %v2301_v16  ;;  %v1408_v31 = vpop.f32.mrb[9].mxu0  ;;  %v2321_v16 = vld [vmem:[%s3209_s0 + $0x3c0] ss:$16 sps:$4 sm:$0xff]  }
 0x113   :  { %v1409_v36 = vpop.f32.mrb[10].mxu0 }
 0x114   :  { %v1101_v22 = vpop.f32.mrb[0].mxu1  ;;  %v1411_v38 = vpop.f32.mrb[11].mxu0 }
 0x115   :  { %v1391_v24 = vadd.f32 %v1390_v7, %v1101_v22  ;;  %v1103_v26 = vpop.f32.mrb[1].mxu1 }
 0x116   :  { %v1104_v29 = vpop.f32.mrb[2].mxu1  ;;  %1621 = vmatmul.mubr.bf16.gmra.mrb[116].mxu0 %v2312_v32 }
 0x117   :  { %v1652_v33 = vmul.f32 %v2839_v23, %v1391_v24  ;;  %v1394_v34 = vadd.f32 %v1393_v11, %v1104_v29  ;;  %v1106_v35 = vpop.f32.mrb[3].mxu1  ;;  %2040 = vmatprep.mubr.msk.bf16.mxu0 %vm970_vm0, %v2316_v37 }
 0x119   :  { %v1723_v39 = vadd.f32 %v2844_v25, %v1652_v33  ;;  %v1653_v40 = vmul.f32 %v2839_v23, %v1394_v34  ;;  %1316 = vmatmul.mubr.bf16.gmra.mrb[108].mxu1 %v2303_v27  ;;  %v1414_v46 = vpop.f32.mrb[12].mxu0  ;;  %v2327_v34 = vld [vmem:[%s3209_s0 + $0x3e0] ss:$16 sps:$4 sm:$0xff]  }
 0x11a   :  { %1323 = vmatprep.mubr.bf16.mxu1 %v2307_v30  ;;  %v1416_v49 = vpop.f32.mrb[13].mxu0 }
 0x11b   :  { %1787 = vst [vmem:[%s3212_s4] sm:$0xff] %v1723_v39  ;;  %v1724_v41 = vadd.f32 %v2844_v25, %v1653_v40  ;;  %v1417_v54 = vpop.f32.mrb[14].mxu0 }
 0x11c   :  { %v1109_v42 = vpop.f32.mrb[4].mxu1  ;;  %v1419_v56 = vpop.f32.mrb[15].mxu0 }
 0x11d   :  { %1788 = vst [vmem:[%s3212_s4 + $0x8] sm:$0xff] %v1724_v41  ;;  %v1399_v43 = vadd.f32 %v1398_v15, %v1109_v42  ;;  %v1111_v44 = vpop.f32.mrb[5].mxu1 }
 0x11e   :  { %v1112_v47 = vpop.f32.mrb[6].mxu1  ;;  %1629 = vmatmul.mubr.bf16.gmra.mrb[120].mxu0 %v2318_v50 }
 0x11f   :  { %v1654_v51 = vmul.f32 %v2839_v23, %v1399_v43  ;;  %v1402_v52 = vadd.f32 %v1401_v19, %v1112_v47  ;;  %v1114_v53 = vpop.f32.mrb[7].mxu1  ;;  %2041 = vmatprep.mubr.msk.bf16.mxu0 %vm970_vm0, %v2322_v55  ;;  %v2325_v19 = vld [vmem:[%s3209_s0 + $0x3e4] ss:$16 sps:$4 sm:$0xff]  }
 0x121   :  { %v1725_v57 = vadd.f32 %v2844_v25, %v1654_v51  ;;  %v1655_v58 = vmul.f32 %v2839_v23, %v1402_v52  ;;  %1324 = vmatmul.mubr.bf16.gmra.mrb[112].mxu1 %v2309_v45  ;;  %v1422_v0 = vpop.f32.mrb[16].mxu0 }
 0x122   :  { %1331 = vmatprep.mubr.bf16.mxu1 %v2313_v48  ;;  %v1424_v3 = vpop.f32.mrb[17].mxu0 }
 0x123   :  { %1789 = vst [vmem:[%s3212_s4 + $0x10] sm:$0xff] %v1725_v57  ;;  %v1726_v59 = vadd.f32 %v2844_v25, %v1655_v58  ;;  %v1425_v8 = vpop.f32.mrb[18].mxu0 }
 0x124   :  { %v1117_v60 = vpop.f32.mrb[8].mxu1  ;;  %v1427_v9 = vpop.f32.mrb[19].mxu0 }
 0x125   :  { %1790 = vst [vmem:[%s3212_s4 + $0x18] sm:$0xff] %v1726_v59  ;;  %v1407_v61 = vadd.f32 %v1406_v28, %v1117_v60  ;;  %v1119_v62 = vpop.f32.mrb[9].mxu1 }
 0x126   :  { %v1120_v1 = vpop.f32.mrb[10].mxu1  ;;  %1637 = vmatmul.mubr.bf16.gmra.mrb[124].mxu0 %v2324_v4 }
 0x127   :  { %v1656_v5 = vmul.f32 %v2839_v23, %v1407_v61  ;;  %v1410_v6 = vadd.f32 %v1409_v36, %v1120_v1  ;;  %v1122_v7 = vpop.f32.mrb[11].mxu1 }
 0x129   :  { %v1727_v10 = vadd.f32 %v2844_v25, %v1656_v5  ;;  %v1657_v11 = vmul.f32 %v2839_v23, %v1410_v6  ;;  %1332 = vmatmul.mubr.bf16.gmra.mrb[116].mxu1 %v2315_v63  ;;  %v1430_v17 = vpop.f32.mrb[20].mxu0 }
 0x12a   :  { %1339 = vmatprep.mubr.bf16.mxu1 %v2319_v2  ;;  %v1432_v20 = vpop.f32.mrb[21].mxu0 }
 0x12b   :  { %1791 = vst [vmem:[%s3212_s4 + $0x20] sm:$0xff] %v1727_v10  ;;  %v1728_v12 = vadd.f32 %v2844_v25, %v1657_v11  ;;  %v1433_v26 = vpop.f32.mrb[22].mxu0 }
 0x12c   :  { %v1125_v13 = vpop.f32.mrb[12].mxu1  ;;  %v1435_v27 = vpop.f32.mrb[23].mxu0 }
 0x12d   :  { %1792 = vst [vmem:[%s3212_s4 + $0x28] sm:$0xff] %v1728_v12  ;;  %v1415_v14 = vadd.f32 %v1414_v46, %v1125_v13  ;;  %v1127_v15 = vpop.f32.mrb[13].mxu1 }
 0x12e   :  { %v1128_v18 = vpop.f32.mrb[14].mxu1 }
 0x12f   :  { %v1658_v21 = vmul.f32 %v2839_v23, %v1415_v14  ;;  %v1418_v22 = vadd.f32 %v1417_v54, %v1128_v18  ;;  %v1130_v24 = vpop.f32.mrb[15].mxu1 }
 0x131   :  { %v1729_v28 = vadd.f32 %v2844_v25, %v1658_v21  ;;  %v1659_v29 = vmul.f32 %v2839_v23, %v1418_v22  ;;  %1340 = vmatmul.mubr.bf16.gmra.mrb[120].mxu1 %v2321_v16  ;;  %v1438_v35 = vpop.f32.mrb[24].mxu0 }
 0x132   :  { %1347 = vmatprep.mubr.bf16.mxu1 %v2325_v19  ;;  %v1440_v37 = vpop.f32.mrb[25].mxu0 }
 0x133   :  { %1793 = vst [vmem:[%s3212_s4 + $0x30] sm:$0xff] %v1729_v28  ;;  %v1730_v30 = vadd.f32 %v2844_v25, %v1659_v29  ;;  %v1441_v41 = vpop.f32.mrb[26].mxu0 }
 0x134   :  { %v1133_v31 = vpop.f32.mrb[16].mxu1  ;;  %v1443_v42 = vpop.f32.mrb[27].mxu0 }
 0x135   :  { %1794 = vst [vmem:[%s3212_s4 + $0x38] sm:$0xff] %v1730_v30  ;;  %v1423_v32 = vadd.f32 %v1422_v0, %v1133_v31  ;;  %v1135_v33 = vpop.f32.mrb[17].mxu1 }
 0x136   :  { %v1136_v36 = vpop.f32.mrb[18].mxu1 }
 0x137   :  { %v1660_v38 = vmul.f32 %v2839_v23, %v1423_v32  ;;  %v1426_v39 = vadd.f32 %v1425_v8, %v1136_v36  ;;  %v1138_v40 = vpop.f32.mrb[19].mxu1 }
 0x139   :  { %v1731_v43 = vadd.f32 %v2844_v25, %v1660_v38  ;;  %v1661_v44 = vmul.f32 %v2839_v23, %v1426_v39  ;;  %1348 = vmatmul.mubr.bf16.gmra.mrb[124].mxu1 %v2327_v34  ;;  %v1446_v49 = vpop.f32.mrb[28].mxu0 }
 0x13a   :  { %v1448_v51 = vpop.f32.mrb[29].mxu0 }
 0x13b   :  { %1795 = vst [vmem:[%s3212_s4 + $0x40] sm:$0xff] %v1731_v43  ;;  %v1732_v45 = vadd.f32 %v2844_v25, %v1661_v44  ;;  %v1449_v55 = vpop.f32.mrb[30].mxu0 }
 0x13c   :  { %v1141_v46 = vpop.f32.mrb[20].mxu1  ;;  %v1451_v56 = vpop.f32.mrb[31].mxu0 }
 0x13d   :  { %1796 = vst [vmem:[%s3212_s4 + $0x48] sm:$0xff] %v1732_v45  ;;  %v1431_v47 = vadd.f32 %v1430_v17, %v1141_v46  ;;  %v1143_v48 = vpop.f32.mrb[21].mxu1 }
 0x13e   :  { %v1144_v50 = vpop.f32.mrb[22].mxu1 }
 0x13f   :  { %v1662_v52 = vmul.f32 %v2839_v23, %v1431_v47  ;;  %v1434_v53 = vadd.f32 %v1433_v26, %v1144_v50  ;;  %v1146_v54 = vpop.f32.mrb[23].mxu1 }
 0x141   :  { %v1733_v57 = vadd.f32 %v2844_v25, %v1662_v52  ;;  %v1663_v58 = vmul.f32 %v2839_v23, %v1434_v53  ;;  %v1454_v63 = vpop.f32.mrb[32].mxu0 }
 0x142   :  { %v1456_v1 = vpop.f32.mrb[33].mxu0 }
 0x143   :  { %1797 = vst [vmem:[%s3212_s4 + $0x50] sm:$0xff] %v1733_v57  ;;  %v1734_v59 = vadd.f32 %v2844_v25, %v1663_v58  ;;  %v1457_v5 = vpop.f32.mrb[34].mxu0 }
 0x144   :  { %v1149_v60 = vpop.f32.mrb[24].mxu1  ;;  %v1459_v6 = vpop.f32.mrb[35].mxu0 }
 0x145   :  { %1798 = vst [vmem:[%s3212_s4 + $0x58] sm:$0xff] %v1734_v59  ;;  %v1439_v61 = vadd.f32 %v1438_v35, %v1149_v60  ;;  %v1151_v62 = vpop.f32.mrb[25].mxu1 }
 0x146   :  { %v1152_v0 = vpop.f32.mrb[26].mxu1 }
 0x147   :  { %v1664_v2 = vmul.f32 %v2839_v23, %v1439_v61  ;;  %v1442_v3 = vadd.f32 %v1441_v41, %v1152_v0  ;;  %v1154_v4 = vpop.f32.mrb[27].mxu1 }
 0x149   :  { %v1735_v7 = vadd.f32 %v2844_v25, %v1664_v2  ;;  %v1665_v8 = vmul.f32 %v2839_v23, %v1442_v3  ;;  %v1462_v13 = vpop.f32.mrb[36].mxu0 }
 0x14a   :  { %v1464_v15 = vpop.f32.mrb[37].mxu0 }
 0x14b   :  { %1799 = vst [vmem:[%s3212_s4 + $0x60] sm:$0xff] %v1735_v7  ;;  %v1736_v9 = vadd.f32 %v2844_v25, %v1665_v8  ;;  %v1465_v19 = vpop.f32.mrb[38].mxu0 }
 0x14c   :  { %v1157_v10 = vpop.f32.mrb[28].mxu1  ;;  %v1467_v20 = vpop.f32.mrb[39].mxu0 }
 0x14d   :  { %1800 = vst [vmem:[%s3212_s4 + $0x68] sm:$0xff] %v1736_v9  ;;  %v1447_v11 = vadd.f32 %v1446_v49, %v1157_v10  ;;  %v1159_v12 = vpop.f32.mrb[29].mxu1 }
 0x14e   :  { %v1160_v14 = vpop.f32.mrb[30].mxu1 }
 0x14f   :  { %v1666_v16 = vmul.f32 %v2839_v23, %v1447_v11  ;;  %v1450_v17 = vadd.f32 %v1449_v55, %v1160_v14  ;;  %v1162_v18 = vpop.f32.mrb[31].mxu1 }
 0x151   :  { %v1737_v21 = vadd.f32 %v2844_v25, %v1666_v16  ;;  %v1667_v22 = vmul.f32 %v2839_v23, %v1450_v17  ;;  %v1470_v29 = vpop.f32.mrb[40].mxu0 }
 0x152   :  { %v1472_v31 = vpop.f32.mrb[41].mxu0 }
 0x153   :  { %1801 = vst [vmem:[%s3212_s4 + $0x70] sm:$0xff] %v1737_v21  ;;  %v1738_v24 = vadd.f32 %v2844_v25, %v1667_v22  ;;  %v1473_v35 = vpop.f32.mrb[42].mxu0 }
 0x154   :  { %v1165_v26 = vpop.f32.mrb[32].mxu1  ;;  %v1475_v36 = vpop.f32.mrb[43].mxu0 }
 0x155   :  { %1802 = vst [vmem:[%s3212_s4 + $0x78] sm:$0xff] %v1738_v24  ;;  %v1455_v27 = vadd.f32 %v1454_v63, %v1165_v26  ;;  %v1167_v28 = vpop.f32.mrb[33].mxu1 }
 0x156   :  { %v1168_v30 = vpop.f32.mrb[34].mxu1 }
 0x157   :  { %v1668_v32 = vmul.f32 %v2839_v23, %v1455_v27  ;;  %v1458_v33 = vadd.f32 %v1457_v5, %v1168_v30  ;;  %v1170_v34 = vpop.f32.mrb[35].mxu1 }
 0x159   :  { %v1739_v37 = vadd.f32 %v2844_v25, %v1668_v32  ;;  %v1669_v38 = vmul.f32 %v2839_v23, %v1458_v33  ;;  %v1478_v43 = vpop.f32.mrb[44].mxu0 }
 0x15a   :  { %v1480_v45 = vpop.f32.mrb[45].mxu0 }
 0x15b   :  { %1803 = vst [vmem:[%s3212_s4 + $0x80] sm:$0xff] %v1739_v37  ;;  %v1740_v39 = vadd.f32 %v2844_v25, %v1669_v38  ;;  %v1481_v49 = vpop.f32.mrb[46].mxu0 }
 0x15c   :  { %v1173_v40 = vpop.f32.mrb[36].mxu1  ;;  %v1483_v50 = vpop.f32.mrb[47].mxu0 }
 0x15d   :  { %1804 = vst [vmem:[%s3212_s4 + $0x88] sm:$0xff] %v1740_v39  ;;  %v1463_v41 = vadd.f32 %v1462_v13, %v1173_v40  ;;  %v1175_v42 = vpop.f32.mrb[37].mxu1 }
 0x15e   :  { %v1176_v44 = vpop.f32.mrb[38].mxu1 }
 0x15f   :  { %v1670_v46 = vmul.f32 %v2839_v23, %v1463_v41  ;;  %v1466_v47 = vadd.f32 %v1465_v19, %v1176_v44  ;;  %v1178_v48 = vpop.f32.mrb[39].mxu1 }
 0x161   :  { %v1741_v51 = vadd.f32 %v2844_v25, %v1670_v46  ;;  %v1671_v52 = vmul.f32 %v2839_v23, %v1466_v47  ;;  %v1486_v57 = vpop.f32.mrb[48].mxu0 }
 0x162   :  { %v1488_v59 = vpop.f32.mrb[49].mxu0 }
 0x163   :  { %1805 = vst [vmem:[%s3212_s4 + $0x90] sm:$0xff] %v1741_v51  ;;  %v1742_v53 = vadd.f32 %v2844_v25, %v1671_v52  ;;  %v1489_v63 = vpop.f32.mrb[50].mxu0 }
 0x164   :  { %v1181_v54 = vpop.f32.mrb[40].mxu1  ;;  %v1491_v0 = vpop.f32.mrb[51].mxu0 }
 0x165   :  { %1806 = vst [vmem:[%s3212_s4 + $0x98] sm:$0xff] %v1742_v53  ;;  %v1471_v55 = vadd.f32 %v1470_v29, %v1181_v54  ;;  %v1183_v56 = vpop.f32.mrb[41].mxu1 }
 0x166   :  { %v1184_v58 = vpop.f32.mrb[42].mxu1 }
 0x167   :  { %v1672_v60 = vmul.f32 %v2839_v23, %v1471_v55  ;;  %v1474_v61 = vadd.f32 %v1473_v35, %v1184_v58  ;;  %v1186_v62 = vpop.f32.mrb[43].mxu1 }
 0x169   :  { %v1743_v1 = vadd.f32 %v2844_v25, %v1672_v60  ;;  %v1673_v2 = vmul.f32 %v2839_v23, %v1474_v61  ;;  %v1494_v7 = vpop.f32.mrb[52].mxu0 }
 0x16a   :  { %v1496_v9 = vpop.f32.mrb[53].mxu0 }
 0x16b   :  { %1807 = vst [vmem:[%s3212_s4 + $0xa0] sm:$0xff] %v1743_v1  ;;  %v1744_v3 = vadd.f32 %v2844_v25, %v1673_v2  ;;  %v1497_v13 = vpop.f32.mrb[54].mxu0 }
 0x16c   :  { %v1189_v4 = vpop.f32.mrb[44].mxu1  ;;  %v1499_v14 = vpop.f32.mrb[55].mxu0 }
 0x16d   :  { %1808 = vst [vmem:[%s3212_s4 + $0xa8] sm:$0xff] %v1744_v3  ;;  %v1479_v5 = vadd.f32 %v1478_v43, %v1189_v4  ;;  %v1191_v6 = vpop.f32.mrb[45].mxu1 }
 0x16e   :  { %v1192_v8 = vpop.f32.mrb[46].mxu1 }
 0x16f   :  { %v1674_v10 = vmul.f32 %v2839_v23, %v1479_v5  ;;  %v1482_v11 = vadd.f32 %v1481_v49, %v1192_v8  ;;  %v1194_v12 = vpop.f32.mrb[47].mxu1 }
 0x171   :  { %v1745_v15 = vadd.f32 %v2844_v25, %v1674_v10  ;;  %v1675_v16 = vmul.f32 %v2839_v23, %v1482_v11  ;;  %v1502_v21 = vpop.f32.mrb[56].mxu0 }
 0x172   :  { %v1504_v24 = vpop.f32.mrb[57].mxu0 }
 0x173   :  { %1809 = vst [vmem:[%s3212_s4 + $0xb0] sm:$0xff] %v1745_v15  ;;  %v1746_v17 = vadd.f32 %v2844_v25, %v1675_v16  ;;  %v1505_v29 = vpop.f32.mrb[58].mxu0 }
 0x174   :  { %v1197_v18 = vpop.f32.mrb[48].mxu1  ;;  %v1507_v30 = vpop.f32.mrb[59].mxu0 }
 0x175   :  { %1810 = vst [vmem:[%s3212_s4 + $0xb8] sm:$0xff] %v1746_v17  ;;  %v1487_v19 = vadd.f32 %v1486_v57, %v1197_v18  ;;  %v1199_v20 = vpop.f32.mrb[49].mxu1 }
 0x176   :  { %v1200_v22 = vpop.f32.mrb[50].mxu1 }
 0x177   :  { %v1676_v26 = vmul.f32 %v2839_v23, %v1487_v19  ;;  %v1490_v27 = vadd.f32 %v1489_v63, %v1200_v22  ;;  %v1202_v28 = vpop.f32.mrb[51].mxu1 }
 0x179   :  { %v1747_v31 = vadd.f32 %v2844_v25, %v1676_v26  ;;  %v1677_v32 = vmul.f32 %v2839_v23, %v1490_v27  ;;  %v1510_v37 = vpop.f32.mrb[60].mxu0 }
 0x17a   :  { %v1512_v39 = vpop.f32.mrb[61].mxu0 }
 0x17b   :  { %1811 = vst [vmem:[%s3212_s4 + $0xc0] sm:$0xff] %v1747_v31  ;;  %v1748_v33 = vadd.f32 %v2844_v25, %v1677_v32  ;;  %v1513_v43 = vpop.f32.mrb[62].mxu0 }
 0x17c   :  { %v1205_v34 = vpop.f32.mrb[52].mxu1  ;;  %v1515_v44 = vpop.f32.mrb[63].mxu0 }
 0x17d   :  { %1812 = vst [vmem:[%s3212_s4 + $0xc8] sm:$0xff] %v1748_v33  ;;  %v1495_v35 = vadd.f32 %v1494_v7, %v1205_v34  ;;  %v1207_v36 = vpop.f32.mrb[53].mxu1 }
 0x17e   :  { %v1208_v38 = vpop.f32.mrb[54].mxu1 }
 0x17f   :  { %v1678_v40 = vmul.f32 %v2839_v23, %v1495_v35  ;;  %v1498_v41 = vadd.f32 %v1497_v13, %v1208_v38  ;;  %v1210_v42 = vpop.f32.mrb[55].mxu1 }
 0x181   :  { %v1749_v45 = vadd.f32 %v2844_v25, %v1678_v40  ;;  %v1679_v46 = vmul.f32 %v2839_v23, %v1498_v41  ;;  %v1518_v51 = vpop.f32.mrb[64].mxu0 }
 0x182   :  { %v1520_v53 = vpop.f32.mrb[65].mxu0 }
 0x183   :  { %1813 = vst [vmem:[%s3212_s4 + $0xd0] sm:$0xff] %v1749_v45  ;;  %v1750_v47 = vadd.f32 %v2844_v25, %v1679_v46  ;;  %v1521_v57 = vpop.f32.mrb[66].mxu0 }
 0x184   :  { %v1213_v48 = vpop.f32.mrb[56].mxu1  ;;  %v1523_v58 = vpop.f32.mrb[67].mxu0 }
 0x185   :  { %1814 = vst [vmem:[%s3212_s4 + $0xd8] sm:$0xff] %v1750_v47  ;;  %v1503_v49 = vadd.f32 %v1502_v21, %v1213_v48  ;;  %v1215_v50 = vpop.f32.mrb[57].mxu1 }
 0x186   :  { %v1216_v52 = vpop.f32.mrb[58].mxu1 }
 0x187   :  { %v1680_v54 = vmul.f32 %v2839_v23, %v1503_v49  ;;  %v1506_v55 = vadd.f32 %v1505_v29, %v1216_v52  ;;  %v1218_v56 = vpop.f32.mrb[59].mxu1 }
 0x189   :  { %v1751_v59 = vadd.f32 %v2844_v25, %v1680_v54  ;;  %v1681_v60 = vmul.f32 %v2839_v23, %v1506_v55  ;;  %v1526_v1 = vpop.f32.mrb[68].mxu0 }
 0x18a   :  { %v1528_v3 = vpop.f32.mrb[69].mxu0 }
 0x18b   :  { %1815 = vst [vmem:[%s3212_s4 + $0xe0] sm:$0xff] %v1751_v59  ;;  %v1752_v61 = vadd.f32 %v2844_v25, %v1681_v60  ;;  %v1529_v7 = vpop.f32.mrb[70].mxu0 }
 0x18c   :  { %v1221_v62 = vpop.f32.mrb[60].mxu1  ;;  %v1531_v8 = vpop.f32.mrb[71].mxu0 }
 0x18d   :  { %1816 = vst [vmem:[%s3212_s4 + $0xe8] sm:$0xff] %v1752_v61  ;;  %v1511_v63 = vadd.f32 %v1510_v37, %v1221_v62  ;;  %v1223_v0 = vpop.f32.mrb[61].mxu1 }
 0x18e   :  { %v1224_v2 = vpop.f32.mrb[62].mxu1 }
 0x18f   :  { %v1682_v4 = vmul.f32 %v2839_v23, %v1511_v63  ;;  %v1514_v5 = vadd.f32 %v1513_v43, %v1224_v2  ;;  %v1226_v6 = vpop.f32.mrb[63].mxu1 }
 0x191   :  { %v1753_v9 = vadd.f32 %v2844_v25, %v1682_v4  ;;  %v1683_v10 = vmul.f32 %v2839_v23, %v1514_v5  ;;  %v1534_v15 = vpop.f32.mrb[72].mxu0 }
 0x192   :  { %v1536_v17 = vpop.f32.mrb[73].mxu0 }
 0x193   :  { %1817 = vst [vmem:[%s3212_s4 + $0xf0] sm:$0xff] %v1753_v9  ;;  %v1754_v11 = vadd.f32 %v2844_v25, %v1683_v10  ;;  %v1537_v21 = vpop.f32.mrb[74].mxu0 }
 0x194   :  { %v1229_v12 = vpop.f32.mrb[64].mxu1  ;;  %v1539_v22 = vpop.f32.mrb[75].mxu0 }
 0x195   :  { %1818 = vst [vmem:[%s3212_s4 + $0xf8] sm:$0xff] %v1754_v11  ;;  %v1519_v13 = vadd.f32 %v1518_v51, %v1229_v12  ;;  %v1231_v14 = vpop.f32.mrb[65].mxu1 }
 0x196   :  { %v1232_v16 = vpop.f32.mrb[66].mxu1 }
 0x197   :  { %v1684_v18 = vmul.f32 %v2839_v23, %v1519_v13  ;;  %v1522_v19 = vadd.f32 %v1521_v57, %v1232_v16  ;;  %v1234_v20 = vpop.f32.mrb[67].mxu1 }
 0x199   :  { %v1755_v24 = vadd.f32 %v2844_v25, %v1684_v18  ;;  %v1685_v26 = vmul.f32 %v2839_v23, %v1522_v19  ;;  %v1542_v31 = vpop.f32.mrb[76].mxu0 }
 0x19a   :  { %v1544_v33 = vpop.f32.mrb[77].mxu0 }
 0x19b   :  { %1819 = vst [vmem:[%s3212_s4 + $0x100] sm:$0xff] %v1755_v24  ;;  %v1756_v27 = vadd.f32 %v2844_v25, %v1685_v26  ;;  %v1545_v37 = vpop.f32.mrb[78].mxu0 }
 0x19c   :  { %v1237_v28 = vpop.f32.mrb[68].mxu1  ;;  %v1547_v38 = vpop.f32.mrb[79].mxu0 }
 0x19d   :  { %1820 = vst [vmem:[%s3212_s4 + $0x108] sm:$0xff] %v1756_v27  ;;  %v1527_v29 = vadd.f32 %v1526_v1, %v1237_v28  ;;  %v1239_v30 = vpop.f32.mrb[69].mxu1 }
 0x19e   :  { %v1240_v32 = vpop.f32.mrb[70].mxu1 }
 0x19f   :  { %v1686_v34 = vmul.f32 %v2839_v23, %v1527_v29  ;;  %v1530_v35 = vadd.f32 %v1529_v7, %v1240_v32  ;;  %v1242_v36 = vpop.f32.mrb[71].mxu1 }
 0x1a1   :  { %v1757_v39 = vadd.f32 %v2844_v25, %v1686_v34  ;;  %v1687_v40 = vmul.f32 %v2839_v23, %v1530_v35  ;;  %v1550_v45 = vpop.f32.mrb[80].mxu0 }
 0x1a2   :  { %v1552_v47 = vpop.f32.mrb[81].mxu0 }
 0x1a3   :  { %1821 = vst [vmem:[%s3212_s4 + $0x110] sm:$0xff] %v1757_v39  ;;  %v1758_v41 = vadd.f32 %v2844_v25, %v1687_v40  ;;  %v1553_v51 = vpop.f32.mrb[82].mxu0 }
 0x1a4   :  { %v1245_v42 = vpop.f32.mrb[72].mxu1  ;;  %v1555_v52 = vpop.f32.mrb[83].mxu0 }
 0x1a5   :  { %1822 = vst [vmem:[%s3212_s4 + $0x118] sm:$0xff] %v1758_v41  ;;  %v1535_v43 = vadd.f32 %v1534_v15, %v1245_v42  ;;  %v1247_v44 = vpop.f32.mrb[73].mxu1 }
 0x1a6   :  { %v1248_v46 = vpop.f32.mrb[74].mxu1 }
 0x1a7   :  { %v1688_v48 = vmul.f32 %v2839_v23, %v1535_v43  ;;  %v1538_v49 = vadd.f32 %v1537_v21, %v1248_v46  ;;  %v1250_v50 = vpop.f32.mrb[75].mxu1 }
 0x1a9   :  { %v1759_v53 = vadd.f32 %v2844_v25, %v1688_v48  ;;  %v1689_v54 = vmul.f32 %v2839_v23, %v1538_v49  ;;  %v1558_v59 = vpop.f32.mrb[84].mxu0 }
 0x1aa   :  { %v1560_v61 = vpop.f32.mrb[85].mxu0 }
 0x1ab   :  { %1823 = vst [vmem:[%s3212_s4 + $0x120] sm:$0xff] %v1759_v53  ;;  %v1760_v55 = vadd.f32 %v2844_v25, %v1689_v54  ;;  %v1561_v1 = vpop.f32.mrb[86].mxu0 }
 0x1ac   :  { %v1253_v56 = vpop.f32.mrb[76].mxu1  ;;  %v1563_v2 = vpop.f32.mrb[87].mxu0 }
 0x1ad   :  { %1824 = vst [vmem:[%s3212_s4 + $0x128] sm:$0xff] %v1760_v55  ;;  %v1543_v57 = vadd.f32 %v1542_v31, %v1253_v56  ;;  %v1255_v58 = vpop.f32.mrb[77].mxu1 }
 0x1ae   :  { %v1256_v60 = vpop.f32.mrb[78].mxu1 }
 0x1af   :  { %v1690_v62 = vmul.f32 %v2839_v23, %v1543_v57  ;;  %v1546_v63 = vadd.f32 %v1545_v37, %v1256_v60  ;;  %v1258_v0 = vpop.f32.mrb[79].mxu1 }
 0x1b1   :  { %v1761_v3 = vadd.f32 %v2844_v25, %v1690_v62  ;;  %v1691_v4 = vmul.f32 %v2839_v23, %v1546_v63  ;;  %v1566_v9 = vpop.f32.mrb[88].mxu0 }
 0x1b2   :  { %v1568_v11 = vpop.f32.mrb[89].mxu0 }
 0x1b3   :  { %1825 = vst [vmem:[%s3212_s4 + $0x130] sm:$0xff] %v1761_v3  ;;  %v1762_v5 = vadd.f32 %v2844_v25, %v1691_v4  ;;  %v1569_v15 = vpop.f32.mrb[90].mxu0 }
 0x1b4   :  { %v1261_v6 = vpop.f32.mrb[80].mxu1  ;;  %v1571_v16 = vpop.f32.mrb[91].mxu0 }
 0x1b5   :  { %1826 = vst [vmem:[%s3212_s4 + $0x138] sm:$0xff] %v1762_v5  ;;  %v1551_v7 = vadd.f32 %v1550_v45, %v1261_v6  ;;  %v1263_v8 = vpop.f32.mrb[81].mxu1 }
 0x1b6   :  { %v1264_v10 = vpop.f32.mrb[82].mxu1 }
 0x1b7   :  { %v1692_v12 = vmul.f32 %v2839_v23, %v1551_v7  ;;  %v1554_v13 = vadd.f32 %v1553_v51, %v1264_v10  ;;  %v1266_v14 = vpop.f32.mrb[83].mxu1 }
 0x1b9   :  { %v1763_v17 = vadd.f32 %v2844_v25, %v1692_v12  ;;  %v1693_v18 = vmul.f32 %v2839_v23, %v1554_v13  ;;  %v1574_v24 = vpop.f32.mrb[92].mxu0 }
 0x1ba   :  { %v1576_v27 = vpop.f32.mrb[93].mxu0 }
 0x1bb   :  { %1827 = vst [vmem:[%s3212_s4 + $0x140] sm:$0xff] %v1763_v17  ;;  %v1764_v19 = vadd.f32 %v2844_v25, %v1693_v18  ;;  %v1577_v31 = vpop.f32.mrb[94].mxu0 }
 0x1bc   :  { %v1269_v20 = vpop.f32.mrb[84].mxu1  ;;  %v1579_v32 = vpop.f32.mrb[95].mxu0 }
 0x1bd   :  { %1828 = vst [vmem:[%s3212_s4 + $0x148] sm:$0xff] %v1764_v19  ;;  %v1559_v21 = vadd.f32 %v1558_v59, %v1269_v20  ;;  %v1271_v22 = vpop.f32.mrb[85].mxu1 }
 0x1be   :  { %v1272_v26 = vpop.f32.mrb[86].mxu1 }
 0x1bf   :  { %v1694_v28 = vmul.f32 %v2839_v23, %v1559_v21  ;;  %v1562_v29 = vadd.f32 %v1561_v1, %v1272_v26  ;;  %v1274_v30 = vpop.f32.mrb[87].mxu1 }
 0x1c1   :  { %v1765_v33 = vadd.f32 %v2844_v25, %v1694_v28  ;;  %v1695_v34 = vmul.f32 %v2839_v23, %v1562_v29  ;;  %v1582_v39 = vpop.f32.mrb[96].mxu0 }
 0x1c2   :  { %v1584_v41 = vpop.f32.mrb[97].mxu0 }
 0x1c3   :  { %1829 = vst [vmem:[%s3212_s4 + $0x150] sm:$0xff] %v1765_v33  ;;  %v1766_v35 = vadd.f32 %v2844_v25, %v1695_v34  ;;  %v1585_v45 = vpop.f32.mrb[98].mxu0 }
 0x1c4   :  { %v1277_v36 = vpop.f32.mrb[88].mxu1  ;;  %v1587_v46 = vpop.f32.mrb[99].mxu0 }
 0x1c5   :  { %1830 = vst [vmem:[%s3212_s4 + $0x158] sm:$0xff] %v1766_v35  ;;  %v1567_v37 = vadd.f32 %v1566_v9, %v1277_v36  ;;  %v1279_v38 = vpop.f32.mrb[89].mxu1 }
 0x1c6   :  { %v1280_v40 = vpop.f32.mrb[90].mxu1 }
 0x1c7   :  { %v1696_v42 = vmul.f32 %v2839_v23, %v1567_v37  ;;  %v1570_v43 = vadd.f32 %v1569_v15, %v1280_v40  ;;  %v1282_v44 = vpop.f32.mrb[91].mxu1 }
 0x1c9   :  { %v1767_v47 = vadd.f32 %v2844_v25, %v1696_v42  ;;  %v1697_v48 = vmul.f32 %v2839_v23, %v1570_v43  ;;  %v1590_v53 = vpop.f32.mrb[100].mxu0 }
 0x1ca   :  { %v1592_v55 = vpop.f32.mrb[101].mxu0 }
 0x1cb   :  { %1831 = vst [vmem:[%s3212_s4 + $0x160] sm:$0xff] %v1767_v47  ;;  %v1768_v49 = vadd.f32 %v2844_v25, %v1697_v48  ;;  %v1593_v59 = vpop.f32.mrb[102].mxu0 }
 0x1cc   :  { %v1285_v50 = vpop.f32.mrb[92].mxu1  ;;  %v1595_v60 = vpop.f32.mrb[103].mxu0 }
 0x1cd   :  { %1832 = vst [vmem:[%s3212_s4 + $0x168] sm:$0xff] %v1768_v49  ;;  %v1575_v51 = vadd.f32 %v1574_v24, %v1285_v50  ;;  %v1287_v52 = vpop.f32.mrb[93].mxu1 }
 0x1ce   :  { %v1288_v54 = vpop.f32.mrb[94].mxu1 }
 0x1cf   :  { %v1698_v56 = vmul.f32 %v2839_v23, %v1575_v51  ;;  %v1578_v57 = vadd.f32 %v1577_v31, %v1288_v54  ;;  %v1290_v58 = vpop.f32.mrb[95].mxu1 }
 0x1d1   :  { %v1769_v61 = vadd.f32 %v2844_v25, %v1698_v56  ;;  %v1699_v62 = vmul.f32 %v2839_v23, %v1578_v57  ;;  %v1598_v3 = vpop.f32.mrb[104].mxu0 }
 0x1d2   :  { %v1600_v5 = vpop.f32.mrb[105].mxu0 }
 0x1d3   :  { %1833 = vst [vmem:[%s3212_s4 + $0x170] sm:$0xff] %v1769_v61  ;;  %v1770_v63 = vadd.f32 %v2844_v25, %v1699_v62  ;;  %v1601_v9 = vpop.f32.mrb[106].mxu0 }
 0x1d4   :  { %v1293_v0 = vpop.f32.mrb[96].mxu1  ;;  %v1603_v10 = vpop.f32.mrb[107].mxu0 }
 0x1d5   :  { %1834 = vst [vmem:[%s3212_s4 + $0x178] sm:$0xff] %v1770_v63  ;;  %v1583_v1 = vadd.f32 %v1582_v39, %v1293_v0  ;;  %v1295_v2 = vpop.f32.mrb[97].mxu1 }
 0x1d6   :  { %v1296_v4 = vpop.f32.mrb[98].mxu1 }
 0x1d7   :  { %v1700_v6 = vmul.f32 %v2839_v23, %v1583_v1  ;;  %v1586_v7 = vadd.f32 %v1585_v45, %v1296_v4  ;;  %v1298_v8 = vpop.f32.mrb[99].mxu1 }
 0x1d9   :  { %v1771_v11 = vadd.f32 %v2844_v25, %v1700_v6  ;;  %v1701_v12 = vmul.f32 %v2839_v23, %v1586_v7  ;;  %v1606_v17 = vpop.f32.mrb[108].mxu0 }
 0x1da   :  { %v1608_v19 = vpop.f32.mrb[109].mxu0 }
 0x1db   :  { %1835 = vst [vmem:[%s3212_s4 + $0x180] sm:$0xff] %v1771_v11  ;;  %v1772_v13 = vadd.f32 %v2844_v25, %v1701_v12  ;;  %v1609_v24 = vpop.f32.mrb[110].mxu0 }
 0x1dc   :  { %v1301_v14 = vpop.f32.mrb[100].mxu1  ;;  %v1611_v26 = vpop.f32.mrb[111].mxu0 }
 0x1dd   :  { %1836 = vst [vmem:[%s3212_s4 + $0x188] sm:$0xff] %v1772_v13  ;;  %v1591_v15 = vadd.f32 %v1590_v53, %v1301_v14  ;;  %v1303_v16 = vpop.f32.mrb[101].mxu1 }
 0x1de   :  { %v1304_v18 = vpop.f32.mrb[102].mxu1 }
 0x1df   :  { %v1702_v20 = vmul.f32 %v2839_v23, %v1591_v15  ;;  %v1594_v21 = vadd.f32 %v1593_v59, %v1304_v18  ;;  %v1306_v22 = vpop.f32.mrb[103].mxu1 }
 0x1e1   :  { %v1773_v27 = vadd.f32 %v2844_v25, %v1702_v20  ;;  %v1703_v28 = vmul.f32 %v2839_v23, %v1594_v21  ;;  %v1614_v33 = vpop.f32.mrb[112].mxu0 }
 0x1e2   :  { %v1616_v35 = vpop.f32.mrb[113].mxu0 }
 0x1e3   :  { %1837 = vst [vmem:[%s3212_s4 + $0x190] sm:$0xff] %v1773_v27  ;;  %v1774_v29 = vadd.f32 %v2844_v25, %v1703_v28  ;;  %v1617_v39 = vpop.f32.mrb[114].mxu0  ;;  %v2328_v28 = vld [vmem:[%s3210_s2] ss:$0 sm:$0xff] }
 0x1e4   :  { %v1309_v30 = vpop.f32.mrb[104].mxu1  ;;  %v1619_v40 = vpop.f32.mrb[115].mxu0 }
 0x1e5   :  { %1838 = vst [vmem:[%s3212_s4 + $0x198] sm:$0xff] %v1774_v29  ;;  %v1599_v31 = vadd.f32 %v1598_v3, %v1309_v30  ;;  %v1311_v32 = vpop.f32.mrb[105].mxu1 }
 0x1e6   :  { %v1312_v34 = vpop.f32.mrb[106].mxu1 }
 0x1e7   :  { %v1704_v36 = vmul.f32 %v2839_v23, %v1599_v31  ;;  %v1602_v37 = vadd.f32 %v1601_v9, %v1312_v34  ;;  %v1314_v38 = vpop.f32.mrb[107].mxu1  ;;  %v2329_v31 = vld [vmem:[%s3211_s3] ss:$0 sm:$0xff] }
 0x1e9   :  { %v1775_v41 = vadd.f32 %v2844_v25, %v1704_v36  ;;  %v1705_v42 = vmul.f32 %v2839_v23, %v1602_v37  ;;  %v1622_v47 = vpop.f32.mrb[116].mxu0 }
 0x1ea   :  { %v1624_v49 = vpop.f32.mrb[117].mxu0 }
 0x1eb   :  { %1839 = vst [vmem:[%s3212_s4 + $0x1a0] sm:$0xff] %v1775_v41  ;;  %v1776_v43 = vadd.f32 %v2844_v25, %v1705_v42  ;;  %v1625_v53 = vpop.f32.mrb[118].mxu0 }
 0x1ec   :  { %v1317_v44 = vpop.f32.mrb[108].mxu1  ;;  %v1627_v54 = vpop.f32.mrb[119].mxu0 }
 0x1ed   :  { %1840 = vst [vmem:[%s3212_s4 + $0x1a8] sm:$0xff] %v1776_v43  ;;  %v1607_v45 = vadd.f32 %v1606_v17, %v1317_v44  ;;  %v1319_v46 = vpop.f32.mrb[109].mxu1 }
 0x1ee   :  { %v1320_v48 = vpop.f32.mrb[110].mxu1 }
 0x1ef   :  { %v1706_v50 = vmul.f32 %v2839_v23, %v1607_v45  ;;  %v1610_v51 = vadd.f32 %v1609_v24, %v1320_v48  ;;  %v1322_v52 = vpop.f32.mrb[111].mxu1 }
 0x1f1   :  { %v1777_v55 = vadd.f32 %v2844_v25, %v1706_v50  ;;  %v1707_v56 = vmul.f32 %v2839_v23, %v1610_v51  ;;  %v1630_v61 = vpop.f32.mrb[120].mxu0 }
 0x1f2   :  { %v1632_v63 = vpop.f32.mrb[121].mxu0 }
 0x1f3   :  { %1841 = vst [vmem:[%s3212_s4 + $0x1b0] sm:$0xff] %v1777_v55  ;;  %v1778_v57 = vadd.f32 %v2844_v25, %v1707_v56  ;;  %v1633_v3 = vpop.f32.mrb[122].mxu0 }
 0x1f4   :  { %v1325_v58 = vpop.f32.mrb[112].mxu1  ;;  %v1635_v4 = vpop.f32.mrb[123].mxu0 }
 0x1f5   :  { %1842 = vst [vmem:[%s3212_s4 + $0x1b8] sm:$0xff] %v1778_v57  ;;  %v1615_v59 = vadd.f32 %v1614_v33, %v1325_v58  ;;  %v1327_v60 = vpop.f32.mrb[113].mxu1 }
 0x1f6   :  { %v1328_v62 = vpop.f32.mrb[114].mxu1 }
 0x1f7   :  { %v1708_v0 = vmul.f32 %v2839_v23, %v1615_v59  ;;  %v1618_v1 = vadd.f32 %v1617_v39, %v1328_v62  ;;  %v1330_v2 = vpop.f32.mrb[115].mxu1 }
 0x1f9   :  { %v1779_v5 = vadd.f32 %v2844_v25, %v1708_v0  ;;  %v1709_v6 = vmul.f32 %v2839_v23, %v1618_v1  ;;  %v1638_v11 = vpop.f32.mrb[124].mxu0 }
 0x1fa   :  { %v1640_v13 = vpop.f32.mrb[125].mxu0 }
 0x1fb   :  { %1843 = vst [vmem:[%s3212_s4 + $0x1c0] sm:$0xff] %v1779_v5  ;;  %v1780_v7 = vadd.f32 %v2844_v25, %v1709_v6  ;;  %v1641_v17 = vpop.f32.mrb[126].mxu0 }
 0x1fc   :  { %v1333_v8 = vpop.f32.mrb[116].mxu1  ;;  %v1643_v18 = vpop.f32.mrb[127].mxu0 }
 0x1fd   :  { %1844 = vst [vmem:[%s3212_s4 + $0x1c8] sm:$0xff] %v1780_v7  ;;  %v1623_v9 = vadd.f32 %v1622_v47, %v1333_v8  ;;  %v1335_v10 = vpop.f32.mrb[117].mxu1 }
 0x1fe   :  { %v1336_v12 = vpop.f32.mrb[118].mxu1 }
 0x1ff   :  { %v1710_v14 = vmul.f32 %v2839_v23, %v1623_v9  ;;  %v1626_v15 = vadd.f32 %v1625_v53, %v1336_v12  ;;  %v1338_v16 = vpop.f32.mrb[119].mxu1 }
 0x201   :  { %v1781_v19 = vadd.f32 %v2844_v25, %v1710_v14  ;;  %v1711_v20 = vmul.f32 %v2839_v23, %v1626_v15 }
 0x203   :  { %1845 = vst [vmem:[%s3212_s4 + $0x1d0] sm:$0xff] %v1781_v19  ;;  %v1782_v21 = vadd.f32 %v2844_v25, %v1711_v20 }
 0x204   :  { %v1341_v22 = vpop.f32.mrb[120].mxu1 }
 0x205   :  { %1846 = vst [vmem:[%s3212_s4 + $0x1d8] sm:$0xff] %v1782_v21  ;;  %v1631_v24 = vadd.f32 %v1630_v61, %v1341_v22  ;;  %v1343_v26 = vpop.f32.mrb[121].mxu1 }
 0x206   :  { %v1344_v27 = vpop.f32.mrb[122].mxu1 }
 0x207   :  { %v1712_v29 = vmul.f32 %v2328_v28, %v1631_v24  ;;  %v1634_v23 = vadd.f32 %v1633_v3, %v1344_v27  ;;  %v1346_v30 = vpop.f32.mrb[123].mxu1 }
 0x209   :  { %v1783_v25 = vadd.f32 %v2329_v31, %v1712_v29  ;;  %v1713_v32 = vmul.f32 %v2328_v28, %v1634_v23 }
 0x20b   :  { %1847 = vst [vmem:[%s3212_s4 + $0x1e0] sm:$0xff] %v1783_v25  ;;  %v1784_v33 = vadd.f32 %v2329_v31, %v1713_v32 }
 0x20c   :  { %v1349_v34 = vpop.f32.mrb[124].mxu1 }
 0x20d   :  { %1848 = vst [vmem:[%s3212_s4 + $0x1e8] sm:$0xff] %v1784_v33  ;;  %v1639_v35 = vadd.f32 %v1638_v11, %v1349_v34  ;;  %v1351_v36 = vpop.f32.mrb[125].mxu1 }
 0x20e   :  { %v1352_v37 = vpop.f32.mrb[126].mxu1 }
 0x20f   :  { %v1714_v38 = vmul.f32 %v2328_v28, %v1639_v35  ;;  %v1642_v39 = vadd.f32 %v1641_v17, %v1352_v37  ;;  %v1354_v40 = vpop.f32.mrb[127].mxu1 }
 0x211   :  { %v1785_v41 = vadd.f32 %v2329_v31, %v1714_v38  ;;  %v1715_v42 = vmul.f32 %v2328_v28, %v1642_v39 }
 0x213   :  { %1849 = vst [vmem:[%s3212_s4 + $0x1f0] sm:$0xff] %v1785_v41  ;;  %v1786_v43 = vadd.f32 %v2329_v31, %v1715_v42 }
 0x215   :  { %1850 = vst [vmem:[%s3212_s4 + $0x1f8] sm:$0xff] %v1786_v43 }

</bundles_post_ra>
